<compile_context>
chip_gen: v7x
topology: tpu7x:2x2x1
jax: 0.10.0
libtpu: 0.0.40
codegen_flags: <defaults>
</compile_context>

<pallas_src>
import math

import jax
import jax.numpy as jnp
import numpy as np
from jax import lax
from jax.experimental import pallas as pl
from jax.experimental.pallas import tpu as pltpu

# ---------------- config (T5Config-equivalent; lane-aligned sizes) ----------------
D_MODEL = 128          # config.d_model
D_KV = 128             # config.d_kv   (multiple of 128 -> head slices are full lane tiles)
N_HEADS = 4            # config.num_heads
INNER = N_HEADS * D_KV
NUM_BUCKETS = 32       # config.relative_attention_num_buckets
MAX_DISTANCE = 128     # config.relative_attention_max_distance
IS_DECODER = False     # encoder self-attention -> causal=False, bidirectional buckets
# dropout_rate = 0 / eval mode -> dropout is a no-op


# ---------------- fused Pallas kernel ----------------
def _make_kernel(seq_len, block_q, block_k):
    """Kernel factory; all tile sizes are static."""
    nk = seq_len // block_k

    def kernel(x_ref, wqkv_ref, wo_ref, bias_ref, o_ref, qkv_ref, attn_ref):
        # x_ref    : (S, D_MODEL) f32          — full sequence of one batch element
        # wqkv_ref : (D_MODEL, 3*INNER) bf16   — [Wq | Wk | Wv], grid-invariant
        # wo_ref   : (INNER, D_MODEL)  bf16    — grid-invariant
        # bias_ref : (N_HEADS, block_q, S) bf16 — q-tiled dense relative-position bias
        # o_ref    : (block_q, D_MODEL)        — output tile
        # qkv_ref  : VMEM scratch (S, 3*INNER) bf16 — fused QKV projection (per batch element)
        # attn_ref : VMEM scratch (block_q, INNER) bf16 — per-head outputs staged for Wo matmul
        qi = pl.program_id(1)

        # Fused Q/K/V projection for the whole sequence, once per batch element.
        # (grid axis 1 is "arbitrary", so qi == 0 always runs first for each new b and the
        #  scratch persists across the remaining q tiles of that batch element.)
        @pl.when(qi == 0)
        def _():
            qkv_ref[...] = jnp.dot(
                x_ref[...].astype(jnp.bfloat16), wqkv_ref[...],
                preferred_element_type=jnp.float32).astype(jnp.bfloat16)

        q0 = pl.multiple_of(qi * block_q, block_q)

        for h in range(N_HEADS):                      # static unroll over heads
            lo = h * D_KV
            qh = qkv_ref[pl.ds(q0, block_q), lo:lo + D_KV]         # (tq, dkv) bf16

            m_i = l_i = acc = None
            for kb in range(nk):                      # online softmax over kv blocks
                k0 = kb * block_k
                kh = qkv_ref[k0:k0 + block_k, INNER + lo:INNER + lo + D_KV]
                vh = qkv_ref[k0:k0 + block_k, 2 * INNER + lo:2 * INNER + lo + D_KV]

                # T5 attention: sm_scale = 1.0; contract last dims (no explicit transpose).
                s = lax.dot_general(qh, kh, (((1,), (1,)), ((), ())),
                                    preferred_element_type=jnp.float32)   # (tq, tk) f32
                s = s + bias_ref[h, :, k0:k0 + block_k].astype(jnp.float32)
                m_blk = jnp.max(s, axis=-1, keepdims=True)
                if kb == 0:
                    m_i = m_blk
                    p = jnp.exp(s - m_i)
                    l_i = jnp.sum(p, axis=-1, keepdims=True)
                    acc = jnp.dot(p.astype(jnp.bfloat16), vh,
                                  preferred_element_type=jnp.float32)
                else:
                    m_new = jnp.maximum(m_i, m_blk)
                    alpha = jnp.exp(m_i - m_new)
                    p = jnp.exp(s - m_new)
                    l_i = alpha * l_i + jnp.sum(p, axis=-1, keepdims=True)
                    acc = alpha * acc + jnp.dot(p.astype(jnp.bfloat16), vh,
                                                preferred_element_type=jnp.float32)
                    m_i = m_new

            oh = acc * pl.reciprocal(l_i, approx=True)
            attn_ref[:, lo:lo + D_KV] = oh.astype(jnp.bfloat16)   # stage head output in VMEM

        # Folded "unshape" + output projection: one wide K=INNER matmul per q tile.
        o_ref[...] = jnp.dot(attn_ref[...], wo_ref[...],
                             preferred_element_type=jnp.float32).astype(o_ref.dtype)

    return kernel


# ---------------- relative position bias (glue: int math + embedding gather) ----------------
def _relative_position_bucket(rel, bidirectional, num_buckets, max_distance):
    buckets = jnp.zeros_like(rel)
    if bidirectional:
        num_buckets //= 2
        buckets = buckets + (rel > 0).astype(rel.dtype) * num_buckets
        rel = jnp.abs(rel)
    else:
        rel = -jnp.minimum(rel, jnp.zeros_like(rel))
    max_exact = num_buckets // 2
    is_small = rel < max_exact
    rel_if_large = max_exact + (
        jnp.log(jnp.maximum(rel, 1).astype(jnp.float32) / max_exact)
        / math.log(max_distance / max_exact)
        * (num_buckets - max_exact)
    ).astype(rel.dtype)
    rel_if_large = jnp.minimum(
        rel_if_large, jnp.full_like(rel_if_large, num_buckets - 1))
    return buckets + jnp.where(is_small, rel, rel_if_large)


def compute_bias(rel_bias_weight, q_len, k_len):
    """Dense bias (N_HEADS, q_len, k_len); computed ONCE in prepare_params and cached."""
    ctx = jnp.arange(q_len, dtype=jnp.int32)[:, None]
    mem = jnp.arange(k_len, dtype=jnp.int32)[None, :]
    rel = mem - ctx
    buckets = _relative_position_bucket(
        rel, bidirectional=not IS_DECODER,
        num_buckets=NUM_BUCKETS, max_distance=MAX_DISTANCE)
    values = rel_bias_weight[buckets]          # (q_len, k_len, H)
    return jnp.transpose(values, (2, 0, 1))    # (H, q_len, k_len)


def prepare_params(params, seq_len):
    """One-time prep (hoisted out of the per-call path): fuse Wq|Wk|Wv, pre-cast MXU operands
    to bf16, and cache the dense relative-position bias for this sequence length."""
    wqkv = jnp.concatenate([params["wq"], params["wk"], params["wv"]],
                           axis=1).astype(jnp.bfloat16)
    wo = params["wo"].astype(jnp.bfloat16)
    bias = compute_bias(params["rel_bias"], seq_len, seq_len).astype(jnp.bfloat16)
    return wqkv, wo, bias


# ---------------- forward ----------------
@jax.jit
def t5_flash_attention_forward(hidden_states, wqkv, wo, bias):
    """Reproduces T5FlashAttention.forward attn_output (mask=None, no cache, eval mode)."""
    B, S, D = hidden_states.shape
    block_q = min(128, S)
    block_k = min(128, S)
    assert S % block_q == 0 and S % block_k == 0
    nq = S // block_q
    kernel = _make_kernel(S, block_q, block_k)

    return pl.pallas_call(
        kernel,
        out_shape=jax.ShapeDtypeStruct((B, S, D), hidden_states.dtype),
        grid=(B, nq),
        in_specs=[
            pl.BlockSpec((None, S, D), lambda b, qi: (b, 0, 0)),            # x (per batch)
            pl.BlockSpec((D, 3 * INNER), lambda b, qi: (0, 0)),             # fused Wqkv (invariant)
            pl.BlockSpec((INNER, D), lambda b, qi: (0, 0)),                 # Wo (invariant)
            pl.BlockSpec((N_HEADS, block_q, S), lambda b, qi: (0, qi, 0)),  # bias (q-tiled, bf16)
        ],
        out_specs=pl.BlockSpec((None, block_q, D), lambda b, qi: (b, qi, 0)),
        scratch_shapes=[
            pltpu.VMEM((S, 3 * INNER), jnp.bfloat16),       # fused QKV projection
            pltpu.VMEM((block_q, INNER), jnp.bfloat16),     # per-head attn outputs
        ],
        compiler_params=pltpu.CompilerParams(
            # qi axis must stay "arbitrary": the per-batch QKV scratch is filled at qi == 0
            # and reused by the remaining q tiles of the same batch element.
            dimension_semantics=("parallel", "arbitrary")),
    )(hidden_states, wqkv, wo, bias)


# ---------------- references ----------------
def reference_forward(hidden_states, params, mixed=False):
    """Pure-JAX reference.  mixed=True mirrors the kernel's bf16-on-MXU precision policy
    (bf16 matmul operands, f32 softmax) for a tight apples-to-apples check."""
    q_ = (lambda a: a.astype(jnp.bfloat16).astype(jnp.float32)) if mixed else (lambda a: a)
    B, S, _ = hidden_states.shape
    H, dk = N_HEADS, D_KV
    x2d = q_(hidden_states).reshape(B * S, D_MODEL)
    q = q_(x2d @ q_(params["wq"])).reshape(B, S, H, dk).transpose(0, 2, 1, 3)
    k = q_(x2d @ q_(params["wk"])).reshape(B, S, H, dk).transpose(0, 2, 1, 3)
    v = q_(x2d @ q_(params["wv"])).reshape(B, S, H, dk).transpose(0, 2, 1, 3)
    bias = q_(compute_bias(params["rel_bias"], S, S))[None]   # (1, H, S, S)
    s = jnp.einsum("bhqd,bhkd->bhqk", q, k) + bias            # sm_scale = 1.0
    p = q_(jax.nn.softmax(s, axis=-1))
    attn = q_(jnp.einsum("bhqk,bhkd->bhqd", p, v))
    attn = attn.transpose(0, 2, 1, 3).reshape(B, S, INNER)
    return (attn @ q_(params["wo"])).reshape(B, S, D_MODEL)


# ---------------- main ----------------
if __name__ == "__main__":
    key = jax.random.PRNGKey(0)
    kq, kk, kv, ko, kb, kx = jax.random.split(key, 6)

    # nn.Linear(d_model, inner, bias=False) weights, stored pre-transposed for x @ W.
    params = {
        "wq": jax.random.normal(kq, (D_MODEL, INNER), jnp.float32) * 0.05,
        "wk": jax.random.normal(kk, (D_MODEL, INNER), jnp.float32) * 0.05,
        "wv": jax.random.normal(kv, (D_MODEL, INNER), jnp.float32) * 0.05,
        "wo": jax.random.normal(ko, (INNER, D_MODEL), jnp.float32) * 0.05,
        # nn.Embedding(num_buckets, n_heads)
        "rel_bias": jax.random.normal(kb, (NUM_BUCKETS, N_HEADS), jnp.float32) * 0.05,
    }

    B, S = 2, 256   # S = 256 exercises q-tiling (2 q tiles) and the online-softmax kv loop
    hidden_states = jax.random.normal(kx, (B, S, D_MODEL), jnp.float32)

    wqkv, wo, bias = prepare_params(params, S)   # one-time prep, outside the per-call path

    out = t5_flash_attention_forward(hidden_states, wqkv, wo, bias)
    out = jax.block_until_ready(out)
    assert out.shape == (B, S, D_MODEL)

    # Tight check against a reference that mirrors the kernel's bf16 MXU-operand policy.
    ref_mixed = jax.block_until_ready(reference_forward(hidden_states, params, mixed=True))
    np.testing.assert_allclose(np.asarray(out), np.asarray(ref_mixed), rtol=2e-2, atol=2e-2)

    # Looser sanity check against the full-f32 module semantics (bf16-sized tolerance).
    ref_f32 = jax.block_until_ready(reference_forward(hidden_states, params, mixed=False))
    np.testing.assert_allclose(np.asarray(out), np.asarray(ref_f32), rtol=1e-1, atol=1e-1)

    print("KERNEL_OK")
</pallas_src>

<mosaic_0001>
module attributes {stable_mosaic.version = 11 : i64} {
  func.func @kernel(%arg0: i32, %arg1: i32, %arg2: memref<1x256x128xf32, #tpu.memory_space<vmem>>, %arg3: memref<128x1536xbf16, #tpu.memory_space<vmem>>, %arg4: memref<512x128xbf16, #tpu.memory_space<vmem>>, %arg5: memref<4x128x256xbf16, #tpu.memory_space<vmem>>, %arg6: memref<1x128x128xf32, #tpu.memory_space<vmem>>, %arg7: memref<256x1536xbf16, #tpu.memory_space<vmem>>, %arg8: memref<128x512xbf16, #tpu.memory_space<vmem>>) attributes {dimension_semantics = [#tpu.dimension_semantics<parallel>, #tpu.dimension_semantics<arbitrary>], iteration_bounds = array<i64: 2, 2>, scalar_prefetch = 0 : i64, scratch_operands = 2 : i64, tpu.core_type = #tpu.core_type<tc>, window_params = [{transform_indices = @transform_0, window_bounds = array<i64: 1, 256, 128>}, {pipeline_mode = #tpu.pipeline_mode<synchronous>, transform_indices = @transform_1, window_bounds = array<i64: 128, 1536>}, {pipeline_mode = #tpu.pipeline_mode<synchronous>, transform_indices = @transform_2, window_bounds = array<i64: 512, 128>}, {transform_indices = @transform_3, window_bounds = array<i64: 4, 128, 256>}, {transform_indices = @transform_4, window_bounds = array<i64: 1, 128, 128>}]} {
    %c0_i32 = arith.constant 0 : i32
    %0 = arith.cmpi eq, %arg1, %c0_i32 : i32
    %1 = arith.extui %0 : i1 to i32
    %c0_i32_0 = arith.constant 0 : i32
    %2 = arith.cmpi ne, %1, %c0_i32_0 : i32
    scf.if %2 {
      %c0_93 = arith.constant 0 : index
      %c0_94 = arith.constant 0 : index
      %c0_95 = arith.constant 0 : index
      %199 = vector.load %arg2[%c0_93, %c0_94, %c0_95] : memref<1x256x128xf32, #tpu.memory_space<vmem>>, vector<1x256x128xf32>
      %200 = vector.shape_cast %199 : vector<1x256x128xf32> to vector<256x128xf32>
      %201 = arith.truncf %200 : vector<256x128xf32> to vector<256x128xbf16>
      %c0_96 = arith.constant 0 : index
      %c0_97 = arith.constant 0 : index
      %202 = vector.load %arg3[%c0_96, %c0_97] : memref<128x1536xbf16, #tpu.memory_space<vmem>>, vector<128x1536xbf16>
      %cst_98 = arith.constant dense<0.000000e+00> : vector<256x1536xf32>
      %203 = tpu.matmul %201, %202, %cst_98 {dimension_numbers = #tpu.dot_dimension_numbers<[1], [0], [0], [1], [0, 0, 1, 1], [], []>} : vector<256x128xbf16>, vector<128x1536xbf16>, vector<256x1536xf32> -> vector<256x1536xf32>
      %204 = arith.truncf %203 : vector<256x1536xf32> to vector<256x1536xbf16>
      %c0_99 = arith.constant 0 : index
      %c0_100 = arith.constant 0 : index
      %205 = vector.load %arg7[%c0_99, %c0_100] : memref<256x1536xbf16, #tpu.memory_space<vmem>>, vector<256x1536xbf16>
      tpu.vector_store %arg7[%c0_99, %c0_100], %204 {strides = array<i32>} : memref<256x1536xbf16, #tpu.memory_space<vmem>>, vector<256x1536xbf16>,
    } else {
    }
    %c128_i32 = arith.constant 128 : i32
    %3 = arith.muli %arg1, %c128_i32 : i32
    %4 = tpu.assume_multiple %3, 128 : i32
    %5 = arith.index_cast %4 : i32 to index
    %c0 = arith.constant 0 : index
    %6 = vector.load %arg7[%5, %c0] : memref<256x1536xbf16, #tpu.memory_space<vmem>>, vector<128x128xbf16>
    %c0_1 = arith.constant 0 : index
    %c512 = arith.constant 512 : index
    %7 = vector.load %arg7[%c0_1, %c512] : memref<256x1536xbf16, #tpu.memory_space<vmem>>, vector<128x128xbf16>
    %c0_2 = arith.constant 0 : index
    %c1024 = arith.constant 1024 : index
    %8 = vector.load %arg7[%c0_2, %c1024] : memref<256x1536xbf16, #tpu.memory_space<vmem>>, vector<128x128xbf16>
    %cst = arith.constant dense<0.000000e+00> : vector<128x128xf32>
    %9 = tpu.matmul %6, %7, %cst {dimension_numbers = #tpu.dot_dimension_numbers<[1], [1], [0], [0], [0, 0, 1, 0], [], []>} : vector<128x128xbf16>, vector<128x128xbf16>, vector<128x128xf32> -> vector<128x128xf32>
    %c0_3 = arith.constant 0 : index
    %c0_4 = arith.constant 0 : index
    %c0_5 = arith.constant 0 : index
    %10 = vector.load %arg5[%c0_3, %c0_4, %c0_5] : memref<4x128x256xbf16, #tpu.memory_space<vmem>>, vector<1x128x128xbf16>
    %11 = vector.shape_cast %10 : vector<1x128x128xbf16> to vector<128x128xbf16>
    %12 = arith.extf %11 : vector<128x128xbf16> to vector<128x128xf32>
    %13 = arith.addf %9, %12 : vector<128x128xf32>
    %cst_6 = arith.constant dense<0xFF800000> : vector<128xf32>
    %14 = vector.multi_reduction <maximumf>, %13, %cst_6 [1] : vector<128x128xf32> to vector<128xf32>
    %15 = vector.shape_cast %14 : vector<128xf32> to vector<128x1xf32>
    %16 = vector.broadcast %15 : vector<128x1xf32> to vector<128x128xf32>
    %17 = arith.subf %13, %16 : vector<128x128xf32>
    %18 = math.exp %17 : vector<128x128xf32>
    %cst_7 = arith.constant dense<0.000000e+00> : vector<128xf32>
    %19 = vector.multi_reduction <add>, %18, %cst_7 [1] : vector<128x128xf32> to vector<128xf32>
    %20 = vector.shape_cast %19 : vector<128xf32> to vector<128x1xf32>
    %21 = arith.truncf %18 : vector<128x128xf32> to vector<128x128xbf16>
    %cst_8 = arith.constant dense<0.000000e+00> : vector<128x128xf32>
    %22 = tpu.matmul %21, %8, %cst_8 {dimension_numbers = #tpu.dot_dimension_numbers<[1], [0], [0], [1], [0, 0, 1, 1], [], []>} : vector<128x128xbf16>, vector<128x128xbf16>, vector<128x128xf32> -> vector<128x128xf32>
    %c128 = arith.constant 128 : index
    %c512_9 = arith.constant 512 : index
    %23 = vector.load %arg7[%c128, %c512_9] : memref<256x1536xbf16, #tpu.memory_space<vmem>>, vector<128x128xbf16>
    %c128_10 = arith.constant 128 : index
    %c1024_11 = arith.constant 1024 : index
    %24 = vector.load %arg7[%c128_10, %c1024_11] : memref<256x1536xbf16, #tpu.memory_space<vmem>>, vector<128x128xbf16>
    %cst_12 = arith.constant dense<0.000000e+00> : vector<128x128xf32>
    %25 = tpu.matmul %6, %23, %cst_12 {dimension_numbers = #tpu.dot_dimension_numbers<[1], [1], [0], [0], [0, 0, 1, 0], [], []>} : vector<128x128xbf16>, vector<128x128xbf16>, vector<128x128xf32> -> vector<128x128xf32>
    %c0_13 = arith.constant 0 : index
    %c0_14 = arith.constant 0 : index
    %c128_15 = arith.constant 128 : index
    %26 = vector.load %arg5[%c0_13, %c0_14, %c128_15] : memref<4x128x256xbf16, #tpu.memory_space<vmem>>, vector<1x128x128xbf16>
    %27 = vector.shape_cast %26 : vector<1x128x128xbf16> to vector<128x128xbf16>
    %28 = arith.extf %27 : vector<128x128xbf16> to vector<128x128xf32>
    %29 = arith.addf %25, %28 : vector<128x128xf32>
    %cst_16 = arith.constant dense<0xFF800000> : vector<128xf32>
    %30 = vector.multi_reduction <maximumf>, %29, %cst_16 [1] : vector<128x128xf32> to vector<128xf32>
    %31 = vector.shape_cast %30 : vector<128xf32> to vector<128x1xf32>
    %32 = arith.maximumf %15, %31 : vector<128x1xf32>
    %33 = arith.subf %15, %32 : vector<128x1xf32>
    %34 = math.exp %33 : vector<128x1xf32>
    %35 = vector.broadcast %32 : vector<128x1xf32> to vector<128x128xf32>
    %36 = arith.subf %29, %35 : vector<128x128xf32>
    %37 = math.exp %36 : vector<128x128xf32>
    %38 = arith.mulf %34, %20 : vector<128x1xf32>
    %cst_17 = arith.constant dense<0.000000e+00> : vector<128xf32>
    %39 = vector.multi_reduction <add>, %37, %cst_17 [1] : vector<128x128xf32> to vector<128xf32>
    %40 = vector.shape_cast %39 : vector<128xf32> to vector<128x1xf32>
    %41 = arith.addf %38, %40 : vector<128x1xf32>
    %42 = vector.broadcast %34 : vector<128x1xf32> to vector<128x128xf32>
    %43 = arith.mulf %42, %22 : vector<128x128xf32>
    %44 = arith.truncf %37 : vector<128x128xf32> to vector<128x128xbf16>
    %cst_18 = arith.constant dense<0.000000e+00> : vector<128x128xf32>
    %45 = tpu.matmul %44, %24, %cst_18 {dimension_numbers = #tpu.dot_dimension_numbers<[1], [0], [0], [1], [0, 0, 1, 1], [], []>} : vector<128x128xbf16>, vector<128x128xbf16>, vector<128x128xf32> -> vector<128x128xf32>
    %46 = arith.addf %43, %45 : vector<128x128xf32>
    %47 = tpu.reciprocal %41 {approx = true} : vector<128x1xf32> -> vector<128x1xf32>
    %48 = vector.broadcast %47 : vector<128x1xf32> to vector<128x128xf32>
    %49 = arith.mulf %46, %48 : vector<128x128xf32>
    %50 = arith.truncf %49 : vector<128x128xf32> to vector<128x128xbf16>
    %c0_19 = arith.constant 0 : index
    %c0_20 = arith.constant 0 : index
    %51 = vector.load %arg8[%c0_19, %c0_20] : memref<128x512xbf16, #tpu.memory_space<vmem>>, vector<128x128xbf16>
    tpu.vector_store %arg8[%c0_19, %c0_20], %50 {strides = array<i32>} : memref<128x512xbf16, #tpu.memory_space<vmem>>, vector<128x128xbf16>,
    %52 = arith.index_cast %4 : i32 to index
    %c128_21 = arith.constant 128 : index
    %53 = vector.load %arg7[%52, %c128_21] : memref<256x1536xbf16, #tpu.memory_space<vmem>>, vector<128x128xbf16>
    %c0_22 = arith.constant 0 : index
    %c640 = arith.constant 640 : index
    %54 = vector.load %arg7[%c0_22, %c640] : memref<256x1536xbf16, #tpu.memory_space<vmem>>, vector<128x128xbf16>
    %c0_23 = arith.constant 0 : index
    %c1152 = arith.constant 1152 : index
    %55 = vector.load %arg7[%c0_23, %c1152] : memref<256x1536xbf16, #tpu.memory_space<vmem>>, vector<128x128xbf16>
    %cst_24 = arith.constant dense<0.000000e+00> : vector<128x128xf32>
    %56 = tpu.matmul %53, %54, %cst_24 {dimension_numbers = #tpu.dot_dimension_numbers<[1], [1], [0], [0], [0, 0, 1, 0], [], []>} : vector<128x128xbf16>, vector<128x128xbf16>, vector<128x128xf32> -> vector<128x128xf32>
    %c1 = arith.constant 1 : index
    %c0_25 = arith.constant 0 : index
    %c0_26 = arith.constant 0 : index
    %57 = vector.load %arg5[%c1, %c0_25, %c0_26] : memref<4x128x256xbf16, #tpu.memory_space<vmem>>, vector<1x128x128xbf16>
    %58 = vector.shape_cast %57 : vector<1x128x128xbf16> to vector<128x128xbf16>
    %59 = arith.extf %58 : vector<128x128xbf16> to vector<128x128xf32>
    %60 = arith.addf %56, %59 : vector<128x128xf32>
    %cst_27 = arith.constant dense<0xFF800000> : vector<128xf32>
    %61 = vector.multi_reduction <maximumf>, %60, %cst_27 [1] : vector<128x128xf32> to vector<128xf32>
    %62 = vector.shape_cast %61 : vector<128xf32> to vector<128x1xf32>
    %63 = vector.broadcast %62 : vector<128x1xf32> to vector<128x128xf32>
    %64 = arith.subf %60, %63 : vector<128x128xf32>
    %65 = math.exp %64 : vector<128x128xf32>
    %cst_28 = arith.constant dense<0.000000e+00> : vector<128xf32>
    %66 = vector.multi_reduction <add>, %65, %cst_28 [1] : vector<128x128xf32> to vector<128xf32>
    %67 = vector.shape_cast %66 : vector<128xf32> to vector<128x1xf32>
    %68 = arith.truncf %65 : vector<128x128xf32> to vector<128x128xbf16>
    %cst_29 = arith.constant dense<0.000000e+00> : vector<128x128xf32>
    %69 = tpu.matmul %68, %55, %cst_29 {dimension_numbers = #tpu.dot_dimension_numbers<[1], [0], [0], [1], [0, 0, 1, 1], [], []>} : vector<128x128xbf16>, vector<128x128xbf16>, vector<128x128xf32> -> vector<128x128xf32>
    %c128_30 = arith.constant 128 : index
    %c640_31 = arith.constant 640 : index
    %70 = vector.load %arg7[%c128_30, %c640_31] : memref<256x1536xbf16, #tpu.memory_space<vmem>>, vector<128x128xbf16>
    %c128_32 = arith.constant 128 : index
    %c1152_33 = arith.constant 1152 : index
    %71 = vector.load %arg7[%c128_32, %c1152_33] : memref<256x1536xbf16, #tpu.memory_space<vmem>>, vector<128x128xbf16>
    %cst_34 = arith.constant dense<0.000000e+00> : vector<128x128xf32>
    %72 = tpu.matmul %53, %70, %cst_34 {dimension_numbers = #tpu.dot_dimension_numbers<[1], [1], [0], [0], [0, 0, 1, 0], [], []>} : vector<128x128xbf16>, vector<128x128xbf16>, vector<128x128xf32> -> vector<128x128xf32>
    %c1_35 = arith.constant 1 : index
    %c0_36 = arith.constant 0 : index
    %c128_37 = arith.constant 128 : index
    %73 = vector.load %arg5[%c1_35, %c0_36, %c128_37] : memref<4x128x256xbf16, #tpu.memory_space<vmem>>, vector<1x128x128xbf16>
    %74 = vector.shape_cast %73 : vector<1x128x128xbf16> to vector<128x128xbf16>
    %75 = arith.extf %74 : vector<128x128xbf16> to vector<128x128xf32>
    %76 = arith.addf %72, %75 : vector<128x128xf32>
    %cst_38 = arith.constant dense<0xFF800000> : vector<128xf32>
    %77 = vector.multi_reduction <maximumf>, %76, %cst_38 [1] : vector<128x128xf32> to vector<128xf32>
    %78 = vector.shape_cast %77 : vector<128xf32> to vector<128x1xf32>
    %79 = arith.maximumf %62, %78 : vector<128x1xf32>
    %80 = arith.subf %62, %79 : vector<128x1xf32>
    %81 = math.exp %80 : vector<128x1xf32>
    %82 = vector.broadcast %79 : vector<128x1xf32> to vector<128x128xf32>
    %83 = arith.subf %76, %82 : vector<128x128xf32>
    %84 = math.exp %83 : vector<128x128xf32>
    %85 = arith.mulf %81, %67 : vector<128x1xf32>
    %cst_39 = arith.constant dense<0.000000e+00> : vector<128xf32>
    %86 = vector.multi_reduction <add>, %84, %cst_39 [1] : vector<128x128xf32> to vector<128xf32>
    %87 = vector.shape_cast %86 : vector<128xf32> to vector<128x1xf32>
    %88 = arith.addf %85, %87 : vector<128x1xf32>
    %89 = vector.broadcast %81 : vector<128x1xf32> to vector<128x128xf32>
    %90 = arith.mulf %89, %69 : vector<128x128xf32>
    %91 = arith.truncf %84 : vector<128x128xf32> to vector<128x128xbf16>
    %cst_40 = arith.constant dense<0.000000e+00> : vector<128x128xf32>
    %92 = tpu.matmul %91, %71, %cst_40 {dimension_numbers = #tpu.dot_dimension_numbers<[1], [0], [0], [1], [0, 0, 1, 1], [], []>} : vector<128x128xbf16>, vector<128x128xbf16>, vector<128x128xf32> -> vector<128x128xf32>
    %93 = arith.addf %90, %92 : vector<128x128xf32>
    %94 = tpu.reciprocal %88 {approx = true} : vector<128x1xf32> -> vector<128x1xf32>
    %95 = vector.broadcast %94 : vector<128x1xf32> to vector<128x128xf32>
    %96 = arith.mulf %93, %95 : vector<128x128xf32>
    %97 = arith.truncf %96 : vector<128x128xf32> to vector<128x128xbf16>
    %c0_41 = arith.constant 0 : index
    %c128_42 = arith.constant 128 : index
    %98 = vector.load %arg8[%c0_41, %c128_42] : memref<128x512xbf16, #tpu.memory_space<vmem>>, vector<128x128xbf16>
    tpu.vector_store %arg8[%c0_41, %c128_42], %97 {strides = array<i32>} : memref<128x512xbf16, #tpu.memory_space<vmem>>, vector<128x128xbf16>,
    %99 = arith.index_cast %4 : i32 to index
    %c256 = arith.constant 256 : index
    %100 = vector.load %arg7[%99, %c256] : memref<256x1536xbf16, #tpu.memory_space<vmem>>, vector<128x128xbf16>
    %c0_43 = arith.constant 0 : index
    %c768 = arith.constant 768 : index
    %101 = vector.load %arg7[%c0_43, %c768] : memref<256x1536xbf16, #tpu.memory_space<vmem>>, vector<128x128xbf16>
    %c0_44 = arith.constant 0 : index
    %c1280 = arith.constant 1280 : index
    %102 = vector.load %arg7[%c0_44, %c1280] : memref<256x1536xbf16, #tpu.memory_space<vmem>>, vector<128x128xbf16>
    %cst_45 = arith.constant dense<0.000000e+00> : vector<128x128xf32>
    %103 = tpu.matmul %100, %101, %cst_45 {dimension_numbers = #tpu.dot_dimension_numbers<[1], [1], [0], [0], [0, 0, 1, 0], [], []>} : vector<128x128xbf16>, vector<128x128xbf16>, vector<128x128xf32> -> vector<128x128xf32>
    %c2 = arith.constant 2 : index
    %c0_46 = arith.constant 0 : index
    %c0_47 = arith.constant 0 : index
    %104 = vector.load %arg5[%c2, %c0_46, %c0_47] : memref<4x128x256xbf16, #tpu.memory_space<vmem>>, vector<1x128x128xbf16>
    %105 = vector.shape_cast %104 : vector<1x128x128xbf16> to vector<128x128xbf16>
    %106 = arith.extf %105 : vector<128x128xbf16> to vector<128x128xf32>
    %107 = arith.addf %103, %106 : vector<128x128xf32>
    %cst_48 = arith.constant dense<0xFF800000> : vector<128xf32>
    %108 = vector.multi_reduction <maximumf>, %107, %cst_48 [1] : vector<128x128xf32> to vector<128xf32>
    %109 = vector.shape_cast %108 : vector<128xf32> to vector<128x1xf32>
    %110 = vector.broadcast %109 : vector<128x1xf32> to vector<128x128xf32>
    %111 = arith.subf %107, %110 : vector<128x128xf32>
    %112 = math.exp %111 : vector<128x128xf32>
    %cst_49 = arith.constant dense<0.000000e+00> : vector<128xf32>
    %113 = vector.multi_reduction <add>, %112, %cst_49 [1] : vector<128x128xf32> to vector<128xf32>
    %114 = vector.shape_cast %113 : vector<128xf32> to vector<128x1xf32>
    %115 = arith.truncf %112 : vector<128x128xf32> to vector<128x128xbf16>
    %cst_50 = arith.constant dense<0.000000e+00> : vector<128x128xf32>
    %116 = tpu.matmul %115, %102, %cst_50 {dimension_numbers = #tpu.dot_dimension_numbers<[1], [0], [0], [1], [0, 0, 1, 1], [], []>} : vector<128x128xbf16>, vector<128x128xbf16>, vector<128x128xf32> -> vector<128x128xf32>
    %c128_51 = arith.constant 128 : index
    %c768_52 = arith.constant 768 : index
    %117 = vector.load %arg7[%c128_51, %c768_52] : memref<256x1536xbf16, #tpu.memory_space<vmem>>, vector<128x128xbf16>
    %c128_53 = arith.constant 128 : index
    %c1280_54 = arith.constant 1280 : index
    %118 = vector.load %arg7[%c128_53, %c1280_54] : memref<256x1536xbf16, #tpu.memory_space<vmem>>, vector<128x128xbf16>
    %cst_55 = arith.constant dense<0.000000e+00> : vector<128x128xf32>
    %119 = tpu.matmul %100, %117, %cst_55 {dimension_numbers = #tpu.dot_dimension_numbers<[1], [1], [0], [0], [0, 0, 1, 0], [], []>} : vector<128x128xbf16>, vector<128x128xbf16>, vector<128x128xf32> -> vector<128x128xf32>
    %c2_56 = arith.constant 2 : index
    %c0_57 = arith.constant 0 : index
    %c128_58 = arith.constant 128 : index
    %120 = vector.load %arg5[%c2_56, %c0_57, %c128_58] : memref<4x128x256xbf16, #tpu.memory_space<vmem>>, vector<1x128x128xbf16>
    %121 = vector.shape_cast %120 : vector<1x128x128xbf16> to vector<128x128xbf16>
    %122 = arith.extf %121 : vector<128x128xbf16> to vector<128x128xf32>
    %123 = arith.addf %119, %122 : vector<128x128xf32>
    %cst_59 = arith.constant dense<0xFF800000> : vector<128xf32>
    %124 = vector.multi_reduction <maximumf>, %123, %cst_59 [1] : vector<128x128xf32> to vector<128xf32>
    %125 = vector.shape_cast %124 : vector<128xf32> to vector<128x1xf32>
    %126 = arith.maximumf %109, %125 : vector<128x1xf32>
    %127 = arith.subf %109, %126 : vector<128x1xf32>
    %128 = math.exp %127 : vector<128x1xf32>
    %129 = vector.broadcast %126 : vector<128x1xf32> to vector<128x128xf32>
    %130 = arith.subf %123, %129 : vector<128x128xf32>
    %131 = math.exp %130 : vector<128x128xf32>
    %132 = arith.mulf %128, %114 : vector<128x1xf32>
    %cst_60 = arith.constant dense<0.000000e+00> : vector<128xf32>
    %133 = vector.multi_reduction <add>, %131, %cst_60 [1] : vector<128x128xf32> to vector<128xf32>
    %134 = vector.shape_cast %133 : vector<128xf32> to vector<128x1xf32>
    %135 = arith.addf %132, %134 : vector<128x1xf32>
    %136 = vector.broadcast %128 : vector<128x1xf32> to vector<128x128xf32>
    %137 = arith.mulf %136, %116 : vector<128x128xf32>
    %138 = arith.truncf %131 : vector<128x128xf32> to vector<128x128xbf16>
    %cst_61 = arith.constant dense<0.000000e+00> : vector<128x128xf32>
    %139 = tpu.matmul %138, %118, %cst_61 {dimension_numbers = #tpu.dot_dimension_numbers<[1], [0], [0], [1], [0, 0, 1, 1], [], []>} : vector<128x128xbf16>, vector<128x128xbf16>, vector<128x128xf32> -> vector<128x128xf32>
    %140 = arith.addf %137, %139 : vector<128x128xf32>
    %141 = tpu.reciprocal %135 {approx = true} : vector<128x1xf32> -> vector<128x1xf32>
    %142 = vector.broadcast %141 : vector<128x1xf32> to vector<128x128xf32>
    %143 = arith.mulf %140, %142 : vector<128x128xf32>
    %144 = arith.truncf %143 : vector<128x128xf32> to vector<128x128xbf16>
    %c0_62 = arith.constant 0 : index
    %c256_63 = arith.constant 256 : index
    %145 = vector.load %arg8[%c0_62, %c256_63] : memref<128x512xbf16, #tpu.memory_space<vmem>>, vector<128x128xbf16>
    tpu.vector_store %arg8[%c0_62, %c256_63], %144 {strides = array<i32>} : memref<128x512xbf16, #tpu.memory_space<vmem>>, vector<128x128xbf16>,
    %146 = arith.index_cast %4 : i32 to index
    %c384 = arith.constant 384 : index
    %147 = vector.load %arg7[%146, %c384] : memref<256x1536xbf16, #tpu.memory_space<vmem>>, vector<128x128xbf16>
    %c0_64 = arith.constant 0 : index
    %c896 = arith.constant 896 : index
    %148 = vector.load %arg7[%c0_64, %c896] : memref<256x1536xbf16, #tpu.memory_space<vmem>>, vector<128x128xbf16>
    %c0_65 = arith.constant 0 : index
    %c1408 = arith.constant 1408 : index
    %149 = vector.load %arg7[%c0_65, %c1408] : memref<256x1536xbf16, #tpu.memory_space<vmem>>, vector<128x128xbf16>
    %cst_66 = arith.constant dense<0.000000e+00> : vector<128x128xf32>
    %150 = tpu.matmul %147, %148, %cst_66 {dimension_numbers = #tpu.dot_dimension_numbers<[1], [1], [0], [0], [0, 0, 1, 0], [], []>} : vector<128x128xbf16>, vector<128x128xbf16>, vector<128x128xf32> -> vector<128x128xf32>
    %c3 = arith.constant 3 : index
    %c0_67 = arith.constant 0 : index
    %c0_68 = arith.constant 0 : index
    %151 = vector.load %arg5[%c3, %c0_67, %c0_68] : memref<4x128x256xbf16, #tpu.memory_space<vmem>>, vector<1x128x128xbf16>
    %152 = vector.shape_cast %151 : vector<1x128x128xbf16> to vector<128x128xbf16>
    %153 = arith.extf %152 : vector<128x128xbf16> to vector<128x128xf32>
    %154 = arith.addf %150, %153 : vector<128x128xf32>
    %cst_69 = arith.constant dense<0xFF800000> : vector<128xf32>
    %155 = vector.multi_reduction <maximumf>, %154, %cst_69 [1] : vector<128x128xf32> to vector<128xf32>
    %156 = vector.shape_cast %155 : vector<128xf32> to vector<128x1xf32>
    %157 = vector.broadcast %156 : vector<128x1xf32> to vector<128x128xf32>
    %158 = arith.subf %154, %157 : vector<128x128xf32>
    %159 = math.exp %158 : vector<128x128xf32>
    %cst_70 = arith.constant dense<0.000000e+00> : vector<128xf32>
    %160 = vector.multi_reduction <add>, %159, %cst_70 [1] : vector<128x128xf32> to vector<128xf32>
    %161 = vector.shape_cast %160 : vector<128xf32> to vector<128x1xf32>
    %162 = arith.truncf %159 : vector<128x128xf32> to vector<128x128xbf16>
    %cst_71 = arith.constant dense<0.000000e+00> : vector<128x128xf32>
    %163 = tpu.matmul %162, %149, %cst_71 {dimension_numbers = #tpu.dot_dimension_numbers<[1], [0], [0], [1], [0, 0, 1, 1], [], []>} : vector<128x128xbf16>, vector<128x128xbf16>, vector<128x128xf32> -> vector<128x128xf32>
    %c128_72 = arith.constant 128 : index
    %c896_73 = arith.constant 896 : index
    %164 = vector.load %arg7[%c128_72, %c896_73] : memref<256x1536xbf16, #tpu.memory_space<vmem>>, vector<128x128xbf16>
    %c128_74 = arith.constant 128 : index
    %c1408_75 = arith.constant 1408 : index
    %165 = vector.load %arg7[%c128_74, %c1408_75] : memref<256x1536xbf16, #tpu.memory_space<vmem>>, vector<128x128xbf16>
    %cst_76 = arith.constant dense<0.000000e+00> : vector<128x128xf32>
    %166 = tpu.matmul %147, %164, %cst_76 {dimension_numbers = #tpu.dot_dimension_numbers<[1], [1], [0], [0], [0, 0, 1, 0], [], []>} : vector<128x128xbf16>, vector<128x128xbf16>, vector<128x128xf32> -> vector<128x128xf32>
    %c3_77 = arith.constant 3 : index
    %c0_78 = arith.constant 0 : index
    %c128_79 = arith.constant 128 : index
    %167 = vector.load %arg5[%c3_77, %c0_78, %c128_79] : memref<4x128x256xbf16, #tpu.memory_space<vmem>>, vector<1x128x128xbf16>
    %168 = vector.shape_cast %167 : vector<1x128x128xbf16> to vector<128x128xbf16>
    %169 = arith.extf %168 : vector<128x128xbf16> to vector<128x128xf32>
    %170 = arith.addf %166, %169 : vector<128x128xf32>
    %cst_80 = arith.constant dense<0xFF800000> : vector<128xf32>
    %171 = vector.multi_reduction <maximumf>, %170, %cst_80 [1] : vector<128x128xf32> to vector<128xf32>
    %172 = vector.shape_cast %171 : vector<128xf32> to vector<128x1xf32>
    %173 = arith.maximumf %156, %172 : vector<128x1xf32>
    %174 = arith.subf %156, %173 : vector<128x1xf32>
    %175 = math.exp %174 : vector<128x1xf32>
    %176 = vector.broadcast %173 : vector<128x1xf32> to vector<128x128xf32>
    %177 = arith.subf %170, %176 : vector<128x128xf32>
    %178 = math.exp %177 : vector<128x128xf32>
    %179 = arith.mulf %175, %161 : vector<128x1xf32>
    %cst_81 = arith.constant dense<0.000000e+00> : vector<128xf32>
    %180 = vector.multi_reduction <add>, %178, %cst_81 [1] : vector<128x128xf32> to vector<128xf32>
    %181 = vector.shape_cast %180 : vector<128xf32> to vector<128x1xf32>
    %182 = arith.addf %179, %181 : vector<128x1xf32>
    %183 = vector.broadcast %175 : vector<128x1xf32> to vector<128x128xf32>
    %184 = arith.mulf %183, %163 : vector<128x128xf32>
    %185 = arith.truncf %178 : vector<128x128xf32> to vector<128x128xbf16>
    %cst_82 = arith.constant dense<0.000000e+00> : vector<128x128xf32>
    %186 = tpu.matmul %185, %165, %cst_82 {dimension_numbers = #tpu.dot_dimension_numbers<[1], [0], [0], [1], [0, 0, 1, 1], [], []>} : vector<128x128xbf16>, vector<128x128xbf16>, vector<128x128xf32> -> vector<128x128xf32>
    %187 = arith.addf %184, %186 : vector<128x128xf32>
    %188 = tpu.reciprocal %182 {approx = true} : vector<128x1xf32> -> vector<128x1xf32>
    %189 = vector.broadcast %188 : vector<128x1xf32> to vector<128x128xf32>
    %190 = arith.mulf %187, %189 : vector<128x128xf32>
    %191 = arith.truncf %190 : vector<128x128xf32> to vector<128x128xbf16>
    %c0_83 = arith.constant 0 : index
    %c384_84 = arith.constant 384 : index
    %192 = vector.load %arg8[%c0_83, %c384_84] : memref<128x512xbf16, #tpu.memory_space<vmem>>, vector<128x128xbf16>
    tpu.vector_store %arg8[%c0_83, %c384_84], %191 {strides = array<i32>} : memref<128x512xbf16, #tpu.memory_space<vmem>>, vector<128x128xbf16>,
    %c0_85 = arith.constant 0 : index
    %c0_86 = arith.constant 0 : index
    %193 = vector.load %arg8[%c0_85, %c0_86] : memref<128x512xbf16, #tpu.memory_space<vmem>>, vector<128x512xbf16>
    %c0_87 = arith.constant 0 : index
    %c0_88 = arith.constant 0 : index
    %194 = vector.load %arg4[%c0_87, %c0_88] : memref<512x128xbf16, #tpu.memory_space<vmem>>, vector<512x128xbf16>
    %cst_89 = arith.constant dense<0.000000e+00> : vector<128x128xf32>
    %195 = tpu.matmul %193, %194, %cst_89 {dimension_numbers = #tpu.dot_dimension_numbers<[1], [0], [0], [1], [0, 0, 1, 1], [], []>} : vector<128x512xbf16>, vector<512x128xbf16>, vector<128x128xf32> -> vector<128x128xf32>
    %c0_90 = arith.constant 0 : index
    %c0_91 = arith.constant 0 : index
    %c0_92 = arith.constant 0 : index
    %196 = vector.load %arg6[%c0_90, %c0_91, %c0_92] : memref<1x128x128xf32, #tpu.memory_space<vmem>>, vector<1x128x128xf32>
    %197 = vector.shape_cast %196 : vector<1x128x128xf32> to vector<128x128xf32>
    %198 = vector.shape_cast %195 : vector<128x128xf32> to vector<1x128x128xf32>
    tpu.vector_store %arg6[%c0_90, %c0_91, %c0_92], %198 {strides = array<i32>} : memref<1x128x128xf32, #tpu.memory_space<vmem>>, vector<1x128x128xf32>,
    return
  }
  func.func @transform_0(%arg0: i32, %arg1: i32) -> (i32, i32, i32) {
    %c0_i32 = arith.constant 0 : i32
    %c0_i32_0 = arith.constant 0 : i32
    %c0_i32_1 = arith.constant 0 : i32
    return %arg0, %c0_i32, %c0_i32_0 : i32, i32, i32
  }
  func.func @transform_1(%arg0: i32, %arg1: i32) -> (i32, i32) {
    %c0_i32 = arith.constant 0 : i32
    %c0_i32_0 = arith.constant 0 : i32
    %c0_i32_1 = arith.constant 0 : i32
    return %c0_i32, %c0_i32_0 : i32, i32
  }
  func.func @transform_2(%arg0: i32, %arg1: i32) -> (i32, i32) {
    %c0_i32 = arith.constant 0 : i32
    %c0_i32_0 = arith.constant 0 : i32
    %c0_i32_1 = arith.constant 0 : i32
    return %c0_i32, %c0_i32_0 : i32, i32
  }
  func.func @transform_3(%arg0: i32, %arg1: i32) -> (i32, i32, i32) {
    %c0_i32 = arith.constant 0 : i32
    %c0_i32_0 = arith.constant 0 : i32
    %c0_i32_1 = arith.constant 0 : i32
    return %c0_i32, %arg1, %c0_i32_0 : i32, i32, i32
  }
  func.func @transform_4(%arg0: i32, %arg1: i32) -> (i32, i32, i32) {
    %c0_i32 = arith.constant 0 : i32
    %c0_i32_0 = arith.constant 0 : i32
    return %arg0, %arg1, %c0_i32 : i32, i32, i32
  }
}

</mosaic_0001>

<bundles_post_ra>
// kernel: t5_flash_attention_forward.1
= control target key start
LH: loop header
LB: loop body
LE: loop exit
PB: predicated region body
PF: predicated region fallthrough
CT: control target
= control target key end

     0   :  { %s12483_s0 = inlined_call_operand.hbm [shape: f32[2,256,128], index: 0, kind: input, shape index: {}]   ;;  %s12484_s1 = inlined_call_operand.hbm [shape: bf16[128,1536], index: 1, kind: input, shape index: {}]   ;;  %s12485_s2 = inlined_call_operand.hbm [shape: bf16[512,128], index: 2, kind: input, shape index: {}]   ;;  %s12486_s3 = inlined_call_operand.hbm [shape: bf16[4,256,256], index: 3, kind: input, shape index: {}]   ;;  %s12487_s4 = inlined_call_operand.hbm [shape: f32[2,256,128], index: 4, kind: output, shape index: {}]  }
   0x1   :  { %12667 = sst [smem:[#allocation240_spill]] %s12487_s4 }
   0x2   :  { %9 = vsyncpa [#allocation5], 0 }
   0x3   :  { %11 = vsyncpa [#allocation5 + $0x1], 0 }
   0x4   :  { %12 = vsyncpa [#allocation8], 0 }
   0x5   :  { %13 = vsyncpa [#allocation11], 0 }
   0x6   :  { %15 = vsyncpa [#allocation11 + $0x1], 0 }
   0x7   :  { %16 = vsyncpa [#allocation6], 0 }
   0x8   :  { %18 = vsyncpa [#allocation6 + $0x1], 0  ;;  %s9076_s15 = smov 0   ;;  %s9078_s16 = smov 0  }
   0x9   :  { %s9080_s17 = smov 0   ;;  %s9082_s18 = smov 0  }
   0xa   :  { %s9084_s19 = smov 0   ;;  %s9086_s20 = smov 0  }
   0xb   :  { %s9088_s21 = smov 0   ;;  %s9090_s22 = smov 0  }
   0xc   :  { %s9092_s23 = smov 0   ;;  %s9094_s24 = smov 0  }
   0xd   :  { %s9096_s25 = smov 0   ;;  %s9098_s26 = smov 0  }
   0xe   :  { %s9100_s27 = smov 0   ;;  %s9102_s28 = smov 0  }
   0xf LB: > { %12668 = sst [smem:[#allocation20_spill]] %s8978_s15  ;;  %s12488_s29 = sadd.s32 4294967295, %s9030_s28   ;;  %s9030_s28 = sphi %s9102_s28, %s24_s28   ;;  %s9026_s27 = sphi %s9100_s27, %s13161_s27   ;;  %s9022_s26 = sphi %s9098_s26, %s13160_s26   ;;  %s9018_s25 = sphi %s9096_s25, %s13159_s25   ;;  %s9014_s24 = sphi %s9094_s24, %s13158_s24   ;;  %s9010_s23 = sphi %s9092_s23, %s13157_s23   ;;  %s9006_s22 = sphi %s9090_s22, %s13156_s22   ;;  %s9002_s21 = sphi %s9088_s21, %s13155_s21   ;;  %s8998_s20 = sphi %s9086_s20, %s13154_s20   ;;  %s8994_s19 = sphi %s9084_s19, %s13153_s19   ;;  %s8990_s18 = sphi %s9082_s18, %s13152_s18   ;;  %s8986_s17 = sphi %s9080_s17, %s13147_s17   ;;  %s8982_s16 = sphi %s9078_s16, %s13146_s16   ;;  %s8978_s15 = sphi %s9076_s15, %s13145_s15  }
  0x10   : > { %12669 = sst [smem:[#allocation21_spill]] %s8982_s16  ;;  %s33_s5 = sadd.s32 1, %s9022_s26 }
  0x11   : > { %12670 = sst [smem:[#allocation22_spill]] %s8986_s17  ;;  %s36_s6 = sadd.s32 1, %s9026_s27 }
  0x12   : > { %12671 = sst [smem:[#allocation23_spill]] %s9014_s24  ;;  %p34_p0 = scmp.ge.s32.totalorder %s33_s5, 2 }
  0x13   : > { %12672 = sst [smem:[#allocation24_spill]] %s9018_s25  ;;  %s43_s7 = sadd.s32 1, %s9010_s23 }
  0x14   : > { %p50_p1 = scmp.ne.s32.totalorder %s9010_s23, %s9006_s22  ;;  %p51_p2 = scmp.eq.s32.totalorder %s9030_s28, 0 }
  0x15   : > { %s13163_s5 = smov (%p34_p0, %s33_s5), 0  ;;  %s13165_s6 = smov (!%p34_p0, %s36_s6), %s9026_s27 }
  0x16   : > { %12673 = sst [smem:[#allocation25_spill]] %s13163_s5  ;;  %p9157_p3 = por %p51_p2, %p50_p1 }
  0x17   : > { %p56_p4 = scmp.ne.s32.totalorder %s9006_s22, %s9002_s21  ;;  %p38_p5 = scmp.ge.s32.totalorder %s13165_s6, 2 }
  0x18   : > { %s12674_s8 = scalar_select %p9157_p3, 1, 0 }
  0x19   : > { %p9164_p6 = scmp.eq.s32.totalorder %s12488_s29, 0  ;;  %s108_s10 = ssub.s32 %s9022_s26, %s13163_s5 }
  0x1a   : > { %s111_s11 = sadd.s32 1, %s8998_s20  ;;  %s13167_s6 = smov (%p38_p5, %s13165_s6), 0 }
  0x1b   : > { %s12675_s9 = scalar_select %p9164_p6, 1, 0 }
  0x1c   : > { %12676 = sst [smem:[#allocation26_spill]] %s13167_s6  ;;  %p9175_p7 = por %p9164_p6, %p56_p4 }
  0x1d   : > { %p109_p8 = scmp.eq.s32.totalorder %s108_s10, 0  ;;  %s40_s13 = ssub.s32 %s9026_s27, %s13167_s6 }
  0x1e   : > { %s12677_s12 = scalar_select %p9175_p7, 1, 0 }
  0x1f   : > { %p118_p9 = scmp.ne.s32.totalorder %s8998_s20, %s8994_s19  ;;  %p41_p10 = scmp.eq.s32.totalorder %s40_s13, 0 }
  0x20   : > { %p124_p11 = scmp.ne.s32.totalorder %s8994_s19, %s8990_s18  ;;  %s136_s6 = sor.u32 %s108_s10, %s40_s13 }
  0x21   : > { %s9186_s14 = scalar_select %p109_p8, %s8998_s20, %s111_s11  }
  0x22   : > { %s9189_s21 = scalar_select %p41_p10, %s9010_s23, %s43_s7  }
  0x23   : > { %12678 = sst [smem:[#allocation27_spill]] %s9186_s14  ;;  %p9193_p12 = por %p118_p9, %p51_p2 }
  0x24   : > { %12679 = sst [smem:[#allocation28_spill]] %s9189_s21  ;;  %p9199_p13 = por %p124_p11, %p9164_p6 }
  0x25   : > { %s12680_s30 = scalar_select %p9193_p12, 1, 0 }
  0x26   : > { %s12681_s29 = scalar_select %p9199_p13, 1, 0 }
  0x27   : > { %s139_s5 = sadd.s32 1, %s8986_s17  ;;  %p137_p0 = scmp.eq.s32.totalorder %s136_s6, 0 }
  0x28   : > { %p149_p1 = scmp.ne.s32.totalorder %s8986_s17, %s8982_s16  ;;  %s12682_s18 = sadd.s32 4294967295, %s9030_s28  }
  0x29   : > { %p150_p4 = scmp.eq.s32.totalorder %s12682_s18, 3  ;;  %p155_p5 = scmp.ne.s32.totalorder %s8982_s16, %s8978_s15 }
  0x2a   : > { %s9211_s7 = scalar_select %p137_p0, %s8986_s17, %s139_s5  }
  0x2b   : > { %p9213_p8 = por %p150_p4, %p149_p1  ;;  %s12686_s21 = sadd.s32 4294967294, %s9030_s28  }
  0x2c   : > { %12683 = sst [smem:[#allocation29_spill]] %s9211_s7  ;;  %p156_p2 = scmp.eq.s32.totalorder %s12686_s21, 3 }
  0x2d   : > { %s12684_s11 = scalar_select %p9213_p8, 1, 0 }
  0x2e   : > { %p6786_p9 = scmp.ge.s32.totalorder %s9030_s28, 1  ;;  %p163_p10 = scmp.lt.s32.totalorder %s9030_s28, 5 }
  0x2f   : > { %12685 = sst [smem:[#allocation30_spill]] %s12684_s11  ;;  %p9221_p11 = por %p156_p2, %p155_p5 }
  0x30   : > { %p9225_p13 = pnand %p6786_p9, %p163_p10  ;;  %s9032_s10 = smov [#allocation7]  }
  0x31   : > { %s12687_s14 = scalar_select %p9221_p11, 1, 0 }
  0x32   : > { %s12689_s6 = scalar_select %p9225_p13, 1, 0 }
  0x33   : > { %12688 = sst [smem:[#allocation31_spill]] %s12687_s14  ;;  %s175_s5 = sshll.u32 %s9032_s10, 4  ;;  %s176_s5 = int_to_ptr.vmem [resolvable:$true] %s175_s5 }
  0x34   : > { %p7959_p0 = pneg %p9225_p13  ;;  %s9033_s21 = smov [#allocation9]  }
  0x35   : > { %s188_s18 = sshll.u32 %s9033_s21, 4  ;;  %s8792_s14 = scalar_lea.hbm %s12484_s1, 12288  ;;  %s9237_s18 = int_to_ptr.vmem [resolvable:$true] %s188_s18 }
  0x36   : > { %p9233_p1 = pnand %p7959_p0, %p9164_p6  ;;  %p8793_p4 = scmp.ne.s32.totalorder %s12484_s1, %s8792_s14 }
  0x37   : > { %p8799_p10 = scmp.lt.u32.totalorder %s8792_s14, %s12484_s1 }
  0x38   : > { %p8794_p5 = pneg %p9233_p1 }
  0x3a   : > { %p8795_p2 = pnand %p8794_p5, %p8793_p4 }
  0x3c   : > { %p8796_p9 = pneg %p8795_p2 }
  0x3e   : > { %p8801_p0 = pnand %p8799_p10, %p8796_p9 }
  0x40   : > { %8804 = shalt.err (!%p8801_p0)
}
  0x41   : > { %s8805_s21 = scalar_lea.vmem %s176_s5, 12288  ;;  %p8813_p7 = scmp.lt.s32.totalorder %s176_s5, %s176_s5 }
  0x42   : > { %p8806_p11 = scmp.ne.s32.totalorder %s176_s5, %s8805_s21  ;;  %p8814_p13 = scmp.lt.s32.totalorder %s8805_s21, %s8805_s21 }
  0x44   : > { %p8808_p8 = pnand %p8806_p11, %p8794_p5  ;;  %p8815_p12 = por %p8814_p13, %p8813_p7 }
  0x46   : > { %p8809_p6 = pneg %p8808_p8 }
  0x48   : > { %p8816_p3 = pnand %p8815_p12, %p8809_p6 }
  0x4a   : > { %8819 = shalt.err (!%p8816_p3)
}
  0x4b   : > { %s9034_s15 = smov 768   ;;  %s9035_s17 = smov 48  }
  0x4c   : > { %7962 = dma.hbm_to_vmem [thread:$0]  (!%p9233_p1), %s12484_s1, 12288, %s176_s5, [#allocation8], %s9034_s15, %s9034_s15, %s9035_s17  }
  0x4d   : > { %s8820_s10 = scalar_lea.hbm %s12485_s2, 4096 }
  0x4e   : > { %p8821_p8 = scmp.ne.s32.totalorder %s12485_s2, %s8820_s10  ;;  %p8827_p7 = scmp.lt.u32.totalorder %s8820_s10, %s12485_s2 }
  0x50   : > { %p8823_p3 = pnand %p8821_p8, %p8794_p5 }
  0x52   : > { %p8824_p6 = pneg %p8823_p3 }
  0x54   : > { %p8829_p12 = pnand %p8827_p7, %p8824_p6 }
  0x56   : > { %8832 = shalt.err (!%p8829_p12)
}
  0x57   : > { %s8833_s5 = scalar_lea.vmem %s9237_s18, 4096  ;;  %p8841_p2 = scmp.lt.s32.totalorder %s9237_s18, %s9237_s18 }
  0x58   : > { %p8834_p13 = scmp.ne.s32.totalorder %s9237_s18, %s8833_s5  ;;  %p8842_p9 = scmp.lt.s32.totalorder %s8833_s5, %s8833_s5 }
  0x5a   : > { %p8836_p11 = pnand %p8834_p13, %p8794_p5  ;;  %p8843_p10 = por %p8842_p9, %p8841_p2 }
  0x5c   : > { %p8837_p4 = pneg %p8836_p11 }
  0x5e   : > { %p8844_p0 = pnand %p8843_p10, %p8837_p4 }
  0x60   : > { %8847 = shalt.err (!%p8844_p0)
}
  0x61   : > { %s9036_s16 = smov 64   ;;  %s9037_s24 = smov 4  }
  0x62   : > { %7965 = dma.hbm_to_vmem [thread:$0]  (!%p9233_p1), %s12485_s2, 4096, %s9237_s18, [#allocation8], %s9036_s16, %s9036_s16, %s9037_s24  }
  0x63   : > { %p6789_p8 = scmp.ge.s32.totalorder %s9030_s28, 4 }
  0x64   : > { %s202_s17 = sand.u32 (!%p6789_p8), 1, %s9010_s23   ;;  %s7038_s4 = sshll.u32 (!%p6789_p8), %s9026_s27, 12 }
  0x65   : > { %198 = sbr.rel (%p6789_p8) target bundleno = 142 (0x8e), region = 24  ;;  %s6790_s14 = sshll.u32 (!%p6789_p8), %s202_s17, 8 }
  0x66   : > { %s9292_s10 = scalar_lea.hbm (!%p6789_p8), %s12483_s0, %s7038_s4  ;;  %s206_s13 = scalar_lea.vmem (!%p6789_p8), [#allocation4], %s6790_s14 }
  0x67   : > { %s213_s18 = sshll.u32 (!%p6789_p8), %s206_s13, 4  ;;  %s9296_s21 = scalar_lea.sflag (!%p6789_p8), [#allocation5], %s202_s17  ;;  %s9294_s18 = int_to_ptr.vmem [resolvable:$true] %s213_s18 }
  0x68   : > { %s8848_s5 = scalar_lea.hbm (!%p6789_p8), %s9292_s10, 4096  ;;  %p12691_p5 = scmp.ne.s32.totalorder (!%p6789_p8), %s12674_s8, 0 }
  0x69   : > { %p8849_p1 = scmp.ne.s32.totalorder (!%p6789_p8), %s9292_s10, %s8848_s5  ;;  %s8852_s25 = scalar_lea.hbm (!%p6789_p8), %s12483_s0, 8192 }
  0x6a   : > { %p8853_p7 = scmp.lt.u32.totalorder (!%p6789_p8), %s9292_s10, %s12483_s0  ;;  %p8854_p12 = scmp.lt.u32.totalorder (!%p6789_p8), %s8852_s25, %s8848_s5 }
  0x6b   : > { %p8850_p3 = pnand (!%p6789_p8), %p8849_p1, %p12691_p5  ;;  %p8856_p11 = scmp.lt.u32.totalorder (!%p6789_p8), %s8848_s5, %s9292_s10 }
  0x6c   : > { %p8855_p13 = por %p8854_p12, %p8853_p7 }
  0x6d   : > { %p8851_p6 = pneg %p8850_p3 }
  0x6e   : > { %p8857_p4 = por %p8856_p11, %p8855_p13 }
  0x70   : > { %p8858_p2 = pnand %p8857_p4, %p8851_p6 }
  0x72   : > { %8861 = shalt.err (!%p8858_p2)
}
  0x73   : > { %s8862_s17 = scalar_lea.vmem %s9294_s18, 4096  ;;  %s9038_s14 = smov [#allocation4]  }
  0x74   : > { %p8863_p9 = scmp.ne.s32.totalorder %s9294_s18, %s8862_s17  ;;  %s8866_s7 = sshll.u32 %s9038_s14, 4  ;;  %s8867_s7 = int_to_ptr.vmem [resolvable:$false] %s8866_s7 }
  0x75   : > { %s8868_s11 = scalar_lea.vmem %s8867_s7, 8192  ;;  %p8869_p8 = scmp.lt.s32.totalorder %s9294_s18, %s8867_s7 }
  0x76   : > { %p8864_p10 = pnand %p8863_p9, %p12691_p5  ;;  %p8870_p1 = scmp.lt.s32.totalorder %s8868_s11, %s8862_s17 }
  0x78   : > { %p8865_p0 = pneg %p8864_p10  ;;  %p8871_p3 = por %p8870_p1, %p8869_p8 }
  0x7a   : > { %p8872_p7 = pnand %p8871_p3, %p8865_p0 }
  0x7c   : > { %8875 = shalt.err (!%p8872_p7)
}
  0x7d   : > { %s9039_s13 = smov 128   ;;  %s9040_s5 = smov 8  }
  0x7e   : > { %7942 = dma.hbm_to_vmem [thread:$0]  (%p12691_p5), %s9292_s10, 4096, %s9294_s18, %s9296_s21, %s9039_s13, %s9039_s13, %s9040_s5  }
  0x7f   : > { %s223_s16 = sand.u32 1, %s8998_s20   ;;  %s7040_s24 = sshll.u32 %s9022_s26, 11 }
  0x80   : > { %s6793_s25 = sshll.u32 %s223_s16, 9  ;;  %s234_s17 = scalar_lea.hbm %s12486_s3, %s7040_s24 }
  0x81   : > { %p12692_p6 = scmp.ne.s32.totalorder %s12680_s30, 0  ;;  %s227_s8 = scalar_lea.vmem [#allocation10], %s6793_s25 }
  0x82   : > { %s247_s10 = sshll.u32 %s227_s8, 4  ;;  %s9041_s21 = smov 4096   ;;  %s248_s10 = int_to_ptr.vmem [resolvable:$true] %s247_s10 }
  0x83   : > { %s7943_s14 = scalar_select %p12692_p6, [#allocation0], [#allocation15] }
  0x84   : > { %7944 = sst [smem:[#allocation14]] (%p12692_p6), %s9041_s21  ;;  %s9042_s7 = smov 2048  }
  0x85   : > { %s239_s18 = sld [smem:[%s7943_s14]]   ;;  %s9043_s11 = smov 16  }
  0x86   : > { %7945 = sst [smem:[#allocation14 + $0x1]] (%p12692_p6), %s9042_s7  ;;  %s9044_s13 = smov 128  }
  0x87   : > { %7946 = sst [smem:[#allocation14 + $0x2]] (%p12692_p6), %s9043_s11  ;;  %s9045_s24 = smov 8  }
  0x88   : > { %7947 = sst [smem:[#allocation14 + $0x3]] (%p12692_p6), %s9044_s13  ;;  %s224_s15 = scalar_lea.sflag [#allocation11], %s223_s16 }
  0x89   : > { %7948 = sst [smem:[#allocation14 + $0x4]] (%p12692_p6), %s9044_s13  ;;  %s9046_s4 = smov [#allocation13]  }
  0x8a   : > { %7949 = sst [smem:[#allocation14 + $0x5]] (%p12692_p6), %s9045_s24 }
  0x8b   : > { %s6797_s5 = sshll.u32 %s239_s18, 26 }
  0x8c   : > { %s6798_s25 = sadd.s32 134217728, %s6797_s5 }
  0x8d   : > { %7950 = dma.general (%p12692_p6), %s234_s17, 8192, %s248_s10, %s224_s15, %s9046_s4, [#allocation14], %s6798_s25, 0  }
  0x8e PF: > { %p12693_p5 = scmp.ne.s32.totalorder %s12689_s6, 0 }
  0x90   : > { %272 = sbr.rel (%p12693_p5) target bundleno = 4884 (0x1314), region = 36 }
  0x97   : > { %s274_s14 = sand.u32 1, %s9006_s22   ;;  %p12694_p12 = scmp.ne.s32.totalorder %s12677_s12, 0 }
  0x98   : > { %s6800_s8 = sshll.u32 %s274_s14, 8  ;;  %s275_s21 = scalar_lea.sflag [#allocation5], %s274_s14 }
  0x99   : > { %s9344_s7 = scalar_lea.vmem [#allocation4], %s6800_s8 }
  0x9a   : > { %8961 = dma.done.wait (%p12694_p12), %s275_s21, 4096  }
  0x9b   : > { %8963 = vsyncadd (%p12694_p12), %s275_s21, 4294963200  ;;  %p12695_p13 = scmp.ne.s32.totalorder %s12675_s9, 0 }
  0x9d   : > { %8965 = dma.done.wait (%p12695_p13), [#allocation8], 16384  }
  0x9e   : > { %8967 = vsyncadd (%p12695_p13), [#allocation8], 4294950912  ;;  %s291_s30 = sand.u32 1, %s8994_s19   ;;  %p12696_p11 = scmp.ne.s32.totalorder %s12681_s29, 0 }
  0x9f   : > { %s6803_s6 = sshll.u32 %s291_s30, 9  ;;  %s292_s16 = scalar_lea.sflag [#allocation11], %s291_s30 }
  0xa0   : > { %s9355_s17 = scalar_lea.vmem [#allocation10], %s6803_s6 }
  0xa1   : > { %8969 = dma.done.wait (%p12696_p11), %s292_s16, 8192  }
  0xa2   : > { %8971 = vsyncadd (%p12696_p11), %s292_s16, 4294959104  ;;  %s12697_s12 = sld [smem:[#allocation21_spill]] }
  0xa3   : > { %s12698_s9 = sld [smem:[#allocation23_spill]] }
  0xa8   : > { %s322_s10 = sand.u32 1, %s12697_s12  }
  0xa9   : > { %s6804_s18 = sshll.u32 %s322_s10, 7  ;;  %p6805_p4 = scmp.ne.s32.totalorder %s12698_s9, 0 }
  0xaa   : > { %s9364_s11 = scalar_lea.vmem [#allocation12], %s6804_s18  ;;  %v8104_v0 = vld [vmem:[#allocation7 + $0x4] ss:$48 sps:$4 sm:$0xff] (!%p6805_p4)   ;;  %v8106_v1 = vld [vmem:[#allocation7 + $0xc] ss:$48 sps:$4 sm:$0xff] (!%p6805_p4)   ;;  %v9047_v2 = vmov (!%p6805_p4), 0  }
  0xab   : > { %331 = sbr.rel (%p6805_p4) target bundleno = 798 (0x31e), region = 56  ;;  %988 = vmatprep.mubr.bf16.mxu0 (!%p6805_p4), %v9047_v2  ;;  %1181 = vmatprep.mubr.bf16.mxu1 (!%p6805_p4), %v9047_v2  ;;  %v8108_v3 = vld [vmem:[#allocation7] ss:$48 sps:$4 sm:$0xff] (!%p6805_p4)   ;;  %v8109_v4 = vld [vmem:[#allocation7 + $0x8] ss:$48 sps:$4 sm:$0xff] (!%p6805_p4)  }
  0xac   : > { %956 = vmatprep.subr.bf16.mxu0 (!%p6805_p4), %v8104_v0  ;;  %1149 = vmatprep.subr.bf16.mxu1 (!%p6805_p4), %v8106_v1  ;;  %v8110_v5 = vld [vmem:[#allocation7 + $0x64] ss:$48 sps:$4 sm:$0xff] (!%p6805_p4)   ;;  %v8112_v6 = vld [vmem:[#allocation7 + $0x6c] ss:$48 sps:$4 sm:$0xff] (!%p6805_p4)   ;;  %v8114_v7 = vld [vmem:[#allocation7 + $0x60] ss:$48 sps:$4 sm:$0xff] (!%p6805_p4)  }
  0xad   : > { %957 = vmatpush1.bf16.msra.mxu0 (!%p6805_p4), %v8108_v3  ;;  %1150 = vmatpush1.bf16.msra.mxu1 (!%p6805_p4), %v8109_v4  ;;  %v8115_v8 = vld [vmem:[#allocation7 + $0x68] ss:$48 sps:$4 sm:$0xff] (!%p6805_p4)   ;;  %v8116_v9 = vld [vmem:[#allocation7 + $0xc4] ss:$48 sps:$4 sm:$0xff] (!%p6805_p4)   ;;  %v8118_v10 = vld [vmem:[#allocation7 + $0xcc] ss:$48 sps:$4 sm:$0xff] (!%p6805_p4)  }
  0xae   : > { %958 = vmatprep.subr.bf16.mxu0 (!%p6805_p4), %v8110_v5  ;;  %1151 = vmatprep.subr.bf16.mxu1 (!%p6805_p4), %v8112_v6  ;;  %v8120_v11 = vld [vmem:[#allocation7 + $0xc0] ss:$48 sps:$4 sm:$0xff] (!%p6805_p4)   ;;  %v8121_v12 = vld [vmem:[#allocation7 + $0xc8] ss:$48 sps:$4 sm:$0xff] (!%p6805_p4)   ;;  %v8122_v13 = vld [vmem:[#allocation7 + $0x124] ss:$48 sps:$4 sm:$0xff] (!%p6805_p4)  }
  0xaf   : > { %v8124_v14 = vld [vmem:[#allocation7 + $0x12c] ss:$48 sps:$4 sm:$0xff] (!%p6805_p4)   ;;  %v8126_v15 = vld [vmem:[#allocation7 + $0x120] ss:$48 sps:$4 sm:$0xff] (!%p6805_p4)   ;;  %v8127_v16 = vld [vmem:[#allocation7 + $0x128] ss:$48 sps:$4 sm:$0xff] (!%p6805_p4)  }
  0xb0   : > { %v8128_v17 = vld [vmem:[#allocation7 + $0x184] ss:$48 sps:$4 sm:$0xff] (!%p6805_p4)   ;;  %v8130_v18 = vld [vmem:[#allocation7 + $0x18c] ss:$48 sps:$4 sm:$0xff] (!%p6805_p4)   ;;  %v8132_v19 = vld [vmem:[#allocation7 + $0x180] ss:$48 sps:$4 sm:$0xff] (!%p6805_p4)  }
  0xb1   : > { %959 = vmatpush1.bf16.msra.mxu0 (!%p6805_p4), %v8114_v7  ;;  %1152 = vmatpush1.bf16.msra.mxu1 (!%p6805_p4), %v8115_v8  ;;  %v8133_v20 = vld [vmem:[#allocation7 + $0x188] ss:$48 sps:$4 sm:$0xff] (!%p6805_p4)   ;;  %v8134_v21 = vld [vmem:[#allocation7 + $0x1e4] ss:$48 sps:$4 sm:$0xff] (!%p6805_p4)   ;;  %v8136_v22 = vld [vmem:[#allocation7 + $0x1ec] ss:$48 sps:$4 sm:$0xff] (!%p6805_p4)  }
  0xb2   : > { %960 = vmatprep.subr.bf16.mxu0 %v8116_v9  ;;  %1153 = vmatprep.subr.bf16.mxu1 %v8118_v10  ;;  %v8138_v23 = vld [vmem:[#allocation7 + $0x1e0] ss:$48 sps:$4 sm:$0xff]   ;;  %v8139_v24 = vld [vmem:[#allocation7 + $0x1e8] ss:$48 sps:$4 sm:$0xff]   ;;  %v8140_v25 = vld [vmem:[#allocation7 + $0x244] ss:$48 sps:$4 sm:$0xff]  }
  0xb3   : > { %v8142_v26 = vld [vmem:[#allocation7 + $0x24c] ss:$48 sps:$4 sm:$0xff]   ;;  %v8144_v27 = vld [vmem:[#allocation7 + $0x240] ss:$48 sps:$4 sm:$0xff]   ;;  %v8145_v28 = vld [vmem:[#allocation7 + $0x248] ss:$48 sps:$4 sm:$0xff]  }
  0xb4   : > { %v8146_v29 = vld [vmem:[#allocation7 + $0x2a4] ss:$48 sps:$4 sm:$0xff]   ;;  %v8148_v30 = vld [vmem:[#allocation7 + $0x2ac] ss:$48 sps:$4 sm:$0xff]   ;;  %v8150_v31 = vld [vmem:[#allocation7 + $0x2a0] ss:$48 sps:$4 sm:$0xff]  }
  0xb5   : > { %961 = vmatpush1.bf16.msra.mxu0 %v8120_v11  ;;  %1154 = vmatpush1.bf16.msra.mxu1 %v8121_v12  ;;  %v8151_v32 = vld [vmem:[#allocation7 + $0x2a8] ss:$48 sps:$4 sm:$0xff]   ;;  %v332_v33 = vld [vmem:[%s9344_s7] sm:$0xff]  ;;  %v8157_v36 = vld [vmem:[#allocation7 + $0x1c] ss:$48 sps:$4 sm:$0xff]  }
  0xb6   : > { %962 = vmatprep.subr.bf16.mxu0 %v8122_v13  ;;  %1155 = vmatprep.subr.bf16.mxu1 %v8124_v14  ;;  %v333_v34 = vld [vmem:[%s9344_s7 + $0x8] sm:$0xff]  ;;  %v8154_v35 = vld [vmem:[#allocation7 + $0x14] ss:$48 sps:$4 sm:$0xff]   ;;  %v8152_v38 = vld [vmem:[#allocation7 + $0x10] ss:$48 sps:$4 sm:$0xff]  }
  0xb7   : > { %v9371_v37 = vpack.c.bf16 %v333_v34, %v332_v33  ;;  %v8155_v39 = vld [vmem:[#allocation7 + $0x18] ss:$48 sps:$4 sm:$0xff]   ;;  %v8160_v40 = vld [vmem:[#allocation7 + $0x74] ss:$48 sps:$4 sm:$0xff]   ;;  %v8163_v41 = vld [vmem:[#allocation7 + $0x7c] ss:$48 sps:$4 sm:$0xff]  }
  0xb8   : > { %v334_v42 = vld [vmem:[%s9344_s7 + $0x10] sm:$0xff]  ;;  %v335_v43 = vld [vmem:[%s9344_s7 + $0x18] sm:$0xff]  ;;  %v336_v53 = vld [vmem:[%s9344_s7 + $0x20] sm:$0xff] }
  0xb9   : > { %963 = vmatpush1.bf16.msra.mxu0 %v8126_v15  ;;  %1156 = vmatpush1.bf16.msra.mxu1 %v8127_v16  ;;  %v8158_v44 = vld [vmem:[#allocation7 + $0x70] ss:$48 sps:$4 sm:$0xff]   ;;  %v8161_v45 = vld [vmem:[#allocation7 + $0x78] ss:$48 sps:$4 sm:$0xff]   ;;  %v8166_v46 = vld [vmem:[#allocation7 + $0xd4] ss:$48 sps:$4 sm:$0xff]   ;;  %v9379_v48 = vpack.c.bf16 %v335_v43, %v334_v42 }
  0xba   : > { %964 = vmatprep.subr.bf16.mxu0 %v8128_v17  ;;  %1157 = vmatprep.subr.bf16.mxu1 %v8130_v18  ;;  %v8169_v47 = vld [vmem:[#allocation7 + $0xdc] ss:$48 sps:$4 sm:$0xff]   ;;  %v8164_v49 = vld [vmem:[#allocation7 + $0xd0] ss:$48 sps:$4 sm:$0xff]   ;;  %v8167_v50 = vld [vmem:[#allocation7 + $0xd8] ss:$48 sps:$4 sm:$0xff]  }
  0xbb   : > { %v8172_v51 = vld [vmem:[#allocation7 + $0x134] ss:$48 sps:$4 sm:$0xff]   ;;  %v8175_v52 = vld [vmem:[#allocation7 + $0x13c] ss:$48 sps:$4 sm:$0xff]   ;;  %v8170_v55 = vld [vmem:[#allocation7 + $0x130] ss:$48 sps:$4 sm:$0xff]  }
  0xbc   : > { %v337_v54 = vld [vmem:[%s9344_s7 + $0x28] sm:$0xff]  ;;  %v8178_v57 = vld [vmem:[#allocation7 + $0x194] ss:$48 sps:$4 sm:$0xff]   ;;  %v8176_v60 = vld [vmem:[#allocation7 + $0x190] ss:$48 sps:$4 sm:$0xff]  }
  0xbd   : > { %965 = vmatpush1.bf16.msra.mxu0 %v8132_v19  ;;  %1158 = vmatpush1.bf16.msra.mxu1 %v8133_v20  ;;  %v8173_v56 = vld [vmem:[#allocation7 + $0x138] ss:$48 sps:$4 sm:$0xff]   ;;  %v8181_v58 = vld [vmem:[#allocation7 + $0x19c] ss:$48 sps:$4 sm:$0xff]   ;;  %v9387_v59 = vpack.c.bf16 %v337_v54, %v336_v53  ;;  %v8184_v62 = vld [vmem:[#allocation7 + $0x1f4] ss:$48 sps:$4 sm:$0xff]  }
  0xbe   : > { %966 = vmatprep.subr.bf16.mxu0 %v8134_v21  ;;  %1159 = vmatprep.subr.bf16.mxu1 %v8136_v22  ;;  %v8179_v61 = vld [vmem:[#allocation7 + $0x198] ss:$48 sps:$4 sm:$0xff]   ;;  %v8187_v63 = vld [vmem:[#allocation7 + $0x1fc] ss:$48 sps:$4 sm:$0xff]   ;;  %v338_v0 = vld [vmem:[%s9344_s7 + $0x30] sm:$0xff] }
  0xbf   : > { %v339_v1 = vld [vmem:[%s9344_s7 + $0x38] sm:$0xff]  ;;  %v8182_v3 = vld [vmem:[#allocation7 + $0x1f0] ss:$48 sps:$4 sm:$0xff]   ;;  %v8190_v5 = vld [vmem:[#allocation7 + $0x254] ss:$48 sps:$4 sm:$0xff]  }
  0xc0   : > { %v8185_v4 = vld [vmem:[#allocation7 + $0x1f8] ss:$48 sps:$4 sm:$0xff]   ;;  %v8193_v6 = vld [vmem:[#allocation7 + $0x25c] ss:$48 sps:$4 sm:$0xff]   ;;  %v9395_v7 = vpack.c.bf16 %v339_v1, %v338_v0  ;;  %v8188_v8 = vld [vmem:[#allocation7 + $0x250] ss:$48 sps:$4 sm:$0xff]  }
  0xc1   : > { %967 = vmatpush1.bf16.msra.mxu0 %v8138_v23  ;;  %1160 = vmatpush1.bf16.msra.mxu1 %v8139_v24  ;;  %v8191_v9 = vld [vmem:[#allocation7 + $0x258] ss:$48 sps:$4 sm:$0xff]   ;;  %v340_v10 = vld [vmem:[%s9344_s7 + $0x40] sm:$0xff]  ;;  %v8199_v13 = vld [vmem:[#allocation7 + $0x2bc] ss:$48 sps:$4 sm:$0xff]  }
  0xc2   : > { %968 = vmatprep.subr.bf16.mxu0 %v8140_v25  ;;  %1161 = vmatprep.subr.bf16.mxu1 %v8142_v26  ;;  %v341_v11 = vld [vmem:[%s9344_s7 + $0x48] sm:$0xff]  ;;  %v8196_v12 = vld [vmem:[#allocation7 + $0x2b4] ss:$48 sps:$4 sm:$0xff]   ;;  %v8194_v14 = vld [vmem:[#allocation7 + $0x2b0] ss:$48 sps:$4 sm:$0xff]  }
  0xc3   : > { %v8197_v15 = vld [vmem:[#allocation7 + $0x2b8] ss:$48 sps:$4 sm:$0xff]   ;;  %v8202_v16 = vld [vmem:[#allocation7 + $0x24] ss:$48 sps:$4 sm:$0xff]   ;;  %v8205_v17 = vld [vmem:[#allocation7 + $0x2c] ss:$48 sps:$4 sm:$0xff]   ;;  %v9403_v18 = vpack.c.bf16 %v341_v11, %v340_v10 }
  0xc4   : > { %v342_v19 = vld [vmem:[%s9344_s7 + $0x50] sm:$0xff]  ;;  %v343_v20 = vld [vmem:[%s9344_s7 + $0x58] sm:$0xff]  ;;  %v344_v22 = vld [vmem:[%s9344_s7 + $0x60] sm:$0xff] }
  0xc5   : > { %969 = vmatpush1.bf16.msra.mxu0 %v8144_v27  ;;  %1162 = vmatpush1.bf16.msra.mxu1 %v8145_v28  ;;  %v9411_v21 = vpack.c.bf16 %v343_v20, %v342_v19  ;;  %v345_v23 = vld [vmem:[%s9344_s7 + $0x68] sm:$0xff]  ;;  %v346_v25 = vld [vmem:[%s9344_s7 + $0x70] sm:$0xff]  ;;  %v347_v26 = vld [vmem:[%s9344_s7 + $0x78] sm:$0xff] }
  0xc6   : > { %970 = vmatprep.subr.bf16.mxu0 %v8146_v29  ;;  %1163 = vmatprep.subr.bf16.mxu1 %v8148_v30  ;;  %v9419_v24 = vpack.c.bf16 %v345_v23, %v344_v22  ;;  %v9427_v27 = vpack.c.bf16 %v347_v26, %v346_v25  ;;  %v348_v28 = vld [vmem:[%s9344_s7 + $0x80] sm:$0xff]  ;;  %v349_v29 = vld [vmem:[%s9344_s7 + $0x88] sm:$0xff] }
  0xc7   : > { %v9435_v30 = vpack.c.bf16 %v349_v29, %v348_v28  ;;  %v352_v34 = vld [vmem:[%s9344_s7 + $0xa0] sm:$0xff]  ;;  %v357_v42 = vld [vmem:[%s9344_s7 + $0xc8] sm:$0xff] }
  0xc8   : > { %v8200_v54 = vld [vmem:[#allocation7 + $0x20] ss:$48 sps:$4 sm:$0xff]   ;;  %v8215_v0 = vld [vmem:[#allocation7 + $0xe8] ss:$48 sps:$4 sm:$0xff]   ;;  %v8220_v1 = vld [vmem:[#allocation7 + $0x144] ss:$48 sps:$4 sm:$0xff]  }
  0xc9   : > { %971 = vmatpush1.bf16.msra.mxu0 %v8150_v31  ;;  %1164 = vmatpush1.bf16.msra.mxu1 %v8151_v32  ;;  %v350_v31 = vld [vmem:[%s9344_s7 + $0x90] sm:$0xff]  ;;  %v351_v32 = vld [vmem:[%s9344_s7 + $0x98] sm:$0xff] }
  0xca   : > { %1342 = vmatprep.subr.bf16.mxu0 %v8154_v35  ;;  %1535 = vmatprep.subr.bf16.mxu1 %v8157_v36  ;;  %v9443_v33 = vpack.c.bf16 %v351_v32, %v350_v31  ;;  %v353_v35 = vld [vmem:[%s9344_s7 + $0xa8] sm:$0xff]  ;;  %v8232_v11 = vld [vmem:[#allocation7 + $0x204] ss:$48 sps:$4 sm:$0xff]   ;;  %v8242_v23 = vld [vmem:[#allocation7 + $0x2c0] ss:$48 sps:$4 sm:$0xff]  }
  0xcb   : > { %v9451_v36 = vpack.c.bf16 %v353_v35, %v352_v34  ;;  %v8227_v10 = vld [vmem:[#allocation7 + $0x1a8] ss:$48 sps:$4 sm:$0xff]   ;;  %v8244_v20 = vld [vmem:[#allocation7 + $0x2c4] ss:$48 sps:$4 sm:$0xff]   ;;  %v8247_v22 = vld [vmem:[#allocation7 + $0x2cc] ss:$48 sps:$4 sm:$0xff]  }
  0xcc   : > { %989 = vmatmul.mubr.bf16.vlgmr.msra.gmra.mrb[0].mxu0 %v9371_v37  ;;  %1182 = vmatmul.mubr.bf16.vlgmr.msra.gmra.mrb[0].mxu1 %v9371_v37  ;;  %v8239_v19 = vld [vmem:[#allocation7 + $0x268] ss:$48 sps:$4 sm:$0xff]  }
  0xcd   : > { %1343 = vmatpush1.bf16.msra.mxu0 %v8152_v38  ;;  %1536 = vmatpush1.bf16.msra.mxu1 %v8155_v39  ;;  %v354_v38 = vld [vmem:[%s9344_s7 + $0xb0] sm:$0xff]  ;;  %v355_v39 = vld [vmem:[%s9344_s7 + $0xb8] sm:$0xff] }
  0xce   : > { %998 = vmatprep.mubr.bf16.mxu0 %v9047_v2  ;;  %1191 = vmatprep.mubr.bf16.mxu1 %v9047_v2  ;;  %v8245_v25 = vld [vmem:[#allocation7 + $0x2c8] ss:$48 sps:$4 sm:$0xff]  }
  0xcf   : > { %1344 = vmatprep.subr.bf16.mxu0 %v8160_v40  ;;  %1537 = vmatprep.subr.bf16.mxu1 %v8163_v41  ;;  %v9459_v40 = vpack.c.bf16 %v355_v39, %v354_v38  ;;  %v356_v41 = vld [vmem:[%s9344_s7 + $0xc0] sm:$0xff] }
  0xd0   : > { %v9467_v43 = vpack.c.bf16 %v357_v42, %v356_v41 }
  0xd1   : > { %1345 = vmatpush1.bf16.msra.mxu0 %v8158_v44  ;;  %1538 = vmatpush1.bf16.msra.mxu1 %v8161_v45  ;;  %v358_v44 = vld [vmem:[%s9344_s7 + $0xd0] sm:$0xff]  ;;  %v359_v45 = vld [vmem:[%s9344_s7 + $0xd8] sm:$0xff] }
  0xd2   : > { %1346 = vmatprep.subr.bf16.mxu0 %v8166_v46  ;;  %1539 = vmatprep.subr.bf16.mxu1 %v8169_v47  ;;  %v9475_v46 = vpack.c.bf16 %v359_v45, %v358_v44  ;;  %v360_v47 = vld [vmem:[%s9344_s7 + $0xe0] sm:$0xff] }
  0xd4   : > { %999 = vmatmul.mubr.bf16.gmra.mrb[4].mxu0 %v9379_v48  ;;  %1192 = vmatmul.mubr.bf16.gmra.mrb[4].mxu1 %v9379_v48 }
  0xd5   : > { %1008 = vmatprep.mubr.bf16.mxu0 %v9047_v2  ;;  %1201 = vmatprep.mubr.bf16.mxu1 %v9047_v2 }
  0xd6   : > { %1347 = vmatpush1.bf16.msra.mxu0 %v8164_v49  ;;  %1540 = vmatpush1.bf16.msra.mxu1 %v8167_v50  ;;  %v361_v49 = vld [vmem:[%s9344_s7 + $0xe8] sm:$0xff] }
  0xd7   : > { %1348 = vmatprep.subr.bf16.mxu0 %v8172_v51  ;;  %1541 = vmatprep.subr.bf16.mxu1 %v8175_v52  ;;  %v9483_v50 = vpack.c.bf16 %v361_v49, %v360_v47  ;;  %v362_v51 = vld [vmem:[%s9344_s7 + $0xf0] sm:$0xff]  ;;  %v363_v52 = vld [vmem:[%s9344_s7 + $0xf8] sm:$0xff] }
  0xd8   : > { %v9491_v53 = vpack.c.bf16 %v363_v52, %v362_v51 }
  0xda   : > { %1349 = vmatpush1.bf16.msra.mxu0 %v8170_v55  ;;  %1542 = vmatpush1.bf16.msra.mxu1 %v8173_v56  ;;  %v8203_v55 = vld [vmem:[#allocation7 + $0x28] ss:$48 sps:$4 sm:$0xff]   ;;  %v8208_v56 = vld [vmem:[#allocation7 + $0x84] ss:$48 sps:$4 sm:$0xff]  }
  0xdb   : > { %1350 = vmatprep.subr.bf16.mxu0 %v8178_v57  ;;  %1543 = vmatprep.subr.bf16.mxu1 %v8181_v58  ;;  %v8211_v57 = vld [vmem:[#allocation7 + $0x8c] ss:$48 sps:$4 sm:$0xff]   ;;  %v8206_v58 = vld [vmem:[#allocation7 + $0x80] ss:$48 sps:$4 sm:$0xff]  }
  0xdc   : > { %1009 = vmatmul.mubr.bf16.gmra.mrb[8].mxu0 %v9387_v59  ;;  %1202 = vmatmul.mubr.bf16.gmra.mrb[8].mxu1 %v9387_v59 }
  0xdd   : > { %1018 = vmatprep.mubr.bf16.mxu0 %v9047_v2  ;;  %1211 = vmatprep.mubr.bf16.mxu1 %v9047_v2 }
  0xde   : > { %1351 = vmatpush1.bf16.msra.mxu0 %v8176_v60  ;;  %1544 = vmatpush1.bf16.msra.mxu1 %v8179_v61  ;;  %v8209_v60 = vld [vmem:[#allocation7 + $0x88] ss:$48 sps:$4 sm:$0xff]   ;;  %v8214_v61 = vld [vmem:[#allocation7 + $0xe4] ss:$48 sps:$4 sm:$0xff]  }
  0xdf   : > { %1352 = vmatprep.subr.bf16.mxu0 %v8184_v62  ;;  %1545 = vmatprep.subr.bf16.mxu1 %v8187_v63  ;;  %v8217_v62 = vld [vmem:[#allocation7 + $0xec] ss:$48 sps:$4 sm:$0xff]   ;;  %v8212_v63 = vld [vmem:[#allocation7 + $0xe0] ss:$48 sps:$4 sm:$0xff]  }
  0xe2   : > { %1353 = vmatpush1.bf16.msra.mxu0 %v8182_v3  ;;  %1546 = vmatpush1.bf16.msra.mxu1 %v8185_v4  ;;  %v8223_v3 = vld [vmem:[#allocation7 + $0x14c] ss:$48 sps:$4 sm:$0xff]   ;;  %v8218_v4 = vld [vmem:[#allocation7 + $0x140] ss:$48 sps:$4 sm:$0xff]  }
  0xe3   : > { %1354 = vmatprep.subr.bf16.mxu0 %v8190_v5  ;;  %1547 = vmatprep.subr.bf16.mxu1 %v8193_v6  ;;  %v8221_v5 = vld [vmem:[#allocation7 + $0x148] ss:$48 sps:$4 sm:$0xff]   ;;  %v8226_v6 = vld [vmem:[#allocation7 + $0x1a4] ss:$48 sps:$4 sm:$0xff]  }
  0xe4   : > { %1019 = vmatmul.mubr.bf16.gmra.mrb[12].mxu0 %v9395_v7  ;;  %1212 = vmatmul.mubr.bf16.gmra.mrb[12].mxu1 %v9395_v7 }
  0xe5   : > { %1028 = vmatprep.mubr.bf16.mxu0 %v9047_v2  ;;  %1221 = vmatprep.mubr.bf16.mxu1 %v9047_v2 }
  0xe6   : > { %1355 = vmatpush1.bf16.msra.mxu0 %v8188_v8  ;;  %1548 = vmatpush1.bf16.msra.mxu1 %v8191_v9  ;;  %v8229_v8 = vld [vmem:[#allocation7 + $0x1ac] ss:$48 sps:$4 sm:$0xff]   ;;  %v8224_v9 = vld [vmem:[#allocation7 + $0x1a0] ss:$48 sps:$4 sm:$0xff]  }
  0xe7   : > { %1356 = vmatprep.subr.bf16.mxu0 %v8196_v12  ;;  %1549 = vmatprep.subr.bf16.mxu1 %v8199_v13  ;;  %v8235_v12 = vld [vmem:[#allocation7 + $0x20c] ss:$48 sps:$4 sm:$0xff]   ;;  %v8230_v13 = vld [vmem:[#allocation7 + $0x200] ss:$48 sps:$4 sm:$0xff]  }
  0xea   : > { %1357 = vmatpush1.bf16.msra.mxu0 %v8194_v14  ;;  %1550 = vmatpush1.bf16.msra.mxu1 %v8197_v15  ;;  %v8233_v14 = vld [vmem:[#allocation7 + $0x208] ss:$48 sps:$4 sm:$0xff]   ;;  %v8238_v15 = vld [vmem:[#allocation7 + $0x264] ss:$48 sps:$4 sm:$0xff]  }
  0xeb   : > { %1728 = vmatprep.subr.bf16.mxu0 %v8202_v16  ;;  %1921 = vmatprep.subr.bf16.mxu1 %v8205_v17  ;;  %v8241_v16 = vld [vmem:[#allocation7 + $0x26c] ss:$48 sps:$4 sm:$0xff]   ;;  %v8236_v17 = vld [vmem:[#allocation7 + $0x260] ss:$48 sps:$4 sm:$0xff]  }
  0xec   : > { %1029 = vmatmul.mubr.bf16.gmra.mrb[16].mxu0 %v9403_v18  ;;  %1222 = vmatmul.mubr.bf16.gmra.mrb[16].mxu1 %v9403_v18 }
  0xed   : > { %1038 = vmatprep.mubr.bf16.mxu0 %v9047_v2  ;;  %1231 = vmatprep.mubr.bf16.mxu1 %v9047_v2 }
  0xf4   : > { %1039 = vmatmul.mubr.bf16.gmra.mrb[20].mxu0 %v9411_v21  ;;  %1232 = vmatmul.mubr.bf16.gmra.mrb[20].mxu1 %v9411_v21 }
  0xf5   : > { %1048 = vmatprep.mubr.bf16.mxu0 %v9047_v2  ;;  %1241 = vmatprep.mubr.bf16.mxu1 %v9047_v2 }
  0xfc   : > { %1049 = vmatmul.mubr.bf16.gmra.mrb[24].mxu0 %v9419_v24  ;;  %1242 = vmatmul.mubr.bf16.gmra.mrb[24].mxu1 %v9419_v24 }
  0xfd   : > { %1058 = vmatprep.mubr.bf16.mxu0 %v9047_v2  ;;  %1251 = vmatprep.mubr.bf16.mxu1 %v9047_v2 }
 0x104   : > { %1059 = vmatmul.mubr.bf16.gmra.mrb[28].mxu0 %v9427_v27  ;;  %1252 = vmatmul.mubr.bf16.gmra.mrb[28].mxu1 %v9427_v27 }
 0x105   : > { %1068 = vmatprep.mubr.bf16.mxu0 %v9047_v2  ;;  %1261 = vmatprep.mubr.bf16.mxu1 %v9047_v2 }
 0x10c   : > { %1069 = vmatmul.mubr.bf16.gmra.mrb[32].mxu0 %v9435_v30  ;;  %1262 = vmatmul.mubr.bf16.gmra.mrb[32].mxu1 %v9435_v30 }
 0x10d   : > { %1078 = vmatprep.mubr.bf16.mxu0 %v9047_v2  ;;  %1271 = vmatprep.mubr.bf16.mxu1 %v9047_v2 }
 0x114   : > { %1079 = vmatmul.mubr.bf16.gmra.mrb[36].mxu0 %v9443_v33  ;;  %1272 = vmatmul.mubr.bf16.gmra.mrb[36].mxu1 %v9443_v33 }
 0x115   : > { %1088 = vmatprep.mubr.bf16.mxu0 %v9047_v2  ;;  %1281 = vmatprep.mubr.bf16.mxu1 %v9047_v2 }
 0x11c   : > { %1089 = vmatmul.mubr.bf16.gmra.mrb[40].mxu0 %v9451_v36  ;;  %1282 = vmatmul.mubr.bf16.gmra.mrb[40].mxu1 %v9451_v36 }
 0x11d   : > { %1098 = vmatprep.mubr.bf16.mxu0 %v9047_v2  ;;  %1291 = vmatprep.mubr.bf16.mxu1 %v9047_v2 }
 0x124   : > { %1099 = vmatmul.mubr.bf16.gmra.mrb[44].mxu0 %v9459_v40  ;;  %1292 = vmatmul.mubr.bf16.gmra.mrb[44].mxu1 %v9459_v40 }
 0x125   : > { %1108 = vmatprep.mubr.bf16.mxu0 %v9047_v2  ;;  %1301 = vmatprep.mubr.bf16.mxu1 %v9047_v2 }
 0x12c   : > { %1109 = vmatmul.mubr.bf16.gmra.mrb[48].mxu0 %v9467_v43  ;;  %1302 = vmatmul.mubr.bf16.gmra.mrb[48].mxu1 %v9467_v43 }
 0x12d   : > { %1118 = vmatprep.mubr.bf16.mxu0 %v9047_v2  ;;  %1311 = vmatprep.mubr.bf16.mxu1 %v9047_v2 }
 0x134   : > { %1119 = vmatmul.mubr.bf16.gmra.mrb[52].mxu0 %v9475_v46  ;;  %1312 = vmatmul.mubr.bf16.gmra.mrb[52].mxu1 %v9475_v46 }
 0x135   : > { %1128 = vmatprep.mubr.bf16.mxu0 %v9047_v2  ;;  %1321 = vmatprep.mubr.bf16.mxu1 %v9047_v2 }
 0x13c   : > { %1129 = vmatmul.mubr.bf16.gmra.mrb[56].mxu0 %v9483_v50  ;;  %1322 = vmatmul.mubr.bf16.gmra.mrb[56].mxu1 %v9483_v50 }
 0x13d   : > { %1138 = vmatprep.mubr.bf16.mxu0 %v9047_v2  ;;  %1331 = vmatprep.mubr.bf16.mxu1 %v9047_v2 }
 0x144   : > { %1139 = vmatmul.mubr.bf16.gmra.mrb[60].mxu0 %v9491_v53  ;;  %1332 = vmatmul.mubr.bf16.gmra.mrb[60].mxu1 %v9491_v53 }
 0x145   : > { %1374 = vmatprep.mubr.bf16.mxu0 %v9047_v2  ;;  %1567 = vmatprep.mubr.bf16.mxu1 %v9047_v2 }
 0x14c   : > { %1375 = vmatmul.mubr.bf16.vlgmr.msra.gmra.mrb[64].mxu0 %v9371_v37  ;;  %1568 = vmatmul.mubr.bf16.vlgmr.msra.gmra.mrb[64].mxu1 %v9371_v37 }
 0x14d   : > { %1729 = vmatpush1.bf16.msra.mxu0 %v8200_v54  ;;  %1922 = vmatpush1.bf16.msra.mxu1 %v8203_v55 }
 0x14e   : > { %1384 = vmatprep.mubr.bf16.mxu0 %v9047_v2  ;;  %1577 = vmatprep.mubr.bf16.mxu1 %v9047_v2 }
 0x14f   : > { %1730 = vmatprep.subr.bf16.mxu0 %v8208_v56  ;;  %1923 = vmatprep.subr.bf16.mxu1 %v8211_v57 }
 0x151   : > { %1731 = vmatpush1.bf16.msra.mxu0 %v8206_v58  ;;  %1924 = vmatpush1.bf16.msra.mxu1 %v8209_v60 }
 0x152   : > { %1732 = vmatprep.subr.bf16.mxu0 %v8214_v61  ;;  %1925 = vmatprep.subr.bf16.mxu1 %v8217_v62 }
 0x154   : > { %1385 = vmatmul.mubr.bf16.gmra.mrb[68].mxu0 %v9379_v48  ;;  %1578 = vmatmul.mubr.bf16.gmra.mrb[68].mxu1 %v9379_v48 }
 0x155   : > { %1394 = vmatprep.mubr.bf16.mxu0 %v9047_v2  ;;  %1587 = vmatprep.mubr.bf16.mxu1 %v9047_v2 }
 0x156   : > { %1733 = vmatpush1.bf16.msra.mxu0 %v8212_v63  ;;  %1926 = vmatpush1.bf16.msra.mxu1 %v8215_v0 }
 0x157   : > { %1734 = vmatprep.subr.bf16.mxu0 %v8220_v1  ;;  %1927 = vmatprep.subr.bf16.mxu1 %v8223_v3 }
 0x15a   : > { %1735 = vmatpush1.bf16.msra.mxu0 %v8218_v4  ;;  %1928 = vmatpush1.bf16.msra.mxu1 %v8221_v5 }
 0x15b   : > { %1736 = vmatprep.subr.bf16.mxu0 %v8226_v6  ;;  %1929 = vmatprep.subr.bf16.mxu1 %v8229_v8 }
 0x15c   : > { %1395 = vmatmul.mubr.bf16.gmra.mrb[72].mxu0 %v9387_v59  ;;  %1588 = vmatmul.mubr.bf16.gmra.mrb[72].mxu1 %v9387_v59 }
 0x15d   : > { %1404 = vmatprep.mubr.bf16.mxu0 %v9047_v2  ;;  %1597 = vmatprep.mubr.bf16.mxu1 %v9047_v2 }
 0x15e   : > { %1737 = vmatpush1.bf16.msra.mxu0 %v8224_v9  ;;  %1930 = vmatpush1.bf16.msra.mxu1 %v8227_v10 }
 0x15f   : > { %1738 = vmatprep.subr.bf16.mxu0 %v8232_v11  ;;  %1931 = vmatprep.subr.bf16.mxu1 %v8235_v12 }
 0x162   : > { %1739 = vmatpush1.bf16.msra.mxu0 %v8230_v13  ;;  %1932 = vmatpush1.bf16.msra.mxu1 %v8233_v14 }
 0x163   : > { %1740 = vmatprep.subr.bf16.mxu0 %v8238_v15  ;;  %1933 = vmatprep.subr.bf16.mxu1 %v8241_v16 }
 0x164   : > { %1405 = vmatmul.mubr.bf16.gmra.mrb[76].mxu0 %v9395_v7  ;;  %1598 = vmatmul.mubr.bf16.gmra.mrb[76].mxu1 %v9395_v7 }
 0x165   : > { %1414 = vmatprep.mubr.bf16.mxu0 %v9047_v2  ;;  %1607 = vmatprep.mubr.bf16.mxu1 %v9047_v2 }
 0x166   : > { %1741 = vmatpush1.bf16.msra.mxu0 %v8236_v17  ;;  %1934 = vmatpush1.bf16.msra.mxu1 %v8239_v19 }
 0x167   : > { %1742 = vmatprep.subr.bf16.mxu0 %v8244_v20  ;;  %1935 = vmatprep.subr.bf16.mxu1 %v8247_v22 }
 0x16a   : > { %1743 = vmatpush1.bf16.msra.mxu0 %v8242_v23  ;;  %1936 = vmatpush1.bf16.msra.mxu1 %v8245_v25 }
 0x16c   : > { %1415 = vmatmul.mubr.bf16.gmra.mrb[80].mxu0 %v9403_v18  ;;  %1608 = vmatmul.mubr.bf16.gmra.mrb[80].mxu1 %v9403_v18 }
 0x16d   : > { %1424 = vmatprep.mubr.bf16.mxu0 %v9047_v2  ;;  %1617 = vmatprep.mubr.bf16.mxu1 %v9047_v2 }
 0x174   : > { %1425 = vmatmul.mubr.bf16.gmra.mrb[84].mxu0 %v9411_v21  ;;  %1618 = vmatmul.mubr.bf16.gmra.mrb[84].mxu1 %v9411_v21 }
 0x175   : > { %1434 = vmatprep.mubr.bf16.mxu0 %v9047_v2  ;;  %1627 = vmatprep.mubr.bf16.mxu1 %v9047_v2 }
 0x17c   : > { %1435 = vmatmul.mubr.bf16.gmra.mrb[88].mxu0 %v9419_v24  ;;  %1628 = vmatmul.mubr.bf16.gmra.mrb[88].mxu1 %v9419_v24 }
 0x17d   : > { %1444 = vmatprep.mubr.bf16.mxu0 %v9047_v2  ;;  %1637 = vmatprep.mubr.bf16.mxu1 %v9047_v2 }
 0x184   : > { %1445 = vmatmul.mubr.bf16.gmra.mrb[92].mxu0 %v9427_v27  ;;  %1638 = vmatmul.mubr.bf16.gmra.mrb[92].mxu1 %v9427_v27 }
 0x185   : > { %1454 = vmatprep.mubr.bf16.mxu0 %v9047_v2  ;;  %1647 = vmatprep.mubr.bf16.mxu1 %v9047_v2 }
 0x18c   : > { %1455 = vmatmul.mubr.bf16.gmra.mrb[96].mxu0 %v9435_v30  ;;  %1648 = vmatmul.mubr.bf16.gmra.mrb[96].mxu1 %v9435_v30 }
 0x18d   : > { %1464 = vmatprep.mubr.bf16.mxu0 %v9047_v2  ;;  %1657 = vmatprep.mubr.bf16.mxu1 %v9047_v2 }
 0x194   : > { %1465 = vmatmul.mubr.bf16.gmra.mrb[100].mxu0 %v9443_v33  ;;  %1658 = vmatmul.mubr.bf16.gmra.mrb[100].mxu1 %v9443_v33 }
 0x195   : > { %1474 = vmatprep.mubr.bf16.mxu0 %v9047_v2  ;;  %1667 = vmatprep.mubr.bf16.mxu1 %v9047_v2 }
 0x19c   : > { %1475 = vmatmul.mubr.bf16.gmra.mrb[104].mxu0 %v9451_v36  ;;  %1668 = vmatmul.mubr.bf16.gmra.mrb[104].mxu1 %v9451_v36 }
 0x19d   : > { %1484 = vmatprep.mubr.bf16.mxu0 %v9047_v2  ;;  %1677 = vmatprep.mubr.bf16.mxu1 %v9047_v2 }
 0x19f   : > { %v990_v26 = vpop.f32.mrb[0].mxu0  ;;  %v1183_v28 = vpop.f32.mrb[0].mxu1 }
 0x1a0   : > { %v992_v29 = vpop.f32.mrb[1].mxu0  ;;  %v1185_v31 = vpop.f32.mrb[1].mxu1 }
 0x1a1   : > { %v994_v32 = vpop.f32.mrb[2].mxu0  ;;  %v1187_v34 = vpop.f32.mrb[2].mxu1 }
 0x1a2   : > { %v2114_v35 = vpack.c.bf16 %v994_v32, %v990_v26  ;;  %v2116_v38 = vpack.c.bf16 %v1187_v34, %v1183_v28  ;;  %v996_v39 = vpop.f32.mrb[3].mxu0  ;;  %v1189_v41 = vpop.f32.mrb[3].mxu1 }
 0x1a3   : > { %v2115_v42 = vpack.c.bf16 %v996_v39, %v992_v29  ;;  %v2117_v44 = vpack.c.bf16 %v1189_v41, %v1185_v31 }
 0x1a4   : > { %2306 = vst [vmem:[#allocation2] sm:$0xff] %v2114_v35  ;;  %2308 = vst [vmem:[#allocation2 + $0x10] sm:$0xff] %v2116_v38  ;;  %1485 = vmatmul.mubr.bf16.gmra.mrb[108].mxu0 %v9459_v40  ;;  %1678 = vmatmul.mubr.bf16.gmra.mrb[108].mxu1 %v9459_v40 }
 0x1a5   : > { %2307 = vst [vmem:[#allocation2 + $0x8] sm:$0xff] %v2115_v42  ;;  %2309 = vst [vmem:[#allocation2 + $0x18] sm:$0xff] %v2117_v44  ;;  %1494 = vmatprep.mubr.bf16.mxu0 %v9047_v2  ;;  %1687 = vmatprep.mubr.bf16.mxu1 %v9047_v2 }
 0x1a7   : > { %v1000_v45 = vpop.f32.mrb[4].mxu0  ;;  %v1193_v47 = vpop.f32.mrb[4].mxu1 }
 0x1a8   : > { %v1002_v49 = vpop.f32.mrb[5].mxu0  ;;  %v1195_v51 = vpop.f32.mrb[5].mxu1 }
 0x1a9   : > { %v1004_v52 = vpop.f32.mrb[6].mxu0  ;;  %v1197_v54 = vpop.f32.mrb[6].mxu1 }
 0x1aa   : > { %v2126_v55 = vpack.c.bf16 %v1004_v52, %v1000_v45  ;;  %v2128_v56 = vpack.c.bf16 %v1197_v54, %v1193_v47  ;;  %v1006_v57 = vpop.f32.mrb[7].mxu0  ;;  %v1199_v58 = vpop.f32.mrb[7].mxu1 }
 0x1ab   : > { %v2127_v60 = vpack.c.bf16 %v1006_v57, %v1002_v49  ;;  %v2129_v61 = vpack.c.bf16 %v1199_v58, %v1195_v51 }
 0x1ac   : > { %2318 = vst [vmem:[#allocation2 + $0x60] sm:$0xff] %v2126_v55  ;;  %2320 = vst [vmem:[#allocation2 + $0x70] sm:$0xff] %v2128_v56  ;;  %1495 = vmatmul.mubr.bf16.gmra.mrb[112].mxu0 %v9467_v43  ;;  %1688 = vmatmul.mubr.bf16.gmra.mrb[112].mxu1 %v9467_v43 }
 0x1ad   : > { %2319 = vst [vmem:[#allocation2 + $0x68] sm:$0xff] %v2127_v60  ;;  %2321 = vst [vmem:[#allocation2 + $0x78] sm:$0xff] %v2129_v61  ;;  %1504 = vmatprep.mubr.bf16.mxu0 %v9047_v2  ;;  %1697 = vmatprep.mubr.bf16.mxu1 %v9047_v2 }
 0x1af   : > { %v1010_v62 = vpop.f32.mrb[8].mxu0  ;;  %v1203_v63 = vpop.f32.mrb[8].mxu1 }
 0x1b0   : > { %v1012_v0 = vpop.f32.mrb[9].mxu0  ;;  %v1205_v1 = vpop.f32.mrb[9].mxu1 }
 0x1b1   : > { %v1014_v3 = vpop.f32.mrb[10].mxu0  ;;  %v1207_v4 = vpop.f32.mrb[10].mxu1 }
 0x1b2   : > { %v2138_v5 = vpack.c.bf16 %v1014_v3, %v1010_v62  ;;  %v2140_v6 = vpack.c.bf16 %v1207_v4, %v1203_v63  ;;  %v1016_v8 = vpop.f32.mrb[11].mxu0  ;;  %v1209_v9 = vpop.f32.mrb[11].mxu1 }
 0x1b3   : > { %v2139_v10 = vpack.c.bf16 %v1016_v8, %v1012_v0  ;;  %v2141_v11 = vpack.c.bf16 %v1209_v9, %v1205_v1 }
 0x1b4   : > { %2330 = vst [vmem:[#allocation2 + $0xc0] sm:$0xff] %v2138_v5  ;;  %2332 = vst [vmem:[#allocation2 + $0xd0] sm:$0xff] %v2140_v6  ;;  %1505 = vmatmul.mubr.bf16.gmra.mrb[116].mxu0 %v9475_v46  ;;  %1698 = vmatmul.mubr.bf16.gmra.mrb[116].mxu1 %v9475_v46 }
 0x1b5   : > { %2331 = vst [vmem:[#allocation2 + $0xc8] sm:$0xff] %v2139_v10  ;;  %2333 = vst [vmem:[#allocation2 + $0xd8] sm:$0xff] %v2141_v11  ;;  %1514 = vmatprep.mubr.bf16.mxu0 %v9047_v2  ;;  %1707 = vmatprep.mubr.bf16.mxu1 %v9047_v2 }
 0x1b7   : > { %v1020_v12 = vpop.f32.mrb[12].mxu0  ;;  %v1213_v13 = vpop.f32.mrb[12].mxu1 }
 0x1b8   : > { %v1022_v14 = vpop.f32.mrb[13].mxu0  ;;  %v1215_v15 = vpop.f32.mrb[13].mxu1 }
 0x1b9   : > { %v1024_v16 = vpop.f32.mrb[14].mxu0  ;;  %v1217_v17 = vpop.f32.mrb[14].mxu1 }
 0x1ba   : > { %v2150_v19 = vpack.c.bf16 %v1024_v16, %v1020_v12  ;;  %v2152_v20 = vpack.c.bf16 %v1217_v17, %v1213_v13  ;;  %v1026_v22 = vpop.f32.mrb[15].mxu0  ;;  %v1219_v23 = vpop.f32.mrb[15].mxu1 }
 0x1bb   : > { %v2151_v25 = vpack.c.bf16 %v1026_v22, %v1022_v14  ;;  %v2153_v26 = vpack.c.bf16 %v1219_v23, %v1215_v15 }
 0x1bc   : > { %2342 = vst [vmem:[#allocation2 + $0x120] sm:$0xff] %v2150_v19  ;;  %2344 = vst [vmem:[#allocation2 + $0x130] sm:$0xff] %v2152_v20  ;;  %1515 = vmatmul.mubr.bf16.gmra.mrb[120].mxu0 %v9483_v50  ;;  %1708 = vmatmul.mubr.bf16.gmra.mrb[120].mxu1 %v9483_v50 }
 0x1bd   : > { %2343 = vst [vmem:[#allocation2 + $0x128] sm:$0xff] %v2151_v25  ;;  %2345 = vst [vmem:[#allocation2 + $0x138] sm:$0xff] %v2153_v26  ;;  %1524 = vmatprep.mubr.bf16.mxu0 %v9047_v2  ;;  %1717 = vmatprep.mubr.bf16.mxu1 %v9047_v2 }
 0x1bf   : > { %v1030_v28 = vpop.f32.mrb[16].mxu0  ;;  %v1223_v29 = vpop.f32.mrb[16].mxu1 }
 0x1c0   : > { %v1032_v31 = vpop.f32.mrb[17].mxu0  ;;  %v1225_v32 = vpop.f32.mrb[17].mxu1 }
 0x1c1   : > { %v1034_v34 = vpop.f32.mrb[18].mxu0  ;;  %v1227_v35 = vpop.f32.mrb[18].mxu1 }
 0x1c2   : > { %v2162_v38 = vpack.c.bf16 %v1034_v34, %v1030_v28  ;;  %v2164_v39 = vpack.c.bf16 %v1227_v35, %v1223_v29  ;;  %v1036_v41 = vpop.f32.mrb[19].mxu0  ;;  %v1229_v42 = vpop.f32.mrb[19].mxu1 }
 0x1c3   : > { %v2163_v44 = vpack.c.bf16 %v1036_v41, %v1032_v31  ;;  %v2165_v45 = vpack.c.bf16 %v1229_v42, %v1225_v32 }
 0x1c4   : > { %2354 = vst [vmem:[#allocation2 + $0x180] sm:$0xff] %v2162_v38  ;;  %2356 = vst [vmem:[#allocation2 + $0x190] sm:$0xff] %v2164_v39  ;;  %1525 = vmatmul.mubr.bf16.gmra.mrb[124].mxu0 %v9491_v53  ;;  %1718 = vmatmul.mubr.bf16.gmra.mrb[124].mxu1 %v9491_v53 }
 0x1c5   : > { %2355 = vst [vmem:[#allocation2 + $0x188] sm:$0xff] %v2163_v44  ;;  %2357 = vst [vmem:[#allocation2 + $0x198] sm:$0xff] %v2165_v45  ;;  %1760 = vmatprep.mubr.bf16.mxu0 %v9047_v2  ;;  %1953 = vmatprep.mubr.bf16.mxu1 %v9047_v2 }
 0x1c7   : > { %v1040_v47 = vpop.f32.mrb[20].mxu0  ;;  %v1233_v49 = vpop.f32.mrb[20].mxu1 }
 0x1c8   : > { %v1042_v51 = vpop.f32.mrb[21].mxu0  ;;  %v1235_v52 = vpop.f32.mrb[21].mxu1 }
 0x1c9   : > { %v1044_v54 = vpop.f32.mrb[22].mxu0  ;;  %v1237_v55 = vpop.f32.mrb[22].mxu1 }
 0x1ca   : > { %v2174_v56 = vpack.c.bf16 %v1044_v54, %v1040_v47  ;;  %v2176_v57 = vpack.c.bf16 %v1237_v55, %v1233_v49  ;;  %v1046_v58 = vpop.f32.mrb[23].mxu0  ;;  %v1239_v60 = vpop.f32.mrb[23].mxu1 }
 0x1cb   : > { %v2175_v61 = vpack.c.bf16 %v1046_v58, %v1042_v51  ;;  %v2177_v62 = vpack.c.bf16 %v1239_v60, %v1235_v52 }
 0x1cc   : > { %2366 = vst [vmem:[#allocation2 + $0x1e0] sm:$0xff] %v2174_v56  ;;  %2368 = vst [vmem:[#allocation2 + $0x1f0] sm:$0xff] %v2176_v57  ;;  %1761 = vmatmul.mubr.bf16.vlgmr.msra.gmra.mrb[128].mxu0 %v9371_v37  ;;  %1954 = vmatmul.mubr.bf16.vlgmr.msra.gmra.mrb[128].mxu1 %v9371_v37 }
 0x1cd   : > { %2367 = vst [vmem:[#allocation2 + $0x1e8] sm:$0xff] %v2175_v61  ;;  %2369 = vst [vmem:[#allocation2 + $0x1f8] sm:$0xff] %v2177_v62  ;;  %1770 = vmatprep.mubr.bf16.mxu0 %v9047_v2  ;;  %1963 = vmatprep.mubr.bf16.mxu1 %v9047_v2 }
 0x1cf   : > { %v1050_v63 = vpop.f32.mrb[24].mxu0  ;;  %v1243_v0 = vpop.f32.mrb[24].mxu1 }
 0x1d0   : > { %v1052_v1 = vpop.f32.mrb[25].mxu0  ;;  %v1245_v3 = vpop.f32.mrb[25].mxu1 }
 0x1d1   : > { %v1054_v4 = vpop.f32.mrb[26].mxu0  ;;  %v1247_v5 = vpop.f32.mrb[26].mxu1 }
 0x1d2   : > { %v2186_v6 = vpack.c.bf16 %v1054_v4, %v1050_v63  ;;  %v2188_v8 = vpack.c.bf16 %v1247_v5, %v1243_v0  ;;  %v1056_v9 = vpop.f32.mrb[27].mxu0  ;;  %v1249_v10 = vpop.f32.mrb[27].mxu1 }
 0x1d3   : > { %v2187_v11 = vpack.c.bf16 %v1056_v9, %v1052_v1  ;;  %v2189_v12 = vpack.c.bf16 %v1249_v10, %v1245_v3 }
 0x1d4   : > { %2378 = vst [vmem:[#allocation2 + $0x240] sm:$0xff] %v2186_v6  ;;  %2380 = vst [vmem:[#allocation2 + $0x250] sm:$0xff] %v2188_v8  ;;  %1771 = vmatmul.mubr.bf16.gmra.mrb[132].mxu0 %v9379_v48  ;;  %1964 = vmatmul.mubr.bf16.gmra.mrb[132].mxu1 %v9379_v48 }
 0x1d5   : > { %2379 = vst [vmem:[#allocation2 + $0x248] sm:$0xff] %v2187_v11  ;;  %2381 = vst [vmem:[#allocation2 + $0x258] sm:$0xff] %v2189_v12  ;;  %1780 = vmatprep.mubr.bf16.mxu0 %v9047_v2  ;;  %1973 = vmatprep.mubr.bf16.mxu1 %v9047_v2 }
 0x1d7   : > { %v1060_v37 = vpop.f32.mrb[28].mxu0  ;;  %v1253_v13 = vpop.f32.mrb[28].mxu1 }
 0x1d8   : > { %v1062_v14 = vpop.f32.mrb[29].mxu0  ;;  %v1255_v15 = vpop.f32.mrb[29].mxu1 }
 0x1d9   : > { %v1064_v16 = vpop.f32.mrb[30].mxu0  ;;  %v1257_v17 = vpop.f32.mrb[30].mxu1 }
 0x1da   : > { %v2198_v19 = vpack.c.bf16 %v1064_v16, %v1060_v37  ;;  %v2200_v20 = vpack.c.bf16 %v1257_v17, %v1253_v13  ;;  %v1066_v22 = vpop.f32.mrb[31].mxu0  ;;  %v1259_v23 = vpop.f32.mrb[31].mxu1 }
 0x1db   : > { %v2199_v25 = vpack.c.bf16 %v1066_v22, %v1062_v14  ;;  %v2201_v26 = vpack.c.bf16 %v1259_v23, %v1255_v15 }
 0x1dc   : > { %2390 = vst [vmem:[#allocation2 + $0x2a0] sm:$0xff] %v2198_v19  ;;  %2392 = vst [vmem:[#allocation2 + $0x2b0] sm:$0xff] %v2200_v20  ;;  %1781 = vmatmul.mubr.bf16.gmra.mrb[136].mxu0 %v9387_v59  ;;  %1974 = vmatmul.mubr.bf16.gmra.mrb[136].mxu1 %v9387_v59 }
 0x1dd   : > { %2391 = vst [vmem:[#allocation2 + $0x2a8] sm:$0xff] %v2199_v25  ;;  %2393 = vst [vmem:[#allocation2 + $0x2b8] sm:$0xff] %v2201_v26  ;;  %1790 = vmatprep.mubr.bf16.mxu0 %v9047_v2  ;;  %1983 = vmatprep.mubr.bf16.mxu1 %v9047_v2 }
 0x1df   : > { %v1070_v48 = vpop.f32.mrb[32].mxu0  ;;  %v1263_v28 = vpop.f32.mrb[32].mxu1 }
 0x1e0   : > { %v1072_v29 = vpop.f32.mrb[33].mxu0  ;;  %v1265_v31 = vpop.f32.mrb[33].mxu1 }
 0x1e1   : > { %v1074_v32 = vpop.f32.mrb[34].mxu0  ;;  %v1267_v34 = vpop.f32.mrb[34].mxu1 }
 0x1e2   : > { %v2210_v35 = vpack.c.bf16 %v1074_v32, %v1070_v48  ;;  %v2212_v38 = vpack.c.bf16 %v1267_v34, %v1263_v28  ;;  %v1076_v39 = vpop.f32.mrb[35].mxu0  ;;  %v1269_v41 = vpop.f32.mrb[35].mxu1 }
 0x1e3   : > { %v2211_v42 = vpack.c.bf16 %v1076_v39, %v1072_v29  ;;  %v2213_v44 = vpack.c.bf16 %v1269_v41, %v1265_v31 }
 0x1e4   : > { %2402 = vst [vmem:[#allocation2 + $0x300] sm:$0xff] %v2210_v35  ;;  %2404 = vst [vmem:[#allocation2 + $0x310] sm:$0xff] %v2212_v38  ;;  %1791 = vmatmul.mubr.bf16.gmra.mrb[140].mxu0 %v9395_v7  ;;  %1984 = vmatmul.mubr.bf16.gmra.mrb[140].mxu1 %v9395_v7 }
 0x1e5   : > { %2403 = vst [vmem:[#allocation2 + $0x308] sm:$0xff] %v2211_v42  ;;  %2405 = vst [vmem:[#allocation2 + $0x318] sm:$0xff] %v2213_v44  ;;  %1800 = vmatprep.mubr.bf16.mxu0 %v9047_v2  ;;  %1993 = vmatprep.mubr.bf16.mxu1 %v9047_v2 }
 0x1e7   : > { %v1080_v59 = vpop.f32.mrb[36].mxu0  ;;  %v1273_v45 = vpop.f32.mrb[36].mxu1 }
 0x1e8   : > { %v1082_v47 = vpop.f32.mrb[37].mxu0  ;;  %v1275_v49 = vpop.f32.mrb[37].mxu1 }
 0x1e9   : > { %v1084_v51 = vpop.f32.mrb[38].mxu0  ;;  %v1277_v52 = vpop.f32.mrb[38].mxu1 }
 0x1ea   : > { %v2222_v54 = vpack.c.bf16 %v1084_v51, %v1080_v59  ;;  %v2224_v55 = vpack.c.bf16 %v1277_v52, %v1273_v45  ;;  %v1086_v56 = vpop.f32.mrb[39].mxu0  ;;  %v1279_v57 = vpop.f32.mrb[39].mxu1 }
 0x1eb   : > { %v2223_v58 = vpack.c.bf16 %v1086_v56, %v1082_v47  ;;  %v2225_v60 = vpack.c.bf16 %v1279_v57, %v1275_v49 }
 0x1ec   : > { %2414 = vst [vmem:[#allocation2 + $0x360] sm:$0xff] %v2222_v54  ;;  %2416 = vst [vmem:[#allocation2 + $0x370] sm:$0xff] %v2224_v55  ;;  %1801 = vmatmul.mubr.bf16.gmra.mrb[144].mxu0 %v9403_v18  ;;  %1994 = vmatmul.mubr.bf16.gmra.mrb[144].mxu1 %v9403_v18 }
 0x1ed   : > { %2415 = vst [vmem:[#allocation2 + $0x368] sm:$0xff] %v2223_v58  ;;  %2417 = vst [vmem:[#allocation2 + $0x378] sm:$0xff] %v2225_v60  ;;  %1810 = vmatprep.mubr.bf16.mxu0 %v9047_v2  ;;  %2003 = vmatprep.mubr.bf16.mxu1 %v9047_v2 }
 0x1ef   : > { %v1090_v7 = vpop.f32.mrb[40].mxu0  ;;  %v1283_v61 = vpop.f32.mrb[40].mxu1 }
 0x1f0   : > { %v1092_v62 = vpop.f32.mrb[41].mxu0  ;;  %v1285_v63 = vpop.f32.mrb[41].mxu1 }
 0x1f1   : > { %v1094_v0 = vpop.f32.mrb[42].mxu0  ;;  %v1287_v1 = vpop.f32.mrb[42].mxu1 }
 0x1f2   : > { %v2234_v3 = vpack.c.bf16 %v1094_v0, %v1090_v7  ;;  %v2236_v4 = vpack.c.bf16 %v1287_v1, %v1283_v61  ;;  %v1096_v5 = vpop.f32.mrb[43].mxu0  ;;  %v1289_v6 = vpop.f32.mrb[43].mxu1 }
 0x1f3   : > { %v2235_v8 = vpack.c.bf16 %v1096_v5, %v1092_v62  ;;  %v2237_v9 = vpack.c.bf16 %v1289_v6, %v1285_v63 }
 0x1f4   : > { %2426 = vst [vmem:[#allocation2 + $0x3c0] sm:$0xff] %v2234_v3  ;;  %2428 = vst [vmem:[#allocation2 + $0x3d0] sm:$0xff] %v2236_v4  ;;  %1811 = vmatmul.mubr.bf16.gmra.mrb[148].mxu0 %v9411_v21  ;;  %2004 = vmatmul.mubr.bf16.gmra.mrb[148].mxu1 %v9411_v21 }
 0x1f5   : > { %2427 = vst [vmem:[#allocation2 + $0x3c8] sm:$0xff] %v2235_v8  ;;  %2429 = vst [vmem:[#allocation2 + $0x3d8] sm:$0xff] %v2237_v9  ;;  %1820 = vmatprep.mubr.bf16.mxu0 %v9047_v2  ;;  %2013 = vmatprep.mubr.bf16.mxu1 %v9047_v2 }
 0x1f7   : > { %v1100_v18 = vpop.f32.mrb[44].mxu0  ;;  %v1293_v10 = vpop.f32.mrb[44].mxu1 }
 0x1f8   : > { %v1102_v11 = vpop.f32.mrb[45].mxu0  ;;  %v1295_v12 = vpop.f32.mrb[45].mxu1 }
 0x1f9   : > { %v1104_v37 = vpop.f32.mrb[46].mxu0  ;;  %v1297_v13 = vpop.f32.mrb[46].mxu1 }
 0x1fa   : > { %v2246_v14 = vpack.c.bf16 %v1104_v37, %v1100_v18  ;;  %v2248_v15 = vpack.c.bf16 %v1297_v13, %v1293_v10  ;;  %v1106_v16 = vpop.f32.mrb[47].mxu0  ;;  %v1299_v17 = vpop.f32.mrb[47].mxu1 }
 0x1fb   : > { %v2247_v19 = vpack.c.bf16 %v1106_v16, %v1102_v11  ;;  %v2249_v20 = vpack.c.bf16 %v1299_v17, %v1295_v12 }
 0x1fc   : > { %2438 = vst [vmem:[#allocation2 + $0x420] sm:$0xff] %v2246_v14  ;;  %2440 = vst [vmem:[#allocation2 + $0x430] sm:$0xff] %v2248_v15  ;;  %1821 = vmatmul.mubr.bf16.gmra.mrb[152].mxu0 %v9419_v24  ;;  %2014 = vmatmul.mubr.bf16.gmra.mrb[152].mxu1 %v9419_v24 }
 0x1fd   : > { %2439 = vst [vmem:[#allocation2 + $0x428] sm:$0xff] %v2247_v19  ;;  %2441 = vst [vmem:[#allocation2 + $0x438] sm:$0xff] %v2249_v20  ;;  %1830 = vmatprep.mubr.bf16.mxu0 %v9047_v2  ;;  %2023 = vmatprep.mubr.bf16.mxu1 %v9047_v2 }
 0x1ff   : > { %v1110_v21 = vpop.f32.mrb[48].mxu0  ;;  %v1303_v22 = vpop.f32.mrb[48].mxu1 }
 0x200   : > { %v1112_v23 = vpop.f32.mrb[49].mxu0  ;;  %v1305_v25 = vpop.f32.mrb[49].mxu1 }
 0x201   : > { %v1114_v26 = vpop.f32.mrb[50].mxu0  ;;  %v1307_v48 = vpop.f32.mrb[50].mxu1 }
 0x202   : > { %v2258_v28 = vpack.c.bf16 %v1114_v26, %v1110_v21  ;;  %v2260_v29 = vpack.c.bf16 %v1307_v48, %v1303_v22  ;;  %v1116_v31 = vpop.f32.mrb[51].mxu0  ;;  %v1309_v32 = vpop.f32.mrb[51].mxu1 }
 0x203   : > { %v2259_v34 = vpack.c.bf16 %v1116_v31, %v1112_v23  ;;  %v2261_v35 = vpack.c.bf16 %v1309_v32, %v1305_v25 }
 0x204   : > { %2450 = vst [vmem:[#allocation2 + $0x480] sm:$0xff] %v2258_v28  ;;  %2452 = vst [vmem:[#allocation2 + $0x490] sm:$0xff] %v2260_v29  ;;  %1831 = vmatmul.mubr.bf16.gmra.mrb[156].mxu0 %v9427_v27  ;;  %2024 = vmatmul.mubr.bf16.gmra.mrb[156].mxu1 %v9427_v27 }
 0x205   : > { %2451 = vst [vmem:[#allocation2 + $0x488] sm:$0xff] %v2259_v34  ;;  %2453 = vst [vmem:[#allocation2 + $0x498] sm:$0xff] %v2261_v35  ;;  %1840 = vmatprep.mubr.bf16.mxu0 %v9047_v2  ;;  %2033 = vmatprep.mubr.bf16.mxu1 %v9047_v2 }
 0x207   : > { %v1120_v24 = vpop.f32.mrb[52].mxu0  ;;  %v1313_v38 = vpop.f32.mrb[52].mxu1 }
 0x208   : > { %v1122_v39 = vpop.f32.mrb[53].mxu0  ;;  %v1315_v41 = vpop.f32.mrb[53].mxu1 }
 0x209   : > { %v1124_v42 = vpop.f32.mrb[54].mxu0  ;;  %v1317_v44 = vpop.f32.mrb[54].mxu1 }
 0x20a   : > { %v2270_v59 = vpack.c.bf16 %v1124_v42, %v1120_v24  ;;  %v2272_v45 = vpack.c.bf16 %v1317_v44, %v1313_v38  ;;  %v1126_v47 = vpop.f32.mrb[55].mxu0  ;;  %v1319_v49 = vpop.f32.mrb[55].mxu1 }
 0x20b   : > { %v2271_v51 = vpack.c.bf16 %v1126_v47, %v1122_v39  ;;  %v2273_v52 = vpack.c.bf16 %v1319_v49, %v1315_v41 }
 0x20c   : > { %2462 = vst [vmem:[#allocation2 + $0x4e0] sm:$0xff] %v2270_v59  ;;  %2464 = vst [vmem:[#allocation2 + $0x4f0] sm:$0xff] %v2272_v45  ;;  %1841 = vmatmul.mubr.bf16.gmra.mrb[160].mxu0 %v9435_v30  ;;  %2034 = vmatmul.mubr.bf16.gmra.mrb[160].mxu1 %v9435_v30 }
 0x20d   : > { %2463 = vst [vmem:[#allocation2 + $0x4e8] sm:$0xff] %v2271_v51  ;;  %2465 = vst [vmem:[#allocation2 + $0x4f8] sm:$0xff] %v2273_v52  ;;  %1850 = vmatprep.mubr.bf16.mxu0 %v9047_v2  ;;  %2043 = vmatprep.mubr.bf16.mxu1 %v9047_v2 }
 0x20f   : > { %v1130_v27 = vpop.f32.mrb[56].mxu0  ;;  %v1323_v54 = vpop.f32.mrb[56].mxu1 }
 0x210   : > { %v1132_v55 = vpop.f32.mrb[57].mxu0  ;;  %v1325_v56 = vpop.f32.mrb[57].mxu1 }
 0x211   : > { %v1134_v57 = vpop.f32.mrb[58].mxu0  ;;  %v1327_v58 = vpop.f32.mrb[58].mxu1 }
 0x212   : > { %v2282_v60 = vpack.c.bf16 %v1134_v57, %v1130_v27  ;;  %v2284_v7 = vpack.c.bf16 %v1327_v58, %v1323_v54  ;;  %v1136_v61 = vpop.f32.mrb[59].mxu0  ;;  %v1329_v62 = vpop.f32.mrb[59].mxu1 }
 0x213   : > { %v2283_v63 = vpack.c.bf16 %v1136_v61, %v1132_v55  ;;  %v2285_v0 = vpack.c.bf16 %v1329_v62, %v1325_v56 }
 0x214   : > { %2474 = vst [vmem:[#allocation2 + $0x540] sm:$0xff] %v2282_v60  ;;  %2476 = vst [vmem:[#allocation2 + $0x550] sm:$0xff] %v2284_v7  ;;  %1851 = vmatmul.mubr.bf16.gmra.mrb[164].mxu0 %v9443_v33  ;;  %2044 = vmatmul.mubr.bf16.gmra.mrb[164].mxu1 %v9443_v33 }
 0x215   : > { %2475 = vst [vmem:[#allocation2 + $0x548] sm:$0xff] %v2283_v63  ;;  %2477 = vst [vmem:[#allocation2 + $0x558] sm:$0xff] %v2285_v0  ;;  %1860 = vmatprep.mubr.bf16.mxu0 %v9047_v2  ;;  %2053 = vmatprep.mubr.bf16.mxu1 %v9047_v2 }
 0x217   : > { %v1140_v30 = vpop.f32.mrb[60].mxu0  ;;  %v1333_v1 = vpop.f32.mrb[60].mxu1 }
 0x218   : > { %v1142_v3 = vpop.f32.mrb[61].mxu0  ;;  %v1335_v4 = vpop.f32.mrb[61].mxu1 }
 0x219   : > { %v1144_v5 = vpop.f32.mrb[62].mxu0  ;;  %v1337_v6 = vpop.f32.mrb[62].mxu1 }
 0x21a   : > { %v2294_v8 = vpack.c.bf16 %v1144_v5, %v1140_v30  ;;  %v2296_v9 = vpack.c.bf16 %v1337_v6, %v1333_v1  ;;  %v1146_v18 = vpop.f32.mrb[63].mxu0  ;;  %v1339_v10 = vpop.f32.mrb[63].mxu1 }
 0x21b   : > { %v2295_v11 = vpack.c.bf16 %v1146_v18, %v1142_v3  ;;  %v2297_v12 = vpack.c.bf16 %v1339_v10, %v1335_v4 }
 0x21c   : > { %2486 = vst [vmem:[#allocation2 + $0x5a0] sm:$0xff] %v2294_v8  ;;  %2488 = vst [vmem:[#allocation2 + $0x5b0] sm:$0xff] %v2296_v9  ;;  %1861 = vmatmul.mubr.bf16.gmra.mrb[168].mxu0 %v9451_v36  ;;  %2054 = vmatmul.mubr.bf16.gmra.mrb[168].mxu1 %v9451_v36 }
 0x21d   : > { %2487 = vst [vmem:[#allocation2 + $0x5a8] sm:$0xff] %v2295_v11  ;;  %2489 = vst [vmem:[#allocation2 + $0x5b8] sm:$0xff] %v2297_v12  ;;  %1870 = vmatprep.mubr.bf16.mxu0 %v9047_v2  ;;  %2063 = vmatprep.mubr.bf16.mxu1 %v9047_v2 }
 0x21f   : > { %v1376_v33 = vpop.f32.mrb[64].mxu0  ;;  %v1569_v37 = vpop.f32.mrb[64].mxu1 }
 0x220   : > { %v1378_v13 = vpop.f32.mrb[65].mxu0  ;;  %v1571_v14 = vpop.f32.mrb[65].mxu1 }
 0x221   : > { %v1380_v15 = vpop.f32.mrb[66].mxu0  ;;  %v1573_v16 = vpop.f32.mrb[66].mxu1 }
 0x222   : > { %v2118_v17 = vpack.c.bf16 %v1380_v15, %v1376_v33  ;;  %v2120_v19 = vpack.c.bf16 %v1573_v16, %v1569_v37  ;;  %v1382_v20 = vpop.f32.mrb[67].mxu0  ;;  %v1575_v21 = vpop.f32.mrb[67].mxu1 }
 0x223   : > { %v2119_v22 = vpack.c.bf16 %v1382_v20, %v1378_v13  ;;  %v2121_v23 = vpack.c.bf16 %v1575_v21, %v1571_v14 }
 0x224   : > { %2310 = vst [vmem:[#allocation2 + $0x20] sm:$0xff] %v2118_v17  ;;  %2312 = vst [vmem:[#allocation2 + $0x30] sm:$0xff] %v2120_v19  ;;  %1871 = vmatmul.mubr.bf16.gmra.mrb[172].mxu0 %v9459_v40  ;;  %2064 = vmatmul.mubr.bf16.gmra.mrb[172].mxu1 %v9459_v40 }
 0x225   : > { %2311 = vst [vmem:[#allocation2 + $0x28] sm:$0xff] %v2119_v22  ;;  %2313 = vst [vmem:[#allocation2 + $0x38] sm:$0xff] %v2121_v23  ;;  %1880 = vmatprep.mubr.bf16.mxu0 %v9047_v2  ;;  %2073 = vmatprep.mubr.bf16.mxu1 %v9047_v2 }
 0x227   : > { %v1386_v36 = vpop.f32.mrb[68].mxu0  ;;  %v1579_v25 = vpop.f32.mrb[68].mxu1 }
 0x228   : > { %v1388_v26 = vpop.f32.mrb[69].mxu0  ;;  %v1581_v48 = vpop.f32.mrb[69].mxu1 }
 0x229   : > { %v1390_v28 = vpop.f32.mrb[70].mxu0  ;;  %v1583_v29 = vpop.f32.mrb[70].mxu1 }
 0x22a   : > { %v2130_v31 = vpack.c.bf16 %v1390_v28, %v1386_v36  ;;  %v2132_v32 = vpack.c.bf16 %v1583_v29, %v1579_v25  ;;  %v1392_v34 = vpop.f32.mrb[71].mxu0  ;;  %v1585_v35 = vpop.f32.mrb[71].mxu1 }
 0x22b   : > { %v2131_v24 = vpack.c.bf16 %v1392_v34, %v1388_v26  ;;  %v2133_v38 = vpack.c.bf16 %v1585_v35, %v1581_v48 }
 0x22c   : > { %2322 = vst [vmem:[#allocation2 + $0x80] sm:$0xff] %v2130_v31  ;;  %2324 = vst [vmem:[#allocation2 + $0x90] sm:$0xff] %v2132_v32  ;;  %1881 = vmatmul.mubr.bf16.gmra.mrb[176].mxu0 %v9467_v43  ;;  %2074 = vmatmul.mubr.bf16.gmra.mrb[176].mxu1 %v9467_v43 }
 0x22d   : > { %2323 = vst [vmem:[#allocation2 + $0x88] sm:$0xff] %v2131_v24  ;;  %2325 = vst [vmem:[#allocation2 + $0x98] sm:$0xff] %v2133_v38  ;;  %1890 = vmatprep.mubr.bf16.mxu0 %v9047_v2  ;;  %2083 = vmatprep.mubr.bf16.mxu1 %v9047_v2 }
 0x22f   : > { %v1396_v40 = vpop.f32.mrb[72].mxu0  ;;  %v1589_v39 = vpop.f32.mrb[72].mxu1 }
 0x230   : > { %v1398_v41 = vpop.f32.mrb[73].mxu0  ;;  %v1591_v42 = vpop.f32.mrb[73].mxu1 }
 0x231   : > { %v1400_v44 = vpop.f32.mrb[74].mxu0  ;;  %v1593_v59 = vpop.f32.mrb[74].mxu1 }
 0x232   : > { %v2142_v45 = vpack.c.bf16 %v1400_v44, %v1396_v40  ;;  %v2144_v47 = vpack.c.bf16 %v1593_v59, %v1589_v39  ;;  %v1402_v49 = vpop.f32.mrb[75].mxu0  ;;  %v1595_v51 = vpop.f32.mrb[75].mxu1 }
 0x233   : > { %v2143_v52 = vpack.c.bf16 %v1402_v49, %v1398_v41  ;;  %v2145_v27 = vpack.c.bf16 %v1595_v51, %v1591_v42 }
 0x234   : > { %2334 = vst [vmem:[#allocation2 + $0xe0] sm:$0xff] %v2142_v45  ;;  %2336 = vst [vmem:[#allocation2 + $0xf0] sm:$0xff] %v2144_v47  ;;  %1891 = vmatmul.mubr.bf16.gmra.mrb[180].mxu0 %v9475_v46  ;;  %2084 = vmatmul.mubr.bf16.gmra.mrb[180].mxu1 %v9475_v46 }
 0x235   : > { %2335 = vst [vmem:[#allocation2 + $0xe8] sm:$0xff] %v2143_v52  ;;  %2337 = vst [vmem:[#allocation2 + $0xf8] sm:$0xff] %v2145_v27  ;;  %1900 = vmatprep.mubr.bf16.mxu0 %v9047_v2  ;;  %2093 = vmatprep.mubr.bf16.mxu1 %v9047_v2 }
 0x237   : > { %v1406_v43 = vpop.f32.mrb[76].mxu0  ;;  %v1599_v54 = vpop.f32.mrb[76].mxu1 }
 0x238   : > { %v1408_v55 = vpop.f32.mrb[77].mxu0  ;;  %v1601_v56 = vpop.f32.mrb[77].mxu1 }
 0x239   : > { %v1410_v57 = vpop.f32.mrb[78].mxu0  ;;  %v1603_v58 = vpop.f32.mrb[78].mxu1 }
 0x23a   : > { %v2154_v60 = vpack.c.bf16 %v1410_v57, %v1406_v43  ;;  %v2156_v7 = vpack.c.bf16 %v1603_v58, %v1599_v54  ;;  %v1412_v61 = vpop.f32.mrb[79].mxu0  ;;  %v1605_v62 = vpop.f32.mrb[79].mxu1 }
 0x23b   : > { %v2155_v63 = vpack.c.bf16 %v1412_v61, %v1408_v55  ;;  %v2157_v0 = vpack.c.bf16 %v1605_v62, %v1601_v56 }
 0x23c   : > { %2346 = vst [vmem:[#allocation2 + $0x140] sm:$0xff] %v2154_v60  ;;  %2348 = vst [vmem:[#allocation2 + $0x150] sm:$0xff] %v2156_v7  ;;  %1901 = vmatmul.mubr.bf16.gmra.mrb[184].mxu0 %v9483_v50  ;;  %2094 = vmatmul.mubr.bf16.gmra.mrb[184].mxu1 %v9483_v50 }
 0x23d   : > { %2347 = vst [vmem:[#allocation2 + $0x148] sm:$0xff] %v2155_v63  ;;  %2349 = vst [vmem:[#allocation2 + $0x158] sm:$0xff] %v2157_v0  ;;  %1910 = vmatprep.mubr.bf16.mxu0 %v9047_v2  ;;  %2103 = vmatprep.mubr.bf16.mxu1 %v9047_v2 }
 0x23f   : > { %v1416_v46 = vpop.f32.mrb[80].mxu0  ;;  %v1609_v30 = vpop.f32.mrb[80].mxu1 }
 0x240   : > { %v1418_v1 = vpop.f32.mrb[81].mxu0  ;;  %v1611_v3 = vpop.f32.mrb[81].mxu1 }
 0x241   : > { %v1420_v4 = vpop.f32.mrb[82].mxu0  ;;  %v1613_v5 = vpop.f32.mrb[82].mxu1 }
 0x242   : > { %v2166_v6 = vpack.c.bf16 %v1420_v4, %v1416_v46  ;;  %v2168_v8 = vpack.c.bf16 %v1613_v5, %v1609_v30  ;;  %v1422_v9 = vpop.f32.mrb[83].mxu0  ;;  %v1615_v18 = vpop.f32.mrb[83].mxu1 }
 0x243   : > { %v2167_v10 = vpack.c.bf16 %v1422_v9, %v1418_v1  ;;  %v2169_v11 = vpack.c.bf16 %v1615_v18, %v1611_v3 }
 0x244   : > { %2358 = vst [vmem:[#allocation2 + $0x1a0] sm:$0xff] %v2166_v6  ;;  %2360 = vst [vmem:[#allocation2 + $0x1b0] sm:$0xff] %v2168_v8  ;;  %1911 = vmatmul.mubr.bf16.gmra.mrb[188].mxu0 %v9491_v53  ;;  %2104 = vmatmul.mubr.bf16.gmra.mrb[188].mxu1 %v9491_v53 }
 0x245   : > { %2359 = vst [vmem:[#allocation2 + $0x1a8] sm:$0xff] %v2167_v10  ;;  %2361 = vst [vmem:[#allocation2 + $0x1b8] sm:$0xff] %v2169_v11 }
 0x247   : > { %v1426_v2 = vpop.f32.mrb[84].mxu0  ;;  %v1619_v50 = vpop.f32.mrb[84].mxu1 }
 0x248   : > { %v1428_v12 = vpop.f32.mrb[85].mxu0  ;;  %v1621_v33 = vpop.f32.mrb[85].mxu1 }
 0x249   : > { %v1430_v37 = vpop.f32.mrb[86].mxu0  ;;  %v1623_v13 = vpop.f32.mrb[86].mxu1 }
 0x24a   : > { %v2178_v14 = vpack.c.bf16 %v1430_v37, %v1426_v2  ;;  %v2180_v15 = vpack.c.bf16 %v1623_v13, %v1619_v50  ;;  %v1432_v16 = vpop.f32.mrb[87].mxu0  ;;  %v1625_v17 = vpop.f32.mrb[87].mxu1 }
 0x24b   : > { %v2179_v19 = vpack.c.bf16 %v1432_v16, %v1428_v12  ;;  %v2181_v20 = vpack.c.bf16 %v1625_v17, %v1621_v33 }
 0x24c   : > { %2370 = vst [vmem:[#allocation2 + $0x200] sm:$0xff] %v2178_v14  ;;  %2372 = vst [vmem:[#allocation2 + $0x210] sm:$0xff] %v2180_v15 }
 0x24d   : > { %2371 = vst [vmem:[#allocation2 + $0x208] sm:$0xff] %v2179_v19  ;;  %2373 = vst [vmem:[#allocation2 + $0x218] sm:$0xff] %v2181_v20 }
 0x24f   : > { %v1436_v21 = vpop.f32.mrb[88].mxu0  ;;  %v1629_v53 = vpop.f32.mrb[88].mxu1 }
 0x250   : > { %v1438_v22 = vpop.f32.mrb[89].mxu0  ;;  %v1631_v23 = vpop.f32.mrb[89].mxu1 }
 0x251   : > { %v1440_v36 = vpop.f32.mrb[90].mxu0  ;;  %v1633_v25 = vpop.f32.mrb[90].mxu1 }
 0x252   : > { %v2190_v26 = vpack.c.bf16 %v1440_v36, %v1436_v21  ;;  %v2192_v48 = vpack.c.bf16 %v1633_v25, %v1629_v53  ;;  %v1442_v28 = vpop.f32.mrb[91].mxu0  ;;  %v1635_v29 = vpop.f32.mrb[91].mxu1 }
 0x253   : > { %v2191_v31 = vpack.c.bf16 %v1442_v28, %v1438_v22  ;;  %v2193_v32 = vpack.c.bf16 %v1635_v29, %v1631_v23 }
 0x254   : > { %2382 = vst [vmem:[#allocation2 + $0x260] sm:$0xff] %v2190_v26  ;;  %2384 = vst [vmem:[#allocation2 + $0x270] sm:$0xff] %v2192_v48 }
 0x255   : > { %2383 = vst [vmem:[#allocation2 + $0x268] sm:$0xff] %v2191_v31  ;;  %2385 = vst [vmem:[#allocation2 + $0x278] sm:$0xff] %v2193_v32 }
 0x257   : > { %v1446_v34 = vpop.f32.mrb[92].mxu0  ;;  %v1639_v35 = vpop.f32.mrb[92].mxu1 }
 0x258   : > { %v1448_v24 = vpop.f32.mrb[93].mxu0  ;;  %v1641_v38 = vpop.f32.mrb[93].mxu1 }
 0x259   : > { %v1450_v40 = vpop.f32.mrb[94].mxu0  ;;  %v1643_v39 = vpop.f32.mrb[94].mxu1 }
 0x25a   : > { %v2202_v41 = vpack.c.bf16 %v1450_v40, %v1446_v34  ;;  %v2204_v42 = vpack.c.bf16 %v1643_v39, %v1639_v35  ;;  %v1452_v44 = vpop.f32.mrb[95].mxu0  ;;  %v1645_v59 = vpop.f32.mrb[95].mxu1 }
 0x25b   : > { %v2203_v45 = vpack.c.bf16 %v1452_v44, %v1448_v24  ;;  %v2205_v47 = vpack.c.bf16 %v1645_v59, %v1641_v38 }
 0x25c   : > { %2394 = vst [vmem:[#allocation2 + $0x2c0] sm:$0xff] %v2202_v41  ;;  %2396 = vst [vmem:[#allocation2 + $0x2d0] sm:$0xff] %v2204_v42 }
 0x25d   : > { %2395 = vst [vmem:[#allocation2 + $0x2c8] sm:$0xff] %v2203_v45  ;;  %2397 = vst [vmem:[#allocation2 + $0x2d8] sm:$0xff] %v2205_v47 }
 0x25f   : > { %v1456_v49 = vpop.f32.mrb[96].mxu0  ;;  %v1649_v51 = vpop.f32.mrb[96].mxu1 }
 0x260   : > { %v1458_v52 = vpop.f32.mrb[97].mxu0  ;;  %v1651_v27 = vpop.f32.mrb[97].mxu1 }
 0x261   : > { %v1460_v43 = vpop.f32.mrb[98].mxu0  ;;  %v1653_v54 = vpop.f32.mrb[98].mxu1 }
 0x262   : > { %v2214_v55 = vpack.c.bf16 %v1460_v43, %v1456_v49  ;;  %v2216_v56 = vpack.c.bf16 %v1653_v54, %v1649_v51  ;;  %v1462_v57 = vpop.f32.mrb[99].mxu0  ;;  %v1655_v58 = vpop.f32.mrb[99].mxu1 }
 0x263   : > { %v2215_v60 = vpack.c.bf16 %v1462_v57, %v1458_v52  ;;  %v2217_v7 = vpack.c.bf16 %v1655_v58, %v1651_v27 }
 0x264   : > { %2406 = vst [vmem:[#allocation2 + $0x320] sm:$0xff] %v2214_v55  ;;  %2408 = vst [vmem:[#allocation2 + $0x330] sm:$0xff] %v2216_v56 }
 0x265   : > { %2407 = vst [vmem:[#allocation2 + $0x328] sm:$0xff] %v2215_v60  ;;  %2409 = vst [vmem:[#allocation2 + $0x338] sm:$0xff] %v2217_v7 }
 0x267   : > { %v1466_v61 = vpop.f32.mrb[100].mxu0  ;;  %v1659_v62 = vpop.f32.mrb[100].mxu1 }
 0x268   : > { %v1468_v63 = vpop.f32.mrb[101].mxu0  ;;  %v1661_v0 = vpop.f32.mrb[101].mxu1 }
 0x269   : > { %v1470_v46 = vpop.f32.mrb[102].mxu0  ;;  %v1663_v30 = vpop.f32.mrb[102].mxu1 }
 0x26a   : > { %v2226_v1 = vpack.c.bf16 %v1470_v46, %v1466_v61  ;;  %v2228_v3 = vpack.c.bf16 %v1663_v30, %v1659_v62  ;;  %v1472_v4 = vpop.f32.mrb[103].mxu0  ;;  %v1665_v5 = vpop.f32.mrb[103].mxu1 }
 0x26b   : > { %v2227_v6 = vpack.c.bf16 %v1472_v4, %v1468_v63  ;;  %v2229_v8 = vpack.c.bf16 %v1665_v5, %v1661_v0 }
 0x26c   : > { %2418 = vst [vmem:[#allocation2 + $0x380] sm:$0xff] %v2226_v1  ;;  %2420 = vst [vmem:[#allocation2 + $0x390] sm:$0xff] %v2228_v3 }
 0x26d   : > { %2419 = vst [vmem:[#allocation2 + $0x388] sm:$0xff] %v2227_v6  ;;  %2421 = vst [vmem:[#allocation2 + $0x398] sm:$0xff] %v2229_v8 }
 0x26f   : > { %v1476_v9 = vpop.f32.mrb[104].mxu0  ;;  %v1669_v18 = vpop.f32.mrb[104].mxu1 }
 0x270   : > { %v1478_v10 = vpop.f32.mrb[105].mxu0  ;;  %v1671_v11 = vpop.f32.mrb[105].mxu1 }
 0x271   : > { %v1480_v2 = vpop.f32.mrb[106].mxu0  ;;  %v1673_v50 = vpop.f32.mrb[106].mxu1 }
 0x272   : > { %v2238_v12 = vpack.c.bf16 %v1480_v2, %v1476_v9  ;;  %v2240_v33 = vpack.c.bf16 %v1673_v50, %v1669_v18  ;;  %v1482_v37 = vpop.f32.mrb[107].mxu0  ;;  %v1675_v13 = vpop.f32.mrb[107].mxu1 }
 0x273   : > { %v2239_v14 = vpack.c.bf16 %v1482_v37, %v1478_v10  ;;  %v2241_v15 = vpack.c.bf16 %v1675_v13, %v1671_v11 }
 0x274   : > { %2430 = vst [vmem:[#allocation2 + $0x3e0] sm:$0xff] %v2238_v12  ;;  %2432 = vst [vmem:[#allocation2 + $0x3f0] sm:$0xff] %v2240_v33 }
 0x275   : > { %2431 = vst [vmem:[#allocation2 + $0x3e8] sm:$0xff] %v2239_v14  ;;  %2433 = vst [vmem:[#allocation2 + $0x3f8] sm:$0xff] %v2241_v15 }
 0x277   : > { %v1486_v16 = vpop.f32.mrb[108].mxu0  ;;  %v1679_v17 = vpop.f32.mrb[108].mxu1 }
 0x278   : > { %v1488_v19 = vpop.f32.mrb[109].mxu0  ;;  %v1681_v20 = vpop.f32.mrb[109].mxu1 }
 0x279   : > { %v1490_v21 = vpop.f32.mrb[110].mxu0  ;;  %v1683_v53 = vpop.f32.mrb[110].mxu1 }
 0x27a   : > { %v2250_v22 = vpack.c.bf16 %v1490_v21, %v1486_v16  ;;  %v2252_v23 = vpack.c.bf16 %v1683_v53, %v1679_v17  ;;  %v1492_v36 = vpop.f32.mrb[111].mxu0  ;;  %v1685_v25 = vpop.f32.mrb[111].mxu1 }
 0x27b   : > { %v2251_v26 = vpack.c.bf16 %v1492_v36, %v1488_v19  ;;  %v2253_v48 = vpack.c.bf16 %v1685_v25, %v1681_v20 }
 0x27c   : > { %2442 = vst [vmem:[#allocation2 + $0x440] sm:$0xff] %v2250_v22  ;;  %2444 = vst [vmem:[#allocation2 + $0x450] sm:$0xff] %v2252_v23 }
 0x27d   : > { %2443 = vst [vmem:[#allocation2 + $0x448] sm:$0xff] %v2251_v26  ;;  %2445 = vst [vmem:[#allocation2 + $0x458] sm:$0xff] %v2253_v48 }
 0x27f   : > { %v1496_v28 = vpop.f32.mrb[112].mxu0  ;;  %v1689_v29 = vpop.f32.mrb[112].mxu1 }
 0x280   : > { %v1498_v31 = vpop.f32.mrb[113].mxu0  ;;  %v1691_v32 = vpop.f32.mrb[113].mxu1 }
 0x281   : > { %v1500_v34 = vpop.f32.mrb[114].mxu0  ;;  %v1693_v35 = vpop.f32.mrb[114].mxu1 }
 0x282   : > { %v2262_v24 = vpack.c.bf16 %v1500_v34, %v1496_v28  ;;  %v2264_v38 = vpack.c.bf16 %v1693_v35, %v1689_v29  ;;  %v1502_v40 = vpop.f32.mrb[115].mxu0  ;;  %v1695_v39 = vpop.f32.mrb[115].mxu1 }
 0x283   : > { %v2263_v41 = vpack.c.bf16 %v1502_v40, %v1498_v31  ;;  %v2265_v42 = vpack.c.bf16 %v1695_v39, %v1691_v32 }
 0x284   : > { %2454 = vst [vmem:[#allocation2 + $0x4a0] sm:$0xff] %v2262_v24  ;;  %2456 = vst [vmem:[#allocation2 + $0x4b0] sm:$0xff] %v2264_v38 }
 0x285   : > { %2455 = vst [vmem:[#allocation2 + $0x4a8] sm:$0xff] %v2263_v41  ;;  %2457 = vst [vmem:[#allocation2 + $0x4b8] sm:$0xff] %v2265_v42 }
 0x287   : > { %v1506_v44 = vpop.f32.mrb[116].mxu0  ;;  %v1699_v59 = vpop.f32.mrb[116].mxu1 }
 0x288   : > { %v1508_v45 = vpop.f32.mrb[117].mxu0  ;;  %v1701_v47 = vpop.f32.mrb[117].mxu1 }
 0x289   : > { %v1510_v49 = vpop.f32.mrb[118].mxu0  ;;  %v1703_v51 = vpop.f32.mrb[118].mxu1 }
 0x28a   : > { %v2274_v52 = vpack.c.bf16 %v1510_v49, %v1506_v44  ;;  %v2276_v27 = vpack.c.bf16 %v1703_v51, %v1699_v59  ;;  %v1512_v43 = vpop.f32.mrb[119].mxu0  ;;  %v1705_v54 = vpop.f32.mrb[119].mxu1 }
 0x28b   : > { %v2275_v55 = vpack.c.bf16 %v1512_v43, %v1508_v45  ;;  %v2277_v56 = vpack.c.bf16 %v1705_v54, %v1701_v47 }
 0x28c   : > { %2466 = vst [vmem:[#allocation2 + $0x500] sm:$0xff] %v2274_v52  ;;  %2468 = vst [vmem:[#allocation2 + $0x510] sm:$0xff] %v2276_v27 }
 0x28d   : > { %2467 = vst [vmem:[#allocation2 + $0x508] sm:$0xff] %v2275_v55  ;;  %2469 = vst [vmem:[#allocation2 + $0x518] sm:$0xff] %v2277_v56 }
 0x28f   : > { %v1516_v57 = vpop.f32.mrb[120].mxu0  ;;  %v1709_v58 = vpop.f32.mrb[120].mxu1 }
 0x290   : > { %v1518_v60 = vpop.f32.mrb[121].mxu0  ;;  %v1711_v7 = vpop.f32.mrb[121].mxu1 }
 0x291   : > { %v1520_v61 = vpop.f32.mrb[122].mxu0  ;;  %v1713_v62 = vpop.f32.mrb[122].mxu1 }
 0x292   : > { %v2286_v63 = vpack.c.bf16 %v1520_v61, %v1516_v57  ;;  %v2288_v0 = vpack.c.bf16 %v1713_v62, %v1709_v58  ;;  %v1522_v46 = vpop.f32.mrb[123].mxu0  ;;  %v1715_v30 = vpop.f32.mrb[123].mxu1 }
 0x293   : > { %v2287_v1 = vpack.c.bf16 %v1522_v46, %v1518_v60  ;;  %v2289_v3 = vpack.c.bf16 %v1715_v30, %v1711_v7 }
 0x294   : > { %2478 = vst [vmem:[#allocation2 + $0x560] sm:$0xff] %v2286_v63  ;;  %2480 = vst [vmem:[#allocation2 + $0x570] sm:$0xff] %v2288_v0 }
 0x295   : > { %2479 = vst [vmem:[#allocation2 + $0x568] sm:$0xff] %v2287_v1  ;;  %2481 = vst [vmem:[#allocation2 + $0x578] sm:$0xff] %v2289_v3 }
 0x297   : > { %v1526_v4 = vpop.f32.mrb[124].mxu0  ;;  %v1719_v5 = vpop.f32.mrb[124].mxu1 }
 0x298   : > { %v1528_v6 = vpop.f32.mrb[125].mxu0  ;;  %v1721_v8 = vpop.f32.mrb[125].mxu1 }
 0x299   : > { %v1530_v9 = vpop.f32.mrb[126].mxu0  ;;  %v1723_v18 = vpop.f32.mrb[126].mxu1 }
 0x29a   : > { %v2298_v10 = vpack.c.bf16 %v1530_v9, %v1526_v4  ;;  %v2300_v11 = vpack.c.bf16 %v1723_v18, %v1719_v5  ;;  %v1532_v2 = vpop.f32.mrb[127].mxu0  ;;  %v1725_v50 = vpop.f32.mrb[127].mxu1 }
 0x29b   : > { %v2299_v12 = vpack.c.bf16 %v1532_v2, %v1528_v6  ;;  %v2301_v33 = vpack.c.bf16 %v1725_v50, %v1721_v8 }
 0x29c   : > { %2490 = vst [vmem:[#allocation2 + $0x5c0] sm:$0xff] %v2298_v10  ;;  %2492 = vst [vmem:[#allocation2 + $0x5d0] sm:$0xff] %v2300_v11 }
 0x29d   : > { %2491 = vst [vmem:[#allocation2 + $0x5c8] sm:$0xff] %v2299_v12  ;;  %2493 = vst [vmem:[#allocation2 + $0x5d8] sm:$0xff] %v2301_v33 }
 0x29f   : > { %v1762_v37 = vpop.f32.mrb[128].mxu0  ;;  %v1955_v13 = vpop.f32.mrb[128].mxu1 }
 0x2a0   : > { %v1764_v14 = vpop.f32.mrb[129].mxu0  ;;  %v1957_v15 = vpop.f32.mrb[129].mxu1 }
 0x2a1   : > { %v1766_v16 = vpop.f32.mrb[130].mxu0  ;;  %v1959_v17 = vpop.f32.mrb[130].mxu1 }
 0x2a2   : > { %v2122_v19 = vpack.c.bf16 %v1766_v16, %v1762_v37  ;;  %v2124_v20 = vpack.c.bf16 %v1959_v17, %v1955_v13  ;;  %v1768_v21 = vpop.f32.mrb[131].mxu0  ;;  %v1961_v53 = vpop.f32.mrb[131].mxu1 }
 0x2a3   : > { %v2123_v22 = vpack.c.bf16 %v1768_v21, %v1764_v14  ;;  %v2125_v23 = vpack.c.bf16 %v1961_v53, %v1957_v15 }
 0x2a4   : > { %2314 = vst [vmem:[#allocation2 + $0x40] sm:$0xff] %v2122_v19  ;;  %2316 = vst [vmem:[#allocation2 + $0x50] sm:$0xff] %v2124_v20 }
 0x2a5   : > { %2315 = vst [vmem:[#allocation2 + $0x48] sm:$0xff] %v2123_v22  ;;  %2317 = vst [vmem:[#allocation2 + $0x58] sm:$0xff] %v2125_v23 }
 0x2a7   : > { %v1772_v36 = vpop.f32.mrb[132].mxu0  ;;  %v1965_v25 = vpop.f32.mrb[132].mxu1 }
 0x2a8   : > { %v1774_v26 = vpop.f32.mrb[133].mxu0  ;;  %v1967_v48 = vpop.f32.mrb[133].mxu1 }
 0x2a9   : > { %v1776_v28 = vpop.f32.mrb[134].mxu0  ;;  %v1969_v29 = vpop.f32.mrb[134].mxu1 }
 0x2aa   : > { %v2134_v31 = vpack.c.bf16 %v1776_v28, %v1772_v36  ;;  %v2136_v32 = vpack.c.bf16 %v1969_v29, %v1965_v25  ;;  %v1778_v34 = vpop.f32.mrb[135].mxu0  ;;  %v1971_v35 = vpop.f32.mrb[135].mxu1 }
 0x2ab   : > { %v2135_v24 = vpack.c.bf16 %v1778_v34, %v1774_v26  ;;  %v2137_v38 = vpack.c.bf16 %v1971_v35, %v1967_v48 }
 0x2ac   : > { %2326 = vst [vmem:[#allocation2 + $0xa0] sm:$0xff] %v2134_v31  ;;  %2328 = vst [vmem:[#allocation2 + $0xb0] sm:$0xff] %v2136_v32 }
 0x2ad   : > { %2327 = vst [vmem:[#allocation2 + $0xa8] sm:$0xff] %v2135_v24  ;;  %2329 = vst [vmem:[#allocation2 + $0xb8] sm:$0xff] %v2137_v38 }
 0x2af   : > { %v1782_v40 = vpop.f32.mrb[136].mxu0  ;;  %v1975_v39 = vpop.f32.mrb[136].mxu1 }
 0x2b0   : > { %v1784_v41 = vpop.f32.mrb[137].mxu0  ;;  %v1977_v42 = vpop.f32.mrb[137].mxu1 }
 0x2b1   : > { %v1786_v44 = vpop.f32.mrb[138].mxu0  ;;  %v1979_v59 = vpop.f32.mrb[138].mxu1 }
 0x2b2   : > { %v2146_v45 = vpack.c.bf16 %v1786_v44, %v1782_v40  ;;  %v2148_v47 = vpack.c.bf16 %v1979_v59, %v1975_v39  ;;  %v1788_v49 = vpop.f32.mrb[139].mxu0  ;;  %v1981_v51 = vpop.f32.mrb[139].mxu1 }
 0x2b3   : > { %v2147_v52 = vpack.c.bf16 %v1788_v49, %v1784_v41  ;;  %v2149_v27 = vpack.c.bf16 %v1981_v51, %v1977_v42 }
 0x2b4   : > { %2338 = vst [vmem:[#allocation2 + $0x100] sm:$0xff] %v2146_v45  ;;  %2340 = vst [vmem:[#allocation2 + $0x110] sm:$0xff] %v2148_v47 }
 0x2b5   : > { %2339 = vst [vmem:[#allocation2 + $0x108] sm:$0xff] %v2147_v52  ;;  %2341 = vst [vmem:[#allocation2 + $0x118] sm:$0xff] %v2149_v27 }
 0x2b7   : > { %v1792_v43 = vpop.f32.mrb[140].mxu0  ;;  %v1985_v54 = vpop.f32.mrb[140].mxu1 }
 0x2b8   : > { %v1794_v55 = vpop.f32.mrb[141].mxu0  ;;  %v1987_v56 = vpop.f32.mrb[141].mxu1 }
 0x2b9   : > { %v1796_v57 = vpop.f32.mrb[142].mxu0  ;;  %v1989_v58 = vpop.f32.mrb[142].mxu1 }
 0x2ba   : > { %v2158_v60 = vpack.c.bf16 %v1796_v57, %v1792_v43  ;;  %v2160_v7 = vpack.c.bf16 %v1989_v58, %v1985_v54  ;;  %v1798_v61 = vpop.f32.mrb[143].mxu0  ;;  %v1991_v62 = vpop.f32.mrb[143].mxu1 }
 0x2bb   : > { %v2159_v63 = vpack.c.bf16 %v1798_v61, %v1794_v55  ;;  %v2161_v0 = vpack.c.bf16 %v1991_v62, %v1987_v56 }
 0x2bc   : > { %2350 = vst [vmem:[#allocation2 + $0x160] sm:$0xff] %v2158_v60  ;;  %2352 = vst [vmem:[#allocation2 + $0x170] sm:$0xff] %v2160_v7 }
 0x2bd   : > { %2351 = vst [vmem:[#allocation2 + $0x168] sm:$0xff] %v2159_v63  ;;  %2353 = vst [vmem:[#allocation2 + $0x178] sm:$0xff] %v2161_v0 }
 0x2bf   : > { %v1802_v46 = vpop.f32.mrb[144].mxu0  ;;  %v1995_v30 = vpop.f32.mrb[144].mxu1 }
 0x2c0   : > { %v1804_v1 = vpop.f32.mrb[145].mxu0  ;;  %v1997_v3 = vpop.f32.mrb[145].mxu1 }
 0x2c1   : > { %v1806_v4 = vpop.f32.mrb[146].mxu0  ;;  %v1999_v5 = vpop.f32.mrb[146].mxu1 }
 0x2c2   : > { %v2170_v6 = vpack.c.bf16 %v1806_v4, %v1802_v46  ;;  %v2172_v8 = vpack.c.bf16 %v1999_v5, %v1995_v30  ;;  %v1808_v9 = vpop.f32.mrb[147].mxu0  ;;  %v2001_v18 = vpop.f32.mrb[147].mxu1 }
 0x2c3   : > { %v2171_v10 = vpack.c.bf16 %v1808_v9, %v1804_v1  ;;  %v2173_v11 = vpack.c.bf16 %v2001_v18, %v1997_v3 }
 0x2c4   : > { %2362 = vst [vmem:[#allocation2 + $0x1c0] sm:$0xff] %v2170_v6  ;;  %2364 = vst [vmem:[#allocation2 + $0x1d0] sm:$0xff] %v2172_v8 }
 0x2c5   : > { %2363 = vst [vmem:[#allocation2 + $0x1c8] sm:$0xff] %v2171_v10  ;;  %2365 = vst [vmem:[#allocation2 + $0x1d8] sm:$0xff] %v2173_v11 }
 0x2c7   : > { %v1812_v2 = vpop.f32.mrb[148].mxu0  ;;  %v2005_v50 = vpop.f32.mrb[148].mxu1 }
 0x2c8   : > { %v1814_v12 = vpop.f32.mrb[149].mxu0  ;;  %v2007_v33 = vpop.f32.mrb[149].mxu1 }
 0x2c9   : > { %v1816_v37 = vpop.f32.mrb[150].mxu0  ;;  %v2009_v13 = vpop.f32.mrb[150].mxu1 }
 0x2ca   : > { %v2182_v14 = vpack.c.bf16 %v1816_v37, %v1812_v2  ;;  %v2184_v15 = vpack.c.bf16 %v2009_v13, %v2005_v50  ;;  %v1818_v16 = vpop.f32.mrb[151].mxu0  ;;  %v2011_v17 = vpop.f32.mrb[151].mxu1 }
 0x2cb   : > { %v2183_v19 = vpack.c.bf16 %v1818_v16, %v1814_v12  ;;  %v2185_v20 = vpack.c.bf16 %v2011_v17, %v2007_v33 }
 0x2cc   : > { %2374 = vst [vmem:[#allocation2 + $0x220] sm:$0xff] %v2182_v14  ;;  %2376 = vst [vmem:[#allocation2 + $0x230] sm:$0xff] %v2184_v15 }
 0x2cd   : > { %2375 = vst [vmem:[#allocation2 + $0x228] sm:$0xff] %v2183_v19  ;;  %2377 = vst [vmem:[#allocation2 + $0x238] sm:$0xff] %v2185_v20 }
 0x2cf   : > { %v1822_v21 = vpop.f32.mrb[152].mxu0  ;;  %v2015_v53 = vpop.f32.mrb[152].mxu1 }
 0x2d0   : > { %v1824_v22 = vpop.f32.mrb[153].mxu0  ;;  %v2017_v23 = vpop.f32.mrb[153].mxu1 }
 0x2d1   : > { %v1826_v36 = vpop.f32.mrb[154].mxu0  ;;  %v2019_v25 = vpop.f32.mrb[154].mxu1 }
 0x2d2   : > { %v2194_v26 = vpack.c.bf16 %v1826_v36, %v1822_v21  ;;  %v2196_v48 = vpack.c.bf16 %v2019_v25, %v2015_v53  ;;  %v1828_v28 = vpop.f32.mrb[155].mxu0  ;;  %v2021_v29 = vpop.f32.mrb[155].mxu1 }
 0x2d3   : > { %v2195_v31 = vpack.c.bf16 %v1828_v28, %v1824_v22  ;;  %v2197_v32 = vpack.c.bf16 %v2021_v29, %v2017_v23 }
 0x2d4   : > { %2386 = vst [vmem:[#allocation2 + $0x280] sm:$0xff] %v2194_v26  ;;  %2388 = vst [vmem:[#allocation2 + $0x290] sm:$0xff] %v2196_v48 }
 0x2d5   : > { %2387 = vst [vmem:[#allocation2 + $0x288] sm:$0xff] %v2195_v31  ;;  %2389 = vst [vmem:[#allocation2 + $0x298] sm:$0xff] %v2197_v32 }
 0x2d7   : > { %v1832_v34 = vpop.f32.mrb[156].mxu0  ;;  %v2025_v35 = vpop.f32.mrb[156].mxu1 }
 0x2d8   : > { %v1834_v24 = vpop.f32.mrb[157].mxu0  ;;  %v2027_v38 = vpop.f32.mrb[157].mxu1 }
 0x2d9   : > { %v1836_v40 = vpop.f32.mrb[158].mxu0  ;;  %v2029_v39 = vpop.f32.mrb[158].mxu1 }
 0x2da   : > { %v2206_v41 = vpack.c.bf16 %v1836_v40, %v1832_v34  ;;  %v2208_v42 = vpack.c.bf16 %v2029_v39, %v2025_v35  ;;  %v1838_v44 = vpop.f32.mrb[159].mxu0  ;;  %v2031_v59 = vpop.f32.mrb[159].mxu1 }
 0x2db   : > { %v2207_v45 = vpack.c.bf16 %v1838_v44, %v1834_v24  ;;  %v2209_v47 = vpack.c.bf16 %v2031_v59, %v2027_v38 }
 0x2dc   : > { %2398 = vst [vmem:[#allocation2 + $0x2e0] sm:$0xff] %v2206_v41  ;;  %2400 = vst [vmem:[#allocation2 + $0x2f0] sm:$0xff] %v2208_v42 }
 0x2dd   : > { %2399 = vst [vmem:[#allocation2 + $0x2e8] sm:$0xff] %v2207_v45  ;;  %2401 = vst [vmem:[#allocation2 + $0x2f8] sm:$0xff] %v2209_v47 }
 0x2df   : > { %v1842_v49 = vpop.f32.mrb[160].mxu0  ;;  %v2035_v51 = vpop.f32.mrb[160].mxu1 }
 0x2e0   : > { %v1844_v52 = vpop.f32.mrb[161].mxu0  ;;  %v2037_v27 = vpop.f32.mrb[161].mxu1 }
 0x2e1   : > { %v1846_v43 = vpop.f32.mrb[162].mxu0  ;;  %v2039_v54 = vpop.f32.mrb[162].mxu1 }
 0x2e2   : > { %v2218_v55 = vpack.c.bf16 %v1846_v43, %v1842_v49  ;;  %v2220_v56 = vpack.c.bf16 %v2039_v54, %v2035_v51  ;;  %v1848_v57 = vpop.f32.mrb[163].mxu0  ;;  %v2041_v58 = vpop.f32.mrb[163].mxu1 }
 0x2e3   : > { %v2219_v60 = vpack.c.bf16 %v1848_v57, %v1844_v52  ;;  %v2221_v7 = vpack.c.bf16 %v2041_v58, %v2037_v27 }
 0x2e4   : > { %2410 = vst [vmem:[#allocation2 + $0x340] sm:$0xff] %v2218_v55  ;;  %2412 = vst [vmem:[#allocation2 + $0x350] sm:$0xff] %v2220_v56 }
 0x2e5   : > { %2411 = vst [vmem:[#allocation2 + $0x348] sm:$0xff] %v2219_v60  ;;  %2413 = vst [vmem:[#allocation2 + $0x358] sm:$0xff] %v2221_v7 }
 0x2e7   : > { %v1852_v61 = vpop.f32.mrb[164].mxu0  ;;  %v2045_v62 = vpop.f32.mrb[164].mxu1 }
 0x2e8   : > { %v1854_v63 = vpop.f32.mrb[165].mxu0  ;;  %v2047_v0 = vpop.f32.mrb[165].mxu1 }
 0x2e9   : > { %v1856_v46 = vpop.f32.mrb[166].mxu0  ;;  %v2049_v30 = vpop.f32.mrb[166].mxu1 }
 0x2ea   : > { %v2230_v1 = vpack.c.bf16 %v1856_v46, %v1852_v61  ;;  %v2232_v3 = vpack.c.bf16 %v2049_v30, %v2045_v62  ;;  %v1858_v4 = vpop.f32.mrb[167].mxu0  ;;  %v2051_v5 = vpop.f32.mrb[167].mxu1 }
 0x2eb   : > { %v2231_v6 = vpack.c.bf16 %v1858_v4, %v1854_v63  ;;  %v2233_v8 = vpack.c.bf16 %v2051_v5, %v2047_v0 }
 0x2ec   : > { %2422 = vst [vmem:[#allocation2 + $0x3a0] sm:$0xff] %v2230_v1  ;;  %2424 = vst [vmem:[#allocation2 + $0x3b0] sm:$0xff] %v2232_v3 }
 0x2ed   : > { %2423 = vst [vmem:[#allocation2 + $0x3a8] sm:$0xff] %v2231_v6  ;;  %2425 = vst [vmem:[#allocation2 + $0x3b8] sm:$0xff] %v2233_v8 }
 0x2ef   : > { %v1862_v9 = vpop.f32.mrb[168].mxu0  ;;  %v2055_v18 = vpop.f32.mrb[168].mxu1 }
 0x2f0   : > { %v1864_v10 = vpop.f32.mrb[169].mxu0  ;;  %v2057_v11 = vpop.f32.mrb[169].mxu1 }
 0x2f1   : > { %v1866_v2 = vpop.f32.mrb[170].mxu0  ;;  %v2059_v50 = vpop.f32.mrb[170].mxu1 }
 0x2f2   : > { %v2242_v12 = vpack.c.bf16 %v1866_v2, %v1862_v9  ;;  %v2244_v33 = vpack.c.bf16 %v2059_v50, %v2055_v18  ;;  %v1868_v37 = vpop.f32.mrb[171].mxu0  ;;  %v2061_v13 = vpop.f32.mrb[171].mxu1 }
 0x2f3   : > { %v2243_v14 = vpack.c.bf16 %v1868_v37, %v1864_v10  ;;  %v2245_v15 = vpack.c.bf16 %v2061_v13, %v2057_v11 }
 0x2f4   : > { %2434 = vst [vmem:[#allocation2 + $0x400] sm:$0xff] %v2242_v12  ;;  %2436 = vst [vmem:[#allocation2 + $0x410] sm:$0xff] %v2244_v33 }
 0x2f5   : > { %2435 = vst [vmem:[#allocation2 + $0x408] sm:$0xff] %v2243_v14  ;;  %2437 = vst [vmem:[#allocation2 + $0x418] sm:$0xff] %v2245_v15 }
 0x2f7   : > { %v1872_v16 = vpop.f32.mrb[172].mxu0  ;;  %v2065_v17 = vpop.f32.mrb[172].mxu1 }
 0x2f8   : > { %v1874_v19 = vpop.f32.mrb[173].mxu0  ;;  %v2067_v20 = vpop.f32.mrb[173].mxu1 }
 0x2f9   : > { %v1876_v21 = vpop.f32.mrb[174].mxu0  ;;  %v2069_v53 = vpop.f32.mrb[174].mxu1 }
 0x2fa   : > { %v2254_v22 = vpack.c.bf16 %v1876_v21, %v1872_v16  ;;  %v2256_v23 = vpack.c.bf16 %v2069_v53, %v2065_v17  ;;  %v1878_v36 = vpop.f32.mrb[175].mxu0  ;;  %v2071_v25 = vpop.f32.mrb[175].mxu1 }
 0x2fb   : > { %v2255_v26 = vpack.c.bf16 %v1878_v36, %v1874_v19  ;;  %v2257_v48 = vpack.c.bf16 %v2071_v25, %v2067_v20 }
 0x2fc   : > { %2446 = vst [vmem:[#allocation2 + $0x460] sm:$0xff] %v2254_v22  ;;  %2448 = vst [vmem:[#allocation2 + $0x470] sm:$0xff] %v2256_v23 }
 0x2fd   : > { %2447 = vst [vmem:[#allocation2 + $0x468] sm:$0xff] %v2255_v26  ;;  %2449 = vst [vmem:[#allocation2 + $0x478] sm:$0xff] %v2257_v48 }
 0x2ff   : > { %v1882_v28 = vpop.f32.mrb[176].mxu0  ;;  %v2075_v29 = vpop.f32.mrb[176].mxu1 }
 0x300   : > { %v1884_v31 = vpop.f32.mrb[177].mxu0  ;;  %v2077_v32 = vpop.f32.mrb[177].mxu1 }
 0x301   : > { %v1886_v34 = vpop.f32.mrb[178].mxu0  ;;  %v2079_v35 = vpop.f32.mrb[178].mxu1 }
 0x302   : > { %v2266_v24 = vpack.c.bf16 %v1886_v34, %v1882_v28  ;;  %v2268_v38 = vpack.c.bf16 %v2079_v35, %v2075_v29  ;;  %v1888_v40 = vpop.f32.mrb[179].mxu0  ;;  %v2081_v39 = vpop.f32.mrb[179].mxu1 }
 0x303   : > { %v2267_v41 = vpack.c.bf16 %v1888_v40, %v1884_v31  ;;  %v2269_v42 = vpack.c.bf16 %v2081_v39, %v2077_v32 }
 0x304   : > { %2458 = vst [vmem:[#allocation2 + $0x4c0] sm:$0xff] %v2266_v24  ;;  %2460 = vst [vmem:[#allocation2 + $0x4d0] sm:$0xff] %v2268_v38 }
 0x305   : > { %2459 = vst [vmem:[#allocation2 + $0x4c8] sm:$0xff] %v2267_v41  ;;  %2461 = vst [vmem:[#allocation2 + $0x4d8] sm:$0xff] %v2269_v42 }
 0x307   : > { %v1892_v44 = vpop.f32.mrb[180].mxu0  ;;  %v2085_v59 = vpop.f32.mrb[180].mxu1 }
 0x308   : > { %v1894_v45 = vpop.f32.mrb[181].mxu0  ;;  %v2087_v47 = vpop.f32.mrb[181].mxu1 }
 0x309   : > { %v1896_v49 = vpop.f32.mrb[182].mxu0  ;;  %v2089_v51 = vpop.f32.mrb[182].mxu1 }
 0x30a   : > { %v2278_v52 = vpack.c.bf16 %v1896_v49, %v1892_v44  ;;  %v2280_v27 = vpack.c.bf16 %v2089_v51, %v2085_v59  ;;  %v1898_v43 = vpop.f32.mrb[183].mxu0  ;;  %v2091_v54 = vpop.f32.mrb[183].mxu1 }
 0x30b   : > { %v2279_v55 = vpack.c.bf16 %v1898_v43, %v1894_v45  ;;  %v2281_v56 = vpack.c.bf16 %v2091_v54, %v2087_v47 }
 0x30c   : > { %2470 = vst [vmem:[#allocation2 + $0x520] sm:$0xff] %v2278_v52  ;;  %2472 = vst [vmem:[#allocation2 + $0x530] sm:$0xff] %v2280_v27 }
 0x30d   : > { %2471 = vst [vmem:[#allocation2 + $0x528] sm:$0xff] %v2279_v55  ;;  %2473 = vst [vmem:[#allocation2 + $0x538] sm:$0xff] %v2281_v56 }
 0x30f   : > { %v1902_v57 = vpop.f32.mrb[184].mxu0  ;;  %v2095_v58 = vpop.f32.mrb[184].mxu1 }
 0x310   : > { %v1904_v60 = vpop.f32.mrb[185].mxu0  ;;  %v2097_v7 = vpop.f32.mrb[185].mxu1 }
 0x311   : > { %v1906_v61 = vpop.f32.mrb[186].mxu0  ;;  %v2099_v62 = vpop.f32.mrb[186].mxu1 }
 0x312   : > { %v2290_v63 = vpack.c.bf16 %v1906_v61, %v1902_v57  ;;  %v2292_v0 = vpack.c.bf16 %v2099_v62, %v2095_v58  ;;  %v1908_v46 = vpop.f32.mrb[187].mxu0  ;;  %v2101_v30 = vpop.f32.mrb[187].mxu1 }
 0x313   : > { %v2291_v1 = vpack.c.bf16 %v1908_v46, %v1904_v60  ;;  %v2293_v3 = vpack.c.bf16 %v2101_v30, %v2097_v7 }
 0x314   : > { %2482 = vst [vmem:[#allocation2 + $0x580] sm:$0xff] %v2290_v63  ;;  %2484 = vst [vmem:[#allocation2 + $0x590] sm:$0xff] %v2292_v0 }
 0x315   : > { %2483 = vst [vmem:[#allocation2 + $0x588] sm:$0xff] %v2291_v1  ;;  %2485 = vst [vmem:[#allocation2 + $0x598] sm:$0xff] %v2293_v3 }
 0x317   : > { %v1912_v4 = vpop.f32.mrb[188].mxu0  ;;  %v2105_v5 = vpop.f32.mrb[188].mxu1 }
 0x318   : > { %v1914_v6 = vpop.f32.mrb[189].mxu0  ;;  %v2107_v8 = vpop.f32.mrb[189].mxu1 }
 0x319   : > { %v1916_v9 = vpop.f32.mrb[190].mxu0  ;;  %v2109_v18 = vpop.f32.mrb[190].mxu1 }
 0x31a   : > { %v2302_v10 = vpack.c.bf16 %v1916_v9, %v1912_v4  ;;  %v2304_v11 = vpack.c.bf16 %v2109_v18, %v2105_v5  ;;  %v1918_v2 = vpop.f32.mrb[191].mxu0  ;;  %v2111_v50 = vpop.f32.mrb[191].mxu1 }
 0x31b   : > { %v2303_v12 = vpack.c.bf16 %v1918_v2, %v1914_v6  ;;  %v2305_v33 = vpack.c.bf16 %v2111_v50, %v2107_v8 }
 0x31c   : > { %2494 = vst [vmem:[#allocation2 + $0x5e0] sm:$0xff] %v2302_v10  ;;  %2496 = vst [vmem:[#allocation2 + $0x5f0] sm:$0xff] %v2304_v11 }
 0x31d   : > { %2495 = vst [vmem:[#allocation2 + $0x5e8] sm:$0xff] %v2303_v12  ;;  %2497 = vst [vmem:[#allocation2 + $0x5f8] sm:$0xff] %v2305_v33 }
 0x31e PF: > { %v2512_v37 = vld [vmem:[#allocation2 + $0x20] sm:$0xff]  ;;  %s12699_s29 = sld [smem:[#allocation23_spill]]  ;;  %v9659_v34 = vld [vmem:[%s9355_s17 + $0x10] sm:$0xff]   ;;  %v9667_v40 = vld [vmem:[%s9355_s17 + $0x18] sm:$0xff]   ;;  %s13136_s15 = sld [smem:[#allocation24_spill]] }
 0x31f   : > { %v2513_v13 = vld [vmem:[#allocation2 + $0x80] sm:$0xff]  ;;  %7426 = vmatprep.subr.bf16.mxu0 %v2512_v37  ;;  %v2546_v24 = vunpack.c.l.bf16 %v9659_v34  ;;  %v9670_v39 = vld [vmem:[%s9355_s17 + $0x8] sm:$0xff]   ;;  %v2547_v59 = vunpack.c.l.bf16 %v9667_v40  ;;  %v9686_v43 = vld [vmem:[%s9355_s17 + $0x30] sm:$0xff]   ;;  %s13138_s7 = sld [smem:[#allocation30_spill]]  ;;  %s6653_s30 = sshll.u32 %s9364_s11, 4  ;;  %s12396_s30 = int_to_ptr.vmem [resolvable:$true] %s6653_s30 }
 0x320   : > { %7427 = vmatpush3.bf16.xpose.msra.mxu0 %v2512_v37  ;;  %v2514_v15 = vld [vmem:[#allocation2 + $0xe0] sm:$0xff]  ;;  %v2545_v49 = vunpack.c.l.bf16 %v9670_v39  ;;  %v9689_v54 = vld [vmem:[%s9355_s17 + $0x28] sm:$0xff]   ;;  %v9696_v57 = vld [vmem:[%s9355_s17 + $0x38] sm:$0xff]   ;;  %v2550_v58 = vunpack.c.l.bf16 %v9686_v43  ;;  %s13139_s12 = sld [smem:[#allocation240_spill]]  ;;  %s12407_s9 = scalar_lea.sflag [#allocation6], %s322_s10 }
 0x321   : > { %7428 = vmatprep.subr.bf16.mxu0 %v2513_v13  ;;  %v2515_v16 = vld [vmem:[#allocation2 + $0x140] sm:$0xff]  ;;  %v2549_v7 = vunpack.c.l.bf16 %v9689_v54  ;;  %v2551_v63 = vunpack.c.l.bf16 %v9696_v57  ;;  %v9713_v4 = vld [vmem:[%s9355_s17 + $0x50] sm:$0xff]   ;;  %v9716_v5 = vld [vmem:[%s9355_s17 + $0x48] sm:$0xff]  }
 0x322   : > { %v2516_v17 = vld [vmem:[#allocation2 + $0x1a0] sm:$0xff]  ;;  %v9723_v9 = vld [vmem:[%s9355_s17 + $0x58] sm:$0xff]   ;;  %v2554_v18 = vunpack.c.l.bf16 %v9713_v4  ;;  %v2553_v11 = vunpack.c.l.bf16 %v9716_v5 }
 0x323   : > { %v2517_v19 = vld [vmem:[#allocation2 + $0x200] sm:$0xff]  ;;  %v2555_v33 = vunpack.c.l.bf16 %v9723_v9 }
 0x324   : > { %s6902_s13 = sshll.u32 %s12699_s29, 7  ;;  %v2518_v20 = vld [vmem:[#allocation2 + $0x260] sm:$0xff]  ;;  %s7033_s4 = sshll.u32 %s12699_s29, 4 }
 0x325   : > { %s2499_s5 = sshra.s32 %s6902_s13, 4  ;;  %v2519_v21 = vld [vmem:[#allocation2 + $0x2c0] sm:$0xff]  ;;  %s7034_s14 = sshll.u32 %s13136_s15, 5 }
 0x326   : > { %s7041_s24 = smul.u32 96, %s2499_s5  ;;  %v2520_v28 = vld [vmem:[#allocation2 + $0x40] sm:$0xff]  ;;  %s6650_s21 = sadd.s32 %s7034_s14, %s7033_s4 }
 0x327   : > { %v2521_v29 = vld [vmem:[#allocation2 + $0xa0] sm:$0xff]  ;;  %7458 = vmatprep.subr.bf16.mxu1 %v2520_v28  ;;  %s7035_s6 = sshll.u32 %s6650_s21, 7  ;;  %s8876_s29 = scalar_lea.vmem %s12396_s30, 2048 }
 0x328   : > { %s9624_s25 = scalar_lea.vmem [#allocation2], %s7041_s24  ;;  %7429 = vmatpush3.bf16.xpose.msra.mxu0 %v2513_v13  ;;  %7459 = vmatpush3.bf16.msra.mxu1 %v2520_v28  ;;  %v2522_v31 = vld [vmem:[#allocation2 + $0x100] sm:$0xff]  ;;  %s12402_s18 = scalar_lea.hbm %s13139_s12, %s7035_s6 }
 0x329   : > { %v9627_v14 = vld [vmem:[%s9624_s25] sm:$0xff]  ;;  %7430 = vmatprep.subr.bf16.mxu0 %v2514_v15  ;;  %7460 = vmatprep.subr.bf16.mxu1 %v2521_v29  ;;  %p8877_p2 = scmp.ne.s32.totalorder %s12396_s30, %s8876_s29  ;;  %p13140_p9 = scmp.ne.s32.totalorder %s13138_s7, 0 }
 0x32a   : > { %7442 = vmatprep.mubr.bf16.mxu0 %v9627_v14  ;;  %v9631_v53 = vld [vmem:[%s9624_s25 + $0x60] sm:$0xff]  ;;  %s9048_s13 = smov [#allocation12]  }
 0x32b   : > { %v9634_v22 = vld [vmem:[%s9624_s25 + $0xc0] sm:$0xff]  ;;  %p8878_p10 = pnand %p8877_p2, %p13140_p9  ;;  %s8880_s5 = sshll.u32 %s9048_s13, 4  ;;  %s8881_s5 = int_to_ptr.vmem [resolvable:$false] %s8880_s5 }
 0x32c   : > { %v9639_v23 = vld [vmem:[%s9624_s25 + $0x120] sm:$0xff]  ;;  %7461 = vmatpush3.bf16.msra.mxu1 %v2521_v29  ;;  %s8882_s24 = scalar_lea.vmem %s8881_s5, 4096  ;;  %p8883_p8 = scmp.lt.s32.totalorder %s12396_s30, %s8881_s5 }
 0x32d   : > { %v9642_v36 = vld [vmem:[%s9624_s25 + $0x180] sm:$0xff]  ;;  %7462 = vmatprep.subr.bf16.mxu1 %v2522_v31  ;;  %p8879_p0 = pneg %p8878_p10  ;;  %p8884_p1 = scmp.lt.s32.totalorder %s8882_s24, %s8876_s29 }
 0x32e   : > { %v9647_v25 = vld [vmem:[%s9624_s25 + $0x1e0] sm:$0xff] }
 0x32f   : > { %v9650_v26 = vld [vmem:[%s9624_s25 + $0x240] sm:$0xff]  ;;  %p8885_p3 = por %p8884_p1, %p8883_p8 }
 0x330   : > { %7431 = vmatpush3.bf16.xpose.msra.mxu0 %v2514_v15  ;;  %v9655_v48 = vld [vmem:[%s9624_s25 + $0x2a0] sm:$0xff]  ;;  %7463 = vmatpush3.bf16.msra.mxu1 %v2522_v31  ;;  %v9751_v31 = vld [vmem:[%s9355_s17 + $0x78] sm:$0xff]  }
 0x331   : > { %7432 = vmatprep.subr.bf16.mxu0 %v2515_v16  ;;  %v2523_v32 = vld [vmem:[#allocation2 + $0x160] sm:$0xff]  ;;  %p8886_p7 = pnand %p8885_p3, %p8879_p0 }
 0x332   : > { %7464 = vmatprep.subr.bf16.mxu1 %v2523_v32  ;;  %v9662_v35 = vld [vmem:[%s9355_s17] sm:$0xff]  }
 0x333   : > { %v2544_v38 = vunpack.c.l.bf16 %v9662_v35  ;;  %v9680_v52 = vld [vmem:[%s9355_s17 + $0x20] sm:$0xff]  }
 0x334   : > { %7465 = vmatpush3.bf16.msra.mxu1 %v2523_v32  ;;  %v2548_v56 = vunpack.c.l.bf16 %v9680_v52  ;;  %v9705_v30 = vld [vmem:[%s9355_s17 + $0x40] sm:$0xff]  }
 0x335   : > { %v2552_v8 = vunpack.c.l.bf16 %v9705_v30  ;;  %v2524_v50 = vld [vmem:[#allocation2 + $0x1c0] sm:$0xff] }
 0x336   : > { %7466 = vmatprep.subr.bf16.mxu1 %v2524_v50  ;;  %v9733_v15 = vld [vmem:[%s9355_s17 + $0x60] sm:$0xff]  }
 0x337   : > { %v2556_v29 = vunpack.c.l.bf16 %v9733_v15 }
 0x338   : > { %7433 = vmatpush3.bf16.xpose.msra.mxu0 %v2515_v16  ;;  %7467 = vmatpush3.bf16.msra.mxu1 %v2524_v50 }
 0x339   : > { %7434 = vmatprep.subr.bf16.mxu0 %v2516_v17 }
 0x340   : > { %7435 = vmatpush3.bf16.xpose.msra.mxu0 %v2516_v17 }
 0x341   : > { %7436 = vmatprep.subr.bf16.mxu0 %v2517_v19 }
 0x348   : > { %7437 = vmatpush3.bf16.xpose.msra.mxu0 %v2517_v19  ;;  %v9741_v19 = vld [vmem:[%s9355_s17 + $0x70] sm:$0xff]  }
 0x349   : > { %7438 = vmatprep.subr.bf16.mxu0 %v2518_v20  ;;  %v2558_v32 = vunpack.c.l.bf16 %v9741_v19 }
 0x350   : > { %7439 = vmatpush3.bf16.xpose.msra.mxu0 %v2518_v20  ;;  %v9744_v20 = vld [vmem:[%s9355_s17 + $0x68] sm:$0xff]  }
 0x351   : > { %7440 = vmatprep.subr.bf16.mxu0 %v2519_v21 }
 0x358   : > { %7441 = vmatpush3.bf16.xpose.msra.mxu0 %v2519_v21  ;;  %v2525_v21 = vld [vmem:[#allocation2 + $0x220] sm:$0xff] }
 0x359   : > { %7468 = vmatprep.subr.bf16.mxu1 %v2525_v21 }
 0x35a   : > { %7469 = vmatpush3.bf16.msra.mxu1 %v2525_v21 }
 0x35f   : > { %7443 = vmatmul.mubr.bf16.vlgmr.msra.gmra.mrb[0].mxu0 %v9631_v53 }
 0x360   : > { %7446 = vmatprep.mubr.bf16.mxu0 %v9634_v22 }
 0x367   : > { %7447 = vmatmul.mubr.bf16.gmra.mrb[4].mxu0 %v9639_v23 }
 0x368   : > { %7450 = vmatprep.mubr.bf16.mxu0 %v9642_v36 }
 0x36f   : > { %7451 = vmatmul.mubr.bf16.gmra.mrb[8].mxu0 %v9647_v25 }
 0x370   : > { %7454 = vmatprep.mubr.bf16.mxu0 %v9650_v26 }
 0x377   : > { %7455 = vmatmul.mubr.bf16.gmra.mrb[12].mxu0 %v9655_v48 }
 0x432   : > { %v7444_v41 = vpop.f32.mrb[0].mxu0 }
 0x433   : > { %v9672_v42 = vadd.f32 %v7444_v41, %v2546_v24  ;;  %v2594_v44 = vpop.f32.mrb[1].mxu0 }
 0x434   : > { %v9675_v45 = vadd.f32 %v2594_v44, %v2544_v38  ;;  %v7445_v47 = vpop.f32.mrb[2].mxu0  ;;  %v2557_v38 = vunpack.c.l.bf16 %v9744_v20  ;;  %v2526_v44 = vld [vmem:[#allocation2 + $0x280] sm:$0xff] }
 0x435   : > { %2661 = vmax.xlane.f32.xlu1 %v9672_v42  ;;  %v2597_v51 = vpop.f32.mrb[3].mxu0  ;;  %v9683_v27 = vadd.f32 %v7445_v47, %v2547_v59  ;;  %v2559_v47 = vunpack.c.l.bf16 %v9751_v31  ;;  %7470 = vmatprep.subr.bf16.mxu1 %v2526_v44 }
 0x436   : > { %2657 = vmax.xlane.f32.xlu0 %v9675_v45  ;;  %v9691_v55 = vadd.f32 %v2597_v51, %v2545_v49  ;;  %7471 = vmatpush3.bf16.msra.mxu1 %v2526_v44 }
 0x439   : > { %2663 = vmax.xlane.f32.xlu1 %v9683_v27 }
 0x43a   : > { %v7448_v60 = vpop.f32.mrb[4].mxu0  ;;  %2659 = vmax.xlane.f32.xlu0 %v9691_v55 }
 0x43b   : > { %v2610_v61 = vpop.f32.mrb[5].mxu0  ;;  %v9707_v1 = vadd.f32 %v7448_v60, %v2550_v58  ;;  %v2527_v60 = vld [vmem:[#allocation2 + $0x2e0] sm:$0xff] }
 0x43c   : > { %v9701_v62 = vadd.f32 %v2610_v61, %v2548_v56  ;;  %v7449_v0 = vpop.f32.mrb[6].mxu0  ;;  %7472 = vmatprep.subr.bf16.mxu1 %v2527_v60  ;;  %v2874_v61 = vld [vmem:[#allocation2 + $0x320] sm:$0xff] }
 0x43d   : > { %v2613_v46 = vpop.f32.mrb[7].mxu0  ;;  %v9718_v6 = vadd.f32 %v7449_v0, %v2551_v63  ;;  %7473 = vmatpush3.bf16.msra.mxu1 %v2527_v60 }
 0x43e   : > { %v9709_v3 = vadd.f32 %v2613_v46, %v2549_v7  ;;  %2665 = vmax.xlane.f32.xlu0 %v9701_v62  ;;  %7490 = vmatprep.subr.bf16.mxu1 %v2874_v61 }
 0x440   : > { %2667 = vmax.xlane.f32.xlu1 %v9709_v3 }
 0x442   : > { %v7452_v10 = vpop.f32.mrb[8].mxu0  ;;  %2669 = vmax.xlane.f32.xlu0 %v9707_v1 }
 0x443   : > { %v2626_v2 = vpop.f32.mrb[9].mxu0  ;;  %v9735_v16 = vadd.f32 %v7452_v10, %v2554_v18 }
 0x444   : > { %v9728_v12 = vadd.f32 %v2626_v2, %v2552_v8  ;;  %v7453_v37 = vpop.f32.mrb[10].mxu0  ;;  %2671 = vmax.xlane.f32.xlu1 %v9718_v6 }
 0x445   : > { %v2629_v13 = vpop.f32.mrb[11].mxu0  ;;  %v9746_v28 = vadd.f32 %v7453_v37, %v2555_v33 }
 0x446   : > { %v9737_v17 = vadd.f32 %v2629_v13, %v2553_v11  ;;  %2673 = vmax.xlane.f32.xlu0 %v9728_v12 }
 0x448   : > { %2675 = vmax.xlane.f32.xlu1 %v9737_v17 }
 0x44a   : > { %v7456_v24 = vpop.f32.mrb[12].mxu0  ;;  %2677 = vmax.xlane.f32.xlu0 %v9735_v16 }
 0x44b   : > { %v2642_v41 = vpop.f32.mrb[13].mxu0  ;;  %v9760_v56 = vadd.f32 %v7456_v24, %v2558_v32 }
 0x44c   : > { %v9756_v59 = vadd.f32 %v2642_v41, %v2556_v29  ;;  %v7457_v49 = vpop.f32.mrb[14].mxu0  ;;  %2679 = vmax.xlane.f32.xlu1 %v9746_v28 }
 0x44d   : > { %v2645_v51 = vpop.f32.mrb[15].mxu0  ;;  %v9765_v7 = vadd.f32 %v7457_v49, %v2559_v47 }
 0x44e   : > { %v9762_v58 = vadd.f32 %v2645_v51, %v2557_v38  ;;  %2681 = vmax.xlane.f32.xlu0 %v9756_v59 }
 0x450   : > { %2683 = vmax.xlane.f32.xlu1 %v9762_v58 }
 0x452   : > { %2685 = vmax.xlane.f32.xlu0 %v9760_v56 }
 0x454   : > { %2687 = vmax.xlane.f32.xlu1 %v9765_v7 }
 0x4c2   : > { %v9770_v63 = vpop.xlane.xlu1 %2661 }
 0x4c3   : > { %v9772_v0 = vpop.xlane.xlu0 %2657  ;;  %v2691_v8 = vsub.f32 %v9672_v42, %v9770_v63 }
 0x4c4   : > { %v2689_v46 = vsub.f32 %v9675_v45, %v9772_v0 }
 0x4c5   : > { %v2709_v33 = vmul.f32 1.442695, %v2691_v8 }
 0x4c6   : > { %v2705_v18 = vmul.f32 1.442695, %v2689_v46  ;;  %v9778_v10 = vpop.xlane.xlu1 %2663 }
 0x4c7   : > { %v2692_v11 = vsub.f32 %v9683_v27, %v9778_v10  ;;  %v9782_v2 = vpop.xlane.xlu0 %2659 }
 0x4c8   : > { %v2690_v50 = vsub.f32 %v9691_v55, %v9782_v2  ;;  %8280 = vpow2.f32 %v2705_v18 }
 0x4c9   : > { %v2711_v37 = vmul.f32 1.442695, %v2692_v11 }
 0x4ca   : > { %v2707_v13 = vmul.f32 1.442695, %v2690_v50 }
 0x4cb   : > { %8282 = vpow2.f32 %v2711_v37  ;;  %v9786_v45 = vpop.xlane.xlu0 %2665 }
 0x4cc   : > { %8284 = vpow2.f32 %v2707_v13  ;;  %v2693_v42 = vsub.f32 %v9701_v62, %v9786_v45  ;;  %v2875_v13 = vld [vmem:[#allocation2 + $0x380] sm:$0xff] }
 0x4cd   : > { %8286 = vpow2.f32 %v2709_v33  ;;  %v9790_v21 = vpop.xlane.xlu1 %2667 }
 0x4ce   : > { %v2713_v27 = vmul.f32 1.442695, %v2693_v42  ;;  %v2694_v29 = vsub.f32 %v9709_v3, %v9790_v21 }
 0x4cf   : > { %v9794_v32 = vpop.xlane.xlu0 %2669 }
 0x4d0   : > { %v2715_v55 = vmul.f32 1.442695, %v2694_v29  ;;  %v2695_v24 = vsub.f32 %v9707_v1, %v9794_v32  ;;  %8288 = vpow2.f32 %v2713_v27 }
 0x4d1   : > { %v9798_v38 = vpop.xlane.xlu1 %2671 }
 0x4d2   : > { %8290 = vpow2.f32 %v2715_v55  ;;  %v2717_v41 = vmul.f32 1.442695, %v2695_v24  ;;  %v2696_v62 = vsub.f32 %v9718_v6, %v9798_v38  ;;  %v9804_v47 = vpop.eup %8280 }
 0x4d3   : > { %v9802_v44 = vpop.xlane.xlu0 %2673  ;;  %12700 = vst [vmem:[#allocation32_spill] sm:$0xff] %v9804_v47 }
 0x4d4   : > { %v2719_v49 = vmul.f32 1.442695, %v2696_v62  ;;  %v2697_v3 = vsub.f32 %v9728_v12, %v9802_v44  ;;  %8292 = vpow2.f32 %v2717_v41 }
 0x4d5   : > { %v9808_v51 = vpop.eup %8282  ;;  %v9810_v1 = vpop.xlane.xlu1 %2675 }
 0x4d6   : > { %12701 = vst [vmem:[#allocation33_spill] sm:$0xff] %v9808_v51  ;;  %v9812_v60 = vpop.eup %8284  ;;  %8294 = vpow2.f32 %v2719_v49  ;;  %v2721_v46 = vmul.f32 1.442695, %v2697_v3  ;;  %v2698_v6 = vsub.f32 %v9737_v17, %v9810_v1 }
 0x4d7   : > { %12702 = vst [vmem:[#allocation34_spill] sm:$0xff] %v9812_v60  ;;  %v9816_v8 = vpop.eup %8286  ;;  %v9818_v18 = vpop.xlane.xlu0 %2677  ;;  %v2769_v11 = vpack.c.bf16 %v9812_v60, %v9804_v47 }
 0x4d8   : > { %12703 = vst [vmem:[#allocation35_spill] sm:$0xff] %v9816_v8  ;;  %v2723_v12 = vmul.f32 1.442695, %v2698_v6  ;;  %v2699_v50 = vsub.f32 %v9735_v16, %v9818_v18  ;;  %v2770_v33 = vpack.c.bf16 %v9808_v51, %v9816_v8  ;;  %8296 = vpow2.f32 %v2721_v46 }
 0x4d9   : > { %v9826_v37 = vpop.xlane.xlu1 %2679  ;;  %7474 = vmatprep.mubr.bf16.mxu1 %v2769_v11 }
 0x4da   : > { %8298 = vpow2.f32 %v2723_v12  ;;  %v2725_v17 = vmul.f32 1.442695, %v2699_v50  ;;  %v2700_v42 = vsub.f32 %v9746_v28, %v9826_v37  ;;  %7475 = vmatmul.mubr.bf16.vlgmr.msra.gmra.mrb[0].mxu1 %v2770_v33  ;;  %v9830_v27 = vpop.eup %8288  ;;  %v2876_v50 = vld [vmem:[#allocation2 + $0x3e0] sm:$0xff] }
 0x4db   : > { %12704 = vst [vmem:[#allocation36_spill] sm:$0xff] %v9830_v27  ;;  %7491 = vmatpush3.bf16.xpose.msra.mxu1 %v2874_v61  ;;  %v9832_v29 = vpop.xlane.xlu0 %2681 }
 0x4dc   : > { %v9834_v16 = vpop.eup %8290  ;;  %v2727_v55 = vmul.f32 1.442695, %v2700_v42  ;;  %v2701_v24 = vsub.f32 %v9756_v59, %v9832_v29  ;;  %7492 = vmatprep.subr.bf16.mxu1 %v2875_v13  ;;  %8300 = vpow2.f32 %v2725_v17 }
 0x4dd   : > { %12705 = vst [vmem:[#allocation37_spill] sm:$0xff] %v9834_v16  ;;  %v9838_v41 = vpop.xlane.xlu1 %2683  ;;  %v2771_v62 = vpack.c.bf16 %v9834_v16, %v9830_v27 }
 0x4de   : > { %8302 = vpow2.f32 %v2727_v55  ;;  %v2729_v28 = vmul.f32 1.442695, %v2701_v24  ;;  %v2702_v61 = vsub.f32 %v9762_v58, %v9838_v41  ;;  %v9844_v49 = vpop.eup %8292 }
 0x4df   : > { %12706 = vst [vmem:[#allocation38_spill] sm:$0xff] %v9844_v49  ;;  %7478 = vmatprep.mubr.bf16.mxu1 %v2771_v62  ;;  %v9846_v3 = vpop.xlane.xlu0 %2685 }
 0x4e0   : > { %v9848_v46 = vpop.eup %8294  ;;  %v2731_v59 = vmul.f32 1.442695, %v2702_v61  ;;  %v2703_v6 = vsub.f32 %v9760_v56, %v9846_v3  ;;  %8304 = vpow2.f32 %v2729_v28  ;;  %v2877_v28 = vld [vmem:[#allocation2 + $0x440] sm:$0xff] }
 0x4e1   : > { %12707 = vst [vmem:[#allocation39_spill] sm:$0xff] %v9848_v46  ;;  %v9852_v11 = vpop.xlane.xlu1 %2687  ;;  %v2772_v12 = vpack.c.bf16 %v9848_v46, %v9844_v49  ;;  %v2909_v46 = vunpack.c.h.bf16 %v9667_v40 }
 0x4e2   : > { %8306 = vpow2.f32 %v2731_v59  ;;  %v2733_v58 = vmul.f32 1.442695, %v2703_v6  ;;  %v2704_v33 = vsub.f32 %v9765_v7, %v9852_v11  ;;  %v9858_v17 = vpop.eup %8296 }
 0x4e3   : > { %12708 = vst [vmem:[#allocation40_spill] sm:$0xff] %v9858_v17  ;;  %7493 = vmatpush3.bf16.xpose.msra.mxu1 %v2875_v13 }
 0x4e4   : > { %v9860_v42 = vpop.eup %8298  ;;  %v2735_v55 = vmul.f32 1.442695, %v2704_v33  ;;  %7479 = vmatmul.mubr.bf16.gmra.mrb[4].mxu1 %v2772_v12  ;;  %7494 = vmatprep.subr.bf16.mxu1 %v2876_v50  ;;  %8308 = vpow2.f32 %v2733_v58  ;;  %v2878_v33 = vld [vmem:[#allocation2 + $0x4a0] sm:$0xff] }
 0x4e5   : > { %12709 = vst [vmem:[#allocation41_spill] sm:$0xff] %v9860_v42  ;;  %v2773_v56 = vpack.c.bf16 %v9860_v42, %v9858_v17 }
 0x4e6   : > { %8310 = vpow2.f32 %v2735_v55  ;;  %v9864_v24 = vpop.eup %8300  ;;  %v2880_v55 = vld [vmem:[#allocation2 + $0x560] sm:$0xff] }
 0x4e7   : > { %12710 = vst [vmem:[#allocation42_spill] sm:$0xff] %v9864_v24  ;;  %7482 = vmatprep.mubr.bf16.mxu1 %v2773_v56  ;;  %v2881_v56 = vld [vmem:[#allocation2 + $0x5c0] sm:$0xff] }
 0x4e8   : > { %v9866_v62 = vpop.eup %8302 }
 0x4e9   : > { %12711 = vst [vmem:[#allocation43_spill] sm:$0xff] %v9866_v62  ;;  %v2774_v7 = vpack.c.bf16 %v9866_v62, %v9864_v24  ;;  %v2908_v62 = vunpack.c.h.bf16 %v9659_v34  ;;  %v2912_v34 = vunpack.c.h.bf16 %v9686_v43 }
 0x4ea   : > { %v9870_v13 = vpop.eup %8304 }
 0x4eb   : > { %12712 = vst [vmem:[#allocation44_spill] sm:$0xff] %v9870_v13  ;;  %7495 = vmatpush3.bf16.xpose.msra.mxu1 %v2876_v50  ;;  %v2879_v50 = vld [vmem:[#allocation2 + $0x500] sm:$0xff] }
 0x4ec   : > { %v9872_v61 = vpop.eup %8306  ;;  %7483 = vmatmul.mubr.bf16.gmra.mrb[8].mxu1 %v2774_v7  ;;  %7496 = vmatprep.subr.bf16.mxu1 %v2877_v28  ;;  %v2883_v7 = vld [vmem:[#allocation2 + $0x3a0] sm:$0xff] }
 0x4ed   : > { %12713 = vst [vmem:[#allocation45_spill] sm:$0xff] %v9872_v61  ;;  %v2775_v59 = vpack.c.bf16 %v9872_v61, %v9870_v13  ;;  %v2907_v61 = vunpack.c.h.bf16 %v9670_v39 }
 0x4ee   : > { %v9876_v6 = vpop.eup %8308 }
 0x4ef   : > { %12714 = vst [vmem:[#allocation46_spill] sm:$0xff] %v9876_v6  ;;  %7486 = vmatprep.mubr.bf16.mxu1 %v2775_v59 }
 0x4f0   : > { %v9878_v12 = vpop.eup %8310 }
 0x4f1   : > { %12715 = vst [vmem:[#allocation47_spill] sm:$0xff] %v9878_v12  ;;  %v2776_v58 = vpack.c.bf16 %v9878_v12, %v9876_v6  ;;  %v2906_v12 = vunpack.c.h.bf16 %v9662_v35  ;;  %v2910_v35 = vunpack.c.h.bf16 %v9680_v52 }
 0x4f3   : > { %7497 = vmatpush3.bf16.xpose.msra.mxu1 %v2877_v28  ;;  %v2884_v28 = vld [vmem:[#allocation2 + $0x400] sm:$0xff] }
 0x4f4   : > { %7487 = vmatmul.mubr.bf16.gmra.mrb[12].mxu1 %v2776_v58  ;;  %7498 = vmatprep.subr.bf16.mxu1 %v2878_v33 }
 0x4f5   : > { %7506 = vmatprep.mubr.bf16.mxu1 %v9627_v14  ;;  %v2882_v14 = vld [vmem:[#allocation2 + $0x340] sm:$0xff] }
 0x4f6   : > { %7522 = vmatprep.subr.bf16.mxu0 %v2882_v14 }
 0x4f7   : > { %7523 = vmatpush3.bf16.msra.mxu0 %v2882_v14 }
 0x4f8   : > { %7524 = vmatprep.subr.bf16.mxu0 %v2883_v7 }
 0x4fb   : > { %7499 = vmatpush3.bf16.xpose.msra.mxu1 %v2878_v33  ;;  %7525 = vmatpush3.bf16.msra.mxu0 %v2883_v7 }
 0x4fc   : > { %7500 = vmatprep.subr.bf16.mxu1 %v2879_v50  ;;  %7526 = vmatprep.subr.bf16.mxu0 %v2884_v28 }
 0x4ff   : > { %7527 = vmatpush3.bf16.msra.mxu0 %v2884_v28 }
 0x503   : > { %7501 = vmatpush3.bf16.xpose.msra.mxu1 %v2879_v50 }
 0x504   : > { %7502 = vmatprep.subr.bf16.mxu1 %v2880_v55 }
 0x50b   : > { %7503 = vmatpush3.bf16.xpose.msra.mxu1 %v2880_v55 }
 0x50c   : > { %7504 = vmatprep.subr.bf16.mxu1 %v2881_v56 }
 0x513   : > { %7505 = vmatpush3.bf16.xpose.msra.mxu1 %v2881_v56 }
 0x51a   : > { %7507 = vmatmul.mubr.bf16.vlgmr.msra.gmra.mrb[16].mxu1 %v9631_v53  ;;  %v2885_v53 = vld [vmem:[#allocation2 + $0x460] sm:$0xff] }
 0x51b   : > { %7510 = vmatprep.mubr.bf16.mxu1 %v9634_v22  ;;  %7528 = vmatprep.subr.bf16.mxu0 %v2885_v53 }
 0x51c   : > { %7529 = vmatpush3.bf16.msra.mxu0 %v2885_v53 }
 0x522   : > { %7511 = vmatmul.mubr.bf16.gmra.mrb[20].mxu1 %v9639_v23 }
 0x523   : > { %7514 = vmatprep.mubr.bf16.mxu1 %v9642_v36 }
 0x52a   : > { %7515 = vmatmul.mubr.bf16.gmra.mrb[24].mxu1 %v9647_v25 }
 0x52b   : > { %7518 = vmatprep.mubr.bf16.mxu1 %v9650_v26 }
 0x532   : > { %7519 = vmatmul.mubr.bf16.gmra.mrb[28].mxu1 %v9655_v48 }
 0x5ad   : > { %v9890_v22 = vpop.f32.mrb[0].mxu1 }
 0x5ae   : > { %v9892_v23 = vpop.f32.mrb[1].mxu1 }
 0x5af   : > { %v9894_v36 = vpop.f32.mrb[2].mxu1 }
 0x5b0   : > { %v9896_v25 = vpop.f32.mrb[3].mxu1 }
 0x5b7   : > { %v9898_v26 = vpop.f32.mrb[4].mxu1 }
 0x5b8   : > { %v9900_v48 = vpop.f32.mrb[5].mxu1 }
 0x5b9   : > { %v9902_v59 = vpop.f32.mrb[6].mxu1 }
 0x5ba   : > { %v9904_v58 = vpop.f32.mrb[7].mxu1 }
 0x5bf   : > { %v9906_v33 = vpop.f32.mrb[8].mxu1 }
 0x5c0   : > { %v9908_v50 = vpop.f32.mrb[9].mxu1 }
 0x5c1   : > { %v9910_v55 = vpop.f32.mrb[10].mxu1 }
 0x5c2   : > { %v9912_v56 = vpop.f32.mrb[11].mxu1 }
 0x5c7   : > { %v9914_v14 = vpop.f32.mrb[12].mxu1 }
 0x5c8   : > { %v9916_v7 = vpop.f32.mrb[13].mxu1 }
 0x5c9   : > { %v9918_v28 = vpop.f32.mrb[14].mxu1 }
 0x5ca   : > { %v9920_v53 = vpop.f32.mrb[15].mxu1 }
 0x5ed   : > { %v7508_v6 = vpop.f32.mrb[16].mxu1 }
 0x5ee   : > { %v2956_v13 = vpop.f32.mrb[17].mxu1  ;;  %v9931_v16 = vadd.f32 %v7508_v6, %v2908_v62 }
 0x5ef   : > { %v9925_v24 = vadd.f32 %v2956_v13, %v2906_v12  ;;  %v7509_v42 = vpop.f32.mrb[18].mxu1  ;;  %v2911_v12 = vunpack.c.h.bf16 %v9689_v54  ;;  %v2914_v54 = vunpack.c.h.bf16 %v9705_v30  ;;  %v2886_v30 = vld [vmem:[#allocation2 + $0x4c0] sm:$0xff] }
 0x5f0   : > { %v2959_v17 = vpop.f32.mrb[19].mxu1  ;;  %v9935_v39 = vadd.f32 %v7509_v42, %v2909_v46  ;;  %v2916_v46 = vunpack.c.h.bf16 %v9713_v4  ;;  %7530 = vmatprep.subr.bf16.mxu0 %v2886_v30 }
 0x5f1   : > { %v9928_v49 = vadd.f32 %v2959_v17, %v2907_v61  ;;  %3019 = vmax.xlane.f32.xlu0 %v9925_v24  ;;  %v2913_v61 = vunpack.c.h.bf16 %v9696_v57  ;;  %v2915_v57 = vunpack.c.h.bf16 %v9716_v5  ;;  %v2918_v5 = vunpack.c.h.bf16 %v9733_v15  ;;  %7531 = vmatpush3.bf16.msra.mxu0 %v2886_v30  ;;  %v9986_v30 = vld [vmem:[#allocation2 + $0x28] sm:$0xff] }
 0x5f3   : > { %3021 = vmax.xlane.f32.xlu1 %v9928_v49 }
 0x5f5   : > { %v7512_v13 = vpop.f32.mrb[20].mxu1  ;;  %3023 = vmax.xlane.f32.xlu0 %v9931_v16 }
 0x5f6   : > { %v2972_v40 = vpop.f32.mrb[21].mxu1  ;;  %v9944_v27 = vadd.f32 %v7512_v13, %v2912_v34  ;;  %v2917_v13 = vunpack.c.h.bf16 %v9723_v9  ;;  %v2920_v9 = vunpack.c.h.bf16 %v9741_v19 }
 0x5f7   : > { %v9940_v17 = vadd.f32 %v2972_v40, %v2910_v35  ;;  %v7513_v62 = vpop.f32.mrb[22].mxu1  ;;  %3025 = vmax.xlane.f32.xlu1 %v9935_v39 }
 0x5f8   : > { %v2975_v6 = vpop.f32.mrb[23].mxu1  ;;  %v9949_v43 = vadd.f32 %v7513_v62, %v2913_v61 }
 0x5f9   : > { %v9946_v52 = vadd.f32 %v2975_v6, %v2911_v12  ;;  %3027 = vmax.xlane.f32.xlu0 %v9940_v17 }
 0x5fb   : > { %3029 = vmax.xlane.f32.xlu1 %v9946_v52 }
 0x5fd   : > { %v7516_v42 = vpop.f32.mrb[24].mxu1  ;;  %3031 = vmax.xlane.f32.xlu0 %v9944_v27 }
 0x5fe   : > { %v2988_v35 = vpop.f32.mrb[25].mxu1  ;;  %v9960_v61 = vadd.f32 %v7516_v42, %v2916_v46 }
 0x5ff   : > { %v9956_v34 = vadd.f32 %v2988_v35, %v2914_v54  ;;  %v7517_v12 = vpop.f32.mrb[26].mxu1  ;;  %3033 = vmax.xlane.f32.xlu1 %v9949_v43  ;;  %v2919_v54 = vunpack.c.h.bf16 %v9744_v20  ;;  %v2888_v20 = vld [vmem:[#allocation2 + $0x580] sm:$0xff] }
 0x600   : > { %v2991_v40 = vpop.f32.mrb[27].mxu1  ;;  %v9965_v4 = vadd.f32 %v7517_v12, %v2917_v13  ;;  %v2887_v13 = vld [vmem:[#allocation2 + $0x520] sm:$0xff] }
 0x601   : > { %v9962_v62 = vadd.f32 %v2991_v40, %v2915_v57  ;;  %3035 = vmax.xlane.f32.xlu0 %v9956_v34  ;;  %v2921_v57 = vunpack.c.h.bf16 %v9751_v31  ;;  %7532 = vmatprep.subr.bf16.mxu0 %v2887_v13  ;;  %v2889_v31 = vld [vmem:[#allocation2 + $0x5e0] sm:$0xff] }
 0x602   : > { %7533 = vmatpush3.bf16.msra.mxu0 %v2887_v13 }
 0x603   : > { %3037 = vmax.xlane.f32.xlu1 %v9962_v62  ;;  %7534 = vmatprep.subr.bf16.mxu0 %v2888_v20 }
 0x605   : > { %v7520_v6 = vpop.f32.mrb[28].mxu1  ;;  %3039 = vmax.xlane.f32.xlu0 %v9960_v61 }
 0x606   : > { %v3004_v46 = vpop.f32.mrb[29].mxu1  ;;  %v9976_v15 = vadd.f32 %v7520_v6, %v2920_v9  ;;  %7535 = vmatpush3.bf16.msra.mxu0 %v2888_v20 }
 0x607   : > { %v9972_v42 = vadd.f32 %v3004_v46, %v2918_v5  ;;  %v7521_v35 = vpop.f32.mrb[30].mxu1  ;;  %3041 = vmax.xlane.f32.xlu1 %v9965_v4  ;;  %7536 = vmatprep.subr.bf16.mxu0 %v2889_v31 }
 0x608   : > { %v3007_v12 = vpop.f32.mrb[31].mxu1  ;;  %v9981_v19 = vadd.f32 %v7521_v35, %v2921_v57 }
 0x609   : > { %v9978_v40 = vadd.f32 %v3007_v12, %v2919_v54  ;;  %3043 = vmax.xlane.f32.xlu0 %v9972_v42 }
 0x60a   : > { %7537 = vmatpush3.bf16.msra.mxu0 %v2889_v31 }
 0x60b   : > { %3045 = vmax.xlane.f32.xlu1 %v9978_v40  ;;  %7554 = vmatprep.subr.bf16.mxu0 %v9986_v30 }
 0x60d   : > { %3047 = vmax.xlane.f32.xlu0 %v9976_v15 }
 0x60f   : > { %3049 = vmax.xlane.f32.xlu1 %v9981_v19 }
 0x67e   : > { %v3020_v5 = vpop.xlane.xlu0 %3019 }
 0x67f   : > { %v3051_v9 = vmax.f32 %v9772_v0, %v3020_v5 }
 0x680   : > { %v3022_v6 = vpop.xlane.xlu1 %3021 }
 0x681   : > { %v3067_v54 = vsub.f32 %v9772_v0, %v3051_v9  ;;  %v3115_v46 = vsub.f32 %v9925_v24, %v3051_v9  ;;  %v3052_v57 = vmax.f32 %v9782_v2, %v3022_v6 }
 0x682   : > { %v3024_v35 = vpop.xlane.xlu0 %3023 }
 0x683   : > { %v3083_v13 = vmul.f32 1.442695, %v3067_v54  ;;  %v3131_v12 = vmul.f32 1.442695, %v3115_v46  ;;  %v3068_v20 = vsub.f32 %v9782_v2, %v3052_v57  ;;  %v3116_v31 = vsub.f32 %v9928_v49, %v3052_v57 }
 0x684   : > { %v3053_v51 = vmax.f32 %v9770_v63, %v3024_v35  ;;  %v3026_v8 = vpop.xlane.xlu1 %3025 }
 0x685   : > { %8312 = vpow2.f32 %v3083_v13  ;;  %v3085_v60 = vmul.f32 1.442695, %v3068_v20  ;;  %v3133_v5 = vmul.f32 1.442695, %v3116_v31  ;;  %v3054_v47 = vmax.f32 %v9778_v10, %v3026_v8 }
 0x686   : > { %8314 = vpow2.f32 %v3131_v12  ;;  %v3069_v0 = vsub.f32 %v9770_v63, %v3053_v51  ;;  %v3117_v24 = vsub.f32 %v9931_v16, %v3053_v51  ;;  %v3028_v9 = vpop.xlane.xlu0 %3027 }
 0x687   : > { %8316 = vpow2.f32 %v3085_v60  ;;  %v3070_v6 = vsub.f32 %v9778_v10, %v3054_v47  ;;  %v3118_v2 = vsub.f32 %v9935_v39, %v3054_v47  ;;  %v3055_v49 = vmax.f32 %v9786_v45, %v3028_v9 }
 0x688   : > { %8318 = vpow2.f32 %v3133_v5  ;;  %v3087_v54 = vmul.f32 1.442695, %v3069_v0  ;;  %v3135_v46 = vmul.f32 1.442695, %v3117_v24  ;;  %v3030_v57 = vpop.xlane.xlu1 %3029 }
 0x689   : > { %v3089_v35 = vmul.f32 1.442695, %v3070_v6  ;;  %v3137_v13 = vmul.f32 1.442695, %v3118_v2  ;;  %v3071_v8 = vsub.f32 %v9786_v45, %v3055_v49  ;;  %v3119_v63 = vsub.f32 %v9940_v17, %v3055_v49 }
 0x68a   : > { %8320 = vpow2.f32 %v3087_v54  ;;  %v3056_v51 = vmax.f32 %v9790_v21, %v3030_v57  ;;  %v3032_v60 = vpop.xlane.xlu0 %3031 }
 0x68b   : > { %8322 = vpow2.f32 %v3135_v46  ;;  %v3091_v10 = vmul.f32 1.442695, %v3071_v8  ;;  %v3139_v16 = vmul.f32 1.442695, %v3119_v63  ;;  %v3057_v47 = vmax.f32 %v9794_v32, %v3032_v60 }
 0x68c   : > { %8324 = vpow2.f32 %v3089_v35  ;;  %v3072_v39 = vsub.f32 %v9790_v21, %v3056_v51  ;;  %v3120_v12 = vsub.f32 %v9946_v52, %v3056_v51  ;;  %v3034_v20 = vpop.xlane.xlu1 %3033 }
 0x68d   : > { %8326 = vpow2.f32 %v3137_v13  ;;  %v3073_v45 = vsub.f32 %v9794_v32, %v3057_v47  ;;  %v3121_v17 = vsub.f32 %v9944_v27, %v3057_v47  ;;  %v3058_v31 = vmax.f32 %v9798_v38, %v3034_v20 }
 0x68e   : > { %8328 = vpow2.f32 %v3091_v10  ;;  %v3093_v5 = vmul.f32 1.442695, %v3072_v39  ;;  %v3141_v0 = vmul.f32 1.442695, %v3120_v12  ;;  %v3036_v24 = vpop.xlane.xlu0 %3035 }
 0x68f   : > { %v10011_v9 = vpop.eup %8312  ;;  %8330 = vpow2.f32 %v3139_v16  ;;  %v3095_v6 = vmul.f32 1.442695, %v3073_v45  ;;  %v3143_v2 = vmul.f32 1.442695, %v3121_v17  ;;  %v3074_v21 = vsub.f32 %v9798_v38, %v3058_v31 }
 0x690   : > { %12716 = vst [vmem:[#allocation48_spill] sm:$0xff] %v10011_v9  ;;  %v10014_v52 = vpop.eup %8314  ;;  %8332 = vpow2.f32 %v3093_v5  ;;  %v3122_v32 = vsub.f32 %v9949_v43, %v3058_v31  ;;  %v3059_v27 = vmax.f32 %v9802_v44, %v3036_v24  ;;  %v3038_v49 = vpop.xlane.xlu1 %3037  ;;  %v10020_v54 = vmul.f32 %v10011_v9, %v9892_v23 }
 0x691   : > { %12717 = vst [vmem:[#allocation49_spill] sm:$0xff] %v10014_v52  ;;  %v10022_v46 = vpop.eup %8316  ;;  %8334 = vpow2.f32 %v3141_v0  ;;  %v3097_v57 = vmul.f32 1.442695, %v3074_v21  ;;  %v3060_v35 = vmax.f32 %v9810_v1, %v3038_v49 }
 0x692   : > { %12718 = vst [vmem:[#allocation50_spill] sm:$0xff] %v10022_v46  ;;  %v10025_v13 = vpop.eup %8318  ;;  %8336 = vpow2.f32 %v3095_v6  ;;  %v3145_v38 = vmul.f32 1.442695, %v3122_v32  ;;  %v3075_v8 = vsub.f32 %v9802_v44, %v3059_v27  ;;  %v3123_v43 = vsub.f32 %v9956_v34, %v3059_v27  ;;  %v3040_v63 = vpop.xlane.xlu0 %3039 }
 0x693   : > { %12719 = vst [vmem:[#allocation51_spill] sm:$0xff] %v10025_v13  ;;  %8338 = vpow2.f32 %v3143_v2  ;;  %v3076_v51 = vsub.f32 %v9810_v1, %v3060_v35  ;;  %v3124_v23 = vsub.f32 %v9962_v62, %v3060_v35  ;;  %v3061_v60 = vmax.f32 %v9818_v18, %v3040_v63 }
 0x694   : > { %v10032_v10 = vpop.eup %8320  ;;  %8340 = vpow2.f32 %v3097_v57  ;;  %v3099_v16 = vmul.f32 1.442695, %v3075_v8  ;;  %v3147_v47 = vmul.f32 1.442695, %v3123_v43  ;;  %v3042_v39 = vpop.xlane.xlu1 %3041  ;;  %v3243_v12 = vpack.c.bf16 %v10025_v13, %v10014_v52 }
 0x695   : > { %12720 = vst [vmem:[#allocation52_spill] sm:$0xff] %v10032_v10  ;;  %v10036_v44 = vpop.eup %8322  ;;  %8342 = vpow2.f32 %v3145_v38  ;;  %v3101_v34 = vmul.f32 1.442695, %v3076_v51  ;;  %v3149_v20 = vmul.f32 1.442695, %v3124_v23  ;;  %v3077_v1 = vsub.f32 %v9818_v18, %v3061_v60  ;;  %v3421_v23 = vld [vmem:[#allocation2 + $0x88] sm:$0xff] }
 0x696   : > { %12721 = vst [vmem:[#allocation53_spill] sm:$0xff] %v10036_v44  ;;  %v10039_v45 = vpop.eup %8324  ;;  %8344 = vpow2.f32 %v3099_v16  ;;  %v3125_v62 = vsub.f32 %v9960_v61, %v3061_v60  ;;  %v3062_v17 = vmax.f32 %v9826_v37, %v3042_v39  ;;  %7538 = vmatprep.mubr.bf16.mxu0 %v3243_v12  ;;  %v3044_v31 = vpop.xlane.xlu0 %3043  ;;  %v10045_v5 = vmul.f32 %v10032_v10, %v9890_v22 }
 0x697   : > { %12722 = vst [vmem:[#allocation54_spill] sm:$0xff] %v10039_v45  ;;  %v10047_v0 = vpop.eup %8326  ;;  %8346 = vpow2.f32 %v3147_v47  ;;  %v3103_v24 = vmul.f32 1.442695, %v3077_v1  ;;  %v3063_v6 = vmax.f32 %v9832_v29, %v3044_v31  ;;  %v10052_v18 = vmul.f32 %v10039_v45, %v9894_v36 }
 0x698   : > { %12723 = vst [vmem:[#allocation55_spill] sm:$0xff] %v10047_v0  ;;  %v10054_v2 = vpop.eup %8328  ;;  %8348 = vpow2.f32 %v3101_v34  ;;  %v3151_v61 = vmul.f32 1.442695, %v3125_v62  ;;  %v3078_v21 = vsub.f32 %v9826_v37, %v3062_v17  ;;  %v3126_v32 = vsub.f32 %v9965_v4, %v3062_v17  ;;  %v3046_v22 = vpop.xlane.xlu1 %3045 }
 0x699   : > { %12724 = vst [vmem:[#allocation56_spill] sm:$0xff] %v10054_v2  ;;  %v10058_v27 = vpop.eup %8330  ;;  %8350 = vpow2.f32 %v3149_v20  ;;  %v3079_v49 = vsub.f32 %v9832_v29, %v3063_v6  ;;  %v3127_v57 = vsub.f32 %v9972_v42, %v3063_v6  ;;  %v3064_v35 = vmax.f32 %v9838_v41, %v3046_v22 }
 0x69a   : > { %12725 = vst [vmem:[#allocation57_spill] sm:$0xff] %v10058_v27  ;;  %v10063_v36 = vpop.eup %8332  ;;  %8352 = vpow2.f32 %v3103_v24  ;;  %v3105_v38 = vmul.f32 1.442695, %v3078_v21  ;;  %v3153_v8 = vmul.f32 1.442695, %v3126_v32  ;;  %v3244_v37 = vpack.c.bf16 %v10047_v0, %v10036_v44  ;;  %v3048_v43 = vpop.xlane.xlu0 %3047 }
 0x69b   : > { %12726 = vst [vmem:[#allocation58_spill] sm:$0xff] %v10063_v36  ;;  %v10067_v4 = vpop.eup %8334  ;;  %8354 = vpow2.f32 %v3151_v61  ;;  %v3107_v63 = vmul.f32 1.442695, %v3079_v49  ;;  %v3155_v51 = vmul.f32 1.442695, %v3127_v57  ;;  %v3080_v29 = vsub.f32 %v9838_v41, %v3064_v35 }
 0x69c   : > { %12727 = vst [vmem:[#allocation59_spill] sm:$0xff] %v10067_v4  ;;  %v10070_v42 = vpop.eup %8336  ;;  %8356 = vpow2.f32 %v3105_v38  ;;  %v3128_v60 = vsub.f32 %v9978_v40, %v3064_v35  ;;  %7539 = vmatmul.mubr.bf16.vlgmr.msra.gmra.mrb[16].mxu0 %v3244_v37  ;;  %v3065_v16 = vmax.f32 %v9846_v3, %v3048_v43  ;;  %v3050_v47 = vpop.xlane.xlu1 %3049  ;;  %v3245_v39 = vpack.c.bf16 %v10067_v4, %v10058_v27 }
 0x69d   : > { %12728 = vst [vmem:[#allocation60_spill] sm:$0xff] %v10070_v42  ;;  %v10076_v12 = vpop.eup %8338  ;;  %8358 = vpow2.f32 %v3153_v8  ;;  %v3109_v34 = vmul.f32 1.442695, %v3080_v29  ;;  %7555 = vmatpush3.bf16.xpose.msra.mxu0 %v9986_v30  ;;  %v3066_v41 = vmax.f32 %v9852_v11, %v3050_v47  ;;  %v10082_v20 = vmul.f32 %v10022_v46, %v9896_v25 }
 0x69e   : > { %12729 = vst [vmem:[#allocation61_spill] sm:$0xff] %v10076_v12  ;;  %v10084_v40 = vpop.eup %8340  ;;  %8360 = vpow2.f32 %v3107_v63  ;;  %v3157_v1 = vmul.f32 1.442695, %v3128_v60  ;;  %v3081_v62 = vsub.f32 %v9846_v3, %v3065_v16  ;;  %v3129_v17 = vsub.f32 %v9976_v15, %v3065_v16  ;;  %7542 = vmatprep.mubr.bf16.mxu0 %v3245_v39  ;;  %7556 = vmatprep.subr.bf16.mxu0 %v3421_v23  ;;  %v3423_v16 = vld [vmem:[#allocation2 + $0x148] sm:$0xff] }
 0x69f   : > { %12730 = vst [vmem:[#allocation62_spill] sm:$0xff] %v10084_v40  ;;  %v10088_v31 = vpop.eup %8342  ;;  %8362 = vpow2.f32 %v3155_v51  ;;  %v3082_v30 = vsub.f32 %v9852_v11, %v3066_v41  ;;  %v3130_v24 = vsub.f32 %v9981_v19, %v3066_v41  ;;  %v10094_v25 = vmul.f32 %v10070_v42, %v9898_v26  ;;  %v10337_v42 = vld [vmem:[%s9355_s17 + $0xe0] sm:$0xff]  }
 0x6a0   : > { %12731 = vst [vmem:[#allocation63_spill] sm:$0xff] %v10088_v31  ;;  %v10096_v6 = vpop.eup %8344  ;;  %8364 = vpow2.f32 %v3109_v34  ;;  %v3111_v61 = vmul.f32 1.442695, %v3081_v62  ;;  %v3159_v3 = vmul.f32 1.442695, %v3129_v17  ;;  %v3246_v15 = vpack.c.bf16 %v10088_v31, %v10076_v12  ;;  %v10183_v17 = vld [vmem:[%s9624_s25 + $0x8] sm:$0xff] }
 0x6a1   : > { %12732 = vst [vmem:[#allocation64_spill] sm:$0xff] %v10096_v6  ;;  %v10100_v21 = vpop.eup %8346  ;;  %8366 = vpow2.f32 %v3157_v1  ;;  %v3113_v32 = vmul.f32 1.442695, %v3082_v30  ;;  %v3161_v22 = vmul.f32 1.442695, %v3130_v24  ;;  %v10104_v11 = vmul.f32 %v10054_v2, %v9900_v48  ;;  %v3422_v48 = vld [vmem:[#allocation2 + $0xe8] sm:$0xff] }
 0x6a2   : > { %12733 = vst [vmem:[#allocation65_spill] sm:$0xff] %v10100_v21  ;;  %v10106_v19 = vpop.eup %8348  ;;  %8368 = vpow2.f32 %v3111_v61  ;;  %v10110_v26 = vmul.f32 %v10084_v40, %v9902_v59  ;;  %v10114_v49 = vmul.f32 %v10063_v36, %v9904_v58  ;;  %v10118_v57 = vmul.f32 %v10096_v6, %v9908_v50  ;;  %v3424_v30 = vld [vmem:[#allocation2 + $0x1a8] sm:$0xff]  ;;  %v10345_v36 = vld [vmem:[%s9355_s17 + $0xf0] sm:$0xff]  }
 0x6a3   : > { %12734 = vst [vmem:[#allocation66_spill] sm:$0xff] %v10106_v19  ;;  %v10120_v35 = vpop.eup %8350  ;;  %8370 = vpow2.f32 %v3159_v3  ;;  %v10124_v38 = vmul.f32 %v10106_v19, %v9912_v56  ;;  %v3427_v24 = vld [vmem:[#allocation2 + $0x2c8] sm:$0xff] }
 0x6a4   : > { %12735 = vst [vmem:[#allocation67_spill] sm:$0xff] %v10120_v35  ;;  %v10126_v8 = vpop.eup %8352  ;;  %8372 = vpow2.f32 %v3113_v32  ;;  %7543 = vmatmul.mubr.bf16.gmra.mrb[20].mxu0 %v3246_v15  ;;  %v3247_v59 = vpack.c.bf16 %v10120_v35, %v10100_v21  ;;  %v10187_v61 = vld [vmem:[%s9624_s25 + $0x68] sm:$0xff] }
 0x6a5   : > { %12736 = vst [vmem:[#allocation68_spill] sm:$0xff] %v10126_v8  ;;  %v10130_v58 = vpop.eup %8354  ;;  %8374 = vpow2.f32 %v3161_v22  ;;  %7557 = vmatpush3.bf16.xpose.msra.mxu0 %v3421_v23  ;;  %v10134_v50 = vmul.f32 %v10126_v8, %v9906_v33  ;;  %v10190_v3 = vld [vmem:[%s9624_s25 + $0xc8] sm:$0xff] }
 0x6a6   : > { %12737 = vst [vmem:[#allocation69_spill] sm:$0xff] %v10130_v58  ;;  %v10136_v37 = vpop.eup %8356  ;;  %7546 = vmatprep.mubr.bf16.mxu0 %v3247_v59  ;;  %7558 = vmatprep.subr.bf16.mxu0 %v3422_v48  ;;  %v10195_v15 = vld [vmem:[%s9624_s25 + $0x128] sm:$0xff] }
 0x6a7   : > { %12738 = vst [vmem:[#allocation70_spill] sm:$0xff] %v10136_v37  ;;  %v10138_v56 = vpop.eup %8358  ;;  %v10142_v43 = vmul.f32 %v10136_v37, %v9910_v55  ;;  %v10198_v32 = vld [vmem:[%s9624_s25 + $0x188] sm:$0xff] }
 0x6a8   : > { %12739 = vst [vmem:[#allocation71_spill] sm:$0xff] %v10138_v56  ;;  %v10144_v63 = vpop.eup %8360  ;;  %v3248_v51 = vpack.c.bf16 %v10138_v56, %v10130_v58  ;;  %v10203_v22 = vld [vmem:[%s9624_s25 + $0x1e8] sm:$0xff] }
 0x6a9   : > { %12740 = vst [vmem:[#allocation72_spill] sm:$0xff] %v10144_v63  ;;  %v10148_v29 = vpop.eup %8362  ;;  %v10152_v33 = vmul.f32 %v10144_v63, %v9916_v7  ;;  %v10211_v59 = vld [vmem:[%s9624_s25 + $0x2a8] sm:$0xff]  ;;  %v10287_v63 = vld [vmem:[%s9355_s17 + $0xb0] sm:$0xff]  }
 0x6aa   : > { %12741 = vst [vmem:[#allocation73_spill] sm:$0xff] %v10148_v29  ;;  %v10154_v23 = vpop.eup %8364  ;;  %v10348_v2 = vld [vmem:[%s9355_s17 + $0xe8] sm:$0xff]  }
 0x6ab   : > { %12742 = vst [vmem:[#allocation74_spill] sm:$0xff] %v10154_v23  ;;  %v10156_v60 = vpop.eup %8366  ;;  %v10160_v55 = vmul.f32 %v10154_v23, %v9920_v53 }
 0x6ac   : > { %12743 = vst [vmem:[#allocation75_spill] sm:$0xff] %v10156_v60  ;;  %v10162_v47 = vpop.eup %8368  ;;  %7547 = vmatmul.mubr.bf16.gmra.mrb[24].mxu0 %v3248_v51  ;;  %v3249_v39 = vpack.c.bf16 %v10156_v60, %v10148_v29  ;;  %v3428_v51 = vld [vmem:[#allocation2 + $0x48] sm:$0xff] }
 0x6ad   : > { %12744 = vst [vmem:[#allocation76_spill] sm:$0xff] %v10162_v47  ;;  %v10166_v34 = vpop.eup %8370  ;;  %7559 = vmatpush3.bf16.xpose.msra.mxu0 %v3422_v48  ;;  %v10170_v7 = vmul.f32 %v10162_v47, %v9914_v14  ;;  %v3425_v14 = vld [vmem:[#allocation2 + $0x208] sm:$0xff]  ;;  %7586 = vmatprep.subr.bf16.mxu1 %v3428_v51 }
 0x6ae   : > { %12745 = vst [vmem:[#allocation77_spill] sm:$0xff] %v10166_v34  ;;  %v10172_v41 = vpop.eup %8372  ;;  %7550 = vmatprep.mubr.bf16.mxu0 %v3249_v39  ;;  %7560 = vmatprep.subr.bf16.mxu0 %v3423_v16  ;;  %v10206_v48 = vld [vmem:[%s9624_s25 + $0x248] sm:$0xff] }
 0x6af   : > { %12746 = vst [vmem:[#allocation78_spill] sm:$0xff] %v10172_v41  ;;  %v10174_v1 = vpop.eup %8374  ;;  %v10178_v53 = vmul.f32 %v10172_v41, %v9918_v28  ;;  %v3426_v28 = vld [vmem:[#allocation2 + $0x268] sm:$0xff]  ;;  %7587 = vmatpush3.bf16.msra.mxu1 %v3428_v51 }
 0x6b0   : > { %12747 = vst [vmem:[#allocation79_spill] sm:$0xff] %v10174_v1  ;;  %v3250_v62 = vpack.c.bf16 %v10174_v1, %v10166_v34  ;;  %v3430_v39 = vld [vmem:[#allocation2 + $0x108] sm:$0xff]  ;;  %v10327_v1 = vld [vmem:[%s9355_s17 + $0xd8] sm:$0xff]  }
 0x6b1   : > { %v3433_v29 = vld [vmem:[#allocation2 + $0x228] sm:$0xff] }
 0x6b4   : > { %7551 = vmatmul.mubr.bf16.gmra.mrb[28].mxu0 %v3250_v62  ;;  %v3431_v62 = vld [vmem:[#allocation2 + $0x168] sm:$0xff] }
 0x6b5   : > { %7561 = vmatpush3.bf16.xpose.msra.mxu0 %v3423_v16  ;;  %7570 = vmatprep.mubr.bf16.mxu0 %v10183_v17  ;;  %v3429_v16 = vld [vmem:[#allocation2 + $0xa8] sm:$0xff] }
 0x6b6   : > { %7562 = vmatprep.subr.bf16.mxu0 %v3424_v30  ;;  %7588 = vmatprep.subr.bf16.mxu1 %v3429_v16 }
 0x6b7   : > { %7589 = vmatpush3.bf16.msra.mxu1 %v3429_v16 }
 0x6b8   : > { %7590 = vmatprep.subr.bf16.mxu1 %v3430_v39 }
 0x6bb   : > { %7591 = vmatpush3.bf16.msra.mxu1 %v3430_v39 }
 0x6bc   : > { %7592 = vmatprep.subr.bf16.mxu1 %v3431_v62 }
 0x6bd   : > { %7563 = vmatpush3.bf16.xpose.msra.mxu0 %v3424_v30 }
 0x6be   : > { %7564 = vmatprep.subr.bf16.mxu0 %v3425_v14 }
 0x6bf   : > { %7593 = vmatpush3.bf16.msra.mxu1 %v3431_v62 }
 0x6c5   : > { %7565 = vmatpush3.bf16.xpose.msra.mxu0 %v3425_v14 }
 0x6c6   : > { %7566 = vmatprep.subr.bf16.mxu0 %v3426_v28 }
 0x6cd   : > { %7567 = vmatpush3.bf16.xpose.msra.mxu0 %v3426_v28 }
 0x6ce   : > { %7568 = vmatprep.subr.bf16.mxu0 %v3427_v24 }
 0x6d5   : > { %7569 = vmatpush3.bf16.xpose.msra.mxu0 %v3427_v24 }
 0x6dc   : > { %7571 = vmatmul.mubr.bf16.vlgmr.msra.gmra.mrb[32].mxu0 %v10187_v61 }
 0x6dd   : > { %7574 = vmatprep.mubr.bf16.mxu0 %v10190_v3 }
 0x6e4   : > { %7575 = vmatmul.mubr.bf16.gmra.mrb[36].mxu0 %v10195_v15 }
 0x6e5   : > { %7578 = vmatprep.mubr.bf16.mxu0 %v10198_v32 }
 0x6ec   : > { %7579 = vmatmul.mubr.bf16.gmra.mrb[40].mxu0 %v10203_v22 }
 0x6ed   : > { %7582 = vmatprep.mubr.bf16.mxu0 %v10206_v48 }
 0x6f4   : > { %7583 = vmatmul.mubr.bf16.gmra.mrb[44].mxu0 %v10211_v59 }
 0x76f   : > { %v7540_v30 = vpop.f32.mrb[16].mxu0 }
 0x770   : > { %v10215_v14 = vadd.f32 %v7540_v30, %v10045_v5  ;;  %v3285_v28 = vpop.f32.mrb[17].mxu0 }
 0x771   : > { %v10218_v24 = vadd.f32 %v3285_v28, %v10020_v54  ;;  %v7541_v41 = vpop.f32.mrb[18].mxu0 }
 0x772   : > { %12748 = vst [vmem:[#allocation80_spill] sm:$0xff] %v10215_v14  ;;  %v10221_v47 = vadd.f32 %v7541_v41, %v10052_v18  ;;  %v3288_v51 = vpop.f32.mrb[19].mxu0  ;;  %v10355_v14 = vld [vmem:[%s9355_s17 + $0xf8] sm:$0xff]  }
 0x773   : > { %12749 = vst [vmem:[#allocation81_spill] sm:$0xff] %v10218_v24  ;;  %v10224_v16 = vadd.f32 %v3288_v51, %v10082_v20 }
 0x774   : > { %12750 = vst [vmem:[#allocation82_spill] sm:$0xff] %v10221_v47  ;;  %v3432_v47 = vld [vmem:[#allocation2 + $0x1c8] sm:$0xff] }
 0x775   : > { %12751 = vst [vmem:[#allocation83_spill] sm:$0xff] %v10224_v16  ;;  %7594 = vmatprep.subr.bf16.mxu1 %v3432_v47 }
 0x776   : > { %7595 = vmatpush3.bf16.msra.mxu1 %v3432_v47  ;;  %v3434_v47 = vld [vmem:[#allocation2 + $0x288] sm:$0xff] }
 0x777   : > { %v7544_v23 = vpop.f32.mrb[20].mxu0  ;;  %7596 = vmatprep.subr.bf16.mxu1 %v3433_v29 }
 0x778   : > { %v10227_v39 = vadd.f32 %v7544_v23, %v10094_v25  ;;  %v3301_v62 = vpop.f32.mrb[21].mxu0 }
 0x779   : > { %v10230_v5 = vadd.f32 %v3301_v62, %v10104_v11  ;;  %v7545_v30 = vpop.f32.mrb[22].mxu0 }
 0x77a   : > { %12752 = vst [vmem:[#allocation84_spill] sm:$0xff] %v10227_v39  ;;  %v10233_v54 = vadd.f32 %v7545_v30, %v10110_v26  ;;  %v3304_v28 = vpop.f32.mrb[23].mxu0  ;;  %v10320_v39 = vld [vmem:[%s9355_s17 + $0xc8] sm:$0xff]   ;;  %7597 = vmatpush3.bf16.msra.mxu1 %v3433_v29 }
 0x77b   : > { %12753 = vst [vmem:[#allocation85_spill] sm:$0xff] %v10230_v5  ;;  %v10236_v18 = vadd.f32 %v3304_v28, %v10114_v49  ;;  %7598 = vmatprep.subr.bf16.mxu1 %v3434_v47 }
 0x77c   : > { %12754 = vst [vmem:[#allocation86_spill] sm:$0xff] %v10233_v54  ;;  %v10317_v54 = vld [vmem:[%s9355_s17 + $0xd0] sm:$0xff]  }
 0x77d   : > { %12755 = vst [vmem:[#allocation87_spill] sm:$0xff] %v10236_v18 }
 0x77e   : > { %7599 = vmatpush3.bf16.msra.mxu1 %v3434_v47 }
 0x77f   : > { %v7548_v41 = vpop.f32.mrb[24].mxu0 }
 0x780   : > { %v10239_v20 = vadd.f32 %v7548_v41, %v10134_v50  ;;  %v3317_v25 = vpop.f32.mrb[25].mxu0 }
 0x781   : > { %v10242_v23 = vadd.f32 %v3317_v25, %v10118_v57  ;;  %v7549_v11 = vpop.f32.mrb[26].mxu0 }
 0x782   : > { %12756 = vst [vmem:[#allocation88_spill] sm:$0xff] %v10239_v20  ;;  %v10245_v51 = vadd.f32 %v7549_v11, %v10142_v43  ;;  %v3320_v26 = vpop.f32.mrb[27].mxu0  ;;  %v10266_v11 = vld [vmem:[%s9355_s17 + $0x88] sm:$0xff]  }
 0x783   : > { %12757 = vst [vmem:[#allocation89_spill] sm:$0xff] %v10242_v23  ;;  %v10248_v62 = vadd.f32 %v3320_v26, %v10124_v38  ;;  %v10263_v38 = vld [vmem:[%s9355_s17 + $0x80] sm:$0xff]   ;;  %v10270_v26 = vld [vmem:[%s9355_s17 + $0x90] sm:$0xff]  }
 0x784   : > { %12758 = vst [vmem:[#allocation90_spill] sm:$0xff] %v10245_v51  ;;  %v10290_v51 = vld [vmem:[%s9355_s17 + $0xa8] sm:$0xff]  }
 0x785   : > { %12759 = vst [vmem:[#allocation91_spill] sm:$0xff] %v10248_v62  ;;  %v3458_v8 = vunpack.c.l.bf16 %v10290_v51 }
 0x787   : > { %v7552_v49 = vpop.f32.mrb[28].mxu0 }
 0x788   : > { %v10251_v30 = vadd.f32 %v7552_v49, %v10170_v7  ;;  %v3333_v50 = vpop.f32.mrb[29].mxu0  ;;  %v3453_v7 = vunpack.c.l.bf16 %v10263_v38  ;;  %v3454_v49 = vunpack.c.l.bf16 %v10266_v11 }
 0x789   : > { %v10254_v28 = vadd.f32 %v3333_v50, %v10152_v33  ;;  %v7553_v57 = vpop.f32.mrb[30].mxu0  ;;  %v10274_v50 = vld [vmem:[%s9355_s17 + $0x98] sm:$0xff]  }
 0x78a   : > { %12760 = vst [vmem:[#allocation92_spill] sm:$0xff] %v10251_v30  ;;  %v10257_v41 = vadd.f32 %v7553_v57, %v10178_v53  ;;  %v3336_v43 = vpop.f32.mrb[31].mxu0  ;;  %v10280_v30 = vld [vmem:[%s9355_s17 + $0xa0] sm:$0xff]   ;;  %v3818_v0 = vunpack.c.h.bf16 %v10274_v50 }
 0x78b   : > { %12761 = vst [vmem:[#allocation93_spill] sm:$0xff] %v10254_v28  ;;  %v10260_v25 = vadd.f32 %v3336_v43, %v10160_v55  ;;  %v3455_v55 = vunpack.c.l.bf16 %v10270_v26 }
 0x78c   : > { %12762 = vst [vmem:[#allocation94_spill] sm:$0xff] %v10257_v41 }
 0x78d   : > { %12763 = vst [vmem:[#allocation95_spill] sm:$0xff] %v10260_v25  ;;  %v3456_v25 = vunpack.c.l.bf16 %v10274_v50 }
 0x7af   : > { %v7572_v33 = vpop.f32.mrb[32].mxu0 }
 0x7b0   : > { %v3503_v53 = vpop.f32.mrb[33].mxu0  ;;  %v10292_v20 = vadd.f32 %v7572_v33, %v3455_v55 }
 0x7b1   : > { %v10277_v57 = vadd.f32 %v3503_v53, %v3453_v7  ;;  %v7573_v43 = vpop.f32.mrb[34].mxu0  ;;  %v3457_v7 = vunpack.c.l.bf16 %v10280_v30  ;;  %v10297_v53 = vld [vmem:[%s9355_s17 + $0xb8] sm:$0xff]  }
 0x7b2   : > { %v3506_v41 = vpop.f32.mrb[35].mxu0  ;;  %v10299_v37 = vadd.f32 %v7573_v43, %v3456_v25  ;;  %v3460_v62 = vunpack.c.l.bf16 %v10297_v53  ;;  %v10309_v25 = vld [vmem:[%s9355_s17 + $0xc0] sm:$0xff]  }
 0x7b3   : > { %v10283_v28 = vadd.f32 %v3506_v41, %v3454_v49  ;;  %3566 = vmax.xlane.f32.xlu0 %v10277_v57  ;;  %v3459_v41 = vunpack.c.l.bf16 %v10287_v63 }
 0x7b5   : > { %3568 = vmax.xlane.f32.xlu1 %v10283_v28 }
 0x7b7   : > { %v7576_v49 = vpop.f32.mrb[36].mxu0  ;;  %3570 = vmax.xlane.f32.xlu0 %v10292_v20 }
 0x7b8   : > { %v3519_v33 = vpop.f32.mrb[37].mxu0  ;;  %v10311_v43 = vadd.f32 %v7576_v49, %v3459_v41  ;;  %v3462_v41 = vunpack.c.l.bf16 %v10320_v39 }
 0x7b9   : > { %v10304_v55 = vadd.f32 %v3519_v33, %v3457_v7  ;;  %v7577_v23 = vpop.f32.mrb[38].mxu0  ;;  %3572 = vmax.xlane.f32.xlu1 %v10299_v37  ;;  %v3461_v33 = vunpack.c.l.bf16 %v10309_v25 }
 0x7ba   : > { %v3522_v19 = vpop.f32.mrb[39].mxu0  ;;  %v10322_v7 = vadd.f32 %v7577_v23, %v3460_v62  ;;  %v3464_v23 = vunpack.c.l.bf16 %v10327_v1 }
 0x7bb   : > { %v10313_v6 = vadd.f32 %v3522_v19, %v3458_v8  ;;  %3574 = vmax.xlane.f32.xlu0 %v10304_v55  ;;  %v3463_v19 = vunpack.c.l.bf16 %v10317_v54 }
 0x7bd   : > { %3576 = vmax.xlane.f32.xlu1 %v10313_v6 }
 0x7bf   : > { %v7580_v8 = vpop.f32.mrb[40].mxu0  ;;  %3578 = vmax.xlane.f32.xlu0 %v10311_v43 }
 0x7c0   : > { %v3535_v49 = vpop.f32.mrb[41].mxu0  ;;  %v10339_v18 = vadd.f32 %v7580_v8, %v3463_v19  ;;  %v3467_v19 = vunpack.c.l.bf16 %v10345_v36  ;;  %v3466_v8 = vunpack.c.l.bf16 %v10348_v2 }
 0x7c1   : > { %v10332_v34 = vadd.f32 %v3535_v49, %v3461_v33  ;;  %v7581_v62 = vpop.f32.mrb[42].mxu0  ;;  %3580 = vmax.xlane.f32.xlu1 %v10322_v7  ;;  %v3465_v49 = vunpack.c.l.bf16 %v10337_v42 }
 0x7c2   : > { %v3538_v40 = vpop.f32.mrb[43].mxu0  ;;  %v10350_v33 = vadd.f32 %v7581_v62, %v3464_v23  ;;  %v3468_v23 = vunpack.c.l.bf16 %v10355_v14 }
 0x7c3   : > { %v10341_v5 = vadd.f32 %v3538_v40, %v3462_v41  ;;  %3582 = vmax.xlane.f32.xlu0 %v10332_v34 }
 0x7c5   : > { %3584 = vmax.xlane.f32.xlu1 %v10341_v5 }
 0x7c7   : > { %v7584_v40 = vpop.f32.mrb[44].mxu0  ;;  %3586 = vmax.xlane.f32.xlu0 %v10339_v18 }
 0x7c8   : > { %v3551_v41 = vpop.f32.mrb[45].mxu0  ;;  %v10364_v10 = vadd.f32 %v7584_v40, %v3467_v19  ;;  %v3783_v19 = vld [vmem:[#allocation2 + $0x328] sm:$0xff] }
 0x7c9   : > { %v10360_v60 = vadd.f32 %v3551_v41, %v3465_v49  ;;  %v7585_v62 = vpop.f32.mrb[46].mxu0  ;;  %3588 = vmax.xlane.f32.xlu1 %v10350_v33  ;;  %v3435_v49 = vld [vmem:[#allocation2 + $0x2e8] sm:$0xff] }
 0x7ca   : > { %v3554_v45 = vpop.f32.mrb[47].mxu0  ;;  %v10369_v24 = vadd.f32 %v7585_v62, %v3468_v23  ;;  %7600 = vmatprep.subr.bf16.mxu1 %v3435_v49 }
 0x7cb   : > { %v10366_v16 = vadd.f32 %v3554_v45, %v3466_v8  ;;  %3590 = vmax.xlane.f32.xlu0 %v10360_v60  ;;  %7601 = vmatpush3.bf16.msra.mxu1 %v3435_v49 }
 0x7cc   : > { %7618 = vmatprep.subr.bf16.mxu1 %v3783_v19 }
 0x7cd   : > { %3592 = vmax.xlane.f32.xlu1 %v10366_v16 }
 0x7cf   : > { %3594 = vmax.xlane.f32.xlu0 %v10364_v10 }
 0x7d1   : > { %3596 = vmax.xlane.f32.xlu1 %v10369_v24 }
 0x840   : > { %v10374_v45 = vpop.xlane.xlu0 %3566 }
 0x841   : > { %v3598_v29 = vsub.f32 %v10277_v57, %v10374_v45 }
 0x842   : > { %v10378_v40 = vpop.xlane.xlu1 %3568 }
 0x843   : > { %v3614_v8 = vmul.f32 1.442695, %v3598_v29  ;;  %v3599_v41 = vsub.f32 %v10283_v28, %v10378_v40 }
 0x844   : > { %v10382_v23 = vpop.xlane.xlu0 %3570 }
 0x845   : > { %v3616_v62 = vmul.f32 1.442695, %v3599_v41  ;;  %v3600_v47 = vsub.f32 %v10292_v20, %v10382_v23  ;;  %8376 = vpow2.f32 %v3614_v8 }
 0x846   : > { %v10386_v49 = vpop.xlane.xlu1 %3572 }
 0x847   : > { %8378 = vpow2.f32 %v3616_v62  ;;  %v3618_v56 = vmul.f32 1.442695, %v3600_v47  ;;  %v3601_v57 = vsub.f32 %v10299_v37, %v10386_v49 }
 0x848   : > { %v10390_v58 = vpop.xlane.xlu0 %3574 }
 0x849   : > { %v3620_v29 = vmul.f32 1.442695, %v3601_v57  ;;  %v3602_v28 = vsub.f32 %v10304_v55, %v10390_v58  ;;  %8380 = vpow2.f32 %v3618_v56 }
 0x84a   : > { %v10394_v46 = vpop.xlane.xlu1 %3576 }
 0x84b   : > { %8382 = vpow2.f32 %v3620_v29  ;;  %v3622_v41 = vmul.f32 1.442695, %v3602_v28  ;;  %v3603_v20 = vsub.f32 %v10313_v6, %v10394_v46 }
 0x84c   : > { %v10398_v8 = vpop.xlane.xlu0 %3578 }
 0x84d   : > { %v3624_v62 = vmul.f32 1.442695, %v3603_v20  ;;  %v3604_v37 = vsub.f32 %v10311_v43, %v10398_v8  ;;  %8384 = vpow2.f32 %v3622_v41 }
 0x84e   : > { %v10402_v47 = vpop.xlane.xlu1 %3580 }
 0x84f   : > { %8386 = vpow2.f32 %v3624_v62  ;;  %v3626_v57 = vmul.f32 1.442695, %v3604_v37  ;;  %v3605_v56 = vsub.f32 %v10322_v7, %v10402_v47  ;;  %v10406_v55 = vpop.eup %8376 }
 0x850   : > { %12764 = vst [vmem:[#allocation96_spill] sm:$0xff] %v10406_v55  ;;  %v10408_v29 = vpop.xlane.xlu0 %3582 }
 0x851   : > { %v10410_v28 = vpop.eup %8378  ;;  %v3628_v6 = vmul.f32 1.442695, %v3605_v56  ;;  %v3606_v20 = vsub.f32 %v10332_v34, %v10408_v29  ;;  %8388 = vpow2.f32 %v3626_v57 }
 0x852   : > { %12765 = vst [vmem:[#allocation97_spill] sm:$0xff] %v10410_v28  ;;  %v10414_v43 = vpop.xlane.xlu1 %3584  ;;  %v3678_v41 = vpack.c.bf16 %v10410_v28, %v10406_v55 }
 0x853   : > { %8390 = vpow2.f32 %v3628_v6  ;;  %v3630_v62 = vmul.f32 1.442695, %v3606_v20  ;;  %v3607_v7 = vsub.f32 %v10341_v5, %v10414_v43  ;;  %v10420_v37 = vpop.eup %8380 }
 0x854   : > { %12766 = vst [vmem:[#allocation98_spill] sm:$0xff] %v10420_v37  ;;  %7602 = vmatprep.mubr.bf16.mxu1 %v3678_v41  ;;  %v10422_v9 = vpop.xlane.xlu0 %3586  ;;  %v3784_v41 = vld [vmem:[#allocation2 + $0x388] sm:$0xff] }
 0x855   : > { %v10424_v56 = vpop.eup %8382  ;;  %v3632_v35 = vmul.f32 1.442695, %v3607_v7  ;;  %v3608_v34 = vsub.f32 %v10339_v18, %v10422_v9  ;;  %8392 = vpow2.f32 %v3630_v62 }
 0x856   : > { %12767 = vst [vmem:[#allocation99_spill] sm:$0xff] %v10424_v56  ;;  %v10428_v57 = vpop.xlane.xlu1 %3588  ;;  %v3679_v6 = vpack.c.bf16 %v10424_v56, %v10420_v37 }
 0x857   : > { %8394 = vpow2.f32 %v3632_v35  ;;  %v3634_v20 = vmul.f32 1.442695, %v3608_v34  ;;  %v3609_v5 = vsub.f32 %v10350_v33, %v10428_v57  ;;  %v10434_v21 = vpop.eup %8384 }
 0x858   : > { %12768 = vst [vmem:[#allocation100_spill] sm:$0xff] %v10434_v21  ;;  %7603 = vmatmul.mubr.bf16.vlgmr.msra.gmra.mrb[32].mxu1 %v3679_v6  ;;  %v10436_v31 = vpop.xlane.xlu0 %3590 }
 0x859   : > { %v10438_v7 = vpop.eup %8386  ;;  %v3636_v18 = vmul.f32 1.442695, %v3609_v5  ;;  %7619 = vmatpush3.bf16.xpose.msra.mxu1 %v3783_v19  ;;  %v3610_v62 = vsub.f32 %v10360_v60, %v10436_v31  ;;  %8396 = vpow2.f32 %v3634_v20 }
 0x85a   : > { %12769 = vst [vmem:[#allocation101_spill] sm:$0xff] %v10438_v7  ;;  %v10442_v12 = vpop.xlane.xlu1 %3592  ;;  %v3680_v35 = vpack.c.bf16 %v10438_v7, %v10434_v21  ;;  %7620 = vmatprep.subr.bf16.mxu1 %v3784_v41 }
 0x85b   : > { %8398 = vpow2.f32 %v3636_v18  ;;  %v3638_v33 = vmul.f32 1.442695, %v3610_v62  ;;  %v3611_v34 = vsub.f32 %v10366_v16, %v10442_v12  ;;  %v10448_v6 = vpop.eup %8388 }
 0x85c   : > { %12770 = vst [vmem:[#allocation102_spill] sm:$0xff] %v10448_v6  ;;  %7606 = vmatprep.mubr.bf16.mxu1 %v3680_v35  ;;  %v10450_v5 = vpop.xlane.xlu0 %3594  ;;  %v3785_v35 = vld [vmem:[#allocation2 + $0x3e8] sm:$0xff] }
 0x85d   : > { %v10452_v19 = vpop.eup %8390  ;;  %v3640_v60 = vmul.f32 1.442695, %v3611_v34  ;;  %v3612_v20 = vsub.f32 %v10364_v10, %v10450_v5  ;;  %8400 = vpow2.f32 %v3638_v33 }
 0x85e   : > { %12771 = vst [vmem:[#allocation103_spill] sm:$0xff] %v10452_v19  ;;  %v10456_v4 = vpop.xlane.xlu1 %3596  ;;  %v3681_v18 = vpack.c.bf16 %v10452_v19, %v10448_v6 }
 0x85f   : > { %8402 = vpow2.f32 %v3640_v60  ;;  %v3642_v62 = vmul.f32 1.442695, %v3612_v20  ;;  %v3613_v16 = vsub.f32 %v10369_v24, %v10456_v4  ;;  %v10462_v27 = vpop.eup %8392  ;;  %v3786_v20 = vld [vmem:[#allocation2 + $0x448] sm:$0xff] }
 0x860   : > { %12772 = vst [vmem:[#allocation104_spill] sm:$0xff] %v10462_v27  ;;  %7607 = vmatmul.mubr.bf16.gmra.mrb[36].mxu1 %v3681_v18 }
 0x861   : > { %v10464_v7 = vpop.eup %8394  ;;  %v3644_v34 = vmul.f32 1.442695, %v3613_v16  ;;  %7621 = vmatpush3.bf16.xpose.msra.mxu1 %v3784_v41  ;;  %8404 = vpow2.f32 %v3642_v62 }
 0x862   : > { %12773 = vst [vmem:[#allocation105_spill] sm:$0xff] %v10464_v7  ;;  %v3682_v10 = vpack.c.bf16 %v10464_v7, %v10462_v27  ;;  %7622 = vmatprep.subr.bf16.mxu1 %v3785_v35  ;;  %v3817_v27 = vunpack.c.h.bf16 %v10270_v26  ;;  %v3821_v26 = vunpack.c.h.bf16 %v10287_v63 }
 0x863   : > { %8406 = vpow2.f32 %v3644_v34  ;;  %v10468_v33 = vpop.eup %8396 }
 0x864   : > { %12774 = vst [vmem:[#allocation106_spill] sm:$0xff] %v10468_v33  ;;  %7610 = vmatprep.mubr.bf16.mxu1 %v3682_v10 }
 0x865   : > { %v10470_v60 = vpop.eup %8398 }
 0x866   : > { %12775 = vst [vmem:[#allocation107_spill] sm:$0xff] %v10470_v60  ;;  %v3683_v24 = vpack.c.bf16 %v10470_v60, %v10468_v33  ;;  %v3787_v60 = vld [vmem:[#allocation2 + $0x4a8] sm:$0xff]  ;;  %v3816_v33 = vunpack.c.h.bf16 %v10266_v11 }
 0x867   : > { %v10474_v18 = vpop.eup %8400 }
 0x868   : > { %12776 = vst [vmem:[#allocation108_spill] sm:$0xff] %v10474_v18  ;;  %7611 = vmatmul.mubr.bf16.gmra.mrb[40].mxu1 %v3683_v24  ;;  %v3788_v24 = vld [vmem:[#allocation2 + $0x508] sm:$0xff] }
 0x869   : > { %v10476_v16 = vpop.eup %8402  ;;  %7623 = vmatpush3.bf16.xpose.msra.mxu1 %v3785_v35  ;;  %v3789_v35 = vld [vmem:[#allocation2 + $0x568] sm:$0xff] }
 0x86a   : > { %12777 = vst [vmem:[#allocation109_spill] sm:$0xff] %v10476_v16  ;;  %v3684_v41 = vpack.c.bf16 %v10476_v16, %v10474_v18  ;;  %7624 = vmatprep.subr.bf16.mxu1 %v3786_v20  ;;  %v3790_v16 = vld [vmem:[#allocation2 + $0x5c8] sm:$0xff] }
 0x86b   : > { %v10480_v62 = vpop.eup %8404 }
 0x86c   : > { %12778 = vst [vmem:[#allocation110_spill] sm:$0xff] %v10480_v62  ;;  %7614 = vmatprep.mubr.bf16.mxu1 %v3684_v41 }
 0x86d   : > { %v10482_v34 = vpop.eup %8406 }
 0x86e   : > { %12779 = vst [vmem:[#allocation111_spill] sm:$0xff] %v10482_v34  ;;  %v3685_v10 = vpack.c.bf16 %v10482_v34, %v10480_v62  ;;  %v3815_v62 = vunpack.c.h.bf16 %v10263_v38  ;;  %v3819_v38 = vunpack.c.h.bf16 %v10280_v30  ;;  %v3825_v30 = vunpack.c.h.bf16 %v10317_v54 }
 0x870   : > { %7615 = vmatmul.mubr.bf16.gmra.mrb[44].mxu1 %v3685_v10 }
 0x871   : > { %7625 = vmatpush3.bf16.xpose.msra.mxu1 %v3786_v20  ;;  %7634 = vmatprep.mubr.bf16.mxu1 %v10183_v17  ;;  %v3791_v17 = vld [vmem:[#allocation2 + $0x348] sm:$0xff] }
 0x872   : > { %7626 = vmatprep.subr.bf16.mxu1 %v3787_v60  ;;  %7650 = vmatprep.subr.bf16.mxu0 %v3791_v17  ;;  %v3793_v20 = vld [vmem:[#allocation2 + $0x408] sm:$0xff] }
 0x873   : > { %7651 = vmatpush3.bf16.msra.mxu0 %v3791_v17 }
 0x879   : > { %7627 = vmatpush3.bf16.xpose.msra.mxu1 %v3787_v60  ;;  %v3792_v60 = vld [vmem:[#allocation2 + $0x3a8] sm:$0xff] }
 0x87a   : > { %7628 = vmatprep.subr.bf16.mxu1 %v3788_v24  ;;  %7652 = vmatprep.subr.bf16.mxu0 %v3792_v60 }
 0x87b   : > { %7653 = vmatpush3.bf16.msra.mxu0 %v3792_v60 }
 0x87c   : > { %7654 = vmatprep.subr.bf16.mxu0 %v3793_v20 }
 0x87f   : > { %7655 = vmatpush3.bf16.msra.mxu0 %v3793_v20 }
 0x881   : > { %7629 = vmatpush3.bf16.xpose.msra.mxu1 %v3788_v24 }
 0x882   : > { %7630 = vmatprep.subr.bf16.mxu1 %v3789_v35 }
 0x889   : > { %7631 = vmatpush3.bf16.xpose.msra.mxu1 %v3789_v35 }
 0x88a   : > { %7632 = vmatprep.subr.bf16.mxu1 %v3790_v16 }
 0x891   : > { %7633 = vmatpush3.bf16.xpose.msra.mxu1 %v3790_v16 }
 0x898   : > { %7635 = vmatmul.mubr.bf16.vlgmr.msra.gmra.mrb[48].mxu1 %v10187_v61  ;;  %v3794_v61 = vld [vmem:[#allocation2 + $0x468] sm:$0xff] }
 0x899   : > { %7638 = vmatprep.mubr.bf16.mxu1 %v10190_v3  ;;  %7656 = vmatprep.subr.bf16.mxu0 %v3794_v61 }
 0x89a   : > { %7657 = vmatpush3.bf16.msra.mxu0 %v3794_v61 }
 0x8a0   : > { %7639 = vmatmul.mubr.bf16.gmra.mrb[52].mxu1 %v10195_v15 }
 0x8a1   : > { %7642 = vmatprep.mubr.bf16.mxu1 %v10198_v32 }
 0x8a8   : > { %7643 = vmatmul.mubr.bf16.gmra.mrb[56].mxu1 %v10203_v22 }
 0x8a9   : > { %7646 = vmatprep.mubr.bf16.mxu1 %v10206_v48 }
 0x8b0   : > { %7647 = vmatmul.mubr.bf16.gmra.mrb[60].mxu1 %v10211_v59 }
 0x92b   : > { %v10494_v3 = vpop.f32.mrb[32].mxu1 }
 0x92c   : > { %v10496_v15 = vpop.f32.mrb[33].mxu1 }
 0x92d   : > { %v10498_v32 = vpop.f32.mrb[34].mxu1 }
 0x92e   : > { %v10500_v22 = vpop.f32.mrb[35].mxu1 }
 0x933   : > { %v10502_v48 = vpop.f32.mrb[36].mxu1 }
 0x934   : > { %v10504_v59 = vpop.f32.mrb[37].mxu1 }
 0x935   : > { %v10506_v16 = vpop.f32.mrb[38].mxu1 }
 0x936   : > { %v10508_v41 = vpop.f32.mrb[39].mxu1 }
 0x93b   : > { %v10510_v10 = vpop.f32.mrb[40].mxu1 }
 0x93c   : > { %v10512_v24 = vpop.f32.mrb[41].mxu1 }
 0x93d   : > { %v10514_v35 = vpop.f32.mrb[42].mxu1 }
 0x93e   : > { %v10516_v17 = vpop.f32.mrb[43].mxu1 }
 0x943   : > { %v10518_v60 = vpop.f32.mrb[44].mxu1 }
 0x944   : > { %v10520_v20 = vpop.f32.mrb[45].mxu1 }
 0x945   : > { %v10522_v61 = vpop.f32.mrb[46].mxu1 }
 0x946   : > { %v10524_v34 = vpop.f32.mrb[47].mxu1 }
 0x96b   : > { %v7636_v18 = vpop.f32.mrb[48].mxu1 }
 0x96c   : > { %v3865_v7 = vpop.f32.mrb[49].mxu1  ;;  %v10535_v56 = vadd.f32 %v7636_v18, %v3817_v27 }
 0x96d   : > { %v10529_v19 = vadd.f32 %v3865_v7, %v3815_v62  ;;  %v7637_v6 = vpop.f32.mrb[50].mxu1  ;;  %v3820_v62 = vunpack.c.h.bf16 %v10290_v51  ;;  %v3823_v51 = vunpack.c.h.bf16 %v10309_v25  ;;  %v3829_v25 = vunpack.c.h.bf16 %v10345_v36 }
 0x96e   : > { %v3868_v21 = vpop.f32.mrb[51].mxu1  ;;  %v10539_v11 = vadd.f32 %v7637_v6, %v3818_v0 }
 0x96f   : > { %v10532_v44 = vadd.f32 %v3868_v21, %v3816_v33  ;;  %3928 = vmax.xlane.f32.xlu0 %v10529_v19  ;;  %v3822_v33 = vunpack.c.h.bf16 %v10297_v53  ;;  %v3824_v53 = vunpack.c.h.bf16 %v10320_v39  ;;  %v3827_v39 = vunpack.c.h.bf16 %v10337_v42 }
 0x971   : > { %3930 = vmax.xlane.f32.xlu1 %v10532_v44 }
 0x973   : > { %v7640_v7 = vpop.f32.mrb[52].mxu1  ;;  %3932 = vmax.xlane.f32.xlu0 %v10535_v56 }
 0x974   : > { %v3881_v50 = vpop.f32.mrb[53].mxu1  ;;  %v10548_v37 = vadd.f32 %v7640_v7, %v3821_v26  ;;  %v3826_v7 = vunpack.c.h.bf16 %v10327_v1  ;;  %v3828_v1 = vunpack.c.h.bf16 %v10348_v2 }
 0x975   : > { %v10544_v21 = vadd.f32 %v3881_v50, %v3819_v38  ;;  %v7641_v27 = vpop.f32.mrb[54].mxu1  ;;  %3934 = vmax.xlane.f32.xlu1 %v10539_v11 }
 0x976   : > { %v3884_v18 = vpop.f32.mrb[55].mxu1  ;;  %v10553_v63 = vadd.f32 %v7641_v27, %v3822_v33 }
 0x977   : > { %v10550_v0 = vadd.f32 %v3884_v18, %v3820_v62  ;;  %3936 = vmax.xlane.f32.xlu0 %v10544_v21 }
 0x979   : > { %3938 = vmax.xlane.f32.xlu1 %v10550_v0 }
 0x97b   : > { %v7644_v6 = vpop.f32.mrb[56].mxu1  ;;  %3940 = vmax.xlane.f32.xlu0 %v10548_v37 }
 0x97c   : > { %v3897_v38 = vpop.f32.mrb[57].mxu1  ;;  %v10564_v33 = vadd.f32 %v7644_v6, %v3825_v30  ;;  %v3795_v30 = vld [vmem:[#allocation2 + $0x4c8] sm:$0xff] }
 0x97d   : > { %v10560_v26 = vadd.f32 %v3897_v38, %v3823_v51  ;;  %v7645_v62 = vpop.f32.mrb[58].mxu1  ;;  %3942 = vmax.xlane.f32.xlu1 %v10553_v63  ;;  %7658 = vmatprep.subr.bf16.mxu0 %v3795_v30 }
 0x97e   : > { %v3900_v50 = vpop.f32.mrb[59].mxu1  ;;  %v10569_v54 = vadd.f32 %v7645_v62, %v3826_v7  ;;  %7659 = vmatpush3.bf16.msra.mxu0 %v3795_v30  ;;  %v3796_v62 = vld [vmem:[#allocation2 + $0x528] sm:$0xff] }
 0x97f   : > { %v10566_v27 = vadd.f32 %v3900_v50, %v3824_v53  ;;  %3944 = vmax.xlane.f32.xlu0 %v10560_v26  ;;  %v3830_v53 = vunpack.c.h.bf16 %v10355_v14  ;;  %7660 = vmatprep.subr.bf16.mxu0 %v3796_v62  ;;  %v3797_v14 = vld [vmem:[#allocation2 + $0x588] sm:$0xff] }
 0x980   : > { %v3798_v50 = vld [vmem:[#allocation2 + $0x5e8] sm:$0xff] }
 0x981   : > { %3946 = vmax.xlane.f32.xlu1 %v10566_v27 }
 0x982   : > { %7661 = vmatpush3.bf16.msra.mxu0 %v3796_v62 }
 0x983   : > { %v7648_v18 = vpop.f32.mrb[60].mxu1  ;;  %3948 = vmax.xlane.f32.xlu0 %v10564_v33  ;;  %7662 = vmatprep.subr.bf16.mxu0 %v3797_v14 }
 0x984   : > { %v3913_v51 = vpop.f32.mrb[61].mxu1  ;;  %v10580_v42 = vadd.f32 %v7648_v18, %v3829_v25 }
 0x985   : > { %v10576_v6 = vadd.f32 %v3913_v51, %v3827_v39  ;;  %v7649_v38 = vpop.f32.mrb[62].mxu1  ;;  %3950 = vmax.xlane.f32.xlu1 %v10569_v54  ;;  %v10590_v39 = vld [vmem:[#allocation2 + $0x30] sm:$0xff] }
 0x986   : > { %v3916_v7 = vpop.f32.mrb[63].mxu1  ;;  %v10585_v2 = vadd.f32 %v7649_v38, %v3830_v53  ;;  %7663 = vmatpush3.bf16.msra.mxu0 %v3797_v14 }
 0x987   : > { %v10582_v36 = vadd.f32 %v3916_v7, %v3828_v1  ;;  %3952 = vmax.xlane.f32.xlu0 %v10576_v6  ;;  %7664 = vmatprep.subr.bf16.mxu0 %v3798_v50 }
 0x989   : > { %3954 = vmax.xlane.f32.xlu1 %v10582_v36 }
 0x98a   : > { %7665 = vmatpush3.bf16.msra.mxu0 %v3798_v50 }
 0x98b   : > { %3956 = vmax.xlane.f32.xlu0 %v10580_v42  ;;  %7682 = vmatprep.subr.bf16.mxu0 %v10590_v39 }
 0x98d   : > { %3958 = vmax.xlane.f32.xlu1 %v10585_v2 }
 0x9fc   : > { %v3929_v25 = vpop.xlane.xlu0 %3928 }
 0x9fd   : > { %v3960_v18 = vmax.f32 %v10374_v45, %v3929_v25 }
 0x9fe   : > { %v3931_v1 = vpop.xlane.xlu1 %3930 }
 0x9ff   : > { %v3976_v51 = vsub.f32 %v10374_v45, %v3960_v18  ;;  %v4024_v30 = vsub.f32 %v10529_v19, %v3960_v18  ;;  %v3961_v53 = vmax.f32 %v10378_v40, %v3931_v1 }
 0xa00   : > { %v3933_v38 = vpop.xlane.xlu0 %3932 }
 0xa01   : > { %v3992_v7 = vmul.f32 1.442695, %v3976_v51  ;;  %v4040_v62 = vmul.f32 1.442695, %v4024_v30  ;;  %v3977_v14 = vsub.f32 %v10378_v40, %v3961_v53  ;;  %v4025_v50 = vsub.f32 %v10532_v44, %v3961_v53 }
 0xa02   : > { %v3962_v13 = vmax.f32 %v10382_v23, %v3933_v38  ;;  %v3935_v52 = vpop.xlane.xlu1 %3934 }
 0xa03   : > { %8408 = vpow2.f32 %v3992_v7  ;;  %v3994_v28 = vmul.f32 1.442695, %v3977_v14  ;;  %v4042_v25 = vmul.f32 1.442695, %v4025_v50  ;;  %v3963_v55 = vmax.f32 %v10386_v49, %v3935_v52 }
 0xa04   : > { %8410 = vpow2.f32 %v4040_v62  ;;  %v3978_v45 = vsub.f32 %v10382_v23, %v3962_v13  ;;  %v4026_v19 = vsub.f32 %v10535_v56, %v3962_v13  ;;  %v3937_v18 = vpop.xlane.xlu0 %3936 }
 0xa05   : > { %8412 = vpow2.f32 %v3994_v28  ;;  %v3979_v1 = vsub.f32 %v10386_v49, %v3963_v55  ;;  %v4027_v40 = vsub.f32 %v10539_v11, %v3963_v55  ;;  %v3964_v44 = vmax.f32 %v10390_v58, %v3937_v18 }
 0xa06   : > { %8414 = vpow2.f32 %v4042_v25  ;;  %v3996_v51 = vmul.f32 1.442695, %v3978_v45  ;;  %v4044_v30 = vmul.f32 1.442695, %v4026_v19  ;;  %v3939_v53 = vpop.xlane.xlu1 %3938 }
 0xa07   : > { %v3998_v38 = vmul.f32 1.442695, %v3979_v1  ;;  %v4046_v7 = vmul.f32 1.442695, %v4027_v40  ;;  %v3980_v52 = vsub.f32 %v10390_v58, %v3964_v44  ;;  %v4028_v23 = vsub.f32 %v10544_v21, %v3964_v44 }
 0xa08   : > { %8416 = vpow2.f32 %v3996_v51  ;;  %v3965_v13 = vmax.f32 %v10394_v46, %v3939_v53  ;;  %v3941_v28 = vpop.xlane.xlu0 %3940 }
 0xa09   : > { %8418 = vpow2.f32 %v4044_v30  ;;  %v4000_v49 = vmul.f32 1.442695, %v3980_v52  ;;  %v4048_v56 = vmul.f32 1.442695, %v4028_v23  ;;  %v3966_v55 = vmax.f32 %v10398_v8, %v3941_v28 }
 0xa0a   : > { %8420 = vpow2.f32 %v3998_v38  ;;  %v3981_v11 = vsub.f32 %v10394_v46, %v3965_v13  ;;  %v4029_v62 = vsub.f32 %v10550_v0, %v3965_v13  ;;  %v3943_v14 = vpop.xlane.xlu1 %3942 }
 0xa0b   : > { %8422 = vpow2.f32 %v4046_v7  ;;  %v3982_v58 = vsub.f32 %v10398_v8, %v3966_v55  ;;  %v4030_v21 = vsub.f32 %v10548_v37, %v3966_v55  ;;  %v3967_v50 = vmax.f32 %v10402_v47, %v3943_v14 }
 0xa0c   : > { %8424 = vpow2.f32 %v4000_v49  ;;  %v4002_v25 = vmul.f32 1.442695, %v3981_v11  ;;  %v4050_v45 = vmul.f32 1.442695, %v4029_v62  ;;  %v3945_v19 = vpop.xlane.xlu0 %3944 }
 0xa0d   : > { %v10615_v18 = vpop.eup %8408  ;;  %8426 = vpow2.f32 %v4048_v56  ;;  %v4004_v1 = vmul.f32 1.442695, %v3982_v58  ;;  %v4052_v40 = vmul.f32 1.442695, %v4030_v21  ;;  %v3983_v46 = vsub.f32 %v10402_v47, %v3967_v50 }
 0xa0e   : > { %12780 = vst [vmem:[#allocation112_spill] sm:$0xff] %v10615_v18  ;;  %v10618_v0 = vpop.eup %8410  ;;  %8428 = vpow2.f32 %v4002_v25  ;;  %v4031_v8 = vsub.f32 %v10553_v63, %v3967_v50  ;;  %v3968_v37 = vmax.f32 %v10408_v29, %v3945_v19  ;;  %v3947_v44 = vpop.xlane.xlu1 %3946  ;;  %v10624_v51 = vmul.f32 %v10615_v18, %v10496_v15 }
 0xa0f   : > { %12781 = vst [vmem:[#allocation113_spill] sm:$0xff] %v10618_v0  ;;  %v10626_v30 = vpop.eup %8412  ;;  %8430 = vpow2.f32 %v4050_v45  ;;  %v4006_v53 = vmul.f32 1.442695, %v3983_v46  ;;  %v3969_v38 = vmax.f32 %v10414_v43, %v3947_v44 }
 0xa10   : > { %12782 = vst [vmem:[#allocation114_spill] sm:$0xff] %v10626_v30  ;;  %v10629_v7 = vpop.eup %8414  ;;  %8432 = vpow2.f32 %v4004_v1  ;;  %v4054_v47 = vmul.f32 1.442695, %v4031_v8  ;;  %v3984_v52 = vsub.f32 %v10408_v29, %v3968_v37  ;;  %v4032_v63 = vsub.f32 %v10560_v26, %v3968_v37  ;;  %v3949_v23 = vpop.xlane.xlu0 %3948 }
 0xa11   : > { %12783 = vst [vmem:[#allocation115_spill] sm:$0xff] %v10629_v7  ;;  %8434 = vpow2.f32 %v4052_v40  ;;  %v3985_v13 = vsub.f32 %v10414_v43, %v3969_v38  ;;  %v4033_v15 = vsub.f32 %v10566_v27, %v3969_v38  ;;  %v3970_v28 = vmax.f32 %v10422_v9, %v3949_v23 }
 0xa12   : > { %v10636_v49 = vpop.eup %8416  ;;  %8436 = vpow2.f32 %v4006_v53  ;;  %v4008_v56 = vmul.f32 1.442695, %v3984_v52  ;;  %v4056_v55 = vmul.f32 1.442695, %v4032_v63  ;;  %v3951_v11 = vpop.xlane.xlu1 %3950  ;;  %v4152_v62 = vpack.c.bf16 %v10629_v7, %v10618_v0 }
 0xa13   : > { %12784 = vst [vmem:[#allocation116_spill] sm:$0xff] %v10636_v49  ;;  %v10640_v29 = vpop.eup %8418  ;;  %8438 = vpow2.f32 %v4054_v47  ;;  %v4010_v26 = vmul.f32 1.442695, %v3985_v13  ;;  %v4058_v14 = vmul.f32 1.442695, %v4033_v15  ;;  %v3986_v43 = vsub.f32 %v10422_v9, %v3970_v28  ;;  %v4330_v15 = vld [vmem:[#allocation2 + $0x90] sm:$0xff] }
 0xa14   : > { %12785 = vst [vmem:[#allocation117_spill] sm:$0xff] %v10640_v29  ;;  %v10643_v58 = vpop.eup %8420  ;;  %8440 = vpow2.f32 %v4008_v56  ;;  %v4034_v27 = vsub.f32 %v10564_v33, %v3970_v28  ;;  %v3971_v21 = vmax.f32 %v10428_v57, %v3951_v11  ;;  %7666 = vmatprep.mubr.bf16.mxu0 %v4152_v62  ;;  %v3953_v50 = vpop.xlane.xlu0 %3952  ;;  %v10649_v25 = vmul.f32 %v10636_v49, %v10494_v3 }
 0xa15   : > { %12786 = vst [vmem:[#allocation118_spill] sm:$0xff] %v10643_v58  ;;  %v10651_v45 = vpop.eup %8422  ;;  %8442 = vpow2.f32 %v4056_v55  ;;  %v4012_v19 = vmul.f32 1.442695, %v3986_v43  ;;  %v3972_v1 = vmax.f32 %v10436_v31, %v3953_v50  ;;  %v10656_v9 = vmul.f32 %v10643_v58, %v10498_v32  ;;  %v4342_v58 = vld [vmem:[#allocation2 + $0x230] sm:$0xff] }
 0xa16   : > { %12787 = vst [vmem:[#allocation119_spill] sm:$0xff] %v10651_v45  ;;  %v10658_v40 = vpop.eup %8424  ;;  %8444 = vpow2.f32 %v4010_v26  ;;  %v4060_v33 = vmul.f32 1.442695, %v4034_v27  ;;  %v3987_v46 = vsub.f32 %v10428_v57, %v3971_v21  ;;  %v4035_v8 = vsub.f32 %v10569_v54, %v3971_v21  ;;  %v3955_v3 = vpop.xlane.xlu1 %3954 }
 0xa17   : > { %12788 = vst [vmem:[#allocation120_spill] sm:$0xff] %v10658_v40  ;;  %v10662_v37 = vpop.eup %8426  ;;  %8446 = vpow2.f32 %v4058_v14  ;;  %v3988_v44 = vsub.f32 %v10436_v31, %v3972_v1  ;;  %v4036_v53 = vsub.f32 %v10576_v6, %v3972_v1  ;;  %v3973_v38 = vmax.f32 %v10442_v12, %v3955_v3 }
 0xa18   : > { %12789 = vst [vmem:[#allocation121_spill] sm:$0xff] %v10662_v37  ;;  %v10667_v32 = vpop.eup %8428  ;;  %8448 = vpow2.f32 %v4012_v19  ;;  %v4014_v47 = vmul.f32 1.442695, %v3987_v46  ;;  %v4062_v52 = vmul.f32 1.442695, %v4035_v8  ;;  %v4153_v57 = vpack.c.bf16 %v10651_v45, %v10640_v29  ;;  %v3957_v63 = vpop.xlane.xlu0 %3956 }
 0xa19   : > { %12790 = vst [vmem:[#allocation122_spill] sm:$0xff] %v10667_v32  ;;  %v10671_v54 = vpop.eup %8430  ;;  %8450 = vpow2.f32 %v4060_v33  ;;  %v4016_v23 = vmul.f32 1.442695, %v3988_v44  ;;  %v4064_v13 = vmul.f32 1.442695, %v4036_v53  ;;  %v3989_v31 = vsub.f32 %v10442_v12, %v3973_v38 }
 0xa1a   : > { %12791 = vst [vmem:[#allocation123_spill] sm:$0xff] %v10671_v54  ;;  %v10674_v6 = vpop.eup %8432  ;;  %8452 = vpow2.f32 %v4014_v47  ;;  %v4037_v28 = vsub.f32 %v10582_v36, %v3973_v38  ;;  %7667 = vmatmul.mubr.bf16.vlgmr.msra.gmra.mrb[48].mxu0 %v4153_v57  ;;  %v3974_v56 = vmax.f32 %v10450_v5, %v3957_v63  ;;  %v3959_v55 = vpop.xlane.xlu1 %3958  ;;  %v4154_v11 = vpack.c.bf16 %v10671_v54, %v10662_v37 }
 0xa1b   : > { %12792 = vst [vmem:[#allocation124_spill] sm:$0xff] %v10674_v6  ;;  %v10680_v62 = vpop.eup %8434  ;;  %8454 = vpow2.f32 %v4062_v52  ;;  %v4018_v26 = vmul.f32 1.442695, %v3989_v31  ;;  %7683 = vmatpush3.bf16.xpose.msra.mxu0 %v10590_v39  ;;  %v3975_v12 = vmax.f32 %v10456_v4, %v3959_v55  ;;  %v10686_v14 = vmul.f32 %v10626_v30, %v10500_v22 }
 0xa1c   : > { %12793 = vst [vmem:[#allocation125_spill] sm:$0xff] %v10680_v62  ;;  %v10688_v36 = vpop.eup %8436  ;;  %8456 = vpow2.f32 %v4016_v23  ;;  %v4066_v43 = vmul.f32 1.442695, %v4037_v28  ;;  %v3990_v27 = vsub.f32 %v10450_v5, %v3974_v56  ;;  %v4038_v21 = vsub.f32 %v10580_v42, %v3974_v56  ;;  %7670 = vmatprep.mubr.bf16.mxu0 %v4154_v11  ;;  %7684 = vmatprep.subr.bf16.mxu0 %v4330_v15  ;;  %v4332_v56 = vld [vmem:[#allocation2 + $0x150] sm:$0xff] }
 0xa1d   : > { %12794 = vst [vmem:[#allocation126_spill] sm:$0xff] %v10688_v36  ;;  %v10692_v50 = vpop.eup %8438  ;;  %8458 = vpow2.f32 %v4064_v13  ;;  %v3991_v39 = vsub.f32 %v10456_v4, %v3975_v12  ;;  %v4039_v19 = vsub.f32 %v10585_v2, %v3975_v12  ;;  %v10698_v22 = vmul.f32 %v10674_v6, %v10502_v48 }
 0xa1e   : > { %12795 = vst [vmem:[#allocation127_spill] sm:$0xff] %v10692_v50  ;;  %v10700_v1 = vpop.eup %8440  ;;  %8460 = vpow2.f32 %v4018_v26  ;;  %v4020_v33 = vmul.f32 1.442695, %v3990_v27  ;;  %v4068_v5 = vmul.f32 1.442695, %v4038_v21  ;;  %v4155_v42 = vpack.c.bf16 %v10692_v50, %v10680_v62  ;;  %v10787_v21 = vld [vmem:[%s9624_s25 + $0x10] sm:$0xff] }
 0xa1f   : > { %12796 = vst [vmem:[#allocation128_spill] sm:$0xff] %v10700_v1  ;;  %v10704_v46 = vpop.eup %8442  ;;  %8462 = vpow2.f32 %v4066_v43  ;;  %v4022_v8 = vmul.f32 1.442695, %v3991_v39  ;;  %v4070_v3 = vmul.f32 1.442695, %v4039_v19  ;;  %v10708_v4 = vmul.f32 %v10658_v40, %v10504_v59  ;;  %v4331_v59 = vld [vmem:[#allocation2 + $0xf0] sm:$0xff] }
 0xa20   : > { %12797 = vst [vmem:[#allocation129_spill] sm:$0xff] %v10704_v46  ;;  %v10710_v2 = vpop.eup %8444  ;;  %8464 = vpow2.f32 %v4020_v33  ;;  %v10714_v48 = vmul.f32 %v10688_v36, %v10506_v16  ;;  %v10718_v44 = vmul.f32 %v10667_v32, %v10508_v41  ;;  %v10722_v53 = vmul.f32 %v10700_v1, %v10512_v24  ;;  %v4333_v39 = vld [vmem:[#allocation2 + $0x1b0] sm:$0xff]  ;;  %v10931_v36 = vld [vmem:[%s9355_s17 + $0x158] sm:$0xff]   ;;  %v10952_v40 = vld [vmem:[%s9355_s17 + $0x168] sm:$0xff]  }
 0xa21   : > { %12798 = vst [vmem:[#allocation130_spill] sm:$0xff] %v10710_v2  ;;  %v10724_v38 = vpop.eup %8446  ;;  %8466 = vpow2.f32 %v4068_v5  ;;  %v10728_v47 = vmul.f32 %v10710_v2, %v10516_v17  ;;  %v4336_v19 = vld [vmem:[#allocation2 + $0x2d0] sm:$0xff] }
 0xa22   : > { %12799 = vst [vmem:[#allocation131_spill] sm:$0xff] %v10724_v38  ;;  %v10730_v52 = vpop.eup %8448  ;;  %8468 = vpow2.f32 %v4022_v8  ;;  %7671 = vmatmul.mubr.bf16.gmra.mrb[52].mxu0 %v4155_v42  ;;  %v4156_v16 = vpack.c.bf16 %v10724_v38, %v10704_v46  ;;  %v10791_v33 = vld [vmem:[%s9624_s25 + $0x70] sm:$0xff] }
 0xa23   : > { %12800 = vst [vmem:[#allocation132_spill] sm:$0xff] %v10730_v52  ;;  %v10734_v41 = vpop.eup %8450  ;;  %8470 = vpow2.f32 %v4070_v3  ;;  %7685 = vmatpush3.bf16.xpose.msra.mxu0 %v4330_v15  ;;  %v10738_v24 = vmul.f32 %v10730_v52, %v10510_v10  ;;  %v10794_v5 = vld [vmem:[%s9624_s25 + $0xd0] sm:$0xff] }
 0xa24   : > { %12801 = vst [vmem:[#allocation133_spill] sm:$0xff] %v10734_v41  ;;  %v10740_v57 = vpop.eup %8452  ;;  %7674 = vmatprep.mubr.bf16.mxu0 %v4156_v16  ;;  %7686 = vmatprep.subr.bf16.mxu0 %v4331_v59  ;;  %v10799_v42 = vld [vmem:[%s9624_s25 + $0x130] sm:$0xff] }
 0xa25   : > { %12802 = vst [vmem:[#allocation134_spill] sm:$0xff] %v10740_v57  ;;  %v10742_v17 = vpop.eup %8454  ;;  %v10746_v63 = vmul.f32 %v10740_v57, %v10514_v35  ;;  %v10802_v8 = vld [vmem:[%s9624_s25 + $0x190] sm:$0xff] }
 0xa26   : > { %12803 = vst [vmem:[#allocation135_spill] sm:$0xff] %v10742_v17  ;;  %v10748_v23 = vpop.eup %8456  ;;  %v4157_v13 = vpack.c.bf16 %v10742_v17, %v10734_v41  ;;  %v10807_v3 = vld [vmem:[%s9624_s25 + $0x1f0] sm:$0xff] }
 0xa27   : > { %12804 = vst [vmem:[#allocation136_spill] sm:$0xff] %v10748_v23  ;;  %v10752_v31 = vpop.eup %8458  ;;  %v10756_v10 = vmul.f32 %v10748_v23, %v10520_v20  ;;  %v10815_v16 = vld [vmem:[%s9624_s25 + $0x2b0] sm:$0xff] }
 0xa28   : > { %12805 = vst [vmem:[#allocation137_spill] sm:$0xff] %v10752_v31  ;;  %v10758_v15 = vpop.eup %8460  ;;  %v10891_v23 = vld [vmem:[%s9355_s17 + $0x130] sm:$0xff]  }
 0xa29   : > { %12806 = vst [vmem:[#allocation138_spill] sm:$0xff] %v10758_v15  ;;  %v10760_v28 = vpop.eup %8462  ;;  %v10764_v35 = vmul.f32 %v10758_v15, %v10524_v34  ;;  %v10949_v32 = vld [vmem:[%s9355_s17 + $0x170] sm:$0xff]  }
 0xa2a   : > { %12807 = vst [vmem:[#allocation139_spill] sm:$0xff] %v10760_v28  ;;  %v10766_v55 = vpop.eup %8464  ;;  %7675 = vmatmul.mubr.bf16.gmra.mrb[56].mxu0 %v4157_v13  ;;  %v4158_v11 = vpack.c.bf16 %v10760_v28, %v10752_v31  ;;  %v4337_v13 = vld [vmem:[#allocation2 + $0x50] sm:$0xff] }
 0xa2b   : > { %12808 = vst [vmem:[#allocation140_spill] sm:$0xff] %v10766_v55  ;;  %v10770_v26 = vpop.eup %8466  ;;  %7687 = vmatpush3.bf16.xpose.msra.mxu0 %v4331_v59  ;;  %v10774_v20 = vmul.f32 %v10766_v55, %v10518_v60  ;;  %v4334_v60 = vld [vmem:[#allocation2 + $0x210] sm:$0xff]  ;;  %7714 = vmatprep.subr.bf16.mxu1 %v4337_v13 }
 0xa2c   : > { %12809 = vst [vmem:[#allocation141_spill] sm:$0xff] %v10770_v26  ;;  %v10776_v12 = vpop.eup %8468  ;;  %7678 = vmatprep.mubr.bf16.mxu0 %v4158_v11  ;;  %7688 = vmatprep.subr.bf16.mxu0 %v4332_v56  ;;  %v10810_v59 = vld [vmem:[%s9624_s25 + $0x250] sm:$0xff] }
 0xa2d   : > { %12810 = vst [vmem:[#allocation142_spill] sm:$0xff] %v10776_v12  ;;  %v10778_v43 = vpop.eup %8470  ;;  %v10782_v34 = vmul.f32 %v10776_v12, %v10522_v61  ;;  %v4335_v61 = vld [vmem:[#allocation2 + $0x270] sm:$0xff]  ;;  %7715 = vmatpush3.bf16.msra.mxu1 %v4337_v13 }
 0xa2e   : > { %12811 = vst [vmem:[#allocation143_spill] sm:$0xff] %v10778_v43  ;;  %v4159_v27 = vpack.c.bf16 %v10778_v43, %v10770_v26  ;;  %v4339_v11 = vld [vmem:[#allocation2 + $0x110] sm:$0xff]  ;;  %v10941_v26 = vld [vmem:[%s9355_s17 + $0x160] sm:$0xff]  }
 0xa32   : > { %7679 = vmatmul.mubr.bf16.gmra.mrb[60].mxu0 %v4159_v27  ;;  %v4340_v27 = vld [vmem:[#allocation2 + $0x170] sm:$0xff] }
 0xa33   : > { %7689 = vmatpush3.bf16.xpose.msra.mxu0 %v4332_v56  ;;  %7698 = vmatprep.mubr.bf16.mxu0 %v10787_v21  ;;  %v4338_v56 = vld [vmem:[#allocation2 + $0xb0] sm:$0xff] }
 0xa34   : > { %7690 = vmatprep.subr.bf16.mxu0 %v4333_v39  ;;  %7716 = vmatprep.subr.bf16.mxu1 %v4338_v56 }
 0xa35   : > { %7717 = vmatpush3.bf16.msra.mxu1 %v4338_v56 }
 0xa36   : > { %7718 = vmatprep.subr.bf16.mxu1 %v4339_v11 }
 0xa39   : > { %7719 = vmatpush3.bf16.msra.mxu1 %v4339_v11 }
 0xa3a   : > { %7720 = vmatprep.subr.bf16.mxu1 %v4340_v27 }
 0xa3b   : > { %7691 = vmatpush3.bf16.xpose.msra.mxu0 %v4333_v39 }
 0xa3c   : > { %7692 = vmatprep.subr.bf16.mxu0 %v4334_v60 }
 0xa3d   : > { %7721 = vmatpush3.bf16.msra.mxu1 %v4340_v27 }
 0xa43   : > { %7693 = vmatpush3.bf16.xpose.msra.mxu0 %v4334_v60 }
 0xa44   : > { %7694 = vmatprep.subr.bf16.mxu0 %v4335_v61 }
 0xa4b   : > { %7695 = vmatpush3.bf16.xpose.msra.mxu0 %v4335_v61 }
 0xa4c   : > { %7696 = vmatprep.subr.bf16.mxu0 %v4336_v19 }
 0xa53   : > { %7697 = vmatpush3.bf16.xpose.msra.mxu0 %v4336_v19 }
 0xa5a   : > { %7699 = vmatmul.mubr.bf16.vlgmr.msra.gmra.mrb[64].mxu0 %v10791_v33 }
 0xa5b   : > { %7702 = vmatprep.mubr.bf16.mxu0 %v10794_v5 }
 0xa62   : > { %7703 = vmatmul.mubr.bf16.gmra.mrb[68].mxu0 %v10799_v42 }
 0xa63   : > { %7706 = vmatprep.mubr.bf16.mxu0 %v10802_v8 }
 0xa6a   : > { %7707 = vmatmul.mubr.bf16.gmra.mrb[72].mxu0 %v10807_v3 }
 0xa6b   : > { %7710 = vmatprep.mubr.bf16.mxu0 %v10810_v59 }
 0xa72   : > { %7711 = vmatmul.mubr.bf16.gmra.mrb[76].mxu0 %v10815_v16 }
 0xaed   : > { %v7668_v39 = vpop.f32.mrb[48].mxu0 }
 0xaee   : > { %v10819_v60 = vadd.f32 %v7668_v39, %v10649_v25  ;;  %v4194_v61 = vpop.f32.mrb[49].mxu0 }
 0xaef   : > { %v10822_v19 = vadd.f32 %v4194_v61, %v10624_v51  ;;  %v7669_v12 = vpop.f32.mrb[50].mxu0 }
 0xaf0   : > { %12812 = vst [vmem:[#allocation144_spill] sm:$0xff] %v10819_v60  ;;  %v10825_v55 = vadd.f32 %v7669_v12, %v10656_v9  ;;  %v4197_v13 = vpop.f32.mrb[51].mxu0  ;;  %v10959_v60 = vld [vmem:[%s9355_s17 + $0x178] sm:$0xff]  }
 0xaf1   : > { %12813 = vst [vmem:[#allocation145_spill] sm:$0xff] %v10822_v19  ;;  %v10828_v56 = vadd.f32 %v4197_v13, %v10686_v14 }
 0xaf2   : > { %12814 = vst [vmem:[#allocation146_spill] sm:$0xff] %v10825_v55  ;;  %v4341_v55 = vld [vmem:[#allocation2 + $0x1d0] sm:$0xff] }
 0xaf3   : > { %12815 = vst [vmem:[#allocation147_spill] sm:$0xff] %v10828_v56  ;;  %7722 = vmatprep.subr.bf16.mxu1 %v4341_v55 }
 0xaf4   : > { %7723 = vmatpush3.bf16.msra.mxu1 %v4341_v55  ;;  %v4343_v55 = vld [vmem:[#allocation2 + $0x290] sm:$0xff] }
 0xaf5   : > { %v7672_v15 = vpop.f32.mrb[52].mxu0  ;;  %7724 = vmatprep.subr.bf16.mxu1 %v4342_v58 }
 0xaf6   : > { %v10831_v11 = vadd.f32 %v7672_v15, %v10698_v22  ;;  %v4210_v27 = vpop.f32.mrb[53].mxu0 }
 0xaf7   : > { %v10834_v25 = vadd.f32 %v4210_v27, %v10708_v4  ;;  %v7673_v39 = vpop.f32.mrb[54].mxu0 }
 0xaf8   : > { %12816 = vst [vmem:[#allocation148_spill] sm:$0xff] %v10831_v11  ;;  %v10837_v51 = vadd.f32 %v7673_v39, %v10714_v48  ;;  %v4213_v61 = vpop.f32.mrb[55].mxu0  ;;  %v10924_v11 = vld [vmem:[%s9355_s17 + $0x148] sm:$0xff]   ;;  %7725 = vmatpush3.bf16.msra.mxu1 %v4342_v58 }
 0xaf9   : > { %12817 = vst [vmem:[#allocation149_spill] sm:$0xff] %v10834_v25  ;;  %v10840_v9 = vadd.f32 %v4213_v61, %v10718_v44  ;;  %7726 = vmatprep.subr.bf16.mxu1 %v4343_v55 }
 0xafa   : > { %12818 = vst [vmem:[#allocation150_spill] sm:$0xff] %v10837_v51  ;;  %v10921_v51 = vld [vmem:[%s9355_s17 + $0x150] sm:$0xff]  }
 0xafb   : > { %12819 = vst [vmem:[#allocation151_spill] sm:$0xff] %v10840_v9 }
 0xafc   : > { %7727 = vmatpush3.bf16.msra.mxu1 %v4343_v55 }
 0xafd   : > { %v7676_v12 = vpop.f32.mrb[56].mxu0 }
 0xafe   : > { %v10843_v14 = vadd.f32 %v7676_v12, %v10738_v24  ;;  %v4226_v22 = vpop.f32.mrb[57].mxu0 }
 0xaff   : > { %v10846_v15 = vadd.f32 %v4226_v22, %v10722_v53  ;;  %v7677_v4 = vpop.f32.mrb[58].mxu0 }
 0xb00   : > { %12820 = vst [vmem:[#allocation152_spill] sm:$0xff] %v10843_v14  ;;  %v10849_v13 = vadd.f32 %v7677_v4, %v10746_v63  ;;  %v4229_v48 = vpop.f32.mrb[59].mxu0  ;;  %v10870_v4 = vld [vmem:[%s9355_s17 + $0x108] sm:$0xff]  }
 0xb01   : > { %12821 = vst [vmem:[#allocation153_spill] sm:$0xff] %v10846_v15  ;;  %v10852_v27 = vadd.f32 %v4229_v48, %v10728_v47  ;;  %v10867_v47 = vld [vmem:[%s9355_s17 + $0x100] sm:$0xff]   ;;  %v10874_v48 = vld [vmem:[%s9355_s17 + $0x110] sm:$0xff]  }
 0xb02   : > { %12822 = vst [vmem:[#allocation154_spill] sm:$0xff] %v10849_v13  ;;  %v10894_v13 = vld [vmem:[%s9355_s17 + $0x128] sm:$0xff]  }
 0xb03   : > { %12823 = vst [vmem:[#allocation155_spill] sm:$0xff] %v10852_v27  ;;  %v4367_v52 = vunpack.c.l.bf16 %v10894_v13 }
 0xb05   : > { %v7680_v44 = vpop.f32.mrb[60].mxu0 }
 0xb06   : > { %v10855_v39 = vadd.f32 %v7680_v44, %v10774_v20  ;;  %v4242_v24 = vpop.f32.mrb[61].mxu0  ;;  %v4362_v20 = vunpack.c.l.bf16 %v10867_v47  ;;  %v4363_v44 = vunpack.c.l.bf16 %v10870_v4 }
 0xb07   : > { %v10858_v61 = vadd.f32 %v4242_v24, %v10756_v10  ;;  %v7681_v53 = vpop.f32.mrb[62].mxu0  ;;  %v10878_v24 = vld [vmem:[%s9355_s17 + $0x118] sm:$0xff]  }
 0xb08   : > { %12824 = vst [vmem:[#allocation156_spill] sm:$0xff] %v10855_v39  ;;  %v10861_v12 = vadd.f32 %v7681_v53, %v10782_v34  ;;  %v4245_v63 = vpop.f32.mrb[63].mxu0  ;;  %v10884_v39 = vld [vmem:[%s9355_s17 + $0x120] sm:$0xff]   ;;  %v4727_v45 = vunpack.c.h.bf16 %v10878_v24 }
 0xb09   : > { %12825 = vst [vmem:[#allocation157_spill] sm:$0xff] %v10858_v61  ;;  %v10864_v22 = vadd.f32 %v4245_v63, %v10764_v35  ;;  %v4364_v35 = vunpack.c.l.bf16 %v10874_v48 }
 0xb0a   : > { %12826 = vst [vmem:[#allocation158_spill] sm:$0xff] %v10861_v12 }
 0xb0b   : > { %12827 = vst [vmem:[#allocation159_spill] sm:$0xff] %v10864_v22  ;;  %v4365_v22 = vunpack.c.l.bf16 %v10878_v24 }
 0xb2d   : > { %v7700_v10 = vpop.f32.mrb[64].mxu0 }
 0xb2e   : > { %v4412_v34 = vpop.f32.mrb[65].mxu0  ;;  %v10896_v14 = vadd.f32 %v7700_v10, %v4364_v35 }
 0xb2f   : > { %v10881_v53 = vadd.f32 %v4412_v34, %v4362_v20  ;;  %v7701_v63 = vpop.f32.mrb[66].mxu0  ;;  %v4366_v20 = vunpack.c.l.bf16 %v10884_v39  ;;  %v10901_v34 = vld [vmem:[%s9355_s17 + $0x138] sm:$0xff]  }
 0xb30   : > { %v4415_v12 = vpop.f32.mrb[67].mxu0  ;;  %v10903_v57 = vadd.f32 %v7701_v63, %v4365_v22  ;;  %v4369_v27 = vunpack.c.l.bf16 %v10901_v34  ;;  %v10913_v22 = vld [vmem:[%s9355_s17 + $0x140] sm:$0xff]  }
 0xb31   : > { %v10887_v61 = vadd.f32 %v4415_v12, %v4363_v44  ;;  %4475 = vmax.xlane.f32.xlu0 %v10881_v53  ;;  %v4368_v12 = vunpack.c.l.bf16 %v10891_v23 }
 0xb33   : > { %4477 = vmax.xlane.f32.xlu1 %v10887_v61 }
 0xb35   : > { %v7704_v44 = vpop.f32.mrb[68].mxu0  ;;  %4479 = vmax.xlane.f32.xlu0 %v10896_v14 }
 0xb36   : > { %v4428_v10 = vpop.f32.mrb[69].mxu0  ;;  %v10915_v63 = vadd.f32 %v7704_v44, %v4368_v12  ;;  %v4371_v12 = vunpack.c.l.bf16 %v10924_v11 }
 0xb37   : > { %v10908_v35 = vadd.f32 %v4428_v10, %v4366_v20  ;;  %v7705_v15 = vpop.f32.mrb[70].mxu0  ;;  %4481 = vmax.xlane.f32.xlu1 %v10903_v57  ;;  %v4370_v10 = vunpack.c.l.bf16 %v10913_v22 }
 0xb38   : > { %v4431_v2 = vpop.f32.mrb[71].mxu0  ;;  %v10926_v20 = vadd.f32 %v7705_v15, %v4369_v27  ;;  %v4373_v15 = vunpack.c.l.bf16 %v10931_v36 }
 0xb39   : > { %v10917_v1 = vadd.f32 %v4431_v2, %v4367_v52  ;;  %4483 = vmax.xlane.f32.xlu0 %v10908_v35  ;;  %v4372_v2 = vunpack.c.l.bf16 %v10921_v51 }
 0xb3b   : > { %4485 = vmax.xlane.f32.xlu1 %v10917_v1 }
 0xb3d   : > { %v7708_v52 = vpop.f32.mrb[72].mxu0  ;;  %4487 = vmax.xlane.f32.xlu0 %v10915_v63 }
 0xb3e   : > { %v4444_v44 = vpop.f32.mrb[73].mxu0  ;;  %v10943_v9 = vadd.f32 %v7708_v52, %v4372_v2  ;;  %v4376_v2 = vunpack.c.l.bf16 %v10949_v32  ;;  %v4375_v52 = vunpack.c.l.bf16 %v10952_v40 }
 0xb3f   : > { %v10936_v6 = vadd.f32 %v4444_v44, %v4370_v10  ;;  %v7709_v27 = vpop.f32.mrb[74].mxu0  ;;  %4489 = vmax.xlane.f32.xlu1 %v10926_v20  ;;  %v4374_v44 = vunpack.c.l.bf16 %v10941_v26 }
 0xb40   : > { %v4447_v43 = vpop.f32.mrb[75].mxu0  ;;  %v10954_v10 = vadd.f32 %v7709_v27, %v4373_v15  ;;  %v4377_v15 = vunpack.c.l.bf16 %v10959_v60 }
 0xb41   : > { %v10945_v25 = vadd.f32 %v4447_v43, %v4371_v12  ;;  %4491 = vmax.xlane.f32.xlu0 %v10936_v6 }
 0xb43   : > { %4493 = vmax.xlane.f32.xlu1 %v10945_v25 }
 0xb45   : > { %v7712_v43 = vpop.f32.mrb[76].mxu0  ;;  %4495 = vmax.xlane.f32.xlu0 %v10943_v9 }
 0xb46   : > { %v4460_v12 = vpop.f32.mrb[77].mxu0  ;;  %v10968_v49 = vadd.f32 %v7712_v43, %v4376_v2  ;;  %v4692_v2 = vld [vmem:[#allocation2 + $0x330] sm:$0xff] }
 0xb47   : > { %v10964_v28 = vadd.f32 %v4460_v12, %v4374_v44  ;;  %v7713_v27 = vpop.f32.mrb[78].mxu0  ;;  %4497 = vmax.xlane.f32.xlu1 %v10954_v10  ;;  %v4344_v44 = vld [vmem:[#allocation2 + $0x2f0] sm:$0xff] }
 0xb48   : > { %v4463_v31 = vpop.f32.mrb[79].mxu0  ;;  %v10973_v19 = vadd.f32 %v7713_v27, %v4377_v15  ;;  %7728 = vmatprep.subr.bf16.mxu1 %v4344_v44 }
 0xb49   : > { %v10970_v56 = vadd.f32 %v4463_v31, %v4375_v52  ;;  %4499 = vmax.xlane.f32.xlu0 %v10964_v28  ;;  %7729 = vmatpush3.bf16.msra.mxu1 %v4344_v44 }
 0xb4a   : > { %7746 = vmatprep.subr.bf16.mxu1 %v4692_v2 }
 0xb4b   : > { %4501 = vmax.xlane.f32.xlu1 %v10970_v56 }
 0xb4d   : > { %4503 = vmax.xlane.f32.xlu0 %v10968_v49 }
 0xb4f   : > { %4505 = vmax.xlane.f32.xlu1 %v10973_v19 }
 0xbbe   : > { %v10978_v31 = vpop.xlane.xlu0 %4475 }
 0xbbf   : > { %v4507_v58 = vsub.f32 %v10881_v53, %v10978_v31 }
 0xbc0   : > { %v10982_v43 = vpop.xlane.xlu1 %4477 }
 0xbc1   : > { %v4523_v52 = vmul.f32 1.442695, %v4507_v58  ;;  %v4508_v12 = vsub.f32 %v10887_v61, %v10982_v43 }
 0xbc2   : > { %v10986_v15 = vpop.xlane.xlu0 %4479 }
 0xbc3   : > { %v4525_v27 = vmul.f32 1.442695, %v4508_v12  ;;  %v4509_v55 = vsub.f32 %v10896_v14, %v10986_v15  ;;  %8472 = vpow2.f32 %v4523_v52 }
 0xbc4   : > { %v10990_v44 = vpop.xlane.xlu1 %4481 }
 0xbc5   : > { %8474 = vpow2.f32 %v4525_v27  ;;  %v4527_v17 = vmul.f32 1.442695, %v4509_v55  ;;  %v4510_v53 = vsub.f32 %v10903_v57, %v10990_v44 }
 0xbc6   : > { %v10994_v41 = vpop.xlane.xlu0 %4483 }
 0xbc7   : > { %v4529_v58 = vmul.f32 1.442695, %v4510_v53  ;;  %v4511_v61 = vsub.f32 %v10908_v35, %v10994_v41  ;;  %8476 = vpow2.f32 %v4527_v17 }
 0xbc8   : > { %v10998_v30 = vpop.xlane.xlu1 %4485 }
 0xbc9   : > { %8478 = vpow2.f32 %v4529_v58  ;;  %v4531_v12 = vmul.f32 1.442695, %v4511_v61  ;;  %v4512_v14 = vsub.f32 %v10917_v1, %v10998_v30 }
 0xbca   : > { %v11002_v52 = vpop.xlane.xlu0 %4487 }
 0xbcb   : > { %v4533_v27 = vmul.f32 1.442695, %v4512_v14  ;;  %v4513_v57 = vsub.f32 %v10915_v63, %v11002_v52  ;;  %8480 = vpow2.f32 %v4531_v12 }
 0xbcc   : > { %v11006_v55 = vpop.xlane.xlu1 %4489 }
 0xbcd   : > { %8482 = vpow2.f32 %v4533_v27  ;;  %v4535_v53 = vmul.f32 1.442695, %v4513_v57  ;;  %v4514_v17 = vsub.f32 %v10926_v20, %v11006_v55  ;;  %v11010_v35 = vpop.eup %8472 }
 0xbce   : > { %12828 = vst [vmem:[#allocation160_spill] sm:$0xff] %v11010_v35  ;;  %v11012_v58 = vpop.xlane.xlu0 %4491 }
 0xbcf   : > { %v11014_v61 = vpop.eup %8474  ;;  %v4537_v1 = vmul.f32 1.442695, %v4514_v17  ;;  %v4515_v14 = vsub.f32 %v10936_v6, %v11012_v58  ;;  %8484 = vpow2.f32 %v4535_v53 }
 0xbd0   : > { %12829 = vst [vmem:[#allocation161_spill] sm:$0xff] %v11014_v61  ;;  %v11018_v63 = vpop.xlane.xlu1 %4493  ;;  %v4587_v12 = vpack.c.bf16 %v11014_v61, %v11010_v35 }
 0xbd1   : > { %8486 = vpow2.f32 %v4537_v1  ;;  %v4539_v27 = vmul.f32 1.442695, %v4515_v14  ;;  %v4516_v20 = vsub.f32 %v10945_v25, %v11018_v63  ;;  %v11024_v57 = vpop.eup %8476 }
 0xbd2   : > { %12830 = vst [vmem:[#allocation162_spill] sm:$0xff] %v11024_v57  ;;  %7730 = vmatprep.mubr.bf16.mxu1 %v4587_v12  ;;  %v11026_v18 = vpop.xlane.xlu0 %4495  ;;  %v4693_v12 = vld [vmem:[#allocation2 + $0x390] sm:$0xff] }
 0xbd3   : > { %v11028_v17 = vpop.eup %8478  ;;  %v4541_v38 = vmul.f32 1.442695, %v4516_v20  ;;  %v4517_v6 = vsub.f32 %v10943_v9, %v11026_v18  ;;  %8488 = vpow2.f32 %v4539_v27 }
 0xbd4   : > { %12831 = vst [vmem:[#allocation163_spill] sm:$0xff] %v11028_v17  ;;  %v11032_v53 = vpop.xlane.xlu1 %4497  ;;  %v4588_v1 = vpack.c.bf16 %v11028_v17, %v11024_v57 }
 0xbd5   : > { %8490 = vpow2.f32 %v4541_v38  ;;  %v4543_v14 = vmul.f32 1.442695, %v4517_v6  ;;  %v4518_v25 = vsub.f32 %v10954_v10, %v11032_v53  ;;  %v11038_v46 = vpop.eup %8480 }
 0xbd6   : > { %12832 = vst [vmem:[#allocation164_spill] sm:$0xff] %v11038_v46  ;;  %7731 = vmatmul.mubr.bf16.vlgmr.msra.gmra.mrb[64].mxu1 %v4588_v1  ;;  %v11040_v50 = vpop.xlane.xlu0 %4499 }
 0xbd7   : > { %v11042_v20 = vpop.eup %8482  ;;  %v4545_v9 = vmul.f32 1.442695, %v4518_v25  ;;  %7747 = vmatpush3.bf16.xpose.msra.mxu1 %v4692_v2  ;;  %v4519_v27 = vsub.f32 %v10964_v28, %v11040_v50  ;;  %8492 = vpow2.f32 %v4543_v14 }
 0xbd8   : > { %12833 = vst [vmem:[#allocation165_spill] sm:$0xff] %v11042_v20  ;;  %v11046_v62 = vpop.xlane.xlu1 %4501  ;;  %v4589_v38 = vpack.c.bf16 %v11042_v20, %v11038_v46  ;;  %7748 = vmatprep.subr.bf16.mxu1 %v4693_v12 }
 0xbd9   : > { %8494 = vpow2.f32 %v4545_v9  ;;  %v4547_v10 = vmul.f32 1.442695, %v4519_v27  ;;  %v4520_v6 = vsub.f32 %v10970_v56, %v11046_v62  ;;  %v11052_v1 = vpop.eup %8484 }
 0xbda   : > { %12834 = vst [vmem:[#allocation166_spill] sm:$0xff] %v11052_v1  ;;  %7734 = vmatprep.mubr.bf16.mxu1 %v4589_v38  ;;  %v11054_v25 = vpop.xlane.xlu0 %4503  ;;  %v4694_v38 = vld [vmem:[#allocation2 + $0x3f0] sm:$0xff] }
 0xbdb   : > { %v11056_v2 = vpop.eup %8486  ;;  %v4549_v28 = vmul.f32 1.442695, %v4520_v6  ;;  %v4521_v14 = vsub.f32 %v10968_v49, %v11054_v25  ;;  %8496 = vpow2.f32 %v4547_v10 }
 0xbdc   : > { %12835 = vst [vmem:[#allocation167_spill] sm:$0xff] %v11056_v2  ;;  %v11060_v54 = vpop.xlane.xlu1 %4505  ;;  %v4590_v9 = vpack.c.bf16 %v11056_v2, %v11052_v1 }
 0xbdd   : > { %8498 = vpow2.f32 %v4549_v28  ;;  %v4551_v27 = vmul.f32 1.442695, %v4521_v14  ;;  %v4522_v56 = vsub.f32 %v10973_v19, %v11060_v54  ;;  %v11066_v37 = vpop.eup %8488  ;;  %v4695_v14 = vld [vmem:[#allocation2 + $0x450] sm:$0xff] }
 0xbde   : > { %12836 = vst [vmem:[#allocation168_spill] sm:$0xff] %v11066_v37  ;;  %7735 = vmatmul.mubr.bf16.gmra.mrb[68].mxu1 %v4590_v9 }
 0xbdf   : > { %v11068_v20 = vpop.eup %8490  ;;  %v4553_v6 = vmul.f32 1.442695, %v4522_v56  ;;  %7749 = vmatpush3.bf16.xpose.msra.mxu1 %v4693_v12  ;;  %8500 = vpow2.f32 %v4551_v27 }
 0xbe0   : > { %12837 = vst [vmem:[#allocation169_spill] sm:$0xff] %v11068_v20  ;;  %v4591_v49 = vpack.c.bf16 %v11068_v20, %v11066_v37  ;;  %7750 = vmatprep.subr.bf16.mxu1 %v4694_v38  ;;  %v4726_v37 = vunpack.c.h.bf16 %v10874_v48  ;;  %v4730_v48 = vunpack.c.h.bf16 %v10891_v23 }
 0xbe1   : > { %8502 = vpow2.f32 %v4553_v6  ;;  %v11072_v10 = vpop.eup %8492 }
 0xbe2   : > { %12838 = vst [vmem:[#allocation170_spill] sm:$0xff] %v11072_v10  ;;  %7738 = vmatprep.mubr.bf16.mxu1 %v4591_v49 }
 0xbe3   : > { %v11074_v28 = vpop.eup %8494 }
 0xbe4   : > { %12839 = vst [vmem:[#allocation171_spill] sm:$0xff] %v11074_v28  ;;  %v4592_v19 = vpack.c.bf16 %v11074_v28, %v11072_v10  ;;  %v4696_v28 = vld [vmem:[#allocation2 + $0x4b0] sm:$0xff]  ;;  %v4725_v10 = vunpack.c.h.bf16 %v10870_v4 }
 0xbe5   : > { %v11078_v9 = vpop.eup %8496 }
 0xbe6   : > { %12840 = vst [vmem:[#allocation172_spill] sm:$0xff] %v11078_v9  ;;  %7739 = vmatmul.mubr.bf16.gmra.mrb[72].mxu1 %v4592_v19  ;;  %v4697_v19 = vld [vmem:[#allocation2 + $0x510] sm:$0xff] }
 0xbe7   : > { %v11080_v56 = vpop.eup %8498  ;;  %7751 = vmatpush3.bf16.xpose.msra.mxu1 %v4694_v38  ;;  %v4698_v38 = vld [vmem:[#allocation2 + $0x570] sm:$0xff] }
 0xbe8   : > { %12841 = vst [vmem:[#allocation173_spill] sm:$0xff] %v11080_v56  ;;  %v4593_v12 = vpack.c.bf16 %v11080_v56, %v11078_v9  ;;  %7752 = vmatprep.subr.bf16.mxu1 %v4695_v14  ;;  %v4699_v56 = vld [vmem:[#allocation2 + $0x5d0] sm:$0xff] }
 0xbe9   : > { %v11084_v27 = vpop.eup %8500 }
 0xbea   : > { %12842 = vst [vmem:[#allocation174_spill] sm:$0xff] %v11084_v27  ;;  %7742 = vmatprep.mubr.bf16.mxu1 %v4593_v12 }
 0xbeb   : > { %v11086_v6 = vpop.eup %8502 }
 0xbec   : > { %12843 = vst [vmem:[#allocation175_spill] sm:$0xff] %v11086_v6  ;;  %v4594_v49 = vpack.c.bf16 %v11086_v6, %v11084_v27  ;;  %v4724_v27 = vunpack.c.h.bf16 %v10867_v47  ;;  %v4728_v47 = vunpack.c.h.bf16 %v10884_v39  ;;  %v4734_v39 = vunpack.c.h.bf16 %v10921_v51 }
 0xbee   : > { %7743 = vmatmul.mubr.bf16.gmra.mrb[76].mxu1 %v4594_v49 }
 0xbef   : > { %7753 = vmatpush3.bf16.xpose.msra.mxu1 %v4695_v14  ;;  %7762 = vmatprep.mubr.bf16.mxu1 %v10787_v21  ;;  %v4700_v21 = vld [vmem:[#allocation2 + $0x350] sm:$0xff] }
 0xbf0   : > { %7754 = vmatprep.subr.bf16.mxu1 %v4696_v28  ;;  %7778 = vmatprep.subr.bf16.mxu0 %v4700_v21  ;;  %v4702_v14 = vld [vmem:[#allocation2 + $0x410] sm:$0xff] }
 0xbf1   : > { %7779 = vmatpush3.bf16.msra.mxu0 %v4700_v21 }
 0xbf7   : > { %7755 = vmatpush3.bf16.xpose.msra.mxu1 %v4696_v28  ;;  %v4701_v28 = vld [vmem:[#allocation2 + $0x3b0] sm:$0xff] }
 0xbf8   : > { %7756 = vmatprep.subr.bf16.mxu1 %v4697_v19  ;;  %7780 = vmatprep.subr.bf16.mxu0 %v4701_v28 }
 0xbf9   : > { %7781 = vmatpush3.bf16.msra.mxu0 %v4701_v28 }
 0xbfa   : > { %7782 = vmatprep.subr.bf16.mxu0 %v4702_v14 }
 0xbfd   : > { %7783 = vmatpush3.bf16.msra.mxu0 %v4702_v14 }
 0xbff   : > { %7757 = vmatpush3.bf16.xpose.msra.mxu1 %v4697_v19 }
 0xc00   : > { %7758 = vmatprep.subr.bf16.mxu1 %v4698_v38 }
 0xc07   : > { %7759 = vmatpush3.bf16.xpose.msra.mxu1 %v4698_v38 }
 0xc08   : > { %7760 = vmatprep.subr.bf16.mxu1 %v4699_v56 }
 0xc0f   : > { %7761 = vmatpush3.bf16.xpose.msra.mxu1 %v4699_v56 }
 0xc16   : > { %7763 = vmatmul.mubr.bf16.vlgmr.msra.gmra.mrb[80].mxu1 %v10791_v33  ;;  %v4703_v33 = vld [vmem:[#allocation2 + $0x470] sm:$0xff] }
 0xc17   : > { %7766 = vmatprep.mubr.bf16.mxu1 %v10794_v5  ;;  %7784 = vmatprep.subr.bf16.mxu0 %v4703_v33 }
 0xc18   : > { %7785 = vmatpush3.bf16.msra.mxu0 %v4703_v33 }
 0xc1e   : > { %7767 = vmatmul.mubr.bf16.gmra.mrb[84].mxu1 %v10799_v42 }
 0xc1f   : > { %7770 = vmatprep.mubr.bf16.mxu1 %v10802_v8 }
 0xc26   : > { %7771 = vmatmul.mubr.bf16.gmra.mrb[88].mxu1 %v10807_v3 }
 0xc27   : > { %7774 = vmatprep.mubr.bf16.mxu1 %v10810_v59 }
 0xc2e   : > { %7775 = vmatmul.mubr.bf16.gmra.mrb[92].mxu1 %v10815_v16 }
 0xca9   : > { %v11098_v5 = vpop.f32.mrb[64].mxu1 }
 0xcaa   : > { %v11100_v42 = vpop.f32.mrb[65].mxu1 }
 0xcab   : > { %v11102_v8 = vpop.f32.mrb[66].mxu1 }
 0xcac   : > { %v11104_v3 = vpop.f32.mrb[67].mxu1 }
 0xcb1   : > { %v11106_v59 = vpop.f32.mrb[68].mxu1 }
 0xcb2   : > { %v11108_v16 = vpop.f32.mrb[69].mxu1 }
 0xcb3   : > { %v11110_v56 = vpop.f32.mrb[70].mxu1 }
 0xcb4   : > { %v11112_v12 = vpop.f32.mrb[71].mxu1 }
 0xcb9   : > { %v11114_v49 = vpop.f32.mrb[72].mxu1 }
 0xcba   : > { %v11116_v19 = vpop.f32.mrb[73].mxu1 }
 0xcbb   : > { %v11118_v38 = vpop.f32.mrb[74].mxu1 }
 0xcbc   : > { %v11120_v21 = vpop.f32.mrb[75].mxu1 }
 0xcc1   : > { %v11122_v28 = vpop.f32.mrb[76].mxu1 }
 0xcc2   : > { %v11124_v14 = vpop.f32.mrb[77].mxu1 }
 0xcc3   : > { %v11126_v33 = vpop.f32.mrb[78].mxu1 }
 0xcc4   : > { %v11128_v6 = vpop.f32.mrb[79].mxu1 }
 0xce9   : > { %v7764_v9 = vpop.f32.mrb[80].mxu1 }
 0xcea   : > { %v4774_v20 = vpop.f32.mrb[81].mxu1  ;;  %v11139_v17 = vadd.f32 %v7764_v9, %v4726_v37 }
 0xceb   : > { %v11133_v2 = vadd.f32 %v4774_v20, %v4724_v27  ;;  %v7765_v1 = vpop.f32.mrb[82].mxu1  ;;  %v4729_v27 = vunpack.c.h.bf16 %v10894_v13  ;;  %v4732_v13 = vunpack.c.h.bf16 %v10913_v22  ;;  %v4738_v22 = vunpack.c.h.bf16 %v10949_v32 }
 0xcec   : > { %v4777_v46 = vpop.f32.mrb[83].mxu1  ;;  %v11143_v4 = vadd.f32 %v7765_v1, %v4727_v45 }
 0xced   : > { %v11136_v29 = vadd.f32 %v4777_v46, %v4725_v10  ;;  %4837 = vmax.xlane.f32.xlu0 %v11133_v2  ;;  %v4731_v10 = vunpack.c.h.bf16 %v10901_v34  ;;  %v4733_v34 = vunpack.c.h.bf16 %v10924_v11  ;;  %v4736_v11 = vunpack.c.h.bf16 %v10941_v26 }
 0xcef   : > { %4839 = vmax.xlane.f32.xlu1 %v11136_v29 }
 0xcf1   : > { %v7768_v20 = vpop.f32.mrb[84].mxu1  ;;  %4841 = vmax.xlane.f32.xlu0 %v11139_v17 }
 0xcf2   : > { %v4790_v24 = vpop.f32.mrb[85].mxu1  ;;  %v11152_v57 = vadd.f32 %v7768_v20, %v4730_v48  ;;  %v4735_v20 = vunpack.c.h.bf16 %v10931_v36  ;;  %v4737_v36 = vunpack.c.h.bf16 %v10952_v40 }
 0xcf3   : > { %v11148_v46 = vadd.f32 %v4790_v24, %v4728_v47  ;;  %v7769_v37 = vpop.f32.mrb[86].mxu1  ;;  %4843 = vmax.xlane.f32.xlu1 %v11143_v4 }
 0xcf4   : > { %v4793_v9 = vpop.f32.mrb[87].mxu1  ;;  %v11157_v23 = vadd.f32 %v7769_v37, %v4731_v10 }
 0xcf5   : > { %v11154_v45 = vadd.f32 %v4793_v9, %v4729_v27  ;;  %4845 = vmax.xlane.f32.xlu0 %v11148_v46 }
 0xcf7   : > { %4847 = vmax.xlane.f32.xlu1 %v11154_v45 }
 0xcf9   : > { %v7772_v1 = vpop.f32.mrb[88].mxu1  ;;  %4849 = vmax.xlane.f32.xlu0 %v11152_v57 }
 0xcfa   : > { %v4806_v47 = vpop.f32.mrb[89].mxu1  ;;  %v11168_v10 = vadd.f32 %v7772_v1, %v4734_v39  ;;  %v4704_v39 = vld [vmem:[#allocation2 + $0x4d0] sm:$0xff] }
 0xcfb   : > { %v11164_v48 = vadd.f32 %v4806_v47, %v4732_v13  ;;  %v7773_v27 = vpop.f32.mrb[90].mxu1  ;;  %4851 = vmax.xlane.f32.xlu1 %v11157_v23  ;;  %7786 = vmatprep.subr.bf16.mxu0 %v4704_v39 }
 0xcfc   : > { %v4809_v24 = vpop.f32.mrb[91].mxu1  ;;  %v11173_v51 = vadd.f32 %v7773_v27, %v4735_v20  ;;  %7787 = vmatpush3.bf16.msra.mxu0 %v4704_v39  ;;  %v4705_v27 = vld [vmem:[#allocation2 + $0x530] sm:$0xff] }
 0xcfd   : > { %v11170_v37 = vadd.f32 %v4809_v24, %v4733_v34  ;;  %4853 = vmax.xlane.f32.xlu0 %v11164_v48  ;;  %v4739_v34 = vunpack.c.h.bf16 %v10959_v60  ;;  %7788 = vmatprep.subr.bf16.mxu0 %v4705_v27  ;;  %v4706_v60 = vld [vmem:[#allocation2 + $0x590] sm:$0xff] }
 0xcfe   : > { %v4707_v24 = vld [vmem:[#allocation2 + $0x5f0] sm:$0xff] }
 0xcff   : > { %4855 = vmax.xlane.f32.xlu1 %v11170_v37 }
 0xd00   : > { %7789 = vmatpush3.bf16.msra.mxu0 %v4705_v27 }
 0xd01   : > { %v7776_v9 = vpop.f32.mrb[92].mxu1  ;;  %4857 = vmax.xlane.f32.xlu0 %v11168_v10  ;;  %7790 = vmatprep.subr.bf16.mxu0 %v4706_v60 }
 0xd02   : > { %v4822_v13 = vpop.f32.mrb[93].mxu1  ;;  %v11184_v26 = vadd.f32 %v7776_v9, %v4738_v22 }
 0xd03   : > { %v11180_v1 = vadd.f32 %v4822_v13, %v4736_v11  ;;  %v7777_v47 = vpop.f32.mrb[94].mxu1  ;;  %4859 = vmax.xlane.f32.xlu1 %v11173_v51  ;;  %v11194_v11 = vld [vmem:[#allocation2 + $0x38] sm:$0xff] }
 0xd04   : > { %v4825_v20 = vpop.f32.mrb[95].mxu1  ;;  %v11189_v40 = vadd.f32 %v7777_v47, %v4739_v34  ;;  %7791 = vmatpush3.bf16.msra.mxu0 %v4706_v60 }
 0xd05   : > { %v11186_v32 = vadd.f32 %v4825_v20, %v4737_v36  ;;  %4861 = vmax.xlane.f32.xlu0 %v11180_v1  ;;  %7792 = vmatprep.subr.bf16.mxu0 %v4707_v24 }
 0xd07   : > { %4863 = vmax.xlane.f32.xlu1 %v11186_v32 }
 0xd08   : > { %7793 = vmatpush3.bf16.msra.mxu0 %v4707_v24 }
 0xd09   : > { %4865 = vmax.xlane.f32.xlu0 %v11184_v26  ;;  %7810 = vmatprep.subr.bf16.mxu0 %v11194_v11 }
 0xd0b   : > { %4867 = vmax.xlane.f32.xlu1 %v11189_v40 }
 0xd7a   : > { %v4838_v22 = vpop.xlane.xlu0 %4837 }
 0xd7b   : > { %v4869_v9 = vmax.f32 %v10978_v31, %v4838_v22 }
 0xd7c   : > { %v4840_v36 = vpop.xlane.xlu1 %4839 }
 0xd7d   : > { %v4885_v13 = vsub.f32 %v10978_v31, %v4869_v9  ;;  %v4933_v39 = vsub.f32 %v11133_v2, %v4869_v9  ;;  %v4870_v34 = vmax.f32 %v10982_v43, %v4840_v36 }
 0xd7e   : > { %v4842_v47 = vpop.xlane.xlu0 %4841 }
 0xd7f   : > { %v4901_v20 = vmul.f32 1.442695, %v4885_v13  ;;  %v4949_v27 = vmul.f32 1.442695, %v4933_v39  ;;  %v4886_v60 = vsub.f32 %v10982_v43, %v4870_v34  ;;  %v4934_v24 = vsub.f32 %v11136_v29, %v4870_v34 }
 0xd80   : > { %v4871_v7 = vmax.f32 %v10986_v15, %v4842_v47  ;;  %v4844_v0 = vpop.xlane.xlu1 %4843 }
 0xd81   : > { %8504 = vpow2.f32 %v4901_v20  ;;  %v4903_v61 = vmul.f32 1.442695, %v4886_v60  ;;  %v4951_v22 = vmul.f32 1.442695, %v4934_v24  ;;  %v4872_v35 = vmax.f32 %v10990_v44, %v4844_v0 }
 0xd82   : > { %8506 = vpow2.f32 %v4949_v27  ;;  %v4887_v31 = vsub.f32 %v10986_v15, %v4871_v7  ;;  %v4935_v2 = vsub.f32 %v11139_v17, %v4871_v7  ;;  %v4846_v9 = vpop.xlane.xlu0 %4845 }
 0xd83   : > { %8508 = vpow2.f32 %v4903_v61  ;;  %v4888_v36 = vsub.f32 %v10990_v44, %v4872_v35  ;;  %v4936_v43 = vsub.f32 %v11143_v4, %v4872_v35  ;;  %v4873_v29 = vmax.f32 %v10994_v41, %v4846_v9 }
 0xd84   : > { %8510 = vpow2.f32 %v4951_v22  ;;  %v4905_v13 = vmul.f32 1.442695, %v4887_v31  ;;  %v4953_v39 = vmul.f32 1.442695, %v4935_v2  ;;  %v4848_v34 = vpop.xlane.xlu1 %4847 }
 0xd85   : > { %v4907_v47 = vmul.f32 1.442695, %v4888_v36  ;;  %v4955_v20 = vmul.f32 1.442695, %v4936_v43  ;;  %v4889_v0 = vsub.f32 %v10994_v41, %v4873_v29  ;;  %v4937_v15 = vsub.f32 %v11148_v46, %v4873_v29 }
 0xd86   : > { %8512 = vpow2.f32 %v4905_v13  ;;  %v4874_v7 = vmax.f32 %v10998_v30, %v4848_v34  ;;  %v4850_v61 = vpop.xlane.xlu0 %4849 }
 0xd87   : > { %8514 = vpow2.f32 %v4953_v39  ;;  %v4909_v44 = vmul.f32 1.442695, %v4889_v0  ;;  %v4957_v17 = vmul.f32 1.442695, %v4937_v15  ;;  %v4875_v35 = vmax.f32 %v11002_v52, %v4850_v61 }
 0xd88   : > { %8516 = vpow2.f32 %v4907_v47  ;;  %v4890_v4 = vsub.f32 %v10998_v30, %v4874_v7  ;;  %v4938_v27 = vsub.f32 %v11154_v45, %v4874_v7  ;;  %v4852_v60 = vpop.xlane.xlu1 %4851 }
 0xd89   : > { %8518 = vpow2.f32 %v4955_v20  ;;  %v4891_v41 = vsub.f32 %v11002_v52, %v4875_v35  ;;  %v4939_v46 = vsub.f32 %v11152_v57, %v4875_v35  ;;  %v4876_v24 = vmax.f32 %v11006_v55, %v4852_v60 }
 0xd8a   : > { %8520 = vpow2.f32 %v4909_v44  ;;  %v4911_v22 = vmul.f32 1.442695, %v4890_v4  ;;  %v4959_v31 = vmul.f32 1.442695, %v4938_v27  ;;  %v4854_v2 = vpop.xlane.xlu0 %4853 }
 0xd8b   : > { %v11219_v9 = vpop.eup %8504  ;;  %8522 = vpow2.f32 %v4957_v17  ;;  %v4913_v36 = vmul.f32 1.442695, %v4891_v41  ;;  %v4961_v43 = vmul.f32 1.442695, %v4939_v46  ;;  %v4892_v30 = vsub.f32 %v11006_v55, %v4876_v24 }
 0xd8c   : > { %12844 = vst [vmem:[#allocation176_spill] sm:$0xff] %v11219_v9  ;;  %v11222_v45 = vpop.eup %8506  ;;  %8524 = vpow2.f32 %v4911_v22  ;;  %v4940_v52 = vsub.f32 %v11157_v23, %v4876_v24  ;;  %v4877_v57 = vmax.f32 %v11012_v58, %v4854_v2  ;;  %v4856_v29 = vpop.xlane.xlu1 %4855  ;;  %v11228_v13 = vmul.f32 %v11219_v9, %v11100_v42 }
 0xd8d   : > { %v11230_v39 = vpop.eup %8508  ;;  %8526 = vpow2.f32 %v4959_v31  ;;  %v4915_v34 = vmul.f32 1.442695, %v4892_v30  ;;  %v4878_v47 = vmax.f32 %v11018_v63, %v4856_v29 }
 0xd8e   : > { %12845 = vst [vmem:[#allocation177_spill] sm:$0xff] %v11230_v39  ;;  %v11233_v20 = vpop.eup %8510  ;;  %8528 = vpow2.f32 %v4913_v36  ;;  %v4963_v55 = vmul.f32 1.442695, %v4940_v52  ;;  %v4893_v0 = vsub.f32 %v11012_v58, %v4877_v57  ;;  %v4941_v23 = vsub.f32 %v11164_v48, %v4877_v57  ;;  %v4858_v15 = vpop.xlane.xlu0 %4857 }
 0xd8f   : > { %8530 = vpow2.f32 %v4961_v43  ;;  %v4894_v7 = vsub.f32 %v11018_v63, %v4878_v47  ;;  %v4942_v42 = vsub.f32 %v11170_v37, %v4878_v47  ;;  %v4879_v61 = vmax.f32 %v11026_v18, %v4858_v15 }
 0xd90   : > { %v11240_v44 = vpop.eup %8512  ;;  %8532 = vpow2.f32 %v4915_v34  ;;  %v4917_v17 = vmul.f32 1.442695, %v4893_v0  ;;  %v4965_v35 = vmul.f32 1.442695, %v4941_v23  ;;  %v4860_v4 = vpop.xlane.xlu1 %4859  ;;  %v5061_v27 = vpack.c.bf16 %v11233_v20, %v11222_v45 }
 0xd91   : > { %12846 = vst [vmem:[#allocation178_spill] sm:$0xff] %v11240_v44  ;;  %v11244_v58 = vpop.eup %8514  ;;  %8534 = vpow2.f32 %v4963_v55  ;;  %v4919_v48 = vmul.f32 1.442695, %v4894_v7  ;;  %v4967_v60 = vmul.f32 1.442695, %v4942_v42  ;;  %v4895_v63 = vsub.f32 %v11026_v18, %v4879_v61  ;;  %v5239_v42 = vld [vmem:[#allocation2 + $0x98] sm:$0xff] }
 0xd92   : > { %v11247_v41 = vpop.eup %8516  ;;  %8536 = vpow2.f32 %v4917_v17  ;;  %v4943_v37 = vsub.f32 %v11168_v10, %v4879_v61  ;;  %v4880_v46 = vmax.f32 %v11032_v53, %v4860_v4  ;;  %7794 = vmatprep.mubr.bf16.mxu0 %v5061_v27  ;;  %v4862_v24 = vpop.xlane.xlu0 %4861  ;;  %v11253_v22 = vmul.f32 %v11240_v44, %v11098_v5 }
 0xd93   : > { %12847 = vst [vmem:[#allocation179_spill] sm:$0xff] %v11247_v41  ;;  %v11255_v31 = vpop.eup %8518  ;;  %8538 = vpow2.f32 %v4965_v35  ;;  %v4921_v2 = vmul.f32 1.442695, %v4895_v63  ;;  %v4881_v36 = vmax.f32 %v11040_v50, %v4862_v24  ;;  %v11260_v18 = vmul.f32 %v11247_v41, %v11102_v8 }
 0xd94   : > { %v11262_v43 = vpop.eup %8520  ;;  %8540 = vpow2.f32 %v4919_v48  ;;  %v4969_v10 = vmul.f32 1.442695, %v4943_v37  ;;  %v4896_v30 = vsub.f32 %v11032_v53, %v4880_v46  ;;  %v4944_v52 = vsub.f32 %v11173_v51, %v4880_v46  ;;  %v4864_v5 = vpop.xlane.xlu1 %4863 }
 0xd95   : > { %12848 = vst [vmem:[#allocation180_spill] sm:$0xff] %v11262_v43  ;;  %v11266_v57 = vpop.eup %8522  ;;  %8542 = vpow2.f32 %v4967_v60  ;;  %v4897_v29 = vsub.f32 %v11040_v50, %v4881_v36  ;;  %v4945_v34 = vsub.f32 %v11180_v1, %v4881_v36  ;;  %v4882_v47 = vmax.f32 %v11046_v62, %v4864_v5 }
 0xd96   : > { %v11271_v8 = vpop.eup %8524  ;;  %8544 = vpow2.f32 %v4921_v2  ;;  %v4923_v55 = vmul.f32 1.442695, %v4896_v30  ;;  %v4971_v0 = vmul.f32 1.442695, %v4944_v52  ;;  %v5062_v53 = vpack.c.bf16 %v11255_v31, %v11244_v58  ;;  %v4866_v23 = vpop.xlane.xlu0 %4865 }
 0xd97   : > { %12849 = vst [vmem:[#allocation181_spill] sm:$0xff] %v11271_v8  ;;  %v11275_v51 = vpop.eup %8526  ;;  %8546 = vpow2.f32 %v4969_v10  ;;  %v4925_v15 = vmul.f32 1.442695, %v4897_v29  ;;  %v4973_v7 = vmul.f32 1.442695, %v4945_v34  ;;  %v4898_v50 = vsub.f32 %v11046_v62, %v4882_v47 }
 0xd98   : > { %v11278_v1 = vpop.eup %8528  ;;  %8548 = vpow2.f32 %v4923_v55  ;;  %v4946_v61 = vsub.f32 %v11186_v32, %v4882_v47  ;;  %7795 = vmatmul.mubr.bf16.vlgmr.msra.gmra.mrb[80].mxu0 %v5062_v53  ;;  %v4883_v17 = vmax.f32 %v11054_v25, %v4866_v23  ;;  %v4868_v35 = vpop.xlane.xlu1 %4867  ;;  %v5063_v4 = vpack.c.bf16 %v11275_v51, %v11266_v57 }
 0xd99   : > { %12850 = vst [vmem:[#allocation182_spill] sm:$0xff] %v11278_v1  ;;  %v11284_v27 = vpop.eup %8530  ;;  %8550 = vpow2.f32 %v4971_v0  ;;  %v4927_v48 = vmul.f32 1.442695, %v4898_v50  ;;  %7811 = vmatpush3.bf16.xpose.msra.mxu0 %v11194_v11  ;;  %v4884_v62 = vmax.f32 %v11060_v54, %v4868_v35  ;;  %v11290_v60 = vmul.f32 %v11230_v39, %v11104_v3 }
 0xd9a   : > { %v11292_v32 = vpop.eup %8532  ;;  %8552 = vpow2.f32 %v4925_v15  ;;  %v4975_v63 = vmul.f32 1.442695, %v4946_v61  ;;  %v4899_v37 = vsub.f32 %v11054_v25, %v4883_v17  ;;  %v4947_v46 = vsub.f32 %v11184_v26, %v4883_v17  ;;  %7798 = vmatprep.mubr.bf16.mxu0 %v5063_v4  ;;  %7812 = vmatprep.subr.bf16.mxu0 %v5239_v42  ;;  %v5241_v17 = vld [vmem:[#allocation2 + $0x158] sm:$0xff] }
 0xd9b   : > { %12851 = vst [vmem:[#allocation183_spill] sm:$0xff] %v11292_v32  ;;  %v11296_v24 = vpop.eup %8534  ;;  %8554 = vpow2.f32 %v4973_v7  ;;  %v4900_v11 = vsub.f32 %v11060_v54, %v4884_v62  ;;  %v4948_v2 = vsub.f32 %v11189_v40, %v4884_v62  ;;  %v11302_v3 = vmul.f32 %v11278_v1, %v11106_v59  ;;  %v11545_v1 = vld [vmem:[%s9355_s17 + $0x1e0] sm:$0xff]  }
 0xd9c   : > { %v11304_v36 = vpop.eup %8536  ;;  %8556 = vpow2.f32 %v4927_v48  ;;  %v4929_v10 = vmul.f32 1.442695, %v4899_v37  ;;  %v4977_v25 = vmul.f32 1.442695, %v4947_v46  ;;  %v5064_v26 = vpack.c.bf16 %v11296_v24, %v11284_v27  ;;  %v11391_v46 = vld [vmem:[%s9624_s25 + $0x18] sm:$0xff] }
 0xd9d   : > { %12852 = vst [vmem:[#allocation184_spill] sm:$0xff] %v11304_v36  ;;  %v11308_v30 = vpop.eup %8538  ;;  %8558 = vpow2.f32 %v4975_v63  ;;  %v4931_v52 = vmul.f32 1.442695, %v4900_v11  ;;  %v4979_v5 = vmul.f32 1.442695, %v4948_v2  ;;  %v11312_v54 = vmul.f32 %v11262_v43, %v11108_v16  ;;  %v5240_v16 = vld [vmem:[#allocation2 + $0xf8] sm:$0xff] }
 0xd9e   : > { %v11314_v40 = vpop.eup %8540  ;;  %8560 = vpow2.f32 %v4929_v10  ;;  %v11318_v59 = vmul.f32 %v11292_v32, %v11110_v56  ;;  %v11322_v29 = vmul.f32 %v11271_v8, %v11112_v12  ;;  %v11326_v34 = vmul.f32 %v11304_v36, %v11116_v19  ;;  %v5242_v11 = vld [vmem:[#allocation2 + $0x1b8] sm:$0xff]  ;;  %v11553_v8 = vld [vmem:[%s9355_s17 + $0x1f0] sm:$0xff]   ;;  %v11556_v43 = vld [vmem:[%s9355_s17 + $0x1e8] sm:$0xff]  }
 0xd9f   : > { %12853 = vst [vmem:[#allocation185_spill] sm:$0xff] %v11314_v40  ;;  %v11328_v47 = vpop.eup %8542  ;;  %8562 = vpow2.f32 %v4977_v25  ;;  %v11332_v55 = vmul.f32 %v11314_v40, %v11120_v21  ;;  %v5245_v2 = vld [vmem:[#allocation2 + $0x2d8] sm:$0xff] }
 0xda0   : > { %12854 = vst [vmem:[#allocation186_spill] sm:$0xff] %v11328_v47  ;;  %v11334_v0 = vpop.eup %8544  ;;  %8564 = vpow2.f32 %v4931_v52  ;;  %7799 = vmatmul.mubr.bf16.gmra.mrb[84].mxu0 %v5064_v26  ;;  %v5065_v56 = vpack.c.bf16 %v11328_v47, %v11308_v30  ;;  %v11395_v10 = vld [vmem:[%s9624_s25 + $0x78] sm:$0xff] }
 0xda1   : > { %12855 = vst [vmem:[#allocation187_spill] sm:$0xff] %v11334_v0  ;;  %v11338_v12 = vpop.eup %8546  ;;  %8566 = vpow2.f32 %v4979_v5  ;;  %7813 = vmatpush3.bf16.xpose.msra.mxu0 %v5239_v42  ;;  %v11342_v19 = vmul.f32 %v11334_v0, %v11114_v49  ;;  %v11398_v25 = vld [vmem:[%s9624_s25 + $0xd8] sm:$0xff] }
 0xda2   : > { %12856 = vst [vmem:[#allocation188_spill] sm:$0xff] %v11338_v12  ;;  %v11344_v53 = vpop.eup %8548  ;;  %7802 = vmatprep.mubr.bf16.mxu0 %v5065_v56  ;;  %7814 = vmatprep.subr.bf16.mxu0 %v5240_v16  ;;  %v11403_v26 = vld [vmem:[%s9624_s25 + $0x138] sm:$0xff] }
 0xda3   : > { %12857 = vst [vmem:[#allocation189_spill] sm:$0xff] %v11344_v53  ;;  %v11346_v21 = vpop.eup %8550  ;;  %v11350_v23 = vmul.f32 %v11344_v53, %v11118_v38  ;;  %v11406_v52 = vld [vmem:[%s9624_s25 + $0x198] sm:$0xff] }
 0xda4   : > { %12858 = vst [vmem:[#allocation190_spill] sm:$0xff] %v11346_v21  ;;  %v11352_v15 = vpop.eup %8552  ;;  %v5066_v7 = vpack.c.bf16 %v11346_v21, %v11338_v12  ;;  %v11411_v5 = vld [vmem:[%s9624_s25 + $0x1f8] sm:$0xff] }
 0xda5   : > { %12859 = vst [vmem:[#allocation191_spill] sm:$0xff] %v11352_v15  ;;  %v11356_v50 = vpop.eup %8554  ;;  %v11360_v49 = vmul.f32 %v11352_v15, %v11124_v14  ;;  %v11419_v56 = vld [vmem:[%s9624_s25 + $0x2b8] sm:$0xff]  ;;  %v11495_v15 = vld [vmem:[%s9355_s17 + $0x1b0] sm:$0xff]  }
 0xda6   : > { %12860 = vst [vmem:[#allocation192_spill] sm:$0xff] %v11356_v50  ;;  %v11362_v42 = vpop.eup %8556 }
 0xda7   : > { %12861 = vst [vmem:[#allocation193_spill] sm:$0xff] %v11362_v42  ;;  %v11364_v61 = vpop.eup %8558  ;;  %v11368_v38 = vmul.f32 %v11362_v42, %v11128_v6 }
 0xda8   : > { %12862 = vst [vmem:[#allocation194_spill] sm:$0xff] %v11364_v61  ;;  %v11370_v35 = vpop.eup %8560  ;;  %7803 = vmatmul.mubr.bf16.gmra.mrb[88].mxu0 %v5066_v7  ;;  %v5067_v4 = vpack.c.bf16 %v11364_v61, %v11356_v50  ;;  %v5246_v7 = vld [vmem:[#allocation2 + $0x58] sm:$0xff] }
 0xda9   : > { %12863 = vst [vmem:[#allocation195_spill] sm:$0xff] %v11370_v35  ;;  %v11374_v48 = vpop.eup %8562  ;;  %7815 = vmatpush3.bf16.xpose.msra.mxu0 %v5240_v16  ;;  %v11378_v14 = vmul.f32 %v11370_v35, %v11122_v28  ;;  %v5243_v28 = vld [vmem:[#allocation2 + $0x218] sm:$0xff]  ;;  %7842 = vmatprep.subr.bf16.mxu1 %v5246_v7 }
 0xdaa   : > { %12864 = vst [vmem:[#allocation196_spill] sm:$0xff] %v11374_v48  ;;  %v11380_v62 = vpop.eup %8564  ;;  %7806 = vmatprep.mubr.bf16.mxu0 %v5067_v4  ;;  %7816 = vmatprep.subr.bf16.mxu0 %v5241_v17  ;;  %v11414_v16 = vld [vmem:[%s9624_s25 + $0x258] sm:$0xff] }
 0xdab   : > { %12865 = vst [vmem:[#allocation197_spill] sm:$0xff] %v11380_v62  ;;  %v11382_v63 = vpop.eup %8566  ;;  %v11386_v6 = vmul.f32 %v11380_v62, %v11126_v33  ;;  %v5244_v33 = vld [vmem:[#allocation2 + $0x278] sm:$0xff]  ;;  %7843 = vmatpush3.bf16.msra.mxu1 %v5246_v7 }
 0xdac   : > { %12866 = vst [vmem:[#allocation198_spill] sm:$0xff] %v11382_v63  ;;  %v5068_v37 = vpack.c.bf16 %v11382_v63, %v11374_v48  ;;  %v5248_v4 = vld [vmem:[#allocation2 + $0x118] sm:$0xff] }
 0xdad   : > { %v11535_v63 = vld [vmem:[%s9355_s17 + $0x1d8] sm:$0xff]  }
 0xdae   : > { %v5251_v50 = vld [vmem:[#allocation2 + $0x238] sm:$0xff] }
 0xdb0   : > { %7807 = vmatmul.mubr.bf16.gmra.mrb[92].mxu0 %v5068_v37  ;;  %v5249_v37 = vld [vmem:[#allocation2 + $0x178] sm:$0xff] }
 0xdb1   : > { %7817 = vmatpush3.bf16.xpose.msra.mxu0 %v5241_v17  ;;  %7826 = vmatprep.mubr.bf16.mxu0 %v11391_v46  ;;  %v5247_v17 = vld [vmem:[#allocation2 + $0xb8] sm:$0xff] }
 0xdb2   : > { %7818 = vmatprep.subr.bf16.mxu0 %v5242_v11  ;;  %7844 = vmatprep.subr.bf16.mxu1 %v5247_v17 }
 0xdb3   : > { %7845 = vmatpush3.bf16.msra.mxu1 %v5247_v17 }
 0xdb4   : > { %7846 = vmatprep.subr.bf16.mxu1 %v5248_v4 }
 0xdb7   : > { %7847 = vmatpush3.bf16.msra.mxu1 %v5248_v4 }
 0xdb8   : > { %7848 = vmatprep.subr.bf16.mxu1 %v5249_v37 }
 0xdb9   : > { %7819 = vmatpush3.bf16.xpose.msra.mxu0 %v5242_v11 }
 0xdba   : > { %7820 = vmatprep.subr.bf16.mxu0 %v5243_v28 }
 0xdbb   : > { %7849 = vmatpush3.bf16.msra.mxu1 %v5249_v37 }
 0xdc1   : > { %7821 = vmatpush3.bf16.xpose.msra.mxu0 %v5243_v28 }
 0xdc2   : > { %7822 = vmatprep.subr.bf16.mxu0 %v5244_v33 }
 0xdc9   : > { %7823 = vmatpush3.bf16.xpose.msra.mxu0 %v5244_v33 }
 0xdca   : > { %7824 = vmatprep.subr.bf16.mxu0 %v5245_v2 }
 0xdd1   : > { %7825 = vmatpush3.bf16.xpose.msra.mxu0 %v5245_v2 }
 0xdd8   : > { %7827 = vmatmul.mubr.bf16.vlgmr.msra.gmra.mrb[96].mxu0 %v11395_v10 }
 0xdd9   : > { %7830 = vmatprep.mubr.bf16.mxu0 %v11398_v25 }
 0xde0   : > { %7831 = vmatmul.mubr.bf16.gmra.mrb[100].mxu0 %v11403_v26 }
 0xde1   : > { %7834 = vmatprep.mubr.bf16.mxu0 %v11406_v52 }
 0xde8   : > { %7835 = vmatmul.mubr.bf16.gmra.mrb[104].mxu0 %v11411_v5 }
 0xde9   : > { %7838 = vmatprep.mubr.bf16.mxu0 %v11414_v16 }
 0xdf0   : > { %7839 = vmatmul.mubr.bf16.gmra.mrb[108].mxu0 %v11419_v56 }
 0xe6b   : > { %v7796_v11 = vpop.f32.mrb[80].mxu0 }
 0xe6c   : > { %v11423_v28 = vadd.f32 %v7796_v11, %v11253_v22  ;;  %v5103_v33 = vpop.f32.mrb[81].mxu0 }
 0xe6d   : > { %v11426_v2 = vadd.f32 %v5103_v33, %v11228_v13  ;;  %v7797_v62 = vpop.f32.mrb[82].mxu0 }
 0xe6e   : > { %12867 = vst [vmem:[#allocation199_spill] sm:$0xff] %v11423_v28  ;;  %v11429_v35 = vadd.f32 %v7797_v62, %v11260_v18  ;;  %v5106_v7 = vpop.f32.mrb[83].mxu0  ;;  %v11563_v28 = vld [vmem:[%s9355_s17 + $0x1f8] sm:$0xff]  }
 0xe6f   : > { %12868 = vst [vmem:[#allocation200_spill] sm:$0xff] %v11426_v2  ;;  %v11432_v17 = vadd.f32 %v5106_v7, %v11290_v60 }
 0xe70   : > { %12869 = vst [vmem:[#allocation201_spill] sm:$0xff] %v11429_v35  ;;  %v5250_v35 = vld [vmem:[#allocation2 + $0x1d8] sm:$0xff] }
 0xe71   : > { %12870 = vst [vmem:[#allocation202_spill] sm:$0xff] %v11432_v17  ;;  %7850 = vmatprep.subr.bf16.mxu1 %v5250_v35 }
 0xe72   : > { %7851 = vmatpush3.bf16.msra.mxu1 %v5250_v35  ;;  %v5252_v35 = vld [vmem:[#allocation2 + $0x298] sm:$0xff] }
 0xe73   : > { %v7800_v42 = vpop.f32.mrb[84].mxu0  ;;  %7852 = vmatprep.subr.bf16.mxu1 %v5251_v50 }
 0xe74   : > { %v11435_v4 = vadd.f32 %v7800_v42, %v11302_v3  ;;  %v5119_v37 = vpop.f32.mrb[85].mxu0 }
 0xe75   : > { %v11438_v22 = vadd.f32 %v5119_v37, %v11312_v54  ;;  %v7801_v11 = vpop.f32.mrb[86].mxu0 }
 0xe76   : > { %12871 = vst [vmem:[#allocation203_spill] sm:$0xff] %v11435_v4  ;;  %v11441_v13 = vadd.f32 %v7801_v11, %v11318_v59  ;;  %v5122_v33 = vpop.f32.mrb[87].mxu0  ;;  %v11528_v4 = vld [vmem:[%s9355_s17 + $0x1c8] sm:$0xff]   ;;  %7853 = vmatpush3.bf16.msra.mxu1 %v5251_v50 }
 0xe77   : > { %12872 = vst [vmem:[#allocation204_spill] sm:$0xff] %v11438_v22  ;;  %v11444_v18 = vadd.f32 %v5122_v33, %v11322_v29  ;;  %7854 = vmatprep.subr.bf16.mxu1 %v5252_v35 }
 0xe78   : > { %12873 = vst [vmem:[#allocation205_spill] sm:$0xff] %v11441_v13  ;;  %v11525_v13 = vld [vmem:[%s9355_s17 + $0x1d0] sm:$0xff]  }
 0xe79   : > { %12874 = vst [vmem:[#allocation206_spill] sm:$0xff] %v11444_v18 }
 0xe7a   : > { %7855 = vmatpush3.bf16.msra.mxu1 %v5252_v35 }
 0xe7b   : > { %v7804_v62 = vpop.f32.mrb[88].mxu0 }
 0xe7c   : > { %v11447_v60 = vadd.f32 %v7804_v62, %v11342_v19  ;;  %v5135_v3 = vpop.f32.mrb[89].mxu0 }
 0xe7d   : > { %v11450_v42 = vadd.f32 %v5135_v3, %v11326_v34  ;;  %v7805_v54 = vpop.f32.mrb[90].mxu0 }
 0xe7e   : > { %12875 = vst [vmem:[#allocation207_spill] sm:$0xff] %v11447_v60  ;;  %v11453_v7 = vadd.f32 %v7805_v54, %v11350_v23  ;;  %v5138_v59 = vpop.f32.mrb[91].mxu0  ;;  %v11474_v54 = vld [vmem:[%s9355_s17 + $0x188] sm:$0xff]  }
 0xe7f   : > { %12876 = vst [vmem:[#allocation208_spill] sm:$0xff] %v11450_v42  ;;  %v11456_v37 = vadd.f32 %v5138_v59, %v11332_v55  ;;  %v11471_v55 = vld [vmem:[%s9355_s17 + $0x180] sm:$0xff]   ;;  %v11478_v59 = vld [vmem:[%s9355_s17 + $0x190] sm:$0xff]  }
 0xe80   : > { %12877 = vst [vmem:[#allocation209_spill] sm:$0xff] %v11453_v7  ;;  %v11498_v7 = vld [vmem:[%s9355_s17 + $0x1a8] sm:$0xff]  }
 0xe81   : > { %12878 = vst [vmem:[#allocation210_spill] sm:$0xff] %v11456_v37  ;;  %v5276_v0 = vunpack.c.l.bf16 %v11498_v7 }
 0xe83   : > { %v7808_v29 = vpop.f32.mrb[92].mxu0 }
 0xe84   : > { %v11459_v11 = vadd.f32 %v7808_v29, %v11378_v14  ;;  %v5151_v19 = vpop.f32.mrb[93].mxu0  ;;  %v5271_v14 = vunpack.c.l.bf16 %v11471_v55  ;;  %v5272_v29 = vunpack.c.l.bf16 %v11474_v54 }
 0xe85   : > { %v11462_v33 = vadd.f32 %v5151_v19, %v11360_v49  ;;  %v7809_v34 = vpop.f32.mrb[94].mxu0  ;;  %v11482_v19 = vld [vmem:[%s9355_s17 + $0x198] sm:$0xff]  }
 0xe86   : > { %12879 = vst [vmem:[#allocation211_spill] sm:$0xff] %v11459_v11  ;;  %v11465_v62 = vadd.f32 %v7809_v34, %v11386_v6  ;;  %v5154_v23 = vpop.f32.mrb[95].mxu0  ;;  %v11488_v11 = vld [vmem:[%s9355_s17 + $0x1a0] sm:$0xff]  }
 0xe87   : > { %12880 = vst [vmem:[#allocation212_spill] sm:$0xff] %v11462_v33  ;;  %v11468_v3 = vadd.f32 %v5154_v23, %v11368_v38  ;;  %v5273_v38 = vunpack.c.l.bf16 %v11478_v59 }
 0xe88   : > { %12881 = vst [vmem:[#allocation213_spill] sm:$0xff] %v11465_v62 }
 0xe89   : > { %12882 = vst [vmem:[#allocation214_spill] sm:$0xff] %v11468_v3  ;;  %v5274_v3 = vunpack.c.l.bf16 %v11482_v19 }
 0xeab   : > { %v7828_v49 = vpop.f32.mrb[96].mxu0 }
 0xeac   : > { %v5321_v6 = vpop.f32.mrb[97].mxu0  ;;  %v11500_v60 = vadd.f32 %v7828_v49, %v5273_v38 }
 0xead   : > { %v11485_v34 = vadd.f32 %v5321_v6, %v5271_v14  ;;  %v7829_v23 = vpop.f32.mrb[98].mxu0  ;;  %v5275_v14 = vunpack.c.l.bf16 %v11488_v11  ;;  %v11505_v6 = vld [vmem:[%s9355_s17 + $0x1b8] sm:$0xff]  }
 0xeae   : > { %v5324_v62 = vpop.f32.mrb[99].mxu0  ;;  %v11507_v53 = vadd.f32 %v7829_v23, %v5274_v3  ;;  %v5278_v37 = vunpack.c.l.bf16 %v11505_v6  ;;  %v11517_v3 = vld [vmem:[%s9355_s17 + $0x1c0] sm:$0xff]  }
 0xeaf   : > { %v11491_v33 = vadd.f32 %v5324_v62, %v5272_v29  ;;  %5384 = vmax.xlane.f32.xlu0 %v11485_v34  ;;  %v5277_v62 = vunpack.c.l.bf16 %v11495_v15 }
 0xeb1   : > { %5386 = vmax.xlane.f32.xlu1 %v11491_v33 }
 0xeb3   : > { %v7832_v29 = vpop.f32.mrb[100].mxu0  ;;  %5388 = vmax.xlane.f32.xlu0 %v11500_v60 }
 0xeb4   : > { %v5337_v49 = vpop.f32.mrb[101].mxu0  ;;  %v11519_v23 = vadd.f32 %v7832_v29, %v5277_v62  ;;  %v5280_v62 = vunpack.c.l.bf16 %v11528_v4 }
 0xeb5   : > { %v11512_v38 = vadd.f32 %v5337_v49, %v5275_v14  ;;  %v7833_v42 = vpop.f32.mrb[102].mxu0  ;;  %5390 = vmax.xlane.f32.xlu1 %v11507_v53  ;;  %v5279_v49 = vunpack.c.l.bf16 %v11517_v3 }
 0xeb6   : > { %v5340_v40 = vpop.f32.mrb[103].mxu0  ;;  %v11530_v14 = vadd.f32 %v7833_v42, %v5278_v37  ;;  %v5282_v42 = vunpack.c.l.bf16 %v11535_v63 }
 0xeb7   : > { %v11521_v36 = vadd.f32 %v5340_v40, %v5276_v0  ;;  %5392 = vmax.xlane.f32.xlu0 %v11512_v38  ;;  %v5281_v40 = vunpack.c.l.bf16 %v11525_v13 }
 0xeb9   : > { %5394 = vmax.xlane.f32.xlu1 %v11521_v36 }
 0xebb   : > { %v7836_v0 = vpop.f32.mrb[104].mxu0  ;;  %5396 = vmax.xlane.f32.xlu0 %v11519_v23 }
 0xebc   : > { %v5353_v29 = vpop.f32.mrb[105].mxu0  ;;  %v11547_v18 = vadd.f32 %v7836_v0, %v5281_v40  ;;  %v5285_v40 = vunpack.c.l.bf16 %v11553_v8  ;;  %v5284_v0 = vunpack.c.l.bf16 %v11556_v43 }
 0xebd   : > { %v11540_v48 = vadd.f32 %v5353_v29, %v5279_v49  ;;  %v7837_v37 = vpop.f32.mrb[106].mxu0  ;;  %5398 = vmax.xlane.f32.xlu1 %v11530_v14  ;;  %v5283_v29 = vunpack.c.l.bf16 %v11545_v1 }
 0xebe   : > { %v5356_v32 = vpop.f32.mrb[107].mxu0  ;;  %v11558_v49 = vadd.f32 %v7837_v37, %v5282_v42  ;;  %v5286_v42 = vunpack.c.l.bf16 %v11563_v28 }
 0xebf   : > { %v11549_v22 = vadd.f32 %v5356_v32, %v5280_v62  ;;  %5400 = vmax.xlane.f32.xlu0 %v11540_v48 }
 0xec1   : > { %5402 = vmax.xlane.f32.xlu1 %v11549_v22 }
 0xec3   : > { %v7840_v32 = vpop.f32.mrb[108].mxu0  ;;  %5404 = vmax.xlane.f32.xlu0 %v11547_v18 }
 0xec4   : > { %v5369_v62 = vpop.f32.mrb[109].mxu0  ;;  %v11572_v44 = vadd.f32 %v7840_v32, %v5285_v40  ;;  %v5601_v40 = vld [vmem:[#allocation2 + $0x338] sm:$0xff] }
 0xec5   : > { %v11568_v61 = vadd.f32 %v5369_v62, %v5283_v29  ;;  %v7841_v37 = vpop.f32.mrb[110].mxu0  ;;  %5406 = vmax.xlane.f32.xlu1 %v11558_v49  ;;  %v5253_v29 = vld [vmem:[#allocation2 + $0x2f8] sm:$0xff] }
 0xec6   : > { %v5372_v41 = vpop.f32.mrb[111].mxu0  ;;  %v11577_v2 = vadd.f32 %v7841_v37, %v5286_v42  ;;  %7856 = vmatprep.subr.bf16.mxu1 %v5253_v29 }
 0xec7   : > { %v11574_v17 = vadd.f32 %v5372_v41, %v5284_v0  ;;  %5408 = vmax.xlane.f32.xlu0 %v11568_v61  ;;  %7857 = vmatpush3.bf16.msra.mxu1 %v5253_v29 }
 0xec8   : > { %7874 = vmatprep.subr.bf16.mxu1 %v5601_v40 }
 0xec9   : > { %5410 = vmax.xlane.f32.xlu1 %v11574_v17 }
 0xecb   : > { %5412 = vmax.xlane.f32.xlu0 %v11572_v44 }
 0xecd   : > { %5414 = vmax.xlane.f32.xlu1 %v11577_v2 }
 0xf3c   : > { %v11582_v41 = vpop.xlane.xlu0 %5384 }
 0xf3d   : > { %v5416_v50 = vsub.f32 %v11485_v34, %v11582_v41 }
 0xf3e   : > { %v11586_v32 = vpop.xlane.xlu1 %5386 }
 0xf3f   : > { %v5432_v0 = vmul.f32 1.442695, %v5416_v50  ;;  %v5417_v62 = vsub.f32 %v11491_v33, %v11586_v32 }
 0xf40   : > { %v11590_v42 = vpop.xlane.xlu0 %5388 }
 0xf41   : > { %v5434_v37 = vmul.f32 1.442695, %v5417_v62  ;;  %v5418_v35 = vsub.f32 %v11500_v60, %v11590_v42  ;;  %8568 = vpow2.f32 %v5432_v0 }
 0xf42   : > { %v11594_v29 = vpop.xlane.xlu1 %5390 }
 0xf43   : > { %8570 = vpow2.f32 %v5434_v37  ;;  %v5436_v21 = vmul.f32 1.442695, %v5418_v35  ;;  %v5419_v34 = vsub.f32 %v11507_v53, %v11594_v29 }
 0xf44   : > { %v11598_v12 = vpop.xlane.xlu0 %5392 }
 0xf45   : > { %v5438_v50 = vmul.f32 1.442695, %v5419_v34  ;;  %v5420_v33 = vsub.f32 %v11512_v38, %v11598_v12  ;;  %8572 = vpow2.f32 %v5436_v21 }
 0xf46   : > { %v11602_v39 = vpop.xlane.xlu1 %5394 }
 0xf47   : > { %8574 = vpow2.f32 %v5438_v50  ;;  %v5440_v62 = vmul.f32 1.442695, %v5420_v33  ;;  %v5421_v60 = vsub.f32 %v11521_v36, %v11602_v39 }
 0xf48   : > { %v11606_v0 = vpop.xlane.xlu0 %5396 }
 0xf49   : > { %v5442_v37 = vmul.f32 1.442695, %v5421_v60  ;;  %v5422_v53 = vsub.f32 %v11519_v23, %v11606_v0  ;;  %8576 = vpow2.f32 %v5440_v62 }
 0xf4a   : > { %v11610_v35 = vpop.xlane.xlu1 %5398 }
 0xf4b   : > { %8578 = vpow2.f32 %v5442_v37  ;;  %v5444_v34 = vmul.f32 1.442695, %v5422_v53  ;;  %v5423_v21 = vsub.f32 %v11530_v14, %v11610_v35  ;;  %v11614_v38 = vpop.eup %8568 }
 0xf4c   : > { %v11616_v50 = vpop.xlane.xlu0 %5400 }
 0xf4d   : > { %12883 = vst [vmem:[#allocation215_spill] sm:$0xff] %v11616_v50  ;;  %v11618_v33 = vpop.eup %8570  ;;  %v5446_v36 = vmul.f32 1.442695, %v5423_v21  ;;  %v5424_v60 = vsub.f32 %v11540_v48, %v11616_v50  ;;  %8580 = vpow2.f32 %v5444_v34 }
 0xf4e   : > { %v11622_v23 = vpop.xlane.xlu1 %5402  ;;  %v5496_v62 = vpack.c.bf16 %v11618_v33, %v11614_v38 }
 0xf4f   : > { %12884 = vst [vmem:[#allocation216_spill] sm:$0xff] %v11622_v23  ;;  %8582 = vpow2.f32 %v5446_v36  ;;  %v5448_v37 = vmul.f32 1.442695, %v5424_v60  ;;  %v5425_v14 = vsub.f32 %v11549_v22, %v11622_v23  ;;  %v11628_v53 = vpop.eup %8572 }
 0xf50   : > { %7858 = vmatprep.mubr.bf16.mxu1 %v5496_v62  ;;  %v11630_v9 = vpop.xlane.xlu0 %5404  ;;  %v5602_v62 = vld [vmem:[#allocation2 + $0x398] sm:$0xff] }
 0xf51   : > { %12885 = vst [vmem:[#allocation217_spill] sm:$0xff] %v11630_v9  ;;  %v11632_v21 = vpop.eup %8574  ;;  %v5450_v47 = vmul.f32 1.442695, %v5425_v14  ;;  %v5426_v48 = vsub.f32 %v11547_v18, %v11630_v9  ;;  %8584 = vpow2.f32 %v5448_v37 }
 0xf52   : > { %v11636_v34 = vpop.xlane.xlu1 %5406  ;;  %v5497_v36 = vpack.c.bf16 %v11632_v21, %v11628_v53 }
 0xf53   : > { %12886 = vst [vmem:[#allocation218_spill] sm:$0xff] %v11636_v34  ;;  %8586 = vpow2.f32 %v5450_v47  ;;  %v5452_v60 = vmul.f32 1.442695, %v5426_v48  ;;  %v5427_v22 = vsub.f32 %v11558_v49, %v11636_v34  ;;  %v11642_v23 = vpop.eup %8576 }
 0xf54   : > { %7859 = vmatmul.mubr.bf16.vlgmr.msra.gmra.mrb[96].mxu1 %v5497_v36  ;;  %v11644_v50 = vpop.xlane.xlu0 %5408 }
 0xf55   : > { %12887 = vst [vmem:[#allocation219_spill] sm:$0xff] %v11644_v50  ;;  %v11646_v14 = vpop.eup %8578  ;;  %v5454_v18 = vmul.f32 1.442695, %v5427_v22  ;;  %7875 = vmatpush3.bf16.xpose.msra.mxu1 %v5601_v40  ;;  %v5428_v37 = vsub.f32 %v11568_v61, %v11644_v50  ;;  %8588 = vpow2.f32 %v5452_v60 }
 0xf56   : > { %v11650_v9 = vpop.xlane.xlu1 %5410  ;;  %v5498_v47 = vpack.c.bf16 %v11646_v14, %v11642_v23  ;;  %7876 = vmatprep.subr.bf16.mxu1 %v5602_v62 }
 0xf57   : > { %12888 = vst [vmem:[#allocation220_spill] sm:$0xff] %v11650_v9  ;;  %8590 = vpow2.f32 %v5454_v18  ;;  %v5456_v49 = vmul.f32 1.442695, %v5428_v37  ;;  %v5429_v48 = vsub.f32 %v11574_v17, %v11650_v9  ;;  %v11656_v36 = vpop.eup %8580 }
 0xf58   : > { %7862 = vmatprep.mubr.bf16.mxu1 %v5498_v47  ;;  %v11658_v22 = vpop.xlane.xlu0 %5412  ;;  %v5603_v47 = vld [vmem:[#allocation2 + $0x3f8] sm:$0xff] }
 0xf59   : > { %12889 = vst [vmem:[#allocation221_spill] sm:$0xff] %v11658_v22  ;;  %v11660_v40 = vpop.eup %8582  ;;  %v5458_v61 = vmul.f32 1.442695, %v5429_v48  ;;  %v5430_v60 = vsub.f32 %v11572_v44, %v11658_v22  ;;  %8592 = vpow2.f32 %v5456_v49  ;;  %v5634_v22 = vunpack.c.h.bf16 %v11474_v54 }
 0xf5a   : > { %v11664_v50 = vpop.xlane.xlu1 %5414  ;;  %v5499_v18 = vpack.c.bf16 %v11660_v40, %v11656_v36  ;;  %v5639_v54 = vunpack.c.h.bf16 %v11495_v15  ;;  %v12909_v15 = vld [vmem:[#allocation97_spill] sm:$0xff] }
 0xf5b   : > { %12890 = vst [vmem:[#allocation222_spill] sm:$0xff] %v11664_v50  ;;  %8594 = vpow2.f32 %v5458_v61  ;;  %v5460_v37 = vmul.f32 1.442695, %v5430_v60  ;;  %v5431_v17 = vsub.f32 %v11577_v2, %v11664_v50  ;;  %v11670_v9 = vpop.eup %8584  ;;  %v5604_v60 = vld [vmem:[#allocation2 + $0x458] sm:$0xff] }
 0xf5c   : > { %7863 = vmatmul.mubr.bf16.gmra.mrb[100].mxu1 %v5499_v18  ;;  %v5605_v50 = vld [vmem:[#allocation2 + $0x4b8] sm:$0xff] }
 0xf5d   : > { %v11672_v34 = vpop.eup %8586  ;;  %v5462_v48 = vmul.f32 1.442695, %v5431_v17  ;;  %7877 = vmatpush3.bf16.xpose.msra.mxu1 %v5602_v62  ;;  %8596 = vpow2.f32 %v5460_v37 }
 0xf5e   : > { %v5500_v44 = vpack.c.bf16 %v11672_v34, %v11670_v9  ;;  %7878 = vmatprep.subr.bf16.mxu1 %v5603_v47 }
 0xf5f   : > { %8598 = vpow2.f32 %v5462_v48  ;;  %v11676_v49 = vpop.eup %8588 }
 0xf60   : > { %12891 = vst [vmem:[#allocation223_spill] sm:$0xff] %v11676_v49  ;;  %7866 = vmatprep.mubr.bf16.mxu1 %v5500_v44 }
 0xf61   : > { %v11678_v61 = vpop.eup %8590 }
 0xf62   : > { %12892 = vst [vmem:[#allocation224_spill] sm:$0xff] %v11678_v61  ;;  %v5501_v2 = vpack.c.bf16 %v11678_v61, %v11676_v49  ;;  %v5613_v49 = vld [vmem:[#allocation2 + $0x4d8] sm:$0xff] }
 0xf63   : > { %v11682_v18 = vpop.eup %8592 }
 0xf64   : > { %12893 = vst [vmem:[#allocation225_spill] sm:$0xff] %v11682_v18  ;;  %7867 = vmatmul.mubr.bf16.gmra.mrb[104].mxu1 %v5501_v2  ;;  %v5606_v2 = vld [vmem:[#allocation2 + $0x518] sm:$0xff] }
 0xf65   : > { %v11684_v17 = vpop.eup %8594  ;;  %7879 = vmatpush3.bf16.xpose.msra.mxu1 %v5603_v47  ;;  %v5607_v47 = vld [vmem:[#allocation2 + $0x578] sm:$0xff] }
 0xf66   : > { %12894 = vst [vmem:[#allocation226_spill] sm:$0xff] %v11684_v17  ;;  %v5502_v62 = vpack.c.bf16 %v11684_v17, %v11682_v18  ;;  %7880 = vmatprep.subr.bf16.mxu1 %v5604_v60  ;;  %v5608_v17 = vld [vmem:[#allocation2 + $0x5d8] sm:$0xff] }
 0xf67   : > { %v11688_v37 = vpop.eup %8596 }
 0xf68   : > { %12895 = vst [vmem:[#allocation227_spill] sm:$0xff] %v11688_v37  ;;  %7870 = vmatprep.mubr.bf16.mxu1 %v5502_v62 }
 0xf69   : > { %v11690_v48 = vpop.eup %8598 }
 0xf6a   : > { %12896 = vst [vmem:[#allocation228_spill] sm:$0xff] %v11690_v48  ;;  %v5503_v44 = vpack.c.bf16 %v11690_v48, %v11688_v37  ;;  %v5633_v37 = vunpack.c.h.bf16 %v11471_v55 }
 0xf6c   : > { %7871 = vmatmul.mubr.bf16.gmra.mrb[108].mxu1 %v5503_v44 }
 0xf6d   : > { %7881 = vmatpush3.bf16.xpose.msra.mxu1 %v5604_v60  ;;  %7890 = vmatprep.mubr.bf16.mxu1 %v11391_v46 }
 0xf6e   : > { %7882 = vmatprep.subr.bf16.mxu1 %v5605_v50 }
 0xf75   : > { %7883 = vmatpush3.bf16.xpose.msra.mxu1 %v5605_v50 }
 0xf76   : > { %7884 = vmatprep.subr.bf16.mxu1 %v5606_v2 }
 0xf7d   : > { %7885 = vmatpush3.bf16.xpose.msra.mxu1 %v5606_v2 }
 0xf7e   : > { %7886 = vmatprep.subr.bf16.mxu1 %v5607_v47 }
 0xf85   : > { %7887 = vmatpush3.bf16.xpose.msra.mxu1 %v5607_v47 }
 0xf86   : > { %7888 = vmatprep.subr.bf16.mxu1 %v5608_v17 }
 0xf8d   : > { %7889 = vmatpush3.bf16.xpose.msra.mxu1 %v5608_v17 }
 0xf94   : > { %7891 = vmatmul.mubr.bf16.vlgmr.msra.gmra.mrb[112].mxu1 %v11395_v10 }
 0xf95   : > { %7894 = vmatprep.mubr.bf16.mxu1 %v11398_v25 }
 0xf9c   : > { %7895 = vmatmul.mubr.bf16.gmra.mrb[116].mxu1 %v11403_v26 }
 0xf9d   : > { %7898 = vmatprep.mubr.bf16.mxu1 %v11406_v52 }
 0xfa4   : > { %7899 = vmatmul.mubr.bf16.gmra.mrb[120].mxu1 %v11411_v5 }
 0xfa5   : > { %7902 = vmatprep.mubr.bf16.mxu1 %v11414_v16 }
 0xfac   : > { %7903 = vmatmul.mubr.bf16.gmra.mrb[124].mxu1 %v11419_v56 }
0x1027   : > { %v11702_v46 = vpop.f32.mrb[96].mxu1 }
0x1028   : > { %v11704_v50 = vpop.f32.mrb[97].mxu1 }
0x1029   : > { %v11706_v60 = vpop.f32.mrb[98].mxu1 }
0x102a   : > { %v11708_v17 = vpop.f32.mrb[99].mxu1 }
0x102f   : > { %v11710_v10 = vpop.f32.mrb[100].mxu1 }
0x1030   : > { %v11712_v25 = vpop.f32.mrb[101].mxu1 }
0x1031   : > { %12897 = vst [vmem:[#allocation229_spill] sm:$0xff] %v11712_v25  ;;  %v11714_v26 = vpop.f32.mrb[102].mxu1 }
0x1032   : > { %12898 = vst [vmem:[#allocation230_spill] sm:$0xff] %v11714_v26  ;;  %v11716_v52 = vpop.f32.mrb[103].mxu1 }
0x1033   : > { %12899 = vst [vmem:[#allocation231_spill] sm:$0xff] %v11716_v52 }
0x1037   : > { %v11718_v5 = vpop.f32.mrb[104].mxu1 }
0x1038   : > { %12900 = vst [vmem:[#allocation232_spill] sm:$0xff] %v11718_v5  ;;  %v11720_v16 = vpop.f32.mrb[105].mxu1 }
0x1039   : > { %12901 = vst [vmem:[#allocation233_spill] sm:$0xff] %v11720_v16  ;;  %v11722_v56 = vpop.f32.mrb[106].mxu1  ;;  %v5635_v16 = vunpack.c.h.bf16 %v11478_v59 }
0x103a   : > { %12902 = vst [vmem:[#allocation234_spill] sm:$0xff] %v11722_v56  ;;  %v11724_v62 = vpop.f32.mrb[107].mxu1 }
0x103b   : > { %12903 = vst [vmem:[#allocation235_spill] sm:$0xff] %v11724_v62 }
0x103f   : > { %v11726_v44 = vpop.f32.mrb[108].mxu1 }
0x1040   : > { %12904 = vst [vmem:[#allocation236_spill] sm:$0xff] %v11726_v44  ;;  %v11728_v2 = vpop.f32.mrb[109].mxu1  ;;  %v5636_v44 = vunpack.c.h.bf16 %v11482_v19 }
0x1041   : > { %12905 = vst [vmem:[#allocation237_spill] sm:$0xff] %v11728_v2  ;;  %v11730_v47 = vpop.f32.mrb[110].mxu1 }
0x1042   : > { %12906 = vst [vmem:[#allocation238_spill] sm:$0xff] %v11730_v47  ;;  %v11732_v48 = vpop.f32.mrb[111].mxu1  ;;  %v5638_v47 = vunpack.c.h.bf16 %v11498_v7  ;;  %v5643_v7 = vunpack.c.h.bf16 %v11525_v13  ;;  %v12911_v13 = vld [vmem:[#allocation34_spill] sm:$0xff] }
0x1043   : > { %12907 = vst [vmem:[#allocation239_spill] sm:$0xff] %v11732_v48 }
0x1067   : > { %v7892_v18 = vpop.f32.mrb[112].mxu1 }
0x1068   : > { %v5683_v5 = vpop.f32.mrb[113].mxu1  ;;  %v11743_v2 = vadd.f32 %v7892_v18, %v5635_v16  ;;  %v5640_v18 = vunpack.c.h.bf16 %v11505_v6  ;;  %v12908_v16 = vld [vmem:[#allocation96_spill] sm:$0xff] }
0x1069   : > { %v11737_v52 = vadd.f32 %v5683_v5, %v5633_v37  ;;  %v7893_v56 = vpop.f32.mrb[114].mxu1  ;;  %v5609_v37 = vld [vmem:[#allocation2 + $0x358] sm:$0xff] }
0x106a   : > { %v5686_v62 = vpop.f32.mrb[115].mxu1  ;;  %v11746_v55 = vadd.f32 %v7893_v56, %v5636_v44  ;;  %7906 = vmatprep.subr.bf16.mxu0 %v5609_v37  ;;  %v5610_v56 = vld [vmem:[#allocation2 + $0x3b8] sm:$0xff]  ;;  %v5637_v44 = vunpack.c.h.bf16 %v11488_v11 }
0x106b   : > { %v11740_v61 = vadd.f32 %v5686_v62, %v5634_v22  ;;  %5746 = vmax.xlane.f32.xlu0 %v11737_v52  ;;  %7907 = vmatpush3.bf16.msra.mxu0 %v5609_v37  ;;  %v5611_v11 = vld [vmem:[#allocation2 + $0x418] sm:$0xff] }
0x106c   : > { %7908 = vmatprep.subr.bf16.mxu0 %v5610_v56 }
0x106d   : > { %5748 = vmax.xlane.f32.xlu1 %v11740_v61 }
0x106f   : > { %5750 = vmax.xlane.f32.xlu0 %v11743_v2  ;;  %v7896_v59 = vpop.f32.mrb[116].mxu1  ;;  %7909 = vmatpush3.bf16.msra.mxu0 %v5610_v56 }
0x1070   : > { %v5699_v5 = vpop.f32.mrb[117].mxu1  ;;  %v11751_v62 = vadd.f32 %v7896_v59, %v5639_v54  ;;  %7910 = vmatprep.subr.bf16.mxu0 %v5611_v11 }
0x1071   : > { %5752 = vmax.xlane.f32.xlu1 %v11746_v55  ;;  %v7897_v19 = vpop.f32.mrb[118].mxu1  ;;  %v11761_v59 = vadd.f32 %v5699_v5, %v5637_v44  ;;  %v5612_v44 = vld [vmem:[#allocation2 + $0x478] sm:$0xff] }
0x1072   : > { %v5702_v22 = vpop.f32.mrb[119].mxu1  ;;  %v11757_v48 = vadd.f32 %v7897_v19, %v5640_v18 }
0x1073   : > { %3646 = vadd.xlane.f32.xlu0 %v12908_v16  ;;  %v11764_v25 = vadd.f32 %v5702_v22, %v5638_v47  ;;  %7911 = vmatpush3.bf16.msra.mxu0 %v5611_v11  ;;  %v5644_v22 = vunpack.c.h.bf16 %v11535_v63  ;;  %v5614_v63 = vld [vmem:[#allocation2 + $0x538] sm:$0xff] }
0x1074   : > { %7912 = vmatprep.subr.bf16.mxu0 %v5612_v44 }
0x1075   : > { %3648 = vadd.xlane.f32.xlu1 %v12909_v15  ;;  %v12910_v15 = vld [vmem:[#allocation32_spill] sm:$0xff] }
0x1077   : > { %5758 = vmax.xlane.f32.xlu0 %v11751_v62  ;;  %v7900_v37 = vpop.f32.mrb[120].mxu1  ;;  %7913 = vmatpush3.bf16.msra.mxu0 %v5612_v44  ;;  %v12914_v44 = vld [vmem:[#allocation113_spill] sm:$0xff] }
0x1078   : > { %v5715_v54 = vpop.f32.mrb[121].mxu1  ;;  %v11771_v47 = vadd.f32 %v7900_v37, %v5643_v7  ;;  %7914 = vmatprep.subr.bf16.mxu0 %v5613_v49 }
0x1079   : > { %5760 = vmax.xlane.f32.xlu1 %v11757_v48  ;;  %v7901_v6 = vpop.f32.mrb[122].mxu1 }
0x107a   : > { %v5718_v16 = vpop.f32.mrb[123].mxu1  ;;  %v11777_v26 = vadd.f32 %v7901_v6, %v5644_v22  ;;  %v12912_v6 = vld [vmem:[#allocation160_spill] sm:$0xff]  ;;  %v5645_v22 = vunpack.c.h.bf16 %v11545_v1  ;;  %v12917_v1 = vld [vmem:[#allocation51_spill] sm:$0xff] }
0x107b   : > { %5754 = vmax.xlane.f32.xlu0 %v11761_v59  ;;  %7915 = vmatpush3.bf16.msra.mxu0 %v5613_v49  ;;  %v12913_v49 = vld [vmem:[#allocation161_spill] sm:$0xff] }
0x107c   : > { %7916 = vmatprep.subr.bf16.mxu0 %v5614_v63 }
0x107d   : > { %5756 = vmax.xlane.f32.xlu1 %v11764_v25 }
0x107f   : > { %5464 = vadd.xlane.f32.xlu0 %v11614_v38  ;;  %v7904_v19 = vpop.f32.mrb[124].mxu1  ;;  %v5641_v38 = vunpack.c.h.bf16 %v11517_v3  ;;  %7917 = vmatpush3.bf16.msra.mxu0 %v5614_v63  ;;  %v5615_v3 = vld [vmem:[#allocation2 + $0x598] sm:$0xff]  ;;  %v12922_v63 = vld [vmem:[#allocation162_spill] sm:$0xff] }
0x1080   : > { %v5731_v18 = vpop.f32.mrb[125].mxu1  ;;  %7918 = vmatprep.subr.bf16.mxu0 %v5615_v3 }
0x1081   : > { %5466 = vadd.xlane.f32.xlu1 %v11618_v33  ;;  %v7905_v5 = vpop.f32.mrb[126].mxu1  ;;  %v5642_v33 = vunpack.c.h.bf16 %v11528_v4  ;;  %v11781_v37 = vadd.f32 %v5715_v54, %v5641_v38  ;;  %v5647_v4 = vunpack.c.h.bf16 %v11553_v8  ;;  %v5616_v54 = vld [vmem:[#allocation2 + $0x5f8] sm:$0xff]  ;;  %v5646_v8 = vunpack.c.h.bf16 %v11556_v43  ;;  %v12918_v43 = vld [vmem:[#allocation98_spill] sm:$0xff] }
0x1082   : > { %v5734_v56 = vpop.f32.mrb[127].mxu1 }
0x1083   : > { %2737 = vadd.xlane.f32.xlu0 %v12910_v15  ;;  %v11784_v11 = vadd.f32 %v5718_v16, %v5642_v33  ;;  %7919 = vmatpush3.bf16.msra.mxu0 %v5615_v3  ;;  %v11791_v7 = vadd.f32 %v7904_v19, %v5647_v4  ;;  %v5648_v16 = vunpack.c.h.bf16 %v11563_v28  ;;  %v12915_v15 = vld [vmem:[#allocation115_spill] sm:$0xff]  ;;  %v11804_v19 = vadd.f32 %v5734_v56, %v5646_v8  ;;  %v12916_v28 = vld [vmem:[#allocation49_spill] sm:$0xff]  ;;  %v12940_v8 = vld [vmem:[#allocation38_spill] sm:$0xff] }
0x1084   : > { %7920 = vmatprep.subr.bf16.mxu0 %v5616_v54  ;;  %v12920_v56 = vld [vmem:[#allocation35_spill] sm:$0xff]  ;;  %v12921_v33 = vld [vmem:[#allocation33_spill] sm:$0xff] }
0x1085   : > { %2739 = vadd.xlane.f32.xlu1 %v12911_v13  ;;  %v11797_v38 = vadd.f32 %v7905_v5, %v5648_v16  ;;  %v11801_v13 = vadd.f32 %v5731_v18, %v5645_v22  ;;  %v12919_v18 = vld [vmem:[#allocation99_spill] sm:$0xff]  ;;  %v8248_v5 = vld [vmem:[#allocation9 + $0x40] sm:$0xff]   ;;  %v12934_v22 = vld [vmem:[#allocation121_spill] sm:$0xff] }
0x1086   : > { %v12923_v3 = vld [vmem:[#allocation163_spill] sm:$0xff]  ;;  %v12932_v16 = vld [vmem:[#allocation164_spill] sm:$0xff] }
0x1087   : > { %5766 = vmax.xlane.f32.xlu0 %v11771_v47  ;;  %7921 = vmatpush3.bf16.msra.mxu0 %v5616_v54  ;;  %v12927_v4 = vld [vmem:[#allocation55_spill] sm:$0xff]  ;;  %v12931_v54 = vld [vmem:[#allocation37_spill] sm:$0xff] }
0x1088   : > { %7298 = vmatprep.subr.bf16.mxu0 %v8248_v5  ;;  %v12947_v5 = vld [vmem:[#allocation63_spill] sm:$0xff] }
0x1089   : > { %5768 = vmax.xlane.f32.xlu1 %v11777_v26 }
0x108b   : > { %5762 = vmax.xlane.f32.xlu0 %v11781_v37 }
0x108d   : > { %5764 = vmax.xlane.f32.xlu1 %v11784_v11 }
0x108f   : > { %4555 = vadd.xlane.f32.xlu0 %v12912_v6  ;;  %v12926_v6 = vld [vmem:[#allocation53_spill] sm:$0xff] }
0x1091   : > { %4557 = vadd.xlane.f32.xlu1 %v12913_v49  ;;  %v12930_v49 = vld [vmem:[#allocation36_spill] sm:$0xff] }
0x1093   : > { %4088 = vadd.xlane.f32.xlu0 %v12914_v44  ;;  %v12933_v44 = vld [vmem:[#allocation165_spill] sm:$0xff] }
0x1095   : > { %4090 = vadd.xlane.f32.xlu1 %v12915_v15  ;;  %v12937_v15 = vld [vmem:[#allocation59_spill] sm:$0xff] }
0x1097   : > { %5774 = vmax.xlane.f32.xlu0 %v11791_v7 }
0x1099   : > { %5776 = vmax.xlane.f32.xlu1 %v11797_v38 }
0x109b   : > { %5770 = vmax.xlane.f32.xlu0 %v11801_v13 }
0x109d   : > { %5772 = vmax.xlane.f32.xlu1 %v11804_v19 }
0x109f   : > { %3179 = vadd.xlane.f32.xlu0 %v12916_v28  ;;  %v12941_v28 = vld [vmem:[#allocation39_spill] sm:$0xff] }
0x10a1   : > { %3181 = vadd.xlane.f32.xlu1 %v12917_v1  ;;  %v12942_v1 = vld [vmem:[#allocation166_spill] sm:$0xff] }
0x10a3   : > { %4997 = vadd.xlane.f32.xlu0 %v11222_v45  ;;  %v12924_v45 = vld [vmem:[#allocation117_spill] sm:$0xff] }
0x10a5   : > { %4999 = vadd.xlane.f32.xlu1 %v11233_v20  ;;  %v12925_v20 = vld [vmem:[#allocation119_spill] sm:$0xff] }
0x10a7   : > { %3650 = vadd.xlane.f32.xlu0 %v12918_v43  ;;  %v12943_v43 = vld [vmem:[#allocation167_spill] sm:$0xff] }
0x10a9   : > { %3652 = vadd.xlane.f32.xlu1 %v12919_v18  ;;  %v12944_v18 = vld [vmem:[#allocation125_spill] sm:$0xff] }
0x10ab   : > { %5468 = vadd.xlane.f32.xlu0 %v11628_v53  ;;  %v12928_v53 = vld [vmem:[#allocation100_spill] sm:$0xff] }
0x10ad   : > { %5470 = vadd.xlane.f32.xlu1 %v11632_v21  ;;  %v12929_v21 = vld [vmem:[#allocation101_spill] sm:$0xff] }
0x10af   : > { %2741 = vadd.xlane.f32.xlu0 %v12920_v56 }
0x10b1   : > { %2743 = vadd.xlane.f32.xlu1 %v12921_v33 }
0x10b3   : > { %4559 = vadd.xlane.f32.xlu0 %v12922_v63 }
0x10b5   : > { %4561 = vadd.xlane.f32.xlu1 %v12923_v3 }
0x10b7   : > { %4092 = vadd.xlane.f32.xlu0 %v12924_v45  ;;  %v12948_v45 = vld [vmem:[#allocation104_spill] sm:$0xff] }
0x10b9   : > { %4094 = vadd.xlane.f32.xlu1 %v12925_v20 }
0x10bb   : > { %3183 = vadd.xlane.f32.xlu0 %v12926_v6 }
0x10bd   : > { %3185 = vadd.xlane.f32.xlu1 %v12927_v4 }
0x10bf   : > { %5001 = vadd.xlane.f32.xlu0 %v11244_v58  ;;  %v12935_v58 = vld [vmem:[#allocation123_spill] sm:$0xff] }
0x10c1   : > { %5003 = vadd.xlane.f32.xlu1 %v11255_v31  ;;  %v12936_v31 = vld [vmem:[#allocation57_spill] sm:$0xff] }
0x10c3   : > { %3654 = vadd.xlane.f32.xlu0 %v12928_v53  ;;  %v12949_v53 = vld [vmem:[#allocation105_spill] sm:$0xff] }
0x10c5   : > { %3656 = vadd.xlane.f32.xlu1 %v12929_v21 }
0x10c7   : > { %5472 = vadd.xlane.f32.xlu0 %v11642_v23  ;;  %v12938_v23 = vld [vmem:[#allocation102_spill] sm:$0xff] }
0x10c9   : > { %5474 = vadd.xlane.f32.xlu1 %v11646_v14  ;;  %v12939_v14 = vld [vmem:[#allocation103_spill] sm:$0xff] }
0x10cb   : > { %2745 = vadd.xlane.f32.xlu0 %v12930_v49 }
0x10cd   : > { %2747 = vadd.xlane.f32.xlu1 %v12931_v54 }
0x10cf   : > { %4563 = vadd.xlane.f32.xlu0 %v12932_v16 }
0x10d1   : > { %4565 = vadd.xlane.f32.xlu1 %v12933_v44 }
0x10d3   : > { %4096 = vadd.xlane.f32.xlu0 %v12934_v22 }
0x10d5   : > { %4098 = vadd.xlane.f32.xlu1 %v12935_v58 }
0x10d7   : > { %3187 = vadd.xlane.f32.xlu0 %v12936_v31 }
0x10d9   : > { %3189 = vadd.xlane.f32.xlu1 %v12937_v15 }
0x10db   : > { %5005 = vadd.xlane.f32.xlu0 %v11266_v57  ;;  %v12945_v57 = vld [vmem:[#allocation127_spill] sm:$0xff] }
0x10dd   : > { %5007 = vadd.xlane.f32.xlu1 %v11275_v51  ;;  %v12946_v51 = vld [vmem:[#allocation61_spill] sm:$0xff] }
0x10df   : > { %3658 = vadd.xlane.f32.xlu0 %v12938_v23 }
0x10e1   : > { %3660 = vadd.xlane.f32.xlu1 %v12939_v14 }
0x10e3   : > { %5476 = vadd.xlane.f32.xlu0 %v11656_v36 }
0x10e5   : > { %5478 = vadd.xlane.f32.xlu1 %v11660_v40 }
0x10e7   : > { %2749 = vadd.xlane.f32.xlu0 %v12940_v8 }
0x10e9   : > { %2751 = vadd.xlane.f32.xlu1 %v12941_v28 }
0x10eb   : > { %4567 = vadd.xlane.f32.xlu0 %v12942_v1  ;;  %v12952_v1 = vld [vmem:[#allocation168_spill] sm:$0xff] }
0x10ed   : > { %4569 = vadd.xlane.f32.xlu1 %v12943_v43 }
0x10ef   : > { %4100 = vadd.xlane.f32.xlu0 %v12944_v18 }
0x10f1   : > { %4102 = vadd.xlane.f32.xlu1 %v12945_v57 }
0x10f3   : > { %3191 = vadd.xlane.f32.xlu0 %v12946_v51 }
0x10f5   : > { %3193 = vadd.xlane.f32.xlu1 %v12947_v5 }
0x10f7   : > { %5009 = vadd.xlane.f32.xlu0 %v11284_v27 }
0x10f8   : > { %v5747_v36 = vpop.xlane.xlu0 %5746 }
0x10f9   : > { %v5778_v40 = vmax.f32 %v11582_v41, %v5747_v36  ;;  %5011 = vadd.xlane.f32.xlu1 %v11296_v24 }
0x10fa   : > { %v5749_v56 = vpop.xlane.xlu1 %5748 }
0x10fb   : > { %v5794_v33 = vsub.f32 %v11582_v41, %v5778_v40  ;;  %v5842_v63 = vsub.f32 %v11737_v52, %v5778_v40  ;;  %v5779_v3 = vmax.f32 %v11586_v32, %v5749_v56  ;;  %3662 = vadd.xlane.f32.xlu0 %v12948_v45  ;;  %v12953_v40 = vld [vmem:[#allocation169_spill] sm:$0xff] }
0x10fc   : > { %v5751_v20 = vpop.xlane.xlu0 %5750 }
0x10fd   : > { %v5810_v6 = vmul.f32 1.442695, %v5794_v33  ;;  %v5795_v4 = vsub.f32 %v11586_v32, %v5779_v3  ;;  %v5843_v27 = vsub.f32 %v11740_v61, %v5779_v3  ;;  %3664 = vadd.xlane.f32.xlu1 %v12949_v53  ;;  %v5858_v21 = vmul.f32 1.442695, %v5842_v63 }
0x10fe   : > { %v5780_v24 = vmax.f32 %v11590_v42, %v5751_v20  ;;  %v5753_v49 = vpop.xlane.xlu1 %5752  ;;  %v12954_v20 = vld [vmem:[#allocation129_spill] sm:$0xff] }
0x10ff   : > { %8600 = vpow2.f32 %v5810_v6  ;;  %v5812_v41 = vmul.f32 1.442695, %v5795_v4  ;;  %v5860_v54 = vmul.f32 1.442695, %v5843_v27  ;;  %v5781_v52 = vmax.f32 %v11594_v29, %v5753_v49  ;;  %5480 = vadd.xlane.f32.xlu0 %v11670_v9  ;;  %v12955_v49 = vld [vmem:[#allocation131_spill] sm:$0xff] }
0x1100   : > { %v5796_v16 = vsub.f32 %v11590_v42, %v5780_v24  ;;  %v5844_v44 = vsub.f32 %v11743_v2, %v5780_v24  ;;  %v11867_v32 = vpop.xlane.xlu0 %3646  ;;  %v12950_v42 = vld [vmem:[#allocation40_spill] sm:$0xff] }
0x1101   : > { %8602 = vpow2.f32 %v5812_v41  ;;  %v5797_v61 = vsub.f32 %v11594_v29, %v5781_v52  ;;  %v5845_v22 = vsub.f32 %v11746_v55, %v5781_v52  ;;  %5482 = vadd.xlane.f32.xlu1 %v11672_v34  ;;  %v12951_v29 = vld [vmem:[#allocation41_spill] sm:$0xff] }
0x1102   : > { %8604 = vpow2.f32 %v5860_v54  ;;  %v5814_v58 = vmul.f32 1.442695, %v5796_v16  ;;  %v5862_v31 = vmul.f32 1.442695, %v5844_v44  ;;  %v11872_v15 = vpop.xlane.xlu1 %3648 }
0x1103   : > { %8606 = vpow2.f32 %v5858_v21  ;;  %v5816_v9 = vmul.f32 1.442695, %v5797_v61  ;;  %v5864_v23 = vmul.f32 1.442695, %v5845_v22  ;;  %2753 = vadd.xlane.f32.xlu0 %v12950_v42 }
0x1104   : > { %8608 = vpow2.f32 %v5814_v58  ;;  %v5759_v2 = vpop.xlane.xlu0 %5758 }
0x1105   : > { %8610 = vpow2.f32 %v5862_v31  ;;  %v5784_v14 = vmax.f32 %v11606_v0, %v5759_v2  ;;  %2755 = vadd.xlane.f32.xlu1 %v12951_v29 }
0x1106   : > { %8612 = vpow2.f32 %v5816_v9  ;;  %v5761_v55 = vpop.xlane.xlu1 %5760  ;;  %v12957_v9 = vld [vmem:[#allocation67_spill] sm:$0xff] }
0x1107   : > { %8614 = vpow2.f32 %v5864_v23  ;;  %v5800_v34 = vsub.f32 %v11606_v0, %v5784_v14  ;;  %v5848_v8 = vsub.f32 %v11751_v62, %v5784_v14  ;;  %v5785_v28 = vmax.f32 %v11610_v35, %v5761_v55  ;;  %4571 = vadd.xlane.f32.xlu0 %v12952_v1  ;;  %v8249_v23 = vld [vmem:[#allocation9] sm:$0xff]   ;;  %v8250_v14 = vld [vmem:[#allocation9 + $0x48] sm:$0xff]  }
0x1108   : > { %v5755_v43 = vpop.xlane.xlu0 %5754 }
0x1109   : > { %v8601_v18 = vpop.eup %8600  ;;  %v5822_v57 = vmul.f32 1.442695, %v5800_v34  ;;  %v5870_v51 = vmul.f32 1.442695, %v5848_v8  ;;  %v5801_v5 = vsub.f32 %v11610_v35, %v5785_v28  ;;  %v5849_v36 = vsub.f32 %v11757_v48, %v5785_v28  ;;  %4573 = vadd.xlane.f32.xlu1 %v12953_v40  ;;  %v12958_v34 = vld [vmem:[#allocation217_spill] sm:$0xff]  ;;  %v12959_v28 = vld [vmem:[#allocation186_spill] sm:$0xff] }
0x110a   : > { %v5782_v56 = vmax.f32 %v11598_v12, %v5755_v43  ;;  %v5757_v33 = vpop.xlane.xlu1 %5756  ;;  %v11886_v0 = vmul.f32 %v8601_v18, %v11704_v50 }
0x110b   : > { %v8603_v62 = vpop.eup %8602  ;;  %8616 = vpow2.f32 %v5822_v57  ;;  %v5824_v63 = vmul.f32 1.442695, %v5801_v5  ;;  %v5872_v3 = vmul.f32 1.442695, %v5849_v36  ;;  %v5783_v45 = vmax.f32 %v11602_v39, %v5757_v33  ;;  %4104 = vadd.xlane.f32.xlu0 %v12954_v20  ;;  %v12960_v36 = vld [vmem:[#allocation218_spill] sm:$0xff] }
0x110c   : > { %v11890_v6 = vpop.eup %8604  ;;  %8618 = vpow2.f32 %v5870_v51  ;;  %v5798_v35 = vsub.f32 %v11598_v12, %v5782_v56  ;;  %v5846_v48 = vsub.f32 %v11761_v59, %v5782_v56  ;;  %v5465_v4 = vpop.xlane.xlu0 %5464  ;;  %v11895_v27 = vmul.f32 %v8603_v62, %v11708_v17  ;;  %v12961_v56 = vld [vmem:[#allocation106_spill] sm:$0xff] }
0x110d   : > { %v11897_v50 = vpop.eup %8606  ;;  %8620 = vpow2.f32 %v5824_v63  ;;  %v5799_v53 = vsub.f32 %v11602_v39, %v5783_v45  ;;  %v5847_v21 = vsub.f32 %v11764_v25, %v5783_v45  ;;  %v11901_v24 = vmul.f32 %v8601_v18, %v5465_v4  ;;  %4106 = vadd.xlane.f32.xlu1 %v12955_v49  ;;  %v12956_v25 = vld [vmem:[#allocation65_spill] sm:$0xff]  ;;  %v8252_v18 = vld [vmem:[#allocation9 + $0x50] sm:$0xff]   ;;  %v12965_v49 = vld [vmem:[#allocation215_spill] sm:$0xff] }
0x110e   : > { %v11904_v41 = vpop.eup %8608  ;;  %8622 = vpow2.f32 %v5872_v3  ;;  %v5818_v12 = vmul.f32 1.442695, %v5798_v35  ;;  %v5866_v59 = vmul.f32 1.442695, %v5846_v48  ;;  %v5467_v54 = vpop.xlane.xlu1 %5466  ;;  %v5970_v17 = vpack.c.bf16 %v11890_v6, %v11897_v50  ;;  %v12962_v63 = vld [vmem:[#allocation230_spill] sm:$0xff]  ;;  %v12963_v48 = vld [vmem:[#allocation107_spill] sm:$0xff] }
0x110f   : > { %v11908_v52 = vpop.eup %8610  ;;  %v5820_v16 = vmul.f32 1.442695, %v5799_v53  ;;  %v5868_v44 = vmul.f32 1.442695, %v5847_v21  ;;  %v11910_v39 = vmul.f32 %v8603_v62, %v5467_v54  ;;  %3195 = vadd.xlane.f32.xlu0 %v12956_v25  ;;  %v11915_v61 = vmul.f32 %v11904_v41, %v11702_v46  ;;  %v12964_v53 = vld [vmem:[#allocation112_spill] sm:$0xff] }
0x1110   : > { %v11917_v22 = vpop.eup %8612  ;;  %8624 = vpow2.f32 %v5818_v12  ;;  %7922 = vmatprep.mubr.bf16.mxu0 %v5970_v17  ;;  %v11919_v58 = vpop.xlane.xlu0 %2737  ;;  %v4072_v21 = vmul.f32 %v12964_v53, %v11867_v32  ;;  %v8254_v17 = vld [vmem:[#allocation9 + $0x58] sm:$0xff]   ;;  %v12966_v25 = vld [vmem:[#allocation216_spill] sm:$0xff] }
0x1111   : > { %v11921_v31 = vpop.eup %8614  ;;  %8626 = vpow2.f32 %v5866_v59  ;;  %3197 = vadd.xlane.f32.xlu1 %v12957_v9  ;;  %v11926_v42 = vmul.f32 %v11917_v22, %v11706_v60  ;;  %v8251_v60 = vld [vmem:[#allocation9 + $0x8] sm:$0xff]  }
0x1112   : > { %8628 = vpow2.f32 %v5820_v16  ;;  %v11928_v2 = vpop.xlane.xlu1 %2739  ;;  %v5971_v46 = vpack.c.bf16 %v11921_v31, %v11908_v52 }
0x1113   : > { %8630 = vpow2.f32 %v5868_v44  ;;  %5013 = vadd.xlane.f32.xlu0 %v11308_v30 }
0x1114   : > { %7923 = vmatmul.mubr.bf16.vlgmr.msra.gmra.mrb[112].mxu0 %v5971_v46  ;;  %v5767_v29 = vpop.xlane.xlu0 %5766 }
0x1115   : > { %v11933_v55 = vpop.eup %8616  ;;  %v5788_v8 = vmax.f32 %v12958_v34, %v5767_v29  ;;  %5015 = vadd.xlane.f32.xlu1 %v12959_v28  ;;  %7299 = vmatpush3.bf16.msra.mxu0 %v8249_v23  ;;  %v12967_v23 = vld [vmem:[#allocation223_spill] sm:$0xff] }
0x1116   : > { %v11937_v1 = vpop.eup %8618  ;;  %v5769_v43 = vpop.xlane.xlu1 %5768  ;;  %7300 = vmatprep.subr.bf16.mxu0 %v8250_v14  ;;  %v11941_v57 = vmul.f32 %v11933_v55, %v11710_v10 }
0x1117   : > { %v11943_v30 = vpop.eup %8620  ;;  %v5804_v51 = vsub.f32 %v12958_v34, %v5788_v8  ;;  %v5852_v5 = vsub.f32 %v11771_v47, %v5788_v8  ;;  %v5789_v40 = vmax.f32 %v12960_v36, %v5769_v43  ;;  %3666 = vadd.xlane.f32.xlu0 %v12961_v56  ;;  %v8253_v47 = vld [vmem:[#allocation9 + $0x10] sm:$0xff]   ;;  %v12968_v34 = vld [vmem:[#allocation229_spill] sm:$0xff] }
0x1118   : > { %v11949_v33 = vpop.eup %8622  ;;  %v5763_v62 = vpop.xlane.xlu0 %5762  ;;  %v11953_v3 = vmul.f32 %v11943_v30, %v12962_v63 }
0x1119   : > { %v5830_v45 = vmul.f32 1.442695, %v5804_v51  ;;  %v5878_v10 = vmul.f32 1.442695, %v5852_v5  ;;  %v5805_v20 = vsub.f32 %v12960_v36, %v5789_v40  ;;  %v5853_v35 = vsub.f32 %v11777_v26, %v5789_v40  ;;  %3668 = vadd.xlane.f32.xlu1 %v12963_v48  ;;  %7301 = vmatpush3.bf16.msra.mxu0 %v8251_v60  ;;  %v12970_v5 = vld [vmem:[#allocation224_spill] sm:$0xff]  ;;  %v12973_v48 = vld [vmem:[#allocation231_spill] sm:$0xff] }
0x111a   : > { %v11958_v4 = vpop.eup %8624  ;;  %v5786_v12 = vmax.f32 %v12965_v49, %v5763_v62  ;;  %v5765_v59 = vpop.xlane.xlu1 %5764  ;;  %v5973_v54 = vpack.c.bf16 %v11949_v33, %v11937_v1  ;;  %7302 = vmatprep.subr.bf16.mxu0 %v8252_v18  ;;  %v12969_v18 = vld [vmem:[#allocation176_spill] sm:$0xff]  ;;  %v8255_v62 = vld [vmem:[#allocation9 + $0x18] sm:$0xff]  }
0x111b   : > { %v11965_v16 = vpop.eup %8626  ;;  %8632 = vpow2.f32 %v5830_v45  ;;  %v5832_v26 = vmul.f32 1.442695, %v5805_v20  ;;  %v5880_v44 = vmul.f32 1.442695, %v5853_v35  ;;  %v5787_v9 = vmax.f32 %v12966_v25, %v5765_v59  ;;  %5484 = vadd.xlane.f32.xlu0 %v12967_v23  ;;  %v8256_v35 = vld [vmem:[#allocation9 + $0x60] sm:$0xff]   ;;  %v8258_v23 = vld [vmem:[#allocation9 + $0x68] sm:$0xff]  }
0x111c   : > { %v11969_v46 = vpop.eup %8628  ;;  %8634 = vpow2.f32 %v5878_v10  ;;  %v5802_v32 = vsub.f32 %v12965_v49, %v5786_v12  ;;  %v5850_v14 = vsub.f32 %v11781_v37, %v5786_v12  ;;  %v4556_v29 = vpop.xlane.xlu0 %4555  ;;  %v11975_v8 = vmul.f32 %v11958_v4, %v12968_v34  ;;  %v12971_v10 = vld [vmem:[#allocation177_spill] sm:$0xff]  ;;  %v12974_v49 = vld [vmem:[#allocation114_spill] sm:$0xff] }
0x111d   : > { %v11977_v28 = vpop.eup %8630  ;;  %8636 = vpow2.f32 %v5832_v26  ;;  %v5803_v60 = vsub.f32 %v12966_v25, %v5787_v9  ;;  %v5851_v43 = vsub.f32 %v11784_v11, %v5787_v9  ;;  %v11982_v51 = vmul.f32 %v12969_v18, %v4556_v29  ;;  %5486 = vadd.xlane.f32.xlu1 %v12970_v5  ;;  %7303 = vmatpush3.bf16.msra.mxu0 %v8253_v47  ;;  %v12972_v11 = vld [vmem:[#allocation42_spill] sm:$0xff] }
0x111e   : > { %8638 = vpow2.f32 %v5880_v44  ;;  %v5826_v37 = vmul.f32 1.442695, %v5802_v32  ;;  %v5874_v36 = vmul.f32 1.442695, %v5850_v14  ;;  %v4558_v40 = vpop.xlane.xlu1 %4557  ;;  %v5972_v56 = vpack.c.bf16 %v11977_v28, %v11965_v16  ;;  %7304 = vmatprep.subr.bf16.mxu0 %v8254_v17  ;;  %v12975_v17 = vld [vmem:[#allocation43_spill] sm:$0xff]  ;;  %v8257_v44 = vld [vmem:[#allocation9 + $0x20] sm:$0xff]  }
0x111f   : > { %v5828_v63 = vmul.f32 1.442695, %v5803_v60  ;;  %v5876_v45 = vmul.f32 1.442695, %v5851_v43  ;;  %v11988_v20 = vmul.f32 %v12971_v10, %v4558_v40  ;;  %2757 = vadd.xlane.f32.xlu0 %v12972_v11  ;;  %v11993_v47 = vmul.f32 %v11969_v46, %v12973_v48  ;;  %v12976_v9 = vld [vmem:[#allocation170_spill] sm:$0xff]  ;;  %v8259_v60 = vld [vmem:[#allocation9 + $0x28] sm:$0xff]  }
0x1120   : > { %8640 = vpow2.f32 %v5826_v37  ;;  %7926 = vmatprep.mubr.bf16.mxu0 %v5972_v56  ;;  %v4089_v53 = vpop.xlane.xlu0 %4088  ;;  %v4073_v12 = vmul.f32 %v12974_v49, %v11872_v15  ;;  %v12977_v15 = vld [vmem:[#allocation221_spill] sm:$0xff]  ;;  %v12979_v43 = vld [vmem:[#allocation232_spill] sm:$0xff]  ;;  %v12981_v40 = vld [vmem:[#allocation222_spill] sm:$0xff] }
0x1121   : > { %8642 = vpow2.f32 %v5874_v36  ;;  %7927 = vmatmul.mubr.bf16.gmra.mrb[116].mxu0 %v5973_v54  ;;  %v4120_v59 = vadd.f32 %v4089_v53, %v4072_v21  ;;  %2759 = vadd.xlane.f32.xlu1 %v12975_v17  ;;  %v12978_v21 = vld [vmem:[#allocation171_spill] sm:$0xff]  ;;  %v12983_v11 = vld [vmem:[#allocation234_spill] sm:$0xff]  ;;  %v12986_v17 = vld [vmem:[#allocation48_spill] sm:$0xff] }
0x1122   : > { %8644 = vpow2.f32 %v5828_v63  ;;  %v4091_v26 = vpop.xlane.xlu1 %4090  ;;  %7305 = vmatpush3.bf16.msra.mxu0 %v8255_v62  ;;  %v12982_v62 = vld [vmem:[#allocation133_spill] sm:$0xff]  ;;  %v8260_v63 = vld [vmem:[#allocation9 + $0x70] sm:$0xff]  }
0x1123   : > { %8646 = vpow2.f32 %v5876_v45  ;;  %v4121_v25 = vadd.f32 %v4091_v26, %v4073_v12  ;;  %4575 = vadd.xlane.f32.xlu0 %v12976_v9  ;;  %7306 = vmatprep.subr.bf16.mxu0 %v8256_v35  ;;  %v3163_v26 = vmul.f32 %v12986_v17, %v11919_v58  ;;  %v12988_v9 = vld [vmem:[#allocation219_spill] sm:$0xff] }
0x1124   : > { %8648 = vrcp.f32 %v4120_v59  ;;  %v5775_v32 = vpop.xlane.xlu0 %5774  ;;  %v8262_v58 = vld [vmem:[#allocation9 + $0x78] sm:$0xff]  }
0x1125   : > { %v11999_v14 = vpop.eup %8632  ;;  %8650 = vrcp.f32 %v4121_v25  ;;  %v5792_v54 = vmax.f32 %v12977_v15, %v5775_v32  ;;  %4577 = vadd.xlane.f32.xlu1 %v12978_v21 }
0x1126   : > { %v12003_v29 = vpop.eup %8634  ;;  %v5777_v34 = vpop.xlane.xlu1 %5776  ;;  %7307 = vmatpush3.bf16.msra.mxu0 %v8257_v44  ;;  %v12007_v18 = vmul.f32 %v11999_v14, %v12979_v43  ;;  %v12987_v44 = vld [vmem:[#allocation50_spill] sm:$0xff]  ;;  %v12989_v43 = vld [vmem:[#allocation220_spill] sm:$0xff] }
0x1127   : > { %v12009_v5 = vpop.eup %8636  ;;  %v5808_v37 = vsub.f32 %v12977_v15, %v5792_v54  ;;  %v5856_v36 = vsub.f32 %v11791_v7, %v5792_v54  ;;  %v5793_v56 = vmax.f32 %v12981_v40, %v5777_v34  ;;  %4108 = vadd.xlane.f32.xlu0 %v12982_v62  ;;  %7308 = vmatprep.subr.bf16.mxu0 %v8258_v23  ;;  %v12985_v7 = vld [vmem:[#allocation135_spill] sm:$0xff]  ;;  %v8261_v54 = vld [vmem:[#allocation9 + $0x30] sm:$0xff]   ;;  %v12991_v62 = vld [vmem:[#allocation233_spill] sm:$0xff] }
0x1128   : > { %12980 = vst [vmem:[#allocation96_spill] sm:$0xff] %v12007_v18  ;;  %v12015_v45 = vpop.eup %8638  ;;  %v5771_v10 = vpop.xlane.xlu0 %5770  ;;  %v12019_v35 = vmul.f32 %v12009_v5, %v12983_v11  ;;  %v3164_v25 = vmul.f32 %v12987_v44, %v11928_v2  ;;  %v13025_v18 = vld [vmem:[#allocation137_spill] sm:$0xff] }
0x1129   : > { %v5838_v48 = vmul.f32 1.442695, %v5808_v37  ;;  %v5886_v53 = vmul.f32 1.442695, %v5856_v36  ;;  %v5809_v49 = vsub.f32 %v12981_v40, %v5793_v56  ;;  %v5857_v12 = vsub.f32 %v11797_v38, %v5793_v56  ;;  %4110 = vadd.xlane.f32.xlu1 %v12985_v7  ;;  %v12990_v36 = vld [vmem:[#allocation69_spill] sm:$0xff] }
0x112a   : > { %12984 = vst [vmem:[#allocation97_spill] sm:$0xff] %v12019_v35  ;;  %v12024_v59 = vpop.eup %8640  ;;  %v5790_v23 = vmax.f32 %v12988_v9, %v5771_v10  ;;  %v5773_v32 = vpop.xlane.xlu1 %5772  ;;  %v5975_v15 = vpack.c.bf16 %v12015_v45, %v12003_v29  ;;  %7309 = vmatpush3.bf16.msra.mxu0 %v8259_v60  ;;  %v13024_v35 = vld [vmem:[#allocation179_spill] sm:$0xff] }
0x112b   : > { %v12033_v21 = vpop.eup %8642  ;;  %8652 = vpow2.f32 %v5838_v48  ;;  %v5840_v38 = vmul.f32 1.442695, %v5809_v49  ;;  %v5888_v34 = vmul.f32 1.442695, %v5857_v12  ;;  %v5791_v37 = vmax.f32 %v12989_v43, %v5773_v32  ;;  %3199 = vadd.xlane.f32.xlu0 %v12990_v36  ;;  %7310 = vmatprep.subr.bf16.mxu0 %v8260_v63  ;;  %v12993_v12 = vld [vmem:[#allocation71_spill] sm:$0xff]  ;;  %v12994_v36 = vld [vmem:[#allocation188_spill] sm:$0xff] }
0x112c   : > { %v12037_v2 = vpop.eup %8644  ;;  %8654 = vpow2.f32 %v5886_v53  ;;  %v5806_v40 = vsub.f32 %v12988_v9, %v5790_v23  ;;  %v5854_v56 = vsub.f32 %v11801_v13, %v5790_v23  ;;  %v3180_v60 = vpop.xlane.xlu0 %3179  ;;  %v12043_v10 = vmul.f32 %v12024_v59, %v12991_v62  ;;  %v8263_v9 = vld [vmem:[#allocation9 + $0x38] sm:$0xff]   ;;  %v12999_v62 = vld [vmem:[#allocation190_spill] sm:$0xff] }
0x112d   : > { %v12045_v11 = vpop.eup %8646  ;;  %8656 = vpow2.f32 %v5840_v38  ;;  %v5807_v48 = vsub.f32 %v12989_v43, %v5791_v37  ;;  %v5855_v63 = vsub.f32 %v11804_v19, %v5791_v37  ;;  %v3211_v49 = vadd.f32 %v3180_v60, %v3163_v26  ;;  %3201 = vadd.xlane.f32.xlu1 %v12993_v12  ;;  %v12995_v26 = vld [vmem:[#allocation145_spill] sm:$0xff]  ;;  %v12996_v37 = vld [vmem:[#allocation147_spill] sm:$0xff] }
0x112e   : > { %12992 = vst [vmem:[#allocation32_spill] sm:$0xff] %v12043_v10  ;;  %v8649_v53 = vpop.eup %8648  ;;  %8658 = vpow2.f32 %v5888_v34  ;;  %v5834_v7 = vmul.f32 1.442695, %v5806_v40  ;;  %v5882_v17 = vmul.f32 1.442695, %v5854_v56  ;;  %v3182_v13 = vpop.xlane.xlu1 %3181  ;;  %v5974_v44 = vpack.c.bf16 %v12045_v11, %v12033_v21  ;;  %7311 = vmatpush3.bf16.msra.mxu0 %v8261_v54  ;;  %v12997_v56 = vld [vmem:[#allocation235_spill] sm:$0xff] }
0x112f   : > { %v8651_v23 = vpop.eup %8650  ;;  %v5836_v32 = vmul.f32 1.442695, %v5807_v48  ;;  %v5884_v38 = vmul.f32 1.442695, %v5855_v63  ;;  %8660 = vrcp.f32 %v3211_v49  ;;  %v3212_v43 = vadd.f32 %v3182_v13, %v3164_v25  ;;  %5017 = vadd.xlane.f32.xlu0 %v12994_v36  ;;  %7312 = vmatprep.subr.bf16.mxu0 %v8262_v58  ;;  %v13000_v63 = vld [vmem:[#allocation108_spill] sm:$0xff]  ;;  %v13009_v36 = vld [vmem:[#allocation226_spill] sm:$0xff] }
0x1130   : > { %8662 = vpow2.f32 %v5834_v7  ;;  %7930 = vmatprep.mubr.bf16.mxu0 %v5974_v44  ;;  %v4998_v19 = vpop.xlane.xlu0 %4997  ;;  %v4289_v34 = vmul.f32 %v8649_v53, %v12995_v26  ;;  %v4290_v40 = vmul.f32 %v8651_v23, %v12996_v37  ;;  %v12057_v60 = vmul.f32 %v12037_v2, %v12997_v56  ;;  %v13002_v53 = vld [vmem:[#allocation109_spill] sm:$0xff]  ;;  %v13003_v7 = vld [vmem:[#allocation236_spill] sm:$0xff]  ;;  %v13007_v23 = vld [vmem:[#allocation238_spill] sm:$0xff] }
0x1131   : > { %8664 = vpow2.f32 %v5882_v17  ;;  %7931 = vmatmul.mubr.bf16.gmra.mrb[120].mxu0 %v5975_v15  ;;  %v5029_v54 = vadd.f32 %v4998_v19, %v11982_v51  ;;  %5019 = vadd.xlane.f32.xlu1 %v12999_v62  ;;  %v13010_v26 = vld [vmem:[#allocation81_spill] sm:$0xff] }
0x1132   : > { %12998 = vst [vmem:[#allocation34_spill] sm:$0xff] %v12057_v60  ;;  %8666 = vpow2.f32 %v5836_v32  ;;  %v5000_v25 = vpop.xlane.xlu1 %4999  ;;  %v4305_v58 = vpack.c.bf16 %v4290_v40, %v4289_v34  ;;  %7313 = vmatpush3.bf16.msra.mxu0 %v8263_v9  ;;  %v13012_v62 = vld [vmem:[#allocation237_spill] sm:$0xff] }
0x1133   : > { %8668 = vpow2.f32 %v5884_v38  ;;  %v5030_v48 = vadd.f32 %v5000_v25, %v11988_v20  ;;  %3670 = vadd.xlane.f32.xlu0 %v13000_v63  ;;  %v13006_v20 = vld [vmem:[#allocation225_spill] sm:$0xff] }
0x1134   : > { %8670 = vrcp.f32 %v3212_v43  ;;  %v3651_v49 = vpop.xlane.xlu0 %3650 }
0x1135   : > { %v12063_v12 = vpop.eup %8652  ;;  %8672 = vrcp.f32 %v5029_v54  ;;  %3672 = vadd.xlane.f32.xlu1 %v13002_v53  ;;  %v13011_v54 = vld [vmem:[#allocation44_spill] sm:$0xff]  ;;  %v13014_v53 = vld [vmem:[#allocation45_spill] sm:$0xff] }
0x1136   : > { %13001 = vst [vmem:[#allocation160_spill] sm:$0xff] %v12063_v12  ;;  %v12066_v15 = vpop.eup %8654  ;;  %8674 = vrcp.f32 %v5030_v48  ;;  %v3653_v51 = vpop.xlane.xlu1 %3652  ;;  %v12070_v17 = vmul.f32 %v12063_v12, %v13003_v7  ;;  %v13015_v7 = vld [vmem:[#allocation239_spill] sm:$0xff]  ;;  %v13022_v12 = vld [vmem:[#allocation173_spill] sm:$0xff] }
0x1137   : > { %v12072_v13 = vpop.eup %8656  ;;  %5488 = vadd.xlane.f32.xlu0 %v13006_v20 }
0x1138   : > { %13004 = vst [vmem:[#allocation161_spill] sm:$0xff] %v12070_v17  ;;  %13005 = vst [vmem:[#allocation113_spill] sm:$0xff] %v12072_v13  ;;  %v12075_v44 = vpop.eup %8658  ;;  %v5469_v9 = vpop.xlane.xlu0 %5468  ;;  %v12079_v32 = vmul.f32 %v12072_v13, %v13007_v23  ;;  %v13021_v17 = vld [vmem:[#allocation178_spill] sm:$0xff] }
0x1139   : > { %v8661_v38 = vpop.eup %8660  ;;  %v12082_v43 = vmul.f32 %v11904_v41, %v5469_v9  ;;  %5490 = vadd.xlane.f32.xlu1 %v13009_v36  ;;  %v13017_v36 = vld [vmem:[#allocation83_spill] sm:$0xff] }
0x113a   : > { %13008 = vst [vmem:[#allocation115_spill] sm:$0xff] %v12079_v32  ;;  %v12085_v19 = vpop.eup %8662  ;;  %v3380_v34 = vmul.f32 %v8661_v38, %v13010_v26  ;;  %v5471_v37 = vpop.xlane.xlu1 %5470  ;;  %v13019_v32 = vld [vmem:[#allocation200_spill] sm:$0xff] }
0x113b   : > { %v12088_v40 = vpop.eup %8664  ;;  %v12091_v56 = vmul.f32 %v11917_v22, %v5471_v37  ;;  %2761 = vadd.xlane.f32.xlu0 %v13011_v54  ;;  %v12096_v25 = vmul.f32 %v12085_v19, %v13012_v62  ;;  %v13018_v37 = vld [vmem:[#allocation172_spill] sm:$0xff]  ;;  %v5977_v54 = vpack.c.bf16 %v12075_v44, %v12066_v15 }
0x113c   : > { %v12098_v41 = vpop.eup %8666  ;;  %v2742_v48 = vpop.xlane.xlu0 %2741 }
0x113d   : > { %13013 = vst [vmem:[#allocation49_spill] sm:$0xff] %v12096_v25  ;;  %v12100_v63 = vpop.eup %8668  ;;  %2763 = vadd.xlane.f32.xlu1 %v13014_v53  ;;  %v12105_v20 = vmul.f32 %v12098_v41, %v13015_v7 }
0x113e   : > { %v8671_v9 = vpop.eup %8670  ;;  %v2744_v22 = vpop.xlane.xlu1 %2743  ;;  %v5976_v23 = vpack.c.bf16 %v12100_v63, %v12088_v40 }
0x113f   : > { %13016 = vst [vmem:[#allocation51_spill] sm:$0xff] %v12105_v20  ;;  %v8673_v38 = vpop.eup %8672  ;;  %v3381_v26 = vmul.f32 %v8671_v9, %v13017_v36  ;;  %4579 = vadd.xlane.f32.xlu0 %v13018_v37  ;;  %v13020_v20 = vld [vmem:[#allocation202_spill] sm:$0xff]  ;;  %v13023_v37 = vld [vmem:[#allocation116_spill] sm:$0xff] }
0x1140   : > { %v8675_v62 = vpop.eup %8674  ;;  %v12114_v53 = vmul.f32 %v8673_v38, %v13019_v32  ;;  %7934 = vmatprep.mubr.bf16.mxu0 %v5976_v23  ;;  %v4560_v7 = vpop.xlane.xlu0 %4559  ;;  %v4074_v60 = vmul.f32 %v13023_v37, %v3651_v49  ;;  %v13030_v37 = vld [vmem:[#allocation73_spill] sm:$0xff] }
0x1141   : > { %v12117_v25 = vmul.f32 %v8675_v62, %v13020_v20  ;;  %7935 = vmatmul.mubr.bf16.gmra.mrb[124].mxu0 %v5977_v54  ;;  %v4983_v13 = vmul.f32 %v13021_v17, %v4560_v7  ;;  %4581 = vadd.xlane.f32.xlu1 %v13022_v12  ;;  %v3396_v9 = vpack.c.bf16 %v3381_v26, %v3380_v34  ;;  %v13026_v20 = vld [vmem:[#allocation118_spill] sm:$0xff]  ;;  %v13027_v62 = vld [vmem:[#allocation139_spill] sm:$0xff]  ;;  %v13028_v12 = vld [vmem:[#allocation52_spill] sm:$0xff] }
0x1142   : > { %6459 = vmatprep.mubr.bf16.mxu0 %v4305_v58  ;;  %v4562_v36 = vpop.xlane.xlu1 %4561  ;;  %v4075_v38 = vmul.f32 %v13026_v20, %v3653_v51  ;;  %v3165_v34 = vmul.f32 %v13028_v12, %v2742_v48 }
0x1143   : > { %v4984_v10 = vmul.f32 %v13024_v35, %v4562_v36  ;;  %4112 = vadd.xlane.f32.xlu0 %v13025_v18  ;;  %v5214_v32 = vpack.c.bf16 %v12117_v25, %v12114_v53  ;;  %v13029_v35 = vld [vmem:[#allocation54_spill] sm:$0xff] }
0x1144   : > { %v4093_v23 = vpop.xlane.xlu0 %4092  ;;  %v3166_v26 = vmul.f32 %v13029_v35, %v2744_v22  ;;  %v8264_v22 = vld [vmem:[#allocation9 + $0xc0] sm:$0xff]   ;;  %v8267_v35 = vld [vmem:[#allocation9 + $0x88] sm:$0xff]  }
0x1145   : > { %v4122_v54 = vadd.f32 %v4093_v23, %v4074_v60  ;;  %4114 = vadd.xlane.f32.xlu1 %v13027_v62  ;;  %7362 = vmatprep.subr.bf16.mxu1 %v8264_v22  ;;  %v13033_v62 = vld [vmem:[#allocation192_spill] sm:$0xff]  ;;  %v8268_v22 = vld [vmem:[#allocation9 + $0xd0] sm:$0xff]  }
0x1146   : > { %v4095_v17 = vpop.xlane.xlu1 %4094 }
0x1147   : > { %8676 = vrcp.f32 %v4122_v54  ;;  %v4123_v58 = vadd.f32 %v4095_v17, %v4075_v38  ;;  %5910 = vadd.xlane.f32.xlu0 %v11908_v52  ;;  %v13034_v17 = vld [vmem:[#allocation146_spill] sm:$0xff] }
0x1148   : > { %v3184_v49 = vpop.xlane.xlu0 %3183 }
0x1149   : > { %8678 = vrcp.f32 %v4123_v58  ;;  %6460 = vmatmul.mubr.bf16.vlgmr.msra.gmra.mrb[128].mxu0 %v3396_v9  ;;  %v3213_v18 = vadd.f32 %v3184_v49, %v3165_v34  ;;  %5912 = vadd.xlane.f32.xlu1 %v11921_v31  ;;  %v8265_v9 = vld [vmem:[#allocation9 + $0x80] sm:$0xff]   ;;  %v13031_v31 = vld [vmem:[#allocation75_spill] sm:$0xff]  ;;  %v13035_v58 = vld [vmem:[#allocation194_spill] sm:$0xff] }
0x114a   : > { %v3186_v7 = vpop.xlane.xlu1 %3185  ;;  %7363 = vmatpush3.bf16.msra.mxu1 %v8265_v9  ;;  %v8266_v49 = vld [vmem:[#allocation9 + $0xc8] sm:$0xff]   ;;  %v8269_v9 = vld [vmem:[#allocation9 + $0x90] sm:$0xff]  }
0x114b   : > { %8680 = vrcp.f32 %v3213_v18  ;;  %v3214_v60 = vadd.f32 %v3186_v7, %v3166_v26  ;;  %5906 = vadd.xlane.f32.xlu0 %v11897_v50  ;;  %v13032_v50 = vld [vmem:[#allocation144_spill] sm:$0xff]  ;;  %7364 = vmatprep.subr.bf16.mxu1 %v8266_v49 }
0x114c   : > { %v5002_v51 = vpop.xlane.xlu0 %5001  ;;  %v13036_v7 = vld [vmem:[#allocation80_spill] sm:$0xff] }
0x114d   : > { %8682 = vrcp.f32 %v3214_v60  ;;  %v5031_v48 = vadd.f32 %v5002_v51, %v4983_v13  ;;  %5908 = vadd.xlane.f32.xlu1 %v11890_v6  ;;  %v13041_v49 = vld [vmem:[#allocation120_spill] sm:$0xff] }
0x114e   : > { %v5004_v36 = vpop.xlane.xlu1 %5003  ;;  %7365 = vmatpush3.bf16.msra.mxu1 %v8267_v35 }
0x114f   : > { %8684 = vrcp.f32 %v5031_v48  ;;  %v5032_v52 = vadd.f32 %v5004_v36, %v4984_v10  ;;  %3203 = vadd.xlane.f32.xlu0 %v13030_v37  ;;  %7366 = vmatprep.subr.bf16.mxu1 %v8268_v22 }
0x1150   : > { %v3655_v23 = vpop.xlane.xlu0 %3654 }
0x1151   : > { %v8677_v20 = vpop.eup %8676  ;;  %8686 = vrcp.f32 %v5032_v52  ;;  %3205 = vadd.xlane.f32.xlu1 %v13031_v31  ;;  %v13037_v52 = vld [vmem:[#allocation82_spill] sm:$0xff]  ;;  %v4076_v35 = vmul.f32 %v13041_v49, %v3655_v23  ;;  %v13047_v23 = vld [vmem:[#allocation227_spill] sm:$0xff] }
0x1152   : > { %v3657_v38 = vpop.xlane.xlu1 %3656  ;;  %v4291_v54 = vmul.f32 %v8677_v20, %v13032_v50  ;;  %v13038_v50 = vld [vmem:[#allocation199_spill] sm:$0xff]  ;;  %7367 = vmatpush3.bf16.msra.mxu1 %v8269_v9  ;;  %v13046_v9 = vld [vmem:[#allocation56_spill] sm:$0xff] }
0x1153   : > { %v8679_v13 = vpop.eup %8678  ;;  %5021 = vadd.xlane.f32.xlu0 %v13033_v62 }
0x1154   : > { %v5473_v6 = vpop.xlane.xlu0 %5472  ;;  %v4292_v10 = vmul.f32 %v8679_v13, %v13034_v17  ;;  %v13039_v13 = vld [vmem:[#allocation201_spill] sm:$0xff] }
0x1155   : > { %v8681_v12 = vpop.eup %8680  ;;  %v12140_v34 = vmul.f32 %v11958_v4, %v5473_v6  ;;  %5023 = vadd.xlane.f32.xlu1 %v13035_v58  ;;  %v13040_v6 = vld [vmem:[#allocation180_spill] sm:$0xff] }
0x1156   : > { %v5475_v26 = vpop.xlane.xlu1 %5474  ;;  %v4306_v18 = vpack.c.bf16 %v4292_v10, %v4291_v54  ;;  %v3382_v60 = vmul.f32 %v8681_v12, %v13036_v7  ;;  %v8271_v10 = vld [vmem:[#allocation9 + $0x98] sm:$0xff]  }
0x1157   : > { %v8683_v51 = vpop.eup %8682  ;;  %v12145_v48 = vmul.f32 %v11969_v46, %v5475_v26  ;;  %5918 = vadd.xlane.f32.xlu0 %v11937_v1 }
0x1158   : > { %6467 = vmatprep.mubr.bf16.mxu0 %v4306_v18  ;;  %v2746_v36 = vpop.xlane.xlu0 %2745  ;;  %v3383_v4 = vmul.f32 %v8683_v51, %v13037_v52  ;;  %v13043_v18 = vld [vmem:[#allocation110_spill] sm:$0xff] }
0x1159   : > { %v8685_v37 = vpop.eup %8684  ;;  %5920 = vadd.xlane.f32.xlu1 %v11949_v33  ;;  %v8270_v33 = vld [vmem:[#allocation9 + $0xd8] sm:$0xff]  }
0x115a   : > { %v2748_v20 = vpop.xlane.xlu1 %2747  ;;  %v3397_v31 = vpack.c.bf16 %v3383_v4, %v3382_v60  ;;  %v12151_v54 = vmul.f32 %v8685_v37, %v13038_v50  ;;  %7368 = vmatprep.subr.bf16.mxu1 %v8270_v33  ;;  %v13044_v60 = vld [vmem:[#allocation122_spill] sm:$0xff]  ;;  %v13045_v4 = vld [vmem:[#allocation111_spill] sm:$0xff]  ;;  %v8273_v37 = vld [vmem:[#allocation9 + $0xa0] sm:$0xff]  }
0x115b   : > { %v8687_v46 = vpop.eup %8686  ;;  %5914 = vadd.xlane.f32.xlu0 %v11965_v16  ;;  %v13042_v16 = vld [vmem:[#allocation181_spill] sm:$0xff]  ;;  %7369 = vmatpush3.bf16.msra.mxu1 %v8271_v10  ;;  %v4077_v51 = vmul.f32 %v13044_v60, %v3657_v38  ;;  %v13049_v38 = vld [vmem:[#allocation228_spill] sm:$0xff]  ;;  %v8277_v60 = vld [vmem:[#allocation9 + $0xb0] sm:$0xff]  }
0x115c   : > { %6468 = vmatmul.mubr.bf16.gmra.mrb[132].mxu0 %v3397_v31  ;;  %v4564_v1 = vpop.xlane.xlu0 %4563  ;;  %v12155_v62 = vmul.f32 %v8687_v46, %v13039_v13  ;;  %v3167_v31 = vmul.f32 %v13046_v9, %v2746_v36  ;;  %v8274_v33 = vld [vmem:[#allocation9 + $0xe8] sm:$0xff]  }
0x115d   : > { %v4985_v17 = vmul.f32 %v13040_v6, %v4564_v1  ;;  %5916 = vadd.xlane.f32.xlu1 %v11977_v28  ;;  %v8272_v28 = vld [vmem:[#allocation9 + $0xe0] sm:$0xff]   ;;  %v13048_v1 = vld [vmem:[#allocation58_spill] sm:$0xff]  ;;  %v8275_v10 = vld [vmem:[#allocation9 + $0xa8] sm:$0xff]  }
0x115e   : > { %v4566_v12 = vpop.xlane.xlu1 %4565  ;;  %v5215_v58 = vpack.c.bf16 %v12155_v62, %v12151_v54  ;;  %7370 = vmatprep.subr.bf16.mxu1 %v8272_v28  ;;  %v3168_v13 = vmul.f32 %v13048_v1, %v2748_v20  ;;  %v13114_v54 = vld [vmem:[#allocation140_spill] sm:$0xff] }
0x115f   : > { %v4986_v26 = vmul.f32 %v13042_v16, %v4566_v12  ;;  %3674 = vadd.xlane.f32.xlu0 %v13043_v18  ;;  %7371 = vmatpush3.bf16.msra.mxu1 %v8273_v37  ;;  %v8276_v18 = vld [vmem:[#allocation9 + $0xf0] sm:$0xff]  }
0x1160   : > { %v4097_v7 = vpop.xlane.xlu0 %4096  ;;  %7372 = vmatprep.subr.bf16.mxu1 %v8274_v33  ;;  %v13051_v37 = vld [vmem:[#allocation46_spill] sm:$0xff] }
0x1161   : > { %v4124_v52 = vadd.f32 %v4097_v7, %v4076_v35  ;;  %3676 = vadd.xlane.f32.xlu1 %v13045_v4  ;;  %v13050_v4 = vld [vmem:[#allocation149_spill] sm:$0xff] }
0x1162   : > { %v4099_v22 = vpop.xlane.xlu1 %4098 }
0x1163   : > { %8688 = vrcp.f32 %v4124_v52  ;;  %v4125_v50 = vadd.f32 %v4099_v22, %v4077_v51  ;;  %5492 = vadd.xlane.f32.xlu0 %v13047_v23  ;;  %7373 = vmatpush3.bf16.msra.mxu1 %v8275_v10  ;;  %v13056_v10 = vld [vmem:[#allocation87_spill] sm:$0xff] }
0x1164   : > { %v3188_v46 = vpop.xlane.xlu0 %3187  ;;  %7374 = vmatprep.subr.bf16.mxu1 %v8276_v18 }
0x1165   : > { %8690 = vrcp.f32 %v4125_v50  ;;  %v3215_v6 = vadd.f32 %v3188_v46, %v3167_v31  ;;  %5494 = vadd.xlane.f32.xlu1 %v13049_v38  ;;  %v13053_v50 = vld [vmem:[#allocation47_spill] sm:$0xff]  ;;  %v13054_v46 = vld [vmem:[#allocation85_spill] sm:$0xff]  ;;  %v13055_v38 = vld [vmem:[#allocation174_spill] sm:$0xff] }
0x1166   : > { %v3190_v12 = vpop.xlane.xlu1 %3189 }
0x1167   : > { %8692 = vrcp.f32 %v3215_v6  ;;  %v3216_v49 = vadd.f32 %v3190_v12, %v3168_v13  ;;  %5926 = vadd.xlane.f32.xlu0 %v12003_v29  ;;  %v8278_v29 = vld [vmem:[#allocation9 + $0xf8] sm:$0xff]   ;;  %7375 = vmatpush3.bf16.msra.mxu1 %v8277_v60  ;;  %v13059_v60 = vld [vmem:[#allocation141_spill] sm:$0xff] }
0x1168   : > { %v5006_v36 = vpop.xlane.xlu0 %5005  ;;  %7376 = vmatprep.subr.bf16.mxu1 %v8278_v29 }
0x1169   : > { %8694 = vrcp.f32 %v3216_v49  ;;  %v5033_v35 = vadd.f32 %v5006_v36, %v4985_v17  ;;  %5928 = vadd.xlane.f32.xlu1 %v12015_v45  ;;  %v8279_v17 = vld [vmem:[#allocation9 + $0xb8] sm:$0xff]  }
0x116a   : > { %v5008_v16 = vpop.xlane.xlu1 %5007 }
0x116b   : > { %8696 = vrcp.f32 %v5033_v35  ;;  %v5034_v20 = vadd.f32 %v5008_v16, %v4986_v26  ;;  %5922 = vadd.xlane.f32.xlu0 %v12033_v21  ;;  %v13052_v21 = vld [vmem:[#allocation151_spill] sm:$0xff]  ;;  %7377 = vmatpush3.bf16.msra.mxu1 %v8279_v17  ;;  %v13058_v16 = vld [vmem:[#allocation204_spill] sm:$0xff] }
0x116c   : > { %v3659_v7 = vpop.xlane.xlu0 %3658  ;;  %v13062_v17 = vld [vmem:[#allocation143_spill] sm:$0xff] }
0x116d   : > { %v8689_v51 = vpop.eup %8688  ;;  %8698 = vrcp.f32 %v5034_v20  ;;  %5924 = vadd.xlane.f32.xlu1 %v12045_v11 }
0x116e   : > { %v3661_v52 = vpop.xlane.xlu1 %3660  ;;  %v4293_v28 = vmul.f32 %v8689_v51, %v13050_v4  ;;  %v13060_v51 = vld [vmem:[#allocation206_spill] sm:$0xff] }
0x116f   : > { %v8691_v45 = vpop.eup %8690  ;;  %2765 = vadd.xlane.f32.xlu0 %v13051_v37  ;;  %v13061_v4 = vld [vmem:[#allocation182_spill] sm:$0xff] }
0x1170   : > { %v5477_v26 = vpop.xlane.xlu0 %5476  ;;  %v4294_v22 = vmul.f32 %v8691_v45, %v13052_v21 }
0x1171   : > { %v8693_v9 = vpop.eup %8692  ;;  %v12178_v31 = vmul.f32 %v11933_v55, %v5477_v26  ;;  %2767 = vadd.xlane.f32.xlu1 %v13053_v50  ;;  %v13057_v55 = vld [vmem:[#allocation175_spill] sm:$0xff]  ;;  %v13063_v26 = vld [vmem:[#allocation124_spill] sm:$0xff] }
0x1172   : > { %v5479_v11 = vpop.xlane.xlu1 %5478  ;;  %v4307_v23 = vpack.c.bf16 %v4294_v22, %v4293_v28  ;;  %v3384_v1 = vmul.f32 %v8693_v9, %v13054_v46  ;;  %v4078_v21 = vmul.f32 %v13063_v26, %v3659_v7  ;;  %v13064_v22 = vld [vmem:[#allocation183_spill] sm:$0xff] }
0x1173   : > { %v8695_v13 = vpop.eup %8694  ;;  %v12183_v6 = vmul.f32 %v11943_v30, %v5479_v11  ;;  %4583 = vadd.xlane.f32.xlu0 %v13055_v38  ;;  %v13065_v11 = vld [vmem:[#allocation126_spill] sm:$0xff] }
0x1174   : > { %6475 = vmatprep.mubr.bf16.mxu0 %v4307_v23  ;;  %v2750_v33 = vpop.xlane.xlu0 %2749  ;;  %v3385_v12 = vmul.f32 %v8695_v13, %v13056_v10  ;;  %v4079_v23 = vmul.f32 %v13065_v11, %v3661_v52  ;;  %v13066_v13 = vld [vmem:[#allocation60_spill] sm:$0xff] }
0x1175   : > { %v8697_v49 = vpop.eup %8696  ;;  %4585 = vadd.xlane.f32.xlu1 %v13057_v55  ;;  %v3169_v38 = vmul.f32 %v13066_v13, %v2750_v33  ;;  %v13069_v33 = vld [vmem:[#allocation79_spill] sm:$0xff] }
0x1176   : > { %v2752_v36 = vpop.xlane.xlu1 %2751  ;;  %v3398_v35 = vpack.c.bf16 %v3385_v12, %v3384_v1  ;;  %v12189_v20 = vmul.f32 %v8697_v49, %v13058_v16  ;;  %v13067_v49 = vld [vmem:[#allocation62_spill] sm:$0xff] }
0x1177   : > { %v8699_v18 = vpop.eup %8698  ;;  %4116 = vadd.xlane.f32.xlu0 %v13059_v60  ;;  %v3170_v7 = vmul.f32 %v13067_v49, %v2752_v36  ;;  %v13070_v60 = vld [vmem:[#allocation196_spill] sm:$0xff] }
0x1178   : > { %6476 = vmatmul.mubr.bf16.gmra.mrb[136].mxu0 %v3398_v35  ;;  %v4568_v30 = vpop.xlane.xlu0 %4567  ;;  %v12193_v29 = vmul.f32 %v8699_v18, %v13060_v51  ;;  %v13068_v35 = vld [vmem:[#allocation77_spill] sm:$0xff]  ;;  %v13071_v51 = vld [vmem:[#allocation198_spill] sm:$0xff] }
0x1179   : > { %v4987_v28 = vmul.f32 %v13061_v4, %v4568_v30  ;;  %4118 = vadd.xlane.f32.xlu1 %v13062_v17  ;;  %v13072_v4 = vld [vmem:[#allocation148_spill] sm:$0xff] }
0x117a   : > { %v4570_v45 = vpop.xlane.xlu1 %4569  ;;  %v5216_v37 = vpack.c.bf16 %v12193_v29, %v12189_v20 }
0x117b   : > { %v4988_v9 = vmul.f32 %v13064_v22, %v4570_v45  ;;  %5930 = vadd.xlane.f32.xlu0 %v12088_v40 }
0x117c   : > { %v4101_v50 = vpop.xlane.xlu0 %4100 }
0x117d   : > { %v4126_v46 = vadd.f32 %v4101_v50, %v4078_v21  ;;  %5932 = vadd.xlane.f32.xlu1 %v12100_v63  ;;  %v13073_v21 = vld [vmem:[#allocation150_spill] sm:$0xff] }
0x117e   : > { %v4103_v1 = vpop.xlane.xlu1 %4102 }
0x117f   : > { %8700 = vrcp.f32 %v4126_v46  ;;  %v4127_v10 = vadd.f32 %v4103_v1, %v4079_v23  ;;  %5934 = vadd.xlane.f32.xlu0 %v12066_v15  ;;  %v13074_v23 = vld [vmem:[#allocation84_spill] sm:$0xff] }
0x1180   : > { %v3192_v12 = vpop.xlane.xlu0 %3191 }
0x1181   : > { %8702 = vrcp.f32 %v4127_v10  ;;  %v3217_v55 = vadd.f32 %v3192_v12, %v3169_v38  ;;  %5936 = vadd.xlane.f32.xlu1 %v12075_v44  ;;  %v13075_v10 = vld [vmem:[#allocation86_spill] sm:$0xff] }
0x1182   : > { %v3194_v40 = vpop.xlane.xlu1 %3193 }
0x1183   : > { %8704 = vrcp.f32 %v3217_v55  ;;  %v3218_v52 = vadd.f32 %v3194_v40, %v3170_v7  ;;  %3207 = vadd.xlane.f32.xlu0 %v13068_v35  ;;  %v13076_v40 = vld [vmem:[#allocation203_spill] sm:$0xff] }
0x1184   : > { %v5010_v63 = vpop.xlane.xlu0 %5009 }
0x1185   : > { %8706 = vrcp.f32 %v3218_v52  ;;  %v5035_v16 = vadd.f32 %v5010_v63, %v4987_v28  ;;  %3209 = vadd.xlane.f32.xlu1 %v13069_v33  ;;  %v13077_v63 = vld [vmem:[#allocation205_spill] sm:$0xff]  ;;  %v13078_v33 = vld [vmem:[#allocation184_spill] sm:$0xff] }
0x1186   : > { %v5012_v18 = vpop.xlane.xlu1 %5011 }
0x1187   : > { %8708 = vrcp.f32 %v5035_v16  ;;  %v5036_v15 = vadd.f32 %v5012_v18, %v4988_v9  ;;  %5025 = vadd.xlane.f32.xlu0 %v13070_v60  ;;  %v13079_v60 = vld [vmem:[#allocation128_spill] sm:$0xff] }
0x1188   : > { %v3663_v36 = vpop.xlane.xlu0 %3662 }
0x1189   : > { %v8701_v30 = vpop.eup %8700  ;;  %8710 = vrcp.f32 %v5036_v15  ;;  %5027 = vadd.xlane.f32.xlu1 %v13071_v51  ;;  %v13080_v51 = vld [vmem:[#allocation185_spill] sm:$0xff] }
0x118a   : > { %v3665_v44 = vpop.xlane.xlu1 %3664  ;;  %v4295_v17 = vmul.f32 %v8701_v30, %v13072_v4  ;;  %v4080_v30 = vmul.f32 %v13079_v60, %v3663_v36 }
0x118b   : > { %v8703_v45 = vpop.eup %8702 }
0x118c   : > { %v5481_v26 = vpop.xlane.xlu0 %5480  ;;  %v4296_v22 = vmul.f32 %v8703_v45, %v13073_v21  ;;  %v13081_v45 = vld [vmem:[#allocation130_spill] sm:$0xff] }
0x118d   : > { %v8705_v28 = vpop.eup %8704  ;;  %v12215_v50 = vmul.f32 %v12024_v59, %v5481_v26  ;;  %v4081_v26 = vmul.f32 %v13081_v45, %v3665_v44 }
0x118e   : > { %v5483_v11 = vpop.xlane.xlu1 %5482  ;;  %v4308_v9 = vpack.c.bf16 %v4296_v22, %v4295_v17  ;;  %v3386_v46 = vmul.f32 %v8705_v28, %v13074_v23  ;;  %v13082_v28 = vld [vmem:[#allocation64_spill] sm:$0xff] }
0x118f   : > { %v8707_v1 = vpop.eup %8706  ;;  %v12219_v13 = vmul.f32 %v12037_v2, %v5483_v11 }
0x1190   : > { %6483 = vmatprep.mubr.bf16.mxu0 %v4308_v9  ;;  %v2754_v38 = vpop.xlane.xlu0 %2753  ;;  %v3387_v12 = vmul.f32 %v8707_v1, %v13075_v10 }
0x1191   : > { %v8709_v49 = vpop.eup %8708  ;;  %v3171_v11 = vmul.f32 %v13082_v28, %v2754_v38 }
0x1192   : > { %v2756_v7 = vpop.xlane.xlu1 %2755  ;;  %v3399_v55 = vpack.c.bf16 %v3387_v12, %v3386_v46  ;;  %v12223_v52 = vmul.f32 %v8709_v49, %v13076_v40  ;;  %v13083_v46 = vld [vmem:[#allocation66_spill] sm:$0xff] }
0x1193   : > { %v8711_v59 = vpop.eup %8710  ;;  %v3172_v1 = vmul.f32 %v13083_v46, %v2756_v7  ;;  %v13085_v7 = vld [vmem:[#allocation155_spill] sm:$0xff] }
0x1194   : > { %6484 = vmatmul.mubr.bf16.gmra.mrb[140].mxu0 %v3399_v55  ;;  %v4572_v35 = vpop.xlane.xlu0 %4571  ;;  %v12226_v16 = vmul.f32 %v8711_v59, %v13077_v63  ;;  %v13084_v63 = vld [vmem:[#allocation153_spill] sm:$0xff] }
0x1195   : > { %v4989_v18 = vmul.f32 %v13078_v33, %v4572_v35 }
0x1196   : > { %v4574_v2 = vpop.xlane.xlu1 %4573  ;;  %v5217_v15 = vpack.c.bf16 %v12226_v16, %v12223_v52 }
0x1197   : > { %v4990_v4 = vmul.f32 %v13080_v51, %v4574_v2 }
0x1198   : > { %v4105_v17 = vpop.xlane.xlu0 %4104 }
0x1199   : > { %v4128_v21 = vadd.f32 %v4105_v17, %v4080_v30 }
0x119a   : > { %v4107_v22 = vpop.xlane.xlu1 %4106 }
0x119b   : > { %8712 = vrcp.f32 %v4128_v21  ;;  %v4129_v9 = vadd.f32 %v4107_v22, %v4081_v26 }
0x119c   : > { %v3196_v23 = vpop.xlane.xlu0 %3195 }
0x119d   : > { %8714 = vrcp.f32 %v4129_v9  ;;  %v3219_v10 = vadd.f32 %v3196_v23, %v3171_v11  ;;  %v13087_v11 = vld [vmem:[#allocation91_spill] sm:$0xff] }
0x119e   : > { %v3198_v12 = vpop.xlane.xlu1 %3197 }
0x119f   : > { %8716 = vrcp.f32 %v3219_v10  ;;  %v3220_v49 = vadd.f32 %v3198_v12, %v3172_v1  ;;  %v13088_v10 = vld [vmem:[#allocation208_spill] sm:$0xff] }
0x11a0   : > { %v5014_v36 = vpop.xlane.xlu0 %5013 }
0x11a1   : > { %8718 = vrcp.f32 %v3220_v49  ;;  %v5037_v55 = vadd.f32 %v5014_v36, %v4989_v18  ;;  %v13086_v18 = vld [vmem:[#allocation89_spill] sm:$0xff]  ;;  %v13089_v36 = vld [vmem:[#allocation210_spill] sm:$0xff] }
0x11a2   : > { %v5016_v40 = vpop.xlane.xlu1 %5015 }
0x11a3   : > { %8720 = vrcp.f32 %v5037_v55  ;;  %v5038_v44 = vadd.f32 %v5016_v40, %v4990_v4  ;;  %v13090_v40 = vld [vmem:[#allocation187_spill] sm:$0xff] }
0x11a4   : > { %v3667_v59 = vpop.xlane.xlu0 %3666 }
0x11a5   : > { %v8713_v35 = vpop.eup %8712  ;;  %8722 = vrcp.f32 %v5038_v44 }
0x11a6   : > { %v3669_v38 = vpop.xlane.xlu1 %3668  ;;  %v4297_v33 = vmul.f32 %v8713_v35, %v13084_v63  ;;  %v13091_v63 = vld [vmem:[#allocation132_spill] sm:$0xff] }
0x11a7   : > { %v8715_v2 = vpop.eup %8714 }
0x11a8   : > { %v5485_v60 = vpop.xlane.xlu0 %5484  ;;  %v4298_v30 = vmul.f32 %v8715_v2, %v13085_v7  ;;  %v13092_v2 = vld [vmem:[#allocation189_spill] sm:$0xff] }
0x11a9   : > { %v8717_v51 = vpop.eup %8716  ;;  %v12239_v17 = vmul.f32 %v11999_v14, %v5485_v60 }
0x11aa   : > { %v5487_v45 = vpop.xlane.xlu1 %5486  ;;  %v4309_v26 = vpack.c.bf16 %v4298_v30, %v4297_v33  ;;  %v3388_v21 = vmul.f32 %v8717_v51, %v13086_v18  ;;  %v4082_v33 = vmul.f32 %v13091_v63, %v3667_v59  ;;  %v13093_v30 = vld [vmem:[#allocation134_spill] sm:$0xff]  ;;  %v13094_v18 = vld [vmem:[#allocation68_spill] sm:$0xff] }
0x11ab   : > { %v8719_v22 = vpop.eup %8718  ;;  %v12243_v4 = vmul.f32 %v12009_v5, %v5487_v45  ;;  %v4083_v51 = vmul.f32 %v13093_v30, %v3669_v38  ;;  %v13096_v63 = vld [vmem:[#allocation152_spill] sm:$0xff] }
0x11ac   : > { %6491 = vmatprep.mubr.bf16.mxu0 %v4309_v26  ;;  %v2758_v28 = vpop.xlane.xlu0 %2757  ;;  %v3389_v9 = vmul.f32 %v8719_v22, %v13087_v11 }
0x11ad   : > { %v8721_v23 = vpop.eup %8720 }
0x11ae   : > { %v2760_v46 = vpop.xlane.xlu1 %2759  ;;  %v3400_v1 = vpack.c.bf16 %v3389_v9, %v3388_v21  ;;  %v12247_v12 = vmul.f32 %v8721_v23, %v13088_v10  ;;  %v3173_v21 = vmul.f32 %v13094_v18, %v2758_v28  ;;  %v13095_v9 = vld [vmem:[#allocation70_spill] sm:$0xff] }
0x11af   : > { %v8723_v14 = vpop.eup %8722  ;;  %v3174_v23 = vmul.f32 %v13095_v9, %v2760_v46  ;;  %v13097_v46 = vld [vmem:[#allocation154_spill] sm:$0xff] }
0x11b0   : > { %6492 = vmatmul.mubr.bf16.gmra.mrb[144].mxu0 %v3400_v1  ;;  %v4576_v49 = vpop.xlane.xlu0 %4575  ;;  %v12250_v55 = vmul.f32 %v8723_v14, %v13089_v36  ;;  %v13099_v9 = vld [vmem:[#allocation90_spill] sm:$0xff] }
0x11b1   : > { %v4991_v44 = vmul.f32 %v13090_v40, %v4576_v49 }
0x11b2   : > { %v4578_v5 = vpop.xlane.xlu1 %4577  ;;  %v5218_v35 = vpack.c.bf16 %v12250_v55, %v12247_v12 }
0x11b3   : > { %v4992_v60 = vmul.f32 %v13092_v2, %v4578_v5 }
0x11b4   : > { %v4109_v7 = vpop.xlane.xlu0 %4108 }
0x11b5   : > { %v4130_v45 = vadd.f32 %v4109_v7, %v4082_v33 }
0x11b6   : > { %v4111_v26 = vpop.xlane.xlu1 %4110 }
0x11b7   : > { %8724 = vrcp.f32 %v4130_v45  ;;  %v4131_v22 = vadd.f32 %v4111_v26, %v4083_v51 }
0x11b8   : > { %v3200_v11 = vpop.xlane.xlu0 %3199 }
0x11b9   : > { %8726 = vrcp.f32 %v4131_v22  ;;  %v3221_v1 = vadd.f32 %v3200_v11, %v3173_v21 }
0x11ba   : > { %v3202_v10 = vpop.xlane.xlu1 %3201 }
0x11bb   : > { %8728 = vrcp.f32 %v3221_v1  ;;  %v3222_v14 = vadd.f32 %v3202_v10, %v3174_v23 }
0x11bc   : > { %v5018_v59 = vpop.xlane.xlu0 %5017 }
0x11bd   : > { %8730 = vrcp.f32 %v3222_v14  ;;  %v5039_v49 = vadd.f32 %v5018_v59, %v4991_v44  ;;  %v13098_v44 = vld [vmem:[#allocation88_spill] sm:$0xff]  ;;  %v13100_v59 = vld [vmem:[#allocation207_spill] sm:$0xff] }
0x11be   : > { %v5020_v36 = vpop.xlane.xlu1 %5019 }
0x11bf   : > { %8732 = vrcp.f32 %v5039_v49  ;;  %v5040_v38 = vadd.f32 %v5020_v36, %v4992_v60 }
0x11c0   : > { %v3671_v40 = vpop.xlane.xlu0 %3670 }
0x11c1   : > { %v8725_v5 = vpop.eup %8724  ;;  %8734 = vrcp.f32 %v5040_v38  ;;  %v13101_v38 = vld [vmem:[#allocation209_spill] sm:$0xff] }
0x11c2   : > { %v3673_v28 = vpop.xlane.xlu1 %3672  ;;  %v4299_v33 = vmul.f32 %v8725_v5, %v13096_v63  ;;  %v13102_v63 = vld [vmem:[#allocation191_spill] sm:$0xff] }
0x11c3   : > { %v8727_v2 = vpop.eup %8726 }
0x11c4   : > { %v5489_v7 = vpop.xlane.xlu0 %5488  ;;  %v4300_v30 = vmul.f32 %v8727_v2, %v13097_v46 }
0x11c5   : > { %v8729_v51 = vpop.eup %8728  ;;  %v12263_v45 = vmul.f32 %v12085_v19, %v5489_v7  ;;  %v13103_v7 = vld [vmem:[#allocation136_spill] sm:$0xff] }
0x11c6   : > { %v5491_v26 = vpop.xlane.xlu1 %5490  ;;  %v4310_v18 = vpack.c.bf16 %v4300_v30, %v4299_v33  ;;  %v3390_v21 = vmul.f32 %v8729_v51, %v13098_v44  ;;  %v4084_v46 = vmul.f32 %v13103_v7, %v3671_v40  ;;  %v13104_v30 = vld [vmem:[#allocation193_spill] sm:$0xff] }
0x11c7   : > { %v8731_v22 = vpop.eup %8730  ;;  %v12267_v60 = vmul.f32 %v12098_v41, %v5491_v26 }
0x11c8   : > { %6499 = vmatprep.mubr.bf16.mxu0 %v4310_v18  ;;  %v2762_v11 = vpop.xlane.xlu0 %2761  ;;  %v3391_v23 = vmul.f32 %v8731_v22, %v13099_v9  ;;  %v13105_v18 = vld [vmem:[#allocation138_spill] sm:$0xff] }
0x11c9   : > { %v8733_v1 = vpop.eup %8732  ;;  %v4085_v44 = vmul.f32 %v13105_v18, %v3673_v28  ;;  %v13107_v28 = vld [vmem:[#allocation74_spill] sm:$0xff] }
0x11ca   : > { %v2764_v10 = vpop.xlane.xlu1 %2763  ;;  %v3401_v14 = vpack.c.bf16 %v3391_v23, %v3390_v21  ;;  %v12271_v49 = vmul.f32 %v8733_v1, %v13100_v59 }
0x11cb   : > { %v8735_v19 = vpop.eup %8734 }
0x11cc   : > { %6500 = vmatmul.mubr.bf16.gmra.mrb[148].mxu0 %v3401_v14  ;;  %v4580_v36 = vpop.xlane.xlu0 %4579  ;;  %v12274_v5 = vmul.f32 %v8735_v19, %v13101_v38  ;;  %v13106_v38 = vld [vmem:[#allocation72_spill] sm:$0xff] }
0x11cd   : > { %v4993_v33 = vmul.f32 %v13102_v63, %v4580_v36  ;;  %v3175_v40 = vmul.f32 %v13106_v38, %v2762_v11  ;;  %v13109_v11 = vld [vmem:[#allocation159_spill] sm:$0xff] }
0x11ce   : > { %v4582_v41 = vpop.xlane.xlu1 %4581  ;;  %v5219_v2 = vpack.c.bf16 %v12274_v5, %v12271_v49  ;;  %v13134_v5 = vld [vmem:[#allocation211_spill] sm:$0xff] }
0x11cf   : > { %v4994_v51 = vmul.f32 %v13104_v30, %v4582_v41 }
0x11d0   : > { %v4113_v26 = vpop.xlane.xlu0 %4112 }
0x11d1   : > { %v4132_v21 = vadd.f32 %v4113_v26, %v4084_v46  ;;  %v3176_v46 = vmul.f32 %v13107_v28, %v2764_v10 }
0x11d2   : > { %v4115_v22 = vpop.xlane.xlu1 %4114 }
0x11d3   : > { %8736 = vrcp.f32 %v4132_v21  ;;  %v4133_v9 = vadd.f32 %v4115_v22, %v4085_v44  ;;  %v13108_v44 = vld [vmem:[#allocation157_spill] sm:$0xff] }
0x11d4   : > { %v5911_v23 = vpop.xlane.xlu0 %5910 }
0x11d5   : > { %8738 = vrcp.f32 %v4133_v9  ;;  %v5940_v59 = vadd.f32 %v5911_v23, %v12082_v43 }
0x11d6   : > { %v5913_v1 = vpop.xlane.xlu1 %5912 }
0x11d7   : > { %v5941_v19 = vadd.f32 %v5913_v1, %v12091_v56  ;;  %8740 = vrcp.f32 %v5940_v59 }
0x11d8   : > { %v5907_v14 = vpop.xlane.xlu0 %5906 }
0x11d9   : > { %v5938_v63 = vadd.f32 %v5907_v14, %v11901_v24  ;;  %8742 = vrcp.f32 %v5941_v19 }
0x11da   : > { %v5909_v36 = vpop.xlane.xlu1 %5908 }
0x11db   : > { %v5939_v26 = vadd.f32 %v5909_v36, %v11910_v39 }
0x11dc   : > { %v3204_v41 = vpop.xlane.xlu0 %3203 }
0x11dd   : > { %v8737_v7 = vpop.eup %8736  ;;  %v3223_v30 = vadd.f32 %v3204_v41, %v3175_v40 }
0x11de   : > { %v3206_v18 = vpop.xlane.xlu1 %3205  ;;  %v4301_v21 = vmul.f32 %v8737_v7, %v13108_v44 }
0x11df   : > { %v8739_v43 = vpop.eup %8738  ;;  %8744 = vrcp.f32 %v3223_v30  ;;  %v3224_v56 = vadd.f32 %v3206_v18, %v3176_v46 }
0x11e0   : > { %8746 = vrcp.f32 %v5938_v63  ;;  %v5022_v22 = vpop.xlane.xlu0 %5021  ;;  %v4302_v9 = vmul.f32 %v8739_v43, %v13109_v11  ;;  %v13110_v43 = vld [vmem:[#allocation93_spill] sm:$0xff] }
0x11e1   : > { %8748 = vrcp.f32 %v3224_v56  ;;  %v5041_v24 = vadd.f32 %v5022_v22, %v4993_v33  ;;  %v8741_v59 = vpop.eup %8740 }
0x11e2   : > { %8750 = vrcp.f32 %v5939_v26  ;;  %v5024_v23 = vpop.xlane.xlu1 %5023  ;;  %v4311_v10 = vpack.c.bf16 %v4302_v9, %v4301_v21 }
0x11e3   : > { %8752 = vrcp.f32 %v5041_v24  ;;  %v5042_v1 = vadd.f32 %v5024_v23, %v4994_v51  ;;  %v8743_v36 = vpop.eup %8742  ;;  %v13111_v24 = vld [vmem:[#allocation95_spill] sm:$0xff] }
0x11e4   : > { %v5919_v14 = vpop.xlane.xlu0 %5918  ;;  %6507 = vmatprep.mubr.bf16.mxu0 %v4311_v10 }
0x11e5   : > { %8754 = vrcp.f32 %v5042_v1  ;;  %v5944_v38 = vadd.f32 %v5919_v14, %v12178_v31 }
0x11e6   : > { %v5921_v39 = vpop.xlane.xlu1 %5920 }
0x11e7   : > { %v7924_v19 = vpop.f32.mrb[112].mxu0  ;;  %v5945_v26 = vadd.f32 %v5921_v39, %v12183_v6  ;;  %v13112_v39 = vld [vmem:[#allocation212_spill] sm:$0xff] }
0x11e8   : > { %v6077_v40 = vadd.f32 %v7924_v19, %v11915_v61  ;;  %v6012_v63 = vpop.f32.mrb[113].mxu0  ;;  %v5915_v41 = vpop.xlane.xlu0 %5914 }
0x11e9   : > { %v8745_v7 = vpop.eup %8744  ;;  %v6075_v33 = vadd.f32 %v6012_v63, %v11886_v0  ;;  %v7925_v28 = vpop.f32.mrb[114].mxu0  ;;  %v5942_v46 = vadd.f32 %v5915_v41, %v12140_v34 }
0x11ea   : > { %v8747_v51 = vpop.eup %8746  ;;  %v6109_v30 = vmul.f32 %v8741_v59, %v6077_v40  ;;  %v6078_v18 = vadd.f32 %v7925_v28, %v11926_v42  ;;  %v6015_v44 = vpop.f32.mrb[115].mxu0  ;;  %v3392_v31 = vmul.f32 %v8745_v7, %v13110_v43 }
0x11eb   : > { %v5917_v21 = vpop.xlane.xlu1 %5916  ;;  %v8749_v56 = vpop.eup %8748  ;;  %v6107_v61 = vmul.f32 %v8747_v51, %v6075_v33  ;;  %v6076_v22 = vadd.f32 %v6015_v44, %v11895_v27  ;;  %8756 = vrcp.f32 %v5942_v46 }
0x11ec   : > { %v5943_v0 = vadd.f32 %v5917_v21, %v12145_v48  ;;  %v8751_v11 = vpop.eup %8750  ;;  %8758 = vrcp.f32 %v5944_v38  ;;  %v6110_v34 = vmul.f32 %v8743_v36, %v6078_v18  ;;  %v3675_v9 = vpop.xlane.xlu0 %3674  ;;  %v3393_v23 = vmul.f32 %v8749_v56, %v13111_v24  ;;  %v13113_v48 = vld [vmem:[#allocation214_spill] sm:$0xff] }
0x11ed   : > { %v8753_v6 = vpop.eup %8752  ;;  %v6108_v10 = vmul.f32 %v8751_v11, %v6076_v22  ;;  %v4086_v62 = vmul.f32 %v13114_v54, %v3675_v9 }
0x11ee   : > { %8760 = vrcp.f32 %v5943_v0  ;;  %v3402_v1 = vpack.c.bf16 %v3393_v23, %v3392_v31  ;;  %v6124_v14 = vpack.c.bf16 %v6110_v34, %v6109_v30  ;;  %v12301_v59 = vmul.f32 %v8753_v6, %v13112_v39  ;;  %v13115_v6 = vld [vmem:[#allocation142_spill] sm:$0xff] }
0x11ef   : > { %8762 = vrcp.f32 %v5945_v26  ;;  %v3677_v42 = vpop.xlane.xlu1 %3676  ;;  %v8755_v27 = vpop.eup %8754  ;;  %v6123_v19 = vpack.c.bf16 %v6108_v10, %v6107_v61 }
0x11f0   : > { %v12303_v40 = vpop.xlane.xlu0 %5492  ;;  %6508 = vmatmul.mubr.bf16.gmra.mrb[152].mxu0 %v3402_v1  ;;  %v12306_v36 = vmul.f32 %v8755_v27, %v13113_v48  ;;  %v4087_v10 = vmul.f32 %v13115_v6, %v3677_v42  ;;  %v13116_v1 = vld [vmem:[#allocation96_spill] sm:$0xff] }
0x11f1   : > { %6556 = vmatprep.mubr.bf16.mxu1 %v6123_v19  ;;  %v13117_v48 = vld [vmem:[#allocation32_spill] sm:$0xff] }
0x11f2   : > { %6557 = vmatmul.mubr.bf16.vlgmr.msra.gmra.mrb[128].mxu1 %v5214_v32  ;;  %v5220_v63 = vpack.c.bf16 %v12306_v36, %v12301_v59 }
0x11f3   : > { %v12311_v38 = vpop.xlane.xlu1 %5494  ;;  %6564 = vmatprep.mubr.bf16.mxu1 %v6124_v14 }
0x11f4   : > { %v7928_v41 = vpop.f32.mrb[116].mxu0  ;;  %v5927_v7 = vpop.xlane.xlu0 %5926 }
0x11f5   : > { %v8757_v33 = vpop.eup %8756  ;;  %v6081_v28 = vadd.f32 %v7928_v41, %v11941_v57  ;;  %v6028_v46 = vpop.f32.mrb[117].mxu0  ;;  %v5948_v31 = vadd.f32 %v5927_v7, %v12239_v17 }
0x11f6   : > { %v8759_v51 = vpop.eup %8758  ;;  %v6079_v30 = vadd.f32 %v6028_v46, %v11975_v8  ;;  %v7929_v26 = vpop.f32.mrb[118].mxu0 }
0x11f7   : > { %v5929_v18 = vpop.xlane.xlu1 %5928  ;;  %v6113_v25 = vmul.f32 %v8759_v51, %v6081_v28  ;;  %v6082_v53 = vadd.f32 %v7929_v26, %v11953_v3  ;;  %v6031_v32 = vpop.f32.mrb[119].mxu0  ;;  %v13119_v26 = vld [vmem:[#allocation34_spill] sm:$0xff] }
0x11f8   : > { %v8761_v44 = vpop.eup %8760  ;;  %v6111_v43 = vmul.f32 %v8757_v33, %v6079_v30  ;;  %v6080_v56 = vadd.f32 %v6031_v32, %v11993_v47  ;;  %v5923_v61 = vpop.xlane.xlu0 %5922  ;;  %v5949_v8 = vadd.f32 %v5929_v18, %v12243_v4 }
0x11f9   : > { %v8763_v21 = vpop.eup %8762  ;;  %v5946_v57 = vadd.f32 %v5923_v61, %v12215_v50 }
0x11fa   : > { %v6114_v22 = vmul.f32 %v8763_v21, %v6082_v53  ;;  %v6112_v0 = vmul.f32 %v8761_v44, %v6080_v56  ;;  %6565 = vmatmul.mubr.bf16.gmra.mrb[132].mxu1 %v5215_v58  ;;  %v13120_v21 = vld [vmem:[#allocation160_spill] sm:$0xff] }
0x11fb   : > { %v5925_v11 = vpop.xlane.xlu1 %5924  ;;  %8764 = vrcp.f32 %v5946_v57  ;;  %v13121_v57 = vld [vmem:[#allocation113_spill] sm:$0xff] }
0x11fc   : > { %v5947_v3 = vadd.f32 %v5925_v11, %v12219_v13  ;;  %v6126_v34 = vpack.c.bf16 %v6114_v22, %v6113_v25  ;;  %8766 = vrcp.f32 %v5948_v31  ;;  %v6125_v17 = vpack.c.bf16 %v6112_v0, %v6111_v43  ;;  %v2766_v24 = vpop.xlane.xlu0 %2765  ;;  %v13122_v11 = vld [vmem:[#allocation76_spill] sm:$0xff] }
0x11fd   : > { %v5904_v43 = vmul.f32 %v13120_v21, %v12303_v40  ;;  %v5905_v0 = vmul.f32 %v13121_v57, %v12311_v38  ;;  %v3177_v52 = vmul.f32 %v13122_v11, %v2766_v24  ;;  %v13123_v40 = vld [vmem:[#allocation78_spill] sm:$0xff]  ;;  %v13124_v38 = vld [vmem:[#allocation156_spill] sm:$0xff] }
0x11fe   : > { %8768 = vrcp.f32 %v5947_v3  ;;  %6572 = vmatprep.mubr.bf16.mxu1 %v6125_v17 }
0x11ff   : > { %8770 = vrcp.f32 %v5949_v8  ;;  %v2768_v47 = vpop.xlane.xlu1 %2767 }
0x1200   : > { %v4584_v50 = vpop.xlane.xlu0 %4583 }
0x1202   : > { %6573 = vmatmul.mubr.bf16.gmra.mrb[136].mxu1 %v5216_v37  ;;  %v13118_v37 = vld [vmem:[#allocation97_spill] sm:$0xff] }
0x1203   : > { %v4586_v4 = vpop.xlane.xlu1 %4585  ;;  %6580 = vmatprep.mubr.bf16.mxu1 %v6126_v34  ;;  %v3178_v34 = vmul.f32 %v13123_v40, %v2768_v47 }
0x1204   : > { %v7932_v58 = vpop.f32.mrb[120].mxu0  ;;  %v4117_v23 = vpop.xlane.xlu0 %4116 }
0x1205   : > { %v8765_v13 = vpop.eup %8764  ;;  %v6085_v14 = vadd.f32 %v7932_v58, %v13116_v1  ;;  %v6044_v39 = vpop.f32.mrb[121].mxu0  ;;  %v4134_v27 = vadd.f32 %v4117_v23, %v4086_v62  ;;  %v13125_v58 = vld [vmem:[#allocation195_spill] sm:$0xff] }
0x1206   : > { %v8767_v19 = vpop.eup %8766  ;;  %v6083_v41 = vadd.f32 %v6044_v39, %v13117_v48  ;;  %v7933_v7 = vpop.f32.mrb[122].mxu0  ;;  %v4995_v23 = vmul.f32 %v13125_v58, %v4584_v50 }
0x1207   : > { %v4119_v33 = vpop.xlane.xlu1 %4118  ;;  %v6117_v29 = vmul.f32 %v8767_v19, %v6085_v14  ;;  %v6086_v28 = vadd.f32 %v7933_v7, %v13118_v37  ;;  %8772 = vrcp.f32 %v4134_v27  ;;  %v6047_v9 = vpop.f32.mrb[123].mxu0  ;;  %v13127_v14 = vld [vmem:[#allocation197_spill] sm:$0xff] }
0x1208   : > { %v8769_v20 = vpop.eup %8768  ;;  %v4135_v46 = vadd.f32 %v4119_v33, %v4087_v10  ;;  %v6115_v30 = vmul.f32 %v8765_v13, %v6083_v41  ;;  %v6084_v42 = vadd.f32 %v6047_v9, %v13119_v26  ;;  %v5931_v18 = vpop.xlane.xlu0 %5930  ;;  %v13126_v10 = vld [vmem:[#allocation158_spill] sm:$0xff]  ;;  %v4996_v39 = vmul.f32 %v13127_v14, %v4586_v4  ;;  %v13128_v27 = vld [vmem:[#allocation161_spill] sm:$0xff] }
0x1209   : > { %v8771_v51 = vpop.eup %8770  ;;  %v5950_v25 = vadd.f32 %v5931_v18, %v12263_v45  ;;  %v13129_v19 = vld [vmem:[#allocation49_spill] sm:$0xff] }
0x120a   : > { %v6118_v44 = vmul.f32 %v8771_v51, %v6086_v28  ;;  %8774 = vrcp.f32 %v4135_v46  ;;  %v6116_v53 = vmul.f32 %v8769_v20, %v6084_v42  ;;  %6581 = vmatmul.mubr.bf16.gmra.mrb[140].mxu1 %v5217_v15  ;;  %v13130_v20 = vld [vmem:[#allocation115_spill] sm:$0xff] }
0x120b   : > { %v5933_v32 = vpop.xlane.xlu1 %5932  ;;  %8776 = vrcp.f32 %v5950_v25  ;;  %v13131_v46 = vld [vmem:[#allocation51_spill] sm:$0xff] }
0x120c   : > { %v5951_v31 = vadd.f32 %v5933_v32, %v12267_v60  ;;  %v6128_v56 = vpack.c.bf16 %v6118_v44, %v6117_v29  ;;  %v6127_v61 = vpack.c.bf16 %v6116_v53, %v6115_v30  ;;  %v5935_v22 = vpop.xlane.xlu0 %5934 }
0x120d   : > { %v5952_v45 = vadd.f32 %v5935_v22, %v5904_v43 }
0x120e   : > { %8778 = vrcp.f32 %v5951_v31  ;;  %6588 = vmatprep.mubr.bf16.mxu1 %v6127_v61 }
0x120f   : > { %v5937_v8 = vpop.xlane.xlu1 %5936  ;;  %8780 = vrcp.f32 %v5952_v45  ;;  %v13133_v45 = vld [vmem:[#allocation94_spill] sm:$0xff] }
0x1210   : > { %v5953_v16 = vadd.f32 %v5937_v8, %v5905_v0  ;;  %v3208_v15 = vpop.xlane.xlu0 %3207 }
0x1211   : > { %v8773_v3 = vpop.eup %8772  ;;  %v3225_v60 = vadd.f32 %v3208_v15, %v3177_v52 }
0x1212   : > { %8782 = vrcp.f32 %v5953_v16  ;;  %6589 = vmatmul.mubr.bf16.gmra.mrb[144].mxu1 %v5218_v35  ;;  %v4303_v54 = vmul.f32 %v8773_v3, %v13124_v38  ;;  %v13135_v16 = vld [vmem:[#allocation213_spill] sm:$0xff] }
0x1213   : > { %v3210_v17 = vpop.xlane.xlu1 %3209  ;;  %8784 = vrcp.f32 %v3225_v60  ;;  %6596 = vmatprep.mubr.bf16.mxu1 %v6128_v56  ;;  %v13132_v56 = vld [vmem:[#allocation92_spill] sm:$0xff] }
0x1214   : > { %v8775_v62 = vpop.eup %8774  ;;  %v3226_v24 = vadd.f32 %v3210_v17, %v3178_v34  ;;  %v7936_v13 = vpop.f32.mrb[124].mxu0 }
0x1215   : > { %v5026_v6 = vpop.xlane.xlu0 %5025  ;;  %v4304_v1 = vmul.f32 %v8775_v62, %v13126_v10  ;;  %v8777_v47 = vpop.eup %8776  ;;  %v6089_v12 = vadd.f32 %v7936_v13, %v13128_v27 }
0x1216   : > { %8786 = vrcp.f32 %v3226_v24  ;;  %v6060_v55 = vpop.f32.mrb[125].mxu0  ;;  %v5043_v35 = vadd.f32 %v5026_v6, %v4995_v23 }
0x1217   : > { %v6087_v48 = vadd.f32 %v6060_v55, %v13129_v19  ;;  %v7937_v41 = vpop.f32.mrb[126].mxu0  ;;  %v5028_v7 = vpop.xlane.xlu1 %5027  ;;  %v4312_v50 = vpack.c.bf16 %v4304_v1, %v4303_v54 }
0x1218   : > { %v8779_v33 = vpop.eup %8778  ;;  %v6090_v29 = vadd.f32 %v7937_v41, %v13130_v20  ;;  %8788 = vrcp.f32 %v5043_v35  ;;  %v6063_v37 = vpop.f32.mrb[127].mxu0  ;;  %v5044_v28 = vadd.f32 %v5028_v7, %v4996_v39 }
0x1219   : > { %v6119_v9 = vmul.f32 %v8777_v47, %v6087_v48  ;;  %v6088_v51 = vadd.f32 %v6063_v37, %v13131_v46  ;;  %6515 = vmatprep.mubr.bf16.mxu0 %v4312_v50  ;;  %v8781_v4 = vpop.eup %8780 }
0x121a   : > { %8790 = vrcp.f32 %v5044_v28  ;;  %v6121_v30 = vmul.f32 %v8781_v4, %v6089_v12  ;;  %6597 = vmatmul.mubr.bf16.gmra.mrb[148].mxu1 %v5219_v2 }
0x121b   : > { %v6120_v26 = vmul.f32 %v8779_v33, %v6088_v51 }
0x121c   : > { %v8783_v42 = vpop.eup %8782  ;;  %v7314_v44 = vpop.f32.mrb[128].mxu0 }
0x121d   : > { %v6122_v18 = vmul.f32 %v8783_v42, %v6090_v29  ;;  %v6129_v25 = vpack.c.bf16 %v6120_v26, %v6119_v9  ;;  %v8785_v53 = vpop.eup %8784  ;;  %v7315_v32 = vpop.f32.mrb[129].mxu0 }
0x121e   : > { %v7316_v21 = vadd.f32 %v7315_v32, %v7314_v44  ;;  %v7317_v43 = vpop.f32.mrb[130].mxu0  ;;  %v3394_v61 = vmul.f32 %v8785_v53, %v13132_v56 }
0x121f   : > { %6604 = vmatprep.mubr.bf16.mxu1 %v6129_v25  ;;  %v6130_v31 = vpack.c.bf16 %v6122_v18, %v6121_v30  ;;  %v7318_v57 = vpop.f32.mrb[131].mxu0 }
0x1220   : > { %v8787_v22 = vpop.eup %8786  ;;  %v7319_v0 = vadd.f32 %v7318_v57, %v7317_v43 }
0x1221   : > { %v3395_v8 = vmul.f32 %v8787_v22, %v13133_v45 }
0x1222   : > { %v8789_v11 = vpop.eup %8788  ;;  %6605 = vmatmul.mubr.bf16.gmra.mrb[152].mxu1 %v5220_v63 }
0x1223   : > { %v3403_v49 = vpack.c.bf16 %v3395_v8, %v3394_v61  ;;  %v5212_v2 = vmul.f32 %v8789_v11, %v13134_v5  ;;  %6612 = vmatprep.mubr.bf16.mxu1 %v6130_v31 }
0x1224   : > { %v8791_v52 = vpop.eup %8790 }
0x1225   : > { %6516 = vmatmul.mubr.bf16.gmra.mrb[156].mxu0 %v3403_v49  ;;  %v5213_v15 = vmul.f32 %v8791_v52, %v13135_v16 }
0x1227   : > { %v5221_v3 = vpack.c.bf16 %v5213_v15, %v5212_v2 }
0x122a   : > { %6613 = vmatmul.mubr.bf16.gmra.mrb[156].mxu1 %v5221_v3 }
0x122f   : > { %v7320_v40 = vpop.f32.mrb[132].mxu0 }
0x1230   : > { %v7321_v34 = vpop.f32.mrb[133].mxu0 }
0x1231   : > { %v7322_v60 = vadd.f32 %v7321_v34, %v7320_v40  ;;  %v7323_v17 = vpop.f32.mrb[134].mxu0 }
0x1232   : > { %v7324_v38 = vpop.f32.mrb[135].mxu0 }
0x1233   : > { %v7325_v54 = vadd.f32 %v7324_v38, %v7323_v17 }
0x124b   : > { %v7326_v62 = vpop.f32.mrb[136].mxu0 }
0x124c   : > { %v7327_v58 = vpop.f32.mrb[137].mxu0 }
0x124d   : > { %v7328_v59 = vadd.f32 %v7327_v58, %v7326_v62  ;;  %v7329_v36 = vpop.f32.mrb[138].mxu0 }
0x124e   : > { %v7330_v63 = vpop.f32.mrb[139].mxu0 }
0x124f   : > { %v7331_v23 = vadd.f32 %v7330_v63, %v7329_v36 }
0x1267   : > { %v7332_v24 = vpop.f32.mrb[140].mxu0 }
0x1268   : > { %v7333_v13 = vpop.f32.mrb[141].mxu0 }
0x1269   : > { %v7334_v6 = vadd.f32 %v7333_v13, %v7332_v24  ;;  %v7335_v10 = vpop.f32.mrb[142].mxu0 }
0x126a   : > { %v7336_v1 = vpop.f32.mrb[143].mxu0 }
0x126b   : > { %v7337_v47 = vadd.f32 %v7336_v1, %v7335_v10 }
0x1283   : > { %v7338_v14 = vpop.f32.mrb[144].mxu0 }
0x1284   : > { %v7339_v39 = vpop.f32.mrb[145].mxu0 }
0x1285   : > { %v7340_v27 = vadd.f32 %v7339_v39, %v7338_v14  ;;  %v7341_v12 = vpop.f32.mrb[146].mxu0 }
0x1286   : > { %v7342_v55 = vpop.f32.mrb[147].mxu0 }
0x1287   : > { %v7343_v35 = vadd.f32 %v7342_v55, %v7341_v12 }
0x129f   : > { %v7344_v19 = vpop.f32.mrb[148].mxu0 }
0x12a0   : > { %v7345_v48 = vpop.f32.mrb[149].mxu0 }
0x12a1   : > { %v12367_v41 = vadd.f32 %v7345_v48, %v7344_v19  ;;  %v7347_v7 = vpop.f32.mrb[150].mxu0 }
0x12a2   : > { %v7348_v50 = vpop.f32.mrb[151].mxu0 }
0x12a3   : > { %v12369_v33 = vadd.f32 %v7348_v50, %v7347_v7 }
0x12c3   : > { %v7350_v20 = vpop.f32.mrb[152].mxu0 }
0x12c4   : > { %v7351_v29 = vpop.f32.mrb[153].mxu0 }
0x12c5   : > { %v7378_v37 = vpop.f32.mrb[128].mxu1  ;;  %v12371_v28 = vadd.f32 %v7351_v29, %v7350_v20  ;;  %v7353_v9 = vpop.f32.mrb[154].mxu0 }
0x12c6   : > { %v7379_v46 = vpop.f32.mrb[129].mxu1  ;;  %v7354_v51 = vpop.f32.mrb[155].mxu0 }
0x12c7   : > { %v7380_v4 = vadd.f32 %v7379_v46, %v7378_v37  ;;  %v7381_v30 = vpop.f32.mrb[130].mxu1  ;;  %v12373_v26 = vadd.f32 %v7354_v51, %v7353_v9 }
0x12c8   : > { %v7382_v42 = vpop.f32.mrb[131].mxu1 }
0x12c9   : > { %v6559_v18 = vadd.f32 %v7380_v4, %v7316_v21  ;;  %v7383_v44 = vadd.f32 %v7382_v42, %v7381_v30 }
0x12cb   : > { %6621 = vst [vmem:[%s9364_s11] sm:$0xff] %v6559_v18  ;;  %v6562_v25 = vadd.f32 %v7383_v44, %v7319_v0 }
0x12cd   : > { %6622 = vst [vmem:[%s9364_s11 + $0x8] sm:$0xff] %v6562_v25  ;;  %v7384_v53 = vpop.f32.mrb[132].mxu1 }
0x12ce   : > { %v7385_v32 = vpop.f32.mrb[133].mxu1 }
0x12cf   : > { %v7386_v43 = vadd.f32 %v7385_v32, %v7384_v53  ;;  %v7387_v31 = vpop.f32.mrb[134].mxu1 }
0x12d0   : > { %v7388_v56 = vpop.f32.mrb[135].mxu1 }
0x12d1   : > { %v6567_v61 = vadd.f32 %v7386_v43, %v7322_v60  ;;  %v7389_v22 = vadd.f32 %v7388_v56, %v7387_v31 }
0x12d3   : > { %6623 = vst [vmem:[%s9364_s11 + $0x10] sm:$0xff] %v6567_v61  ;;  %v6570_v57 = vadd.f32 %v7389_v22, %v7325_v54 }
0x12d5   : > { %6624 = vst [vmem:[%s9364_s11 + $0x18] sm:$0xff] %v6570_v57  ;;  %v7390_v45 = vpop.f32.mrb[136].mxu1 }
0x12d6   : > { %v7391_v8 = vpop.f32.mrb[137].mxu1 }
0x12d7   : > { %v7392_v21 = vadd.f32 %v7391_v8, %v7390_v45  ;;  %v7393_v11 = vpop.f32.mrb[138].mxu1 }
0x12d8   : > { %v7394_v0 = vpop.f32.mrb[139].mxu1 }
0x12d9   : > { %v6575_v49 = vadd.f32 %v7392_v21, %v7328_v59  ;;  %v7395_v5 = vadd.f32 %v7394_v0, %v7393_v11 }
0x12db   : > { %6625 = vst [vmem:[%s9364_s11 + $0x20] sm:$0xff] %v6575_v49  ;;  %v6578_v2 = vadd.f32 %v7395_v5, %v7331_v23 }
0x12dd   : > { %6626 = vst [vmem:[%s9364_s11 + $0x28] sm:$0xff] %v6578_v2  ;;  %v7396_v52 = vpop.f32.mrb[140].mxu1 }
0x12de   : > { %v7397_v16 = vpop.f32.mrb[141].mxu1 }
0x12df   : > { %v7398_v15 = vadd.f32 %v7397_v16, %v7396_v52  ;;  %v7399_v3 = vpop.f32.mrb[142].mxu1 }
0x12e0   : > { %v7400_v40 = vpop.f32.mrb[143].mxu1 }
0x12e1   : > { %v6583_v34 = vadd.f32 %v7398_v15, %v7334_v6  ;;  %v7401_v60 = vadd.f32 %v7400_v40, %v7399_v3 }
0x12e3   : > { %6627 = vst [vmem:[%s9364_s11 + $0x30] sm:$0xff] %v6583_v34  ;;  %v6586_v17 = vadd.f32 %v7401_v60, %v7337_v47 }
0x12e5   : > { %6628 = vst [vmem:[%s9364_s11 + $0x38] sm:$0xff] %v6586_v17  ;;  %v7402_v38 = vpop.f32.mrb[144].mxu1 }
0x12e6   : > { %v7403_v54 = vpop.f32.mrb[145].mxu1 }
0x12e7   : > { %v7404_v62 = vadd.f32 %v7403_v54, %v7402_v38  ;;  %v7405_v58 = vpop.f32.mrb[146].mxu1 }
0x12e8   : > { %v7406_v59 = vpop.f32.mrb[147].mxu1 }
0x12e9   : > { %v6591_v36 = vadd.f32 %v7404_v62, %v7340_v27  ;;  %v7407_v63 = vadd.f32 %v7406_v59, %v7405_v58 }
0x12eb   : > { %6629 = vst [vmem:[%s9364_s11 + $0x40] sm:$0xff] %v6591_v36  ;;  %v6594_v23 = vadd.f32 %v7407_v63, %v7343_v35 }
0x12ed   : > { %6630 = vst [vmem:[%s9364_s11 + $0x48] sm:$0xff] %v6594_v23  ;;  %v7408_v24 = vpop.f32.mrb[148].mxu1 }
0x12ee   : > { %v7409_v13 = vpop.f32.mrb[149].mxu1 }
0x12ef   : > { %v7410_v10 = vadd.f32 %v7409_v13, %v7408_v24  ;;  %v7411_v6 = vpop.f32.mrb[150].mxu1 }
0x12f0   : > { %v7412_v1 = vpop.f32.mrb[151].mxu1 }
0x12f1   : > { %v6599_v47 = vadd.f32 %v7410_v10, %v12367_v41  ;;  %v7413_v14 = vadd.f32 %v7412_v1, %v7411_v6 }
0x12f3   : > { %6631 = vst [vmem:[%s9364_s11 + $0x50] sm:$0xff] %v6599_v47  ;;  %v6602_v39 = vadd.f32 %v7413_v14, %v12369_v33 }
0x12f5   : > { %6632 = vst [vmem:[%s9364_s11 + $0x58] sm:$0xff] %v6602_v39  ;;  %v7414_v27 = vpop.f32.mrb[152].mxu1 }
0x12f6   : > { %v7415_v12 = vpop.f32.mrb[153].mxu1 }
0x12f7   : > { %v7416_v55 = vadd.f32 %v7415_v12, %v7414_v27  ;;  %v7417_v35 = vpop.f32.mrb[154].mxu1 }
0x12f8   : > { %v7356_v19 = vpop.f32.mrb[156].mxu0  ;;  %v7418_v48 = vpop.f32.mrb[155].mxu1 }
0x12f9   : > { %v7357_v7 = vpop.f32.mrb[157].mxu0  ;;  %v6607_v50 = vadd.f32 %v7416_v55, %v12371_v28  ;;  %v7419_v41 = vadd.f32 %v7418_v48, %v7417_v35 }
0x12fa   : > { %v7358_v20 = vadd.f32 %v7357_v7, %v7356_v19  ;;  %v7359_v29 = vpop.f32.mrb[158].mxu0 }
0x12fb   : > { %v7360_v37 = vpop.f32.mrb[159].mxu0  ;;  %6633 = vst [vmem:[%s9364_s11 + $0x60] sm:$0xff] %v6607_v50  ;;  %v6610_v33 = vadd.f32 %v7419_v41, %v12373_v26 }
0x12fc   : > { %v7361_v9 = vadd.f32 %v7360_v37, %v7359_v29 }
0x12fd   : > { %6634 = vst [vmem:[%s9364_s11 + $0x68] sm:$0xff] %v6610_v33  ;;  %v7420_v46 = vpop.f32.mrb[156].mxu1 }
0x12fe   : > { %v7421_v51 = vpop.f32.mrb[157].mxu1 }
0x12ff   : > { %v7422_v28 = vadd.f32 %v7421_v51, %v7420_v46  ;;  %v7423_v4 = vpop.f32.mrb[158].mxu1 }
0x1300   : > { %v7424_v30 = vpop.f32.mrb[159].mxu1 }
0x1301   : > { %v6615_v42 = vadd.f32 %v7422_v28, %v7358_v20  ;;  %v7425_v18 = vadd.f32 %v7424_v30, %v7423_v4 }
0x1303   : > { %6635 = vst [vmem:[%s9364_s11 + $0x70] sm:$0xff] %v6615_v42  ;;  %v6618_v26 = vadd.f32 %v7425_v18, %v7361_v9 }
0x1305   : > { %6636 = vst [vmem:[%s9364_s11 + $0x78] sm:$0xff] %v6618_v26 }
0x1306   : > { %8889 = shalt.err (!%p8886_p7)
}
0x1307   : > { %s8890_s10 = scalar_lea.hbm %s12402_s18, 2048  ;;  %s8894_s15 = scalar_lea.hbm %s13139_s12, 8192 }
0x1308   : > { %p8891_p6 = scmp.ne.s32.totalorder %s12402_s18, %s8890_s10  ;;  %p8895_p13 = scmp.lt.u32.totalorder %s12402_s18, %s13139_s12 }
0x1309   : > { %p8896_p11 = scmp.lt.u32.totalorder %s8894_s15, %s8890_s10  ;;  %p8898_p2 = scmp.lt.u32.totalorder %s8890_s10, %s12402_s18 }
0x130a   : > { %p8892_p5 = pnand %p8891_p6, %p13140_p9 }
0x130b   : > { %p8897_p4 = por %p8896_p11, %p8895_p13 }
0x130c   : > { %p8893_p12 = pneg %p8892_p5 }
0x130d   : > { %p8899_p10 = por %p8898_p2, %p8897_p4 }
0x130f   : > { %p8900_p0 = pnand %p8899_p10, %p8893_p12 }
0x1311   : > { %8903 = shalt.err (!%p8900_p0)
}
0x1312   : > { %s9049_s8 = smov 128   ;;  %s9050_s21 = smov 8  }
0x1313   : > { %7957 = dma.vmem_to_hbm [thread:$0]  (%p13140_p9), %s12396_s30, 2048, %s12402_s18, %s12407_s9, %s9049_s8, %s9049_s8, %s9050_s21  }
0x1314 PF: > { %s13141_s6 = sld [smem:[#allocation20_spill]]  ;;  %s13142_s16 = sld [smem:[#allocation31_spill]] }
0x1315   : > { %p7974_p8 = scmp.ge.s32.totalorder %s9030_s28, 2 }
0x131a   : > { %s6668_s17 = sand.u32 1, %s13141_s6   ;;  %p13143_p1 = scmp.ne.s32.totalorder %s13142_s16, 0 }
0x131b   : > { %s6669_s29 = scalar_lea.sflag [#allocation6], %s6668_s17 }
0x131c   : > { %p7967_p3 = pnand %p7974_p8, %p13143_p1 }
0x131e   : > { %8973 = dma.done.wait (!%p7967_p3), %s6669_s29, 2048  }
0x131f   : > { %8975 = vsyncadd (!%p7967_p3), %s6669_s29, 4294965248  ;;  %s24_s28 = sadd.s32 1, %s9030_s28   ;;  %s13145_s15 = sld [smem:[#allocation21_spill]] }
0x1320   : > { %p12436_p7 = scmp.ge.s32.totalorder %s24_s28, 6   ;;  %s13146_s16 = sld [smem:[#allocation22_spill]] }
0x1321   : > { %s13147_s17 = sld [smem:[#allocation29_spill]]  ;;  %s13148_s7 = sld [smem:[#allocation27_spill]] }
0x1322   : > { %s13149_s30 = sld [smem:[#allocation28_spill]]  ;;  %s13150_s9 = sld [smem:[#allocation25_spill]] }
0x1323   : > { %s13151_s5 = sld [smem:[#allocation26_spill]]  ;;  %s13152_s18 = smov %s8994_s19 }
0x1324   : > { %s13153_s19 = smov %s8998_s20  ;;  %s13155_s21 = smov %s9006_s22 }
0x1325   : > { %s13156_s22 = smov %s9010_s23  ;;  %s13158_s24 = smov %s9022_s26 }
0x1326   : > { %s13159_s25 = smov %s9026_s27  ;;  %23 = sbr.rel (!%p12436_p7) target bundleno = 15 (0xf), region = 115 }
0x1327   : > { %s13154_s20 = smov %s13148_s7 }
0x1328   : > { %s13157_s23 = smov %s13149_s30  ;;  %s13160_s26 = smov %s13150_s9 }
0x1329   : > { %s13161_s27 = smov %s13151_s5 }
0x132d   :  { %6674 = vsyncpa [#allocation5], 1 }
0x132e   :  { %6676 = vsyncpa [#allocation5 + $0x1], 1 }
0x132f   :  { %6677 = vsyncpa [#allocation8], 1 }
0x1330   :  { %6678 = vsyncpa [#allocation11], 1 }
0x1331   :  { %6680 = vsyncpa [#allocation11 + $0x1], 1 }
0x1332   :  { %6681 = vsyncpa [#allocation6], 1 }
0x1333   :  { %6683 = vsyncpa [#allocation6 + $0x1], 1 }

</bundles_post_ra>
